<compile_context>
chip_gen: v6e
topology: v6e:2x2x1
jax: 0.10.0
libtpu: 0.0.40
codegen_flags: <defaults>
</compile_context>

<pallas_src>
import functools

import jax
import jax.numpy as jnp
from jax.experimental import pallas as pl
from jax.experimental.pallas import tpu as pltpu

LANE = 128


def _round_up(x, m):
    return (x + m - 1) // m * m


def _bottleneck_kernel(Wp, lead, x_ref, w1_ref, b1_ref, w2_ref, b2_ref,
                       mask_ref, o_ref, mid_ref):
    # x_ref   : (P_in, Cp)    bf16  zero-padded input image, flat (row*Wp+col, C)
    # w1_ref  : (9, Cp, Cpo)  bf16  conv1 taps, tap t = (dy, dx) = divmod(t, 3)
    # b1_ref  : (1, Cpo)      f32
    # w2_ref  : (9, Cpo, Cpo) bf16
    # b2_ref  : (1, Cpo)      f32
    # mask_ref: (L, 1)        f32   1.0 on valid rows (col < W), else 0.0
    # o_ref   : (L, Cpo)      f32   L = H * Wp (flat padded-layout rows)
    # mid_ref : (mid_rows, Cpo) bf16 scratch: conv1 output in padded-flat layout
    L = o_ref.shape[0]

    # The scratch border supplies conv2's SAME zero-padding. It is never written
    # below, so zero the whole scratch only once (scratch persists over grid).
    @pl.when(pl.program_id(0) == 0)
    def _init():
        mid_ref[...] = jnp.zeros_like(mid_ref)

    # ---- conv1: 9 full-depth (L, Cp) @ (Cp, Cpo) matmuls, f32 accumulate ----
    acc = jnp.dot(x_ref[pl.ds(0, L), :], w1_ref[0],
                  preferred_element_type=jnp.float32)
    for t in range(1, 9):
        dy, dx = divmod(t, 3)
        acc += jnp.dot(x_ref[pl.ds(dy * Wp + dx, L), :], w1_ref[t],
                       preferred_element_type=jnp.float32)

    # Bias + ReLU in f32, zero the junk rows that land on padding columns, and
    # store the interior into the padded-flat scratch. The interior starts at
    # row (lead + Wp + 1), which is 16-aligned -> unmasked aligned bf16 store.
    mid_vals = mask_ref[...] * jnp.maximum(acc + b1_ref[...], 0.0)
    mid_ref[pl.ds(lead + Wp + 1, L), :] = mid_vals.astype(mid_ref.dtype)

    # ---- conv2: same 9-tap scheme reading the padded-flat scratch ----
    acc2 = jnp.dot(mid_ref[pl.ds(lead, L), :], w2_ref[0],
                   preferred_element_type=jnp.float32)
    for t in range(1, 9):
        dy, dx = divmod(t, 3)
        acc2 += jnp.dot(mid_ref[pl.ds(lead + dy * Wp + dx, L), :], w2_ref[t],
                        preferred_element_type=jnp.float32)

    # Bias + ReLU; rows on padding columns are junk and stripped by the wrapper.
    o_ref[...] = jnp.maximum(acc2 + b2_ref[...], 0.0).astype(o_ref.dtype)


def bottleneck_forward(x_nchw, w1, b1, w2, b2):
    """x_nchw: [N, Cin, H, W] f32 (PyTorch layout). w1/w2 in HWIO. Returns NCHW."""
    N, Cin, H, W = x_nchw.shape
    Cout = w1.shape[-1]
    Hp, Wp = H + 2, W + 2

    Cp = _round_up(Cin, LANE)        # lane-dense padded input channels
    Cpo = _round_up(Cout, LANE)      # lane-dense padded output channels
    L = H * Wp                       # flat rows containing all valid outputs
    P_in = _round_up(Hp * Wp, 8)     # flat padded-input rows (+ zero tail)
    lead = (-(Wp + 1)) % 16          # makes scratch interior start 16-aligned
    mid_rows = _round_up(lead + 2 * Wp + 2 + L, 16)

    # Layout glue (fused by XLA): NCHW -> NHWC, 1-px spatial halo, channel pad
    # to 128 lanes, bf16 cast, flatten spatial dims, fold batch into rows.
    x = jnp.transpose(x_nchw, (0, 2, 3, 1)).astype(jnp.bfloat16)
    x = jnp.pad(x, ((0, 0), (1, 1), (1, 1), (0, Cp - Cin)))
    x = x.reshape(N, Hp * Wp, Cp)
    x = jnp.pad(x, ((0, 0), (0, P_in - Hp * Wp), (0, 0)))
    x = x.reshape(N * P_in, Cp)

    w1p = jnp.pad(w1, ((0, 0), (0, 0), (0, Cp - Cin), (0, Cpo - Cout)))
    w1p = w1p.astype(jnp.bfloat16).reshape(9, Cp, Cpo)
    w2p = jnp.pad(w2, ((0, 0), (0, 0), (0, Cpo - Cout), (0, Cpo - Cout)))
    w2p = w2p.astype(jnp.bfloat16).reshape(9, Cpo, Cpo)
    b1p = jnp.pad(b1, (0, Cpo - Cout)).astype(jnp.float32).reshape(1, Cpo)
    b2p = jnp.pad(b2, (0, Cpo - Cout)).astype(jnp.float32).reshape(1, Cpo)

    # Valid-row mask: flat row r = h*Wp + w is a real output iff w < W.
    mask = jnp.tile(jnp.arange(Wp) < W, (H,)).astype(jnp.float32).reshape(L, 1)

    kernel = functools.partial(_bottleneck_kernel, Wp, lead)

    out_flat = pl.pallas_call(
        kernel,
        out_shape=jax.ShapeDtypeStruct((N * L, Cpo), jnp.float32),
        grid_spec=pltpu.PrefetchScalarGridSpec(
            num_scalar_prefetch=0,
            grid=(N,),
            in_specs=[
                pl.BlockSpec((P_in, Cp), lambda n: (n, 0)),
                pl.BlockSpec((9, Cp, Cpo), lambda n: (0, 0, 0)),
                pl.BlockSpec((1, Cpo), lambda n: (0, 0)),
                pl.BlockSpec((9, Cpo, Cpo), lambda n: (0, 0, 0)),
                pl.BlockSpec((1, Cpo), lambda n: (0, 0)),
                pl.BlockSpec((L, 1), lambda n: (0, 0)),
            ],
            out_specs=pl.BlockSpec((L, Cpo), lambda n: (n, 0)),
            scratch_shapes=[pltpu.VMEM((mid_rows, Cpo), jnp.bfloat16)],
        ),
        compiler_params=pltpu.CompilerParams(
            dimension_semantics=("parallel",),
            vmem_limit_bytes=32 * 1024 * 1024,
        ),
    )(x, w1p, b1p, w2p, b2p, mask)

    # Strip junk padding columns / padded channels, back to NCHW.
    out = out_flat.reshape(N, H, Wp, Cpo)[:, :, :W, :Cout]
    return jnp.transpose(out, (0, 3, 1, 2))


def bottleneck_reference(x_nchw, w1, b1, w2, b2):
    """Pure-JAX f32 reference (lax conv) for correctness checking."""
    x = jnp.transpose(x_nchw, (0, 2, 3, 1))
    dn = ('NHWC', 'HWIO', 'NHWC')
    y = jax.lax.conv_general_dilated(x, w1, (1, 1), 'SAME',
                                     dimension_numbers=dn) + b1
    y = jnp.maximum(y, 0.0)
    y = jax.lax.conv_general_dilated(y, w2, (1, 1), 'SAME',
                                     dimension_numbers=dn) + b2
    y = jnp.maximum(y, 0.0)
    return jnp.transpose(y, (0, 3, 1, 2))


if __name__ == "__main__":
    N, Cin, Cout, H, W = 2, 4, 8, 16, 16

    key = jax.random.PRNGKey(0)
    kx, k1, kb1, k2, kb2 = jax.random.split(key, 5)

    x = jax.random.normal(kx, (N, Cin, H, W), dtype=jnp.float32)
    # Deterministic synthetic parameters (module __init__ defines the shapes).
    w1 = jax.random.normal(k1, (3, 3, Cin, Cout), dtype=jnp.float32) * 0.1
    b1 = jax.random.normal(kb1, (Cout,), dtype=jnp.float32) * 0.1
    w2 = jax.random.normal(k2, (3, 3, Cout, Cout), dtype=jnp.float32) * 0.1
    b2 = jax.random.normal(kb2, (Cout,), dtype=jnp.float32) * 0.1

    out = jax.block_until_ready(bottleneck_forward(x, w1, b1, w2, b2))
    ref = jax.block_until_ready(bottleneck_reference(x, w1, b1, w2, b2))

    assert out.shape == (N, Cout, H, W), out.shape
    # Kernel uses bf16 MXU operands with f32 accumulation vs the f32 reference,
    # so allow bf16-level tolerance (a tap/offset bug produces O(1) errors).
    max_err = float(jnp.max(jnp.abs(out - ref)))
    assert jnp.allclose(out, ref, atol=5e-2, rtol=5e-2), max_err

    print("KERNEL_OK")
</pallas_src>

<mosaic_0001>
module attributes {stable_mosaic.version = 11 : i64} {
  func.func @_bottleneck_kernel(%arg0: i32, %arg1: memref<328x128xbf16, #tpu.memory_space<vmem>>, %arg2: memref<9x128x128xbf16, #tpu.memory_space<vmem>>, %arg3: memref<1x128xf32, #tpu.memory_space<vmem>>, %arg4: memref<9x128x128xbf16, #tpu.memory_space<vmem>>, %arg5: memref<1x128xf32, #tpu.memory_space<vmem>>, %arg6: memref<288x1xf32, #tpu.memory_space<vmem>>, %arg7: memref<288x128xf32, #tpu.memory_space<vmem>>, %arg8: memref<352x128xbf16, #tpu.memory_space<vmem>>) attributes {dimension_semantics = [#tpu.dimension_semantics<parallel>], iteration_bounds = array<i64: 2>, scalar_prefetch = 0 : i64, scratch_operands = 1 : i64, tpu.core_type = #tpu.core_type<tc>, window_params = [{transform_indices = @transform_0, window_bounds = array<i64: 328, 128>}, {pipeline_mode = #tpu.pipeline_mode<synchronous>, transform_indices = @transform_1, window_bounds = array<i64: 9, 128, 128>}, {pipeline_mode = #tpu.pipeline_mode<synchronous>, transform_indices = @transform_2, window_bounds = array<i64: 1, 128>}, {pipeline_mode = #tpu.pipeline_mode<synchronous>, transform_indices = @transform_3, window_bounds = array<i64: 9, 128, 128>}, {pipeline_mode = #tpu.pipeline_mode<synchronous>, transform_indices = @transform_4, window_bounds = array<i64: 1, 128>}, {pipeline_mode = #tpu.pipeline_mode<synchronous>, transform_indices = @transform_5, window_bounds = array<i64: 288, 1>}, {transform_indices = @transform_6, window_bounds = array<i64: 288, 128>}]} {
    %c0_i32 = arith.constant 0 : i32
    %0 = arith.cmpi eq, %arg0, %c0_i32 : i32
    %1 = arith.extui %0 : i1 to i32
    %c0_i32_0 = arith.constant 0 : i32
    %2 = arith.cmpi ne, %1, %c0_i32_0 : i32
    scf.if %2 {
      %cst_96 = arith.constant 0.000000e+00 : bf16
      %107 = vector.broadcast %cst_96 : bf16 to vector<352x128xbf16>
      %c0_97 = arith.constant 0 : index
      %c0_98 = arith.constant 0 : index
      %108 = vector.load %arg8[%c0_97, %c0_98] : memref<352x128xbf16, #tpu.memory_space<vmem>>, vector<352x128xbf16>
      tpu.vector_store %arg8[%c0_97, %c0_98], %107 {strides = array<i32>} : memref<352x128xbf16, #tpu.memory_space<vmem>>, vector<352x128xbf16>,
    } else {
    }
    %c0 = arith.constant 0 : index
    %c0_1 = arith.constant 0 : index
    %3 = vector.load %arg1[%c0, %c0_1] : memref<328x128xbf16, #tpu.memory_space<vmem>>, vector<288x128xbf16>
    %c0_2 = arith.constant 0 : index
    %c0_3 = arith.constant 0 : index
    %c0_4 = arith.constant 0 : index
    %4 = vector.load %arg2[%c0_2, %c0_3, %c0_4] : memref<9x128x128xbf16, #tpu.memory_space<vmem>>, vector<1x128x128xbf16>
    %5 = vector.shape_cast %4 : vector<1x128x128xbf16> to vector<128x128xbf16>
    %cst = arith.constant dense<0.000000e+00> : vector<288x128xf32>
    %6 = tpu.matmul %3, %5, %cst {dimension_numbers = #tpu.dot_dimension_numbers<[1], [0], [0], [1], [0, 0, 1, 1], [], []>} : vector<288x128xbf16>, vector<128x128xbf16>, vector<288x128xf32> -> vector<288x128xf32>
    %c1 = arith.constant 1 : index
    %c0_5 = arith.constant 0 : index
    %7 = vector.load %arg1[%c1, %c0_5] : memref<328x128xbf16, #tpu.memory_space<vmem>>, vector<288x128xbf16>
    %c1_6 = arith.constant 1 : index
    %c0_7 = arith.constant 0 : index
    %c0_8 = arith.constant 0 : index
    %8 = vector.load %arg2[%c1_6, %c0_7, %c0_8] : memref<9x128x128xbf16, #tpu.memory_space<vmem>>, vector<1x128x128xbf16>
    %9 = vector.shape_cast %8 : vector<1x128x128xbf16> to vector<128x128xbf16>
    %cst_9 = arith.constant dense<0.000000e+00> : vector<288x128xf32>
    %10 = tpu.matmul %7, %9, %cst_9 {dimension_numbers = #tpu.dot_dimension_numbers<[1], [0], [0], [1], [0, 0, 1, 1], [], []>} : vector<288x128xbf16>, vector<128x128xbf16>, vector<288x128xf32> -> vector<288x128xf32>
    %11 = arith.addf %6, %10 : vector<288x128xf32>
    %c2 = arith.constant 2 : index
    %c0_10 = arith.constant 0 : index
    %12 = vector.load %arg1[%c2, %c0_10] : memref<328x128xbf16, #tpu.memory_space<vmem>>, vector<288x128xbf16>
    %c2_11 = arith.constant 2 : index
    %c0_12 = arith.constant 0 : index
    %c0_13 = arith.constant 0 : index
    %13 = vector.load %arg2[%c2_11, %c0_12, %c0_13] : memref<9x128x128xbf16, #tpu.memory_space<vmem>>, vector<1x128x128xbf16>
    %14 = vector.shape_cast %13 : vector<1x128x128xbf16> to vector<128x128xbf16>
    %cst_14 = arith.constant dense<0.000000e+00> : vector<288x128xf32>
    %15 = tpu.matmul %12, %14, %cst_14 {dimension_numbers = #tpu.dot_dimension_numbers<[1], [0], [0], [1], [0, 0, 1, 1], [], []>} : vector<288x128xbf16>, vector<128x128xbf16>, vector<288x128xf32> -> vector<288x128xf32>
    %16 = arith.addf %11, %15 : vector<288x128xf32>
    %c18 = arith.constant 18 : index
    %c0_15 = arith.constant 0 : index
    %17 = vector.load %arg1[%c18, %c0_15] : memref<328x128xbf16, #tpu.memory_space<vmem>>, vector<288x128xbf16>
    %c3 = arith.constant 3 : index
    %c0_16 = arith.constant 0 : index
    %c0_17 = arith.constant 0 : index
    %18 = vector.load %arg2[%c3, %c0_16, %c0_17] : memref<9x128x128xbf16, #tpu.memory_space<vmem>>, vector<1x128x128xbf16>
    %19 = vector.shape_cast %18 : vector<1x128x128xbf16> to vector<128x128xbf16>
    %cst_18 = arith.constant dense<0.000000e+00> : vector<288x128xf32>
    %20 = tpu.matmul %17, %19, %cst_18 {dimension_numbers = #tpu.dot_dimension_numbers<[1], [0], [0], [1], [0, 0, 1, 1], [], []>} : vector<288x128xbf16>, vector<128x128xbf16>, vector<288x128xf32> -> vector<288x128xf32>
    %21 = arith.addf %16, %20 : vector<288x128xf32>
    %c19 = arith.constant 19 : index
    %c0_19 = arith.constant 0 : index
    %22 = vector.load %arg1[%c19, %c0_19] : memref<328x128xbf16, #tpu.memory_space<vmem>>, vector<288x128xbf16>
    %c4 = arith.constant 4 : index
    %c0_20 = arith.constant 0 : index
    %c0_21 = arith.constant 0 : index
    %23 = vector.load %arg2[%c4, %c0_20, %c0_21] : memref<9x128x128xbf16, #tpu.memory_space<vmem>>, vector<1x128x128xbf16>
    %24 = vector.shape_cast %23 : vector<1x128x128xbf16> to vector<128x128xbf16>
    %cst_22 = arith.constant dense<0.000000e+00> : vector<288x128xf32>
    %25 = tpu.matmul %22, %24, %cst_22 {dimension_numbers = #tpu.dot_dimension_numbers<[1], [0], [0], [1], [0, 0, 1, 1], [], []>} : vector<288x128xbf16>, vector<128x128xbf16>, vector<288x128xf32> -> vector<288x128xf32>
    %26 = arith.addf %21, %25 : vector<288x128xf32>
    %c20 = arith.constant 20 : index
    %c0_23 = arith.constant 0 : index
    %27 = vector.load %arg1[%c20, %c0_23] : memref<328x128xbf16, #tpu.memory_space<vmem>>, vector<288x128xbf16>
    %c5 = arith.constant 5 : index
    %c0_24 = arith.constant 0 : index
    %c0_25 = arith.constant 0 : index
    %28 = vector.load %arg2[%c5, %c0_24, %c0_25] : memref<9x128x128xbf16, #tpu.memory_space<vmem>>, vector<1x128x128xbf16>
    %29 = vector.shape_cast %28 : vector<1x128x128xbf16> to vector<128x128xbf16>
    %cst_26 = arith.constant dense<0.000000e+00> : vector<288x128xf32>
    %30 = tpu.matmul %27, %29, %cst_26 {dimension_numbers = #tpu.dot_dimension_numbers<[1], [0], [0], [1], [0, 0, 1, 1], [], []>} : vector<288x128xbf16>, vector<128x128xbf16>, vector<288x128xf32> -> vector<288x128xf32>
    %31 = arith.addf %26, %30 : vector<288x128xf32>
    %c36 = arith.constant 36 : index
    %c0_27 = arith.constant 0 : index
    %32 = vector.load %arg1[%c36, %c0_27] : memref<328x128xbf16, #tpu.memory_space<vmem>>, vector<288x128xbf16>
    %c6 = arith.constant 6 : index
    %c0_28 = arith.constant 0 : index
    %c0_29 = arith.constant 0 : index
    %33 = vector.load %arg2[%c6, %c0_28, %c0_29] : memref<9x128x128xbf16, #tpu.memory_space<vmem>>, vector<1x128x128xbf16>
    %34 = vector.shape_cast %33 : vector<1x128x128xbf16> to vector<128x128xbf16>
    %cst_30 = arith.constant dense<0.000000e+00> : vector<288x128xf32>
    %35 = tpu.matmul %32, %34, %cst_30 {dimension_numbers = #tpu.dot_dimension_numbers<[1], [0], [0], [1], [0, 0, 1, 1], [], []>} : vector<288x128xbf16>, vector<128x128xbf16>, vector<288x128xf32> -> vector<288x128xf32>
    %36 = arith.addf %31, %35 : vector<288x128xf32>
    %c37 = arith.constant 37 : index
    %c0_31 = arith.constant 0 : index
    %37 = vector.load %arg1[%c37, %c0_31] : memref<328x128xbf16, #tpu.memory_space<vmem>>, vector<288x128xbf16>
    %c7 = arith.constant 7 : index
    %c0_32 = arith.constant 0 : index
    %c0_33 = arith.constant 0 : index
    %38 = vector.load %arg2[%c7, %c0_32, %c0_33] : memref<9x128x128xbf16, #tpu.memory_space<vmem>>, vector<1x128x128xbf16>
    %39 = vector.shape_cast %38 : vector<1x128x128xbf16> to vector<128x128xbf16>
    %cst_34 = arith.constant dense<0.000000e+00> : vector<288x128xf32>
    %40 = tpu.matmul %37, %39, %cst_34 {dimension_numbers = #tpu.dot_dimension_numbers<[1], [0], [0], [1], [0, 0, 1, 1], [], []>} : vector<288x128xbf16>, vector<128x128xbf16>, vector<288x128xf32> -> vector<288x128xf32>
    %41 = arith.addf %36, %40 : vector<288x128xf32>
    %c38 = arith.constant 38 : index
    %c0_35 = arith.constant 0 : index
    %42 = vector.load %arg1[%c38, %c0_35] : memref<328x128xbf16, #tpu.memory_space<vmem>>, vector<288x128xbf16>
    %c8 = arith.constant 8 : index
    %c0_36 = arith.constant 0 : index
    %c0_37 = arith.constant 0 : index
    %43 = vector.load %arg2[%c8, %c0_36, %c0_37] : memref<9x128x128xbf16, #tpu.memory_space<vmem>>, vector<1x128x128xbf16>
    %44 = vector.shape_cast %43 : vector<1x128x128xbf16> to vector<128x128xbf16>
    %cst_38 = arith.constant dense<0.000000e+00> : vector<288x128xf32>
    %45 = tpu.matmul %42, %44, %cst_38 {dimension_numbers = #tpu.dot_dimension_numbers<[1], [0], [0], [1], [0, 0, 1, 1], [], []>} : vector<288x128xbf16>, vector<128x128xbf16>, vector<288x128xf32> -> vector<288x128xf32>
    %46 = arith.addf %41, %45 : vector<288x128xf32>
    %c0_39 = arith.constant 0 : index
    %c0_40 = arith.constant 0 : index
    %47 = vector.load %arg6[%c0_39, %c0_40] : memref<288x1xf32, #tpu.memory_space<vmem>>, vector<288x1xf32>
    %c0_41 = arith.constant 0 : index
    %c0_42 = arith.constant 0 : index
    %48 = vector.load %arg3[%c0_41, %c0_42] : memref<1x128xf32, #tpu.memory_space<vmem>>, vector<1x128xf32>
    %49 = vector.broadcast %48 : vector<1x128xf32> to vector<288x128xf32>
    %50 = arith.addf %46, %49 : vector<288x128xf32>
    %cst_43 = arith.constant 0.000000e+00 : f32
    %51 = vector.broadcast %cst_43 : f32 to vector<288x128xf32>
    %52 = arith.maximumf %50, %51 : vector<288x128xf32>
    %53 = vector.broadcast %47 : vector<288x1xf32> to vector<288x128xf32>
    %54 = arith.mulf %53, %52 : vector<288x128xf32>
    %55 = arith.truncf %54 : vector<288x128xf32> to vector<288x128xbf16>
    %c32 = arith.constant 32 : index
    %c0_44 = arith.constant 0 : index
    %56 = vector.load %arg8[%c32, %c0_44] : memref<352x128xbf16, #tpu.memory_space<vmem>>, vector<288x128xbf16>
    tpu.vector_store %arg8[%c32, %c0_44], %55 {strides = array<i32>} : memref<352x128xbf16, #tpu.memory_space<vmem>>, vector<288x128xbf16>,
    %c13 = arith.constant 13 : index
    %c0_45 = arith.constant 0 : index
    %57 = vector.load %arg8[%c13, %c0_45] : memref<352x128xbf16, #tpu.memory_space<vmem>>, vector<288x128xbf16>
    %c0_46 = arith.constant 0 : index
    %c0_47 = arith.constant 0 : index
    %c0_48 = arith.constant 0 : index
    %58 = vector.load %arg4[%c0_46, %c0_47, %c0_48] : memref<9x128x128xbf16, #tpu.memory_space<vmem>>, vector<1x128x128xbf16>
    %59 = vector.shape_cast %58 : vector<1x128x128xbf16> to vector<128x128xbf16>
    %cst_49 = arith.constant dense<0.000000e+00> : vector<288x128xf32>
    %60 = tpu.matmul %57, %59, %cst_49 {dimension_numbers = #tpu.dot_dimension_numbers<[1], [0], [0], [1], [0, 0, 1, 1], [], []>} : vector<288x128xbf16>, vector<128x128xbf16>, vector<288x128xf32> -> vector<288x128xf32>
    %c14 = arith.constant 14 : index
    %c0_50 = arith.constant 0 : index
    %61 = vector.load %arg8[%c14, %c0_50] : memref<352x128xbf16, #tpu.memory_space<vmem>>, vector<288x128xbf16>
    %c1_51 = arith.constant 1 : index
    %c0_52 = arith.constant 0 : index
    %c0_53 = arith.constant 0 : index
    %62 = vector.load %arg4[%c1_51, %c0_52, %c0_53] : memref<9x128x128xbf16, #tpu.memory_space<vmem>>, vector<1x128x128xbf16>
    %63 = vector.shape_cast %62 : vector<1x128x128xbf16> to vector<128x128xbf16>
    %cst_54 = arith.constant dense<0.000000e+00> : vector<288x128xf32>
    %64 = tpu.matmul %61, %63, %cst_54 {dimension_numbers = #tpu.dot_dimension_numbers<[1], [0], [0], [1], [0, 0, 1, 1], [], []>} : vector<288x128xbf16>, vector<128x128xbf16>, vector<288x128xf32> -> vector<288x128xf32>
    %65 = arith.addf %60, %64 : vector<288x128xf32>
    %c15 = arith.constant 15 : index
    %c0_55 = arith.constant 0 : index
    %66 = vector.load %arg8[%c15, %c0_55] : memref<352x128xbf16, #tpu.memory_space<vmem>>, vector<288x128xbf16>
    %c2_56 = arith.constant 2 : index
    %c0_57 = arith.constant 0 : index
    %c0_58 = arith.constant 0 : index
    %67 = vector.load %arg4[%c2_56, %c0_57, %c0_58] : memref<9x128x128xbf16, #tpu.memory_space<vmem>>, vector<1x128x128xbf16>
    %68 = vector.shape_cast %67 : vector<1x128x128xbf16> to vector<128x128xbf16>
    %cst_59 = arith.constant dense<0.000000e+00> : vector<288x128xf32>
    %69 = tpu.matmul %66, %68, %cst_59 {dimension_numbers = #tpu.dot_dimension_numbers<[1], [0], [0], [1], [0, 0, 1, 1], [], []>} : vector<288x128xbf16>, vector<128x128xbf16>, vector<288x128xf32> -> vector<288x128xf32>
    %70 = arith.addf %65, %69 : vector<288x128xf32>
    %c31 = arith.constant 31 : index
    %c0_60 = arith.constant 0 : index
    %71 = vector.load %arg8[%c31, %c0_60] : memref<352x128xbf16, #tpu.memory_space<vmem>>, vector<288x128xbf16>
    %c3_61 = arith.constant 3 : index
    %c0_62 = arith.constant 0 : index
    %c0_63 = arith.constant 0 : index
    %72 = vector.load %arg4[%c3_61, %c0_62, %c0_63] : memref<9x128x128xbf16, #tpu.memory_space<vmem>>, vector<1x128x128xbf16>
    %73 = vector.shape_cast %72 : vector<1x128x128xbf16> to vector<128x128xbf16>
    %cst_64 = arith.constant dense<0.000000e+00> : vector<288x128xf32>
    %74 = tpu.matmul %71, %73, %cst_64 {dimension_numbers = #tpu.dot_dimension_numbers<[1], [0], [0], [1], [0, 0, 1, 1], [], []>} : vector<288x128xbf16>, vector<128x128xbf16>, vector<288x128xf32> -> vector<288x128xf32>
    %75 = arith.addf %70, %74 : vector<288x128xf32>
    %c32_65 = arith.constant 32 : index
    %c0_66 = arith.constant 0 : index
    %76 = vector.load %arg8[%c32_65, %c0_66] : memref<352x128xbf16, #tpu.memory_space<vmem>>, vector<288x128xbf16>
    %c4_67 = arith.constant 4 : index
    %c0_68 = arith.constant 0 : index
    %c0_69 = arith.constant 0 : index
    %77 = vector.load %arg4[%c4_67, %c0_68, %c0_69] : memref<9x128x128xbf16, #tpu.memory_space<vmem>>, vector<1x128x128xbf16>
    %78 = vector.shape_cast %77 : vector<1x128x128xbf16> to vector<128x128xbf16>
    %cst_70 = arith.constant dense<0.000000e+00> : vector<288x128xf32>
    %79 = tpu.matmul %76, %78, %cst_70 {dimension_numbers = #tpu.dot_dimension_numbers<[1], [0], [0], [1], [0, 0, 1, 1], [], []>} : vector<288x128xbf16>, vector<128x128xbf16>, vector<288x128xf32> -> vector<288x128xf32>
    %80 = arith.addf %75, %79 : vector<288x128xf32>
    %c33 = arith.constant 33 : index
    %c0_71 = arith.constant 0 : index
    %81 = vector.load %arg8[%c33, %c0_71] : memref<352x128xbf16, #tpu.memory_space<vmem>>, vector<288x128xbf16>
    %c5_72 = arith.constant 5 : index
    %c0_73 = arith.constant 0 : index
    %c0_74 = arith.constant 0 : index
    %82 = vector.load %arg4[%c5_72, %c0_73, %c0_74] : memref<9x128x128xbf16, #tpu.memory_space<vmem>>, vector<1x128x128xbf16>
    %83 = vector.shape_cast %82 : vector<1x128x128xbf16> to vector<128x128xbf16>
    %cst_75 = arith.constant dense<0.000000e+00> : vector<288x128xf32>
    %84 = tpu.matmul %81, %83, %cst_75 {dimension_numbers = #tpu.dot_dimension_numbers<[1], [0], [0], [1], [0, 0, 1, 1], [], []>} : vector<288x128xbf16>, vector<128x128xbf16>, vector<288x128xf32> -> vector<288x128xf32>
    %85 = arith.addf %80, %84 : vector<288x128xf32>
    %c49 = arith.constant 49 : index
    %c0_76 = arith.constant 0 : index
    %86 = vector.load %arg8[%c49, %c0_76] : memref<352x128xbf16, #tpu.memory_space<vmem>>, vector<288x128xbf16>
    %c6_77 = arith.constant 6 : index
    %c0_78 = arith.constant 0 : index
    %c0_79 = arith.constant 0 : index
    %87 = vector.load %arg4[%c6_77, %c0_78, %c0_79] : memref<9x128x128xbf16, #tpu.memory_space<vmem>>, vector<1x128x128xbf16>
    %88 = vector.shape_cast %87 : vector<1x128x128xbf16> to vector<128x128xbf16>
    %cst_80 = arith.constant dense<0.000000e+00> : vector<288x128xf32>
    %89 = tpu.matmul %86, %88, %cst_80 {dimension_numbers = #tpu.dot_dimension_numbers<[1], [0], [0], [1], [0, 0, 1, 1], [], []>} : vector<288x128xbf16>, vector<128x128xbf16>, vector<288x128xf32> -> vector<288x128xf32>
    %90 = arith.addf %85, %89 : vector<288x128xf32>
    %c50 = arith.constant 50 : index
    %c0_81 = arith.constant 0 : index
    %91 = vector.load %arg8[%c50, %c0_81] : memref<352x128xbf16, #tpu.memory_space<vmem>>, vector<288x128xbf16>
    %c7_82 = arith.constant 7 : index
    %c0_83 = arith.constant 0 : index
    %c0_84 = arith.constant 0 : index
    %92 = vector.load %arg4[%c7_82, %c0_83, %c0_84] : memref<9x128x128xbf16, #tpu.memory_space<vmem>>, vector<1x128x128xbf16>
    %93 = vector.shape_cast %92 : vector<1x128x128xbf16> to vector<128x128xbf16>
    %cst_85 = arith.constant dense<0.000000e+00> : vector<288x128xf32>
    %94 = tpu.matmul %91, %93, %cst_85 {dimension_numbers = #tpu.dot_dimension_numbers<[1], [0], [0], [1], [0, 0, 1, 1], [], []>} : vector<288x128xbf16>, vector<128x128xbf16>, vector<288x128xf32> -> vector<288x128xf32>
    %95 = arith.addf %90, %94 : vector<288x128xf32>
    %c51 = arith.constant 51 : index
    %c0_86 = arith.constant 0 : index
    %96 = vector.load %arg8[%c51, %c0_86] : memref<352x128xbf16, #tpu.memory_space<vmem>>, vector<288x128xbf16>
    %c8_87 = arith.constant 8 : index
    %c0_88 = arith.constant 0 : index
    %c0_89 = arith.constant 0 : index
    %97 = vector.load %arg4[%c8_87, %c0_88, %c0_89] : memref<9x128x128xbf16, #tpu.memory_space<vmem>>, vector<1x128x128xbf16>
    %98 = vector.shape_cast %97 : vector<1x128x128xbf16> to vector<128x128xbf16>
    %cst_90 = arith.constant dense<0.000000e+00> : vector<288x128xf32>
    %99 = tpu.matmul %96, %98, %cst_90 {dimension_numbers = #tpu.dot_dimension_numbers<[1], [0], [0], [1], [0, 0, 1, 1], [], []>} : vector<288x128xbf16>, vector<128x128xbf16>, vector<288x128xf32> -> vector<288x128xf32>
    %100 = arith.addf %95, %99 : vector<288x128xf32>
    %c0_91 = arith.constant 0 : index
    %c0_92 = arith.constant 0 : index
    %101 = vector.load %arg5[%c0_91, %c0_92] : memref<1x128xf32, #tpu.memory_space<vmem>>, vector<1x128xf32>
    %102 = vector.broadcast %101 : vector<1x128xf32> to vector<288x128xf32>
    %103 = arith.addf %100, %102 : vector<288x128xf32>
    %cst_93 = arith.constant 0.000000e+00 : f32
    %104 = vector.broadcast %cst_93 : f32 to vector<288x128xf32>
    %105 = arith.maximumf %103, %104 : vector<288x128xf32>
    %c0_94 = arith.constant 0 : index
    %c0_95 = arith.constant 0 : index
    %106 = vector.load %arg7[%c0_94, %c0_95] : memref<288x128xf32, #tpu.memory_space<vmem>>, vector<288x128xf32>
    tpu.vector_store %arg7[%c0_94, %c0_95], %105 {strides = array<i32>} : memref<288x128xf32, #tpu.memory_space<vmem>>, vector<288x128xf32>,
    return
  }
  func.func @transform_0(%arg0: i32) -> (i32, i32) {
    %c0_i32 = arith.constant 0 : i32
    %c0_i32_0 = arith.constant 0 : i32
    return %arg0, %c0_i32 : i32, i32
  }
  func.func @transform_1(%arg0: i32) -> (i32, i32, i32) {
    %c0_i32 = arith.constant 0 : i32
    %c0_i32_0 = arith.constant 0 : i32
    %c0_i32_1 = arith.constant 0 : i32
    %c0_i32_2 = arith.constant 0 : i32
    return %c0_i32, %c0_i32_0, %c0_i32_1 : i32, i32, i32
  }
  func.func @transform_2(%arg0: i32) -> (i32, i32) {
    %c0_i32 = arith.constant 0 : i32
    %c0_i32_0 = arith.constant 0 : i32
    %c0_i32_1 = arith.constant 0 : i32
    return %c0_i32, %c0_i32_0 : i32, i32
  }
  func.func @transform_3(%arg0: i32) -> (i32, i32, i32) {
    %c0_i32 = arith.constant 0 : i32
    %c0_i32_0 = arith.constant 0 : i32
    %c0_i32_1 = arith.constant 0 : i32
    %c0_i32_2 = arith.constant 0 : i32
    return %c0_i32, %c0_i32_0, %c0_i32_1 : i32, i32, i32
  }
  func.func @transform_4(%arg0: i32) -> (i32, i32) {
    %c0_i32 = arith.constant 0 : i32
    %c0_i32_0 = arith.constant 0 : i32
    %c0_i32_1 = arith.constant 0 : i32
    return %c0_i32, %c0_i32_0 : i32, i32
  }
  func.func @transform_5(%arg0: i32) -> (i32, i32) {
    %c0_i32 = arith.constant 0 : i32
    %c0_i32_0 = arith.constant 0 : i32
    %c0_i32_1 = arith.constant 0 : i32
    return %c0_i32, %c0_i32_0 : i32, i32
  }
  func.func @transform_6(%arg0: i32) -> (i32, i32) {
    %c0_i32 = arith.constant 0 : i32
    %c0_i32_0 = arith.constant 0 : i32
    return %arg0, %c0_i32 : i32, i32
  }
}

</mosaic_0001>

<bundles_post_ra>
// kernel: tpu_custom_call.1
= control target key start
LH: loop header
LB: loop body
LE: loop exit
PB: predicated region body
PF: predicated region fallthrough
CT: control target
= control target key end

     0   :  { %11 = vsyncpa [#allocation4], 0  ;;  %s14801_s0 = inlined_call_operand.hbm [shape: bf16[656,128], index: 0, kind: input, shape index: {}]   ;;  %s14802_s1 = inlined_call_operand.hbm [shape: bf16[9,128,128], index: 1, kind: input, shape index: {}]   ;;  %s14803_s2 = inlined_call_operand.vmem [shape: f32[1,128], index: 2, kind: input, shape index: {}]   ;;  %s14804_s3 = inlined_call_operand.hbm [shape: bf16[9,128,128], index: 3, kind: input, shape index: {}]   ;;  %s14805_s4 = inlined_call_operand.vmem [shape: f32[1,128], index: 4, kind: input, shape index: {}]   ;;  %s14806_s5 = inlined_call_operand.vmem [shape: f32[288,1], index: 5, kind: input, shape index: {}]   ;;  %s14807_s6 = inlined_call_operand.hbm [shape: f32[576,128], index: 6, kind: output, shape index: {}]  }
   0x1   :  { %13 = vsyncpa [#allocation4 + $0x1], 0 }
   0x2   :  { %14 = vsyncpa [#allocation7], 0 }
   0x3   :  { %15 = vsyncpa [#allocation5], 0 }
   0x4   :  { %17 = vsyncpa [#allocation5 + $0x1], 0  ;;  %s11272_s21 = smov 0   ;;  %s11274_s22 = smov 0  }
   0x5   :  { %s11276_s23 = smov 0   ;;  %s11278_s24 = smov 0  }
   0x6 LB: > { %s11293_s25 = sadd.s32 4294967295, %s11225_s24   ;;  %s8788_s26 = sadd.s32 4294967294, %s11225_s24   ;;  %s11225_s24 = sphi %s11278_s24, %s15191_s24   ;;  %s11221_s23 = sphi %s11276_s23, %s15190_s23   ;;  %s11217_s22 = sphi %s11274_s22, %s15189_s22   ;;  %s11213_s21 = sphi %s11272_s21, %s15188_s21  }
   0x7   : > { %p43_p0 = scmp.ne.s32.totalorder %s11217_s22, %s11213_s21  ;;  %p14810_p1 = scmp.eq.s32.totalorder %s11293_s25, 0 }
   0x8   : > { %p172_p2 = scmp.eq.s32.totalorder %s11293_s25, 1  ;;  %p178_p3 = scmp.eq.s32.totalorder %s8788_s26, 1 }
   0x9   : > { %p11302_p4 = por %p14810_p1, %p43_p0  ;;  %p8789_p5 = scmp.ge.s32.totalorder %s11225_s24, 1 }
   0xa   : > { %p11307_p6 = por %p178_p3, %p43_p0  ;;  %p185_p7 = scmp.lt.s32.totalorder %s11225_s24, 3 }
   0xb   : > { %s14853_s27 = scalar_select %p11302_p4, 1, 0 }
   0xc   : > { %s14854_s28 = scalar_select %p11307_p6, 1, 0 }
   0xd   : > { %p11313_p9 = pnand %p8789_p5, %p185_p7  ;;  %s11227_s30 = smov [#allocation6]  }
   0xe   : > { %s197_s7 = sshll.u32 %s11227_s30, 4  ;;  %s11228_s9 = smov [#allocation8]   ;;  %s198_s7 = int_to_ptr.vmem [resolvable:$true] %s197_s7 }
   0xf   : > { %s14855_s29 = scalar_select %p11313_p9, 1, 0 }
  0x10   : > { %p10708_p10 = pneg %p11313_p9  ;;  %s213_s10 = sshll.u32 %s11228_s9, 4  ;;  %s214_s10 = int_to_ptr.vmem [resolvable:$true] %s213_s10 }
  0x11   : > { %s11088_s11 = scalar_lea.vmem %s198_s7, 9216  ;;  %p11096_p7 = scmp.lt.s32.totalorder %s198_s7, %s198_s7 }
  0x12   : > { %p11322_p12 = pnand %p10708_p10, %p14810_p1  ;;  %p11089_p0 = scmp.ne.s32.totalorder %s198_s7, %s11088_s11 }
  0x13   : > { %p11097_p11 = scmp.lt.s32.totalorder %s11088_s11, %s11088_s11 }
  0x14   : > { %p11079_p13 = pneg %p11322_p12 }
  0x15   : > { %p11098_p8 = por %p11097_p11, %p11096_p7 }
  0x16   : > { %p11091_p3 = pnand %p11089_p0, %p11079_p13 }
  0x18   : > { %p11092_p5 = pneg %p11091_p3 }
  0x1a   : > { %p11099_p10 = pnand %p11098_p8, %p11092_p5 }
  0x1c   : > { %11102 = shalt.err (!%p11099_p10)
}
  0x1d   : > { %s14808_s12 = smov 64   ;;  %s14809_s13 = smov 4  }
  0x1e   : > { %10711 = dma.hbm_to_vmem [thread:$0]  (!%p11322_p12), %s14802_s1, 9216, %s198_s7, [#allocation7], %s14808_s12, %s14808_s12, %s14809_s13  }
  0x1f   : > { %s11114_s16 = scalar_lea.vmem %s214_s10, 9216  ;;  %p11122_p8 = scmp.lt.s32.totalorder %s214_s10, %s214_s10 }
  0x20   : > { %p11115_p0 = scmp.ne.s32.totalorder %s214_s10, %s11114_s16  ;;  %p11123_p5 = scmp.lt.s32.totalorder %s11114_s16, %s11114_s16 }
  0x22   : > { %p11117_p3 = pnand %p11115_p0, %p11079_p13  ;;  %p11124_p7 = por %p11123_p5, %p11122_p8 }
  0x24   : > { %p11118_p11 = pneg %p11117_p3 }
  0x26   : > { %p11125_p10 = pnand %p11124_p7, %p11118_p11 }
  0x28   : > { %11128 = shalt.err (!%p11125_p10)
}
  0x29   : > { %10714 = dma.hbm_to_vmem [thread:$0]  (!%p11322_p12), %s14804_s3, 9216, %s214_s10, [#allocation7], %s14808_s12, %s14808_s12, %s14809_s13  }
  0x2a   : > { %s11351_s19 = sadd.s32 1, %s11225_s24   ;;  %s30_s20 = sadd.s32 1, %s11221_s23 }
  0x2b   : > { %s27_s26 = ssub.s32 %s11225_s24, %s11351_s19  ;;  %p37_p13 = scmp.ne.s32.totalorder %s11221_s23, %s11217_s22 }
  0x2c   : > { %p28_p0 = scmp.eq.s32.totalorder %s27_s26, 0  ;;  %p38_p3 = scmp.eq.s32.totalorder %s11225_s24, 0 }
  0x2d   : > { %p11361_p11 = por %p172_p2, %p37_p13  ;;  %p10725_p8 = scmp.lt.s32.totalorder %s11225_s24, 2 }
  0x2e   : > { %s11367_s7 = scalar_select %p28_p0, %s11221_s23, %s30_s20  }
  0x2f   : > { %s14857_s30 = scalar_select %p11361_p11, 1, 0 }
  0x30   : > { %p39_p5 = por %p38_p3, %p37_p13  ;;  %s233_s8 = sand.u32 1, %s11221_s23  }
  0x31   : > { %s10693_s9 = smul.u32 164, %s233_s8  ;;  %s11382_s20 = scalar_lea.sflag [#allocation4], %s233_s8 }
  0x32   : > { %s9143_s10 = smul.u32 2624, %s11225_s24  ;;  %p11371_p12 = pnand %p10725_p8, %p39_p5 }
  0x33   : > { %s237_s17 = scalar_lea.vmem [#allocation3], %s10693_s9 }
  0x34   : > { %s11378_s16 = scalar_lea.hbm %s14801_s0, %s9143_s10  ;;  %s244_s18 = sshll.u32 %s237_s17, 4  ;;  %s11380_s18 = int_to_ptr.vmem [resolvable:$true] %s244_s18 }
  0x35   : > { %s11129_s26 = scalar_lea.hbm %s11378_s16, 2624  ;;  %p11131_p7 = pneg %p11371_p12 }
  0x36   : > { %p11130_p2 = scmp.ne.s32.totalorder %s11378_s16, %s11129_s26  ;;  %s11134_s10 = scalar_lea.hbm %s14801_s0, 5248 }
  0x37   : > { %p11135_p0 = scmp.lt.s32.totalorder %s11378_s16, %s14801_s0  ;;  %p11136_p3 = scmp.lt.s32.totalorder %s11134_s10, %s11129_s26 }
  0x38   : > { %p11132_p10 = pnand %p11131_p7, %p11130_p2 }
  0x39   : > { %p11137_p8 = por %p11136_p3, %p11135_p0 }
  0x3a   : > { %p11133_p13 = pneg %p11132_p10 }
  0x3c   : > { %p11138_p5 = pnand %p11137_p8, %p11133_p13 }
  0x3e   : > { %11141 = shalt.err (!%p11138_p5)
}
  0x3f   : > { %s11142_s8 = scalar_lea.vmem %s11380_s18, 2624  ;;  %s11231_s9 = smov [#allocation3]  }
  0x40   : > { %p11143_p1 = scmp.ne.s32.totalorder %s11380_s18, %s11142_s8  ;;  %s11147_s17 = sshll.u32 %s11231_s9, 4  ;;  %s11148_s17 = int_to_ptr.vmem [resolvable:$false] %s11147_s17 }
  0x41   : > { %s11149_s12 = scalar_lea.vmem %s11148_s17, 5248  ;;  %p11150_p10 = scmp.lt.s32.totalorder %s11380_s18, %s11148_s17 }
  0x42   : > { %p11145_p6 = pnand %p11143_p1, %p11131_p7  ;;  %p11151_p11 = scmp.lt.s32.totalorder %s11149_s12, %s11142_s8 }
  0x44   : > { %p11146_p2 = pneg %p11145_p6  ;;  %p11152_p4 = por %p11151_p11, %p11150_p10 }
  0x46   : > { %p11153_p9 = pnand %p11152_p4, %p11146_p2 }
  0x48   : > { %11156 = shalt.err (!%p11153_p9)
}
  0x49   : > { %s14859_s13 = smov 4   ;;  %s14860_s26 = smov 64  }
  0x4a   : > { %10718 = dma.hbm_to_vmem [thread:$0]  (!%p11371_p12), %s11378_s16, 2624, %s11380_s18, %s11382_s20, %s14860_s26, %s14860_s26, %s14859_s13  }
  0x4b   : > { %p14861_p1 = scmp.ne.s32.totalorder %s14855_s29, 0 }
  0x4d   : > { %256 = sbr.rel (%p14861_p1) target bundleno = 1245 (0x4dd), region = 44 }
  0x52   : > { %s11409_s14 = sand.u32 1, %s11217_s22   ;;  %p14862_p4 = scmp.ne.s32.totalorder %s14853_s27, 0 }
  0x53   : > { %s10694_s10 = smul.u32 164, %s11409_s14  ;;  %s259_s15 = scalar_lea.sflag [#allocation4], %s11409_s14 }
  0x55   : > { %s11413_s8 = scalar_lea.vmem [#allocation3], %s10694_s10 }
  0x56   : > { %11200 = dma.done.wait (%p14862_p4), %s259_s15, 2624  }
  0x57   : > { %11202 = vsyncadd (%p14862_p4), %s259_s15, 4294964672  ;;  %p14863_p6 = scmp.eq.s32.totalorder %s11293_s25, 0 }
  0x59   : > { %11204 = dma.done.wait (%p14863_p6), [#allocation7], 18432   ;;  %p14864_p9 = pmov %p14863_p6 }
  0x5a   : > { %s10695_s29 = smul.u32 288, %s11409_s14  ;;  %p14865_p11 = scmp.ne.s32.totalorder %s11293_s25, 0 }
  0x5b   : > { %11206 = vsyncadd (%p14864_p9), [#allocation7], 4294948864 }
  0x5c   : > { %s11424_s11 = scalar_lea.vmem [#allocation9], %s10695_s29  ;;  %305 = sbr.rel (%p14865_p11) target bundleno = 119 (0x77), region = 60 }
  0x61   : > { %v11232_v0 = vmov 0  }
  0x62   : > { %307 = vst [vmem:[#allocation2 + $0x4] sm:$0xf] %v11232_v0  ;;  %308 = vst [vmem:[#allocation2 + $0x8] sm:$0xf] %v11232_v0 }
  0x63   : > { %309 = vst [vmem:[#allocation2 + $0xc] sm:$0xf] %v11232_v0  ;;  %310 = vst [vmem:[#allocation2 + $0x10] sm:$0xf] %v11232_v0 }
  0x64   : > { %311 = vst [vmem:[#allocation2 + $0x14] sm:$0xf] %v11232_v0  ;;  %312 = vst [vmem:[#allocation2 + $0x18] sm:$0xf] %v11232_v0 }
  0x65   : > { %313 = vst [vmem:[#allocation2 + $0x1c] sm:$0xf] %v11232_v0  ;;  %314 = vst [vmem:[#allocation2 + $0x20] sm:$0xf] %v11232_v0 }
  0x66   : > { %315 = vst [vmem:[#allocation2 + $0x24] sm:$0xf] %v11232_v0  ;;  %316 = vst [vmem:[#allocation2 + $0x28] sm:$0xf] %v11232_v0 }
  0x67   : > { %317 = vst [vmem:[#allocation2 + $0x2c] sm:$0xf] %v11232_v0  ;;  %318 = vst [vmem:[#allocation2 + $0x30] sm:$0xf] %v11232_v0 }
  0x68   : > { %319 = vst [vmem:[#allocation2 + $0x34] sm:$0xf] %v11232_v0  ;;  %320 = vst [vmem:[#allocation2 + $0x38] sm:$0xf] %v11232_v0 }
  0x69   : > { %321 = vst [vmem:[#allocation2 + $0x3c] sm:$0xf] %v11232_v0  ;;  %322 = vst [vmem:[#allocation2 + $0x40] sm:$0xf] %v11232_v0 }
  0x6a   : > { %323 = vst [vmem:[#allocation2 + $0x44] sm:$0xf] %v11232_v0  ;;  %324 = vst [vmem:[#allocation2 + $0x48] sm:$0xf] %v11232_v0 }
  0x6b   : > { %325 = vst [vmem:[#allocation2 + $0x4c] sm:$0xf] %v11232_v0  ;;  %326 = vst [vmem:[#allocation2 + $0x50] sm:$0xf] %v11232_v0 }
  0x6c   : > { %327 = vst [vmem:[#allocation2 + $0x54] sm:$0xf] %v11232_v0  ;;  %328 = vst [vmem:[#allocation2 + $0x58] sm:$0xf] %v11232_v0 }
  0x6d   : > { %329 = vst [vmem:[#allocation2 + $0x5c] sm:$0xf] %v11232_v0  ;;  %330 = vst [vmem:[#allocation2 + $0x60] sm:$0xf] %v11232_v0 }
  0x6e   : > { %331 = vst [vmem:[#allocation2 + $0x64] sm:$0xf] %v11232_v0  ;;  %332 = vst [vmem:[#allocation2 + $0x68] sm:$0xf] %v11232_v0 }
  0x6f   : > { %333 = vst [vmem:[#allocation2 + $0x6c] sm:$0xf] %v11232_v0  ;;  %334 = vst [vmem:[#allocation2 + $0x70] sm:$0xf] %v11232_v0 }
  0x70   : > { %335 = vst [vmem:[#allocation2 + $0x74] sm:$0xf] %v11232_v0  ;;  %336 = vst [vmem:[#allocation2 + $0x78] sm:$0xf] %v11232_v0 }
  0x71   : > { %337 = vst [vmem:[#allocation2 + $0x7c] sm:$0xf] %v11232_v0  ;;  %338 = vst [vmem:[#allocation2 + $0x80] sm:$0xf] %v11232_v0 }
  0x72   : > { %339 = vst [vmem:[#allocation2 + $0x84] sm:$0xf] %v11232_v0  ;;  %340 = vst [vmem:[#allocation2 + $0x88] sm:$0xf] %v11232_v0 }
  0x73   : > { %341 = vst [vmem:[#allocation2 + $0x8c] sm:$0xf] %v11232_v0  ;;  %342 = vst [vmem:[#allocation2 + $0x90] sm:$0xf] %v11232_v0 }
  0x74   : > { %343 = vst [vmem:[#allocation2 + $0x94] sm:$0xf] %v11232_v0  ;;  %344 = vst [vmem:[#allocation2 + $0x98] sm:$0xf] %v11232_v0 }
  0x75   : > { %345 = vst [vmem:[#allocation2 + $0x9c] sm:$0xf] %v11232_v0  ;;  %346 = vst [vmem:[#allocation2 + $0xa0] sm:$0xf] %v11232_v0 }
  0x76   : > { %347 = vst [vmem:[#allocation2 + $0xa4] sm:$0xf] %v11232_v0  ;;  %348 = vst [vmem:[#allocation2 + $0xa8] sm:$0xf] %v11232_v0 }
  0x77 PF: > { %v10771_v1 = vld [vmem:[#allocation6 + $0x78] sm:$0xff]   ;;  %v10773_v3 = vld [vmem:[#allocation6 + $0x70] sm:$0xff]   ;;  %v10775_v5 = vld [vmem:[#allocation6 + $0x68] sm:$0xff]   ;;  %vm513_vm0 = vsmask.f32 7424  ;;  %vm1169_vm1 = vcmask 1046528  }
  0x78   : > { %v10772_v2 = vld [vmem:[#allocation6 + $0x38] sm:$0xff]   ;;  %9757 = vmatprep.subr.bf16.mxu0 %v10771_v1  ;;  %v10774_v4 = vld [vmem:[#allocation6 + $0x30] sm:$0xff]   ;;  %v10776_v6 = vld [vmem:[#allocation6 + $0x28] sm:$0xff]   ;;  %vm1970_vm2 = vsmask.f32 6400  ;;  %vm2441_vm3 = vcmask 1045504  }
  0x79   : > { %9809 = vmatprep.subr.bf16.mxu1 %v10772_v2  ;;  %9758 = vmatpush3.bf16.msra.mxu0 %v10771_v1  ;;  %v10777_v7 = vld [vmem:[#allocation6 + $0x60] sm:$0xff]   ;;  %v10779_v9 = vld [vmem:[#allocation6 + $0x58] sm:$0xff]   ;;  %v10781_v11 = vld [vmem:[#allocation6 + $0x50] sm:$0xff]   ;;  %vm3713_vm4 = vcmask 1044480   ;;  %vm3242_vm5 = vsmask.f32 5376 }
  0x7a   : > { %9810 = vmatpush3.bf16.msra.mxu1 %v10772_v2  ;;  %9759 = vmatprep.subr.bf16.mxu0 %v10773_v3  ;;  %v10778_v8 = vld [vmem:[#allocation6 + $0x20] sm:$0xff]   ;;  %v10780_v10 = vld [vmem:[#allocation6 + $0x18] sm:$0xff]   ;;  %v10782_v14 = vld [vmem:[#allocation6 + $0x10] sm:$0xff]   ;;  %vm5422_vm6 = vsmask.f32 4352  ;;  %s9180_s17 = smul.u32 4608, %s11293_s25 }
  0x7b   : > { %9811 = vmatprep.subr.bf16.mxu1 %v10774_v4  ;;  %v350_v12 = vld [vmem:[%s11413_s8] sm:$0xf]  ;;  %v11430_v13 = vld [vmem:[%s11413_s8 + $0x4] sm:$0xf]  ;;  %v11434_v16 = vld [vmem:[%s11413_s8 + $0x8] sm:$0xff]   ;;  %s8696_s12 = sshll.u32 %s11424_s11, 4  ;;  %s14757_s12 = int_to_ptr.vmem [resolvable:$true] %s8696_s12 }
  0x7c   : > { %v8798_v15 = vcombine.low %v350_v12, %v11430_v13  ;;  %v522_v19 = vshll.u32 %v11434_v16, 16  ;;  %v11438_v20 = vld [vmem:[%s11413_s8 + $0x10] sm:$0xff]   ;;  %v11441_v25 = vld [vmem:[%s11413_s8 + $0x18] sm:$0xff]   ;;  %v10785_v26 = vld [vmem:[#allocation6 + $0x40] sm:$0xff]   ;;  %v526_v28 = vshrl.u32 %v11434_v16, 16  ;;  %s14754_s10 = scalar_lea.hbm %s14807_s6, %s9180_s17  ;;  %s8683_s25 = scalar_lea.sflag [#allocation5], %s11409_s14 }
  0x7d   : > { %9760 = vmatpush3.bf16.msra.mxu0 %v10773_v3  ;;  %v10783_v21 = vld [vmem:[#allocation6 + $0x48] sm:$0xff]   ;;  %v530_v29 = vshll.u32 %v11438_v20, 16  ;;  %v10786_v30 = vld [vmem:[#allocation6] sm:$0xff]   ;;  %v534_v32 = vshrl.u32 %v11438_v20, 16  ;;  %v538_v33 = vshll.u32 %v11441_v25, 16  ;;  %v10790_v37 = vld [vmem:[#allocation6 + $0xb8] sm:$0xff]  }
  0x7e   : > { %9812 = vmatpush3.bf16.msra.mxu1 %v10774_v4  ;;  %9761 = vmatprep.subr.bf16.mxu0 %v10775_v5  ;;  %v515_v17 = vshrl.u32 %v8798_v15, 16  ;;  %v517_v18 = vshll.u32 %v8798_v15, 16  ;;  %v10784_v22 = vld [vmem:[#allocation6 + $0x8] sm:$0xff]   ;;  %v524_v24 = vrot.slane %v522_v19, 1  ;;  %v11449_v34 = vld [vmem:[%s11413_s8 + $0x20] sm:$0xff]   ;;  %v542_v43 = vshrl.u32 %v11441_v25, 16 }
  0x7f   : > { %9813 = vmatprep.subr.bf16.mxu1 %v10776_v6  ;;  %9825 = vmatprep.mubr.bf16.mxu1 %v8798_v15  ;;  %v532_v36 = vrot.slane %v530_v29, 1  ;;  %v11452_v38 = vld [vmem:[%s11413_s8 + $0x28] sm:$0xff]   ;;  %v540_v40 = vrot.slane %v538_v33, 1  ;;  %v546_v41 = vshll.u32 %v11449_v34, 16  ;;  %v550_v44 = vshrl.u32 %v11449_v34, 16  ;;  %v10793_v47 = vld [vmem:[#allocation6 + $0xb0] sm:$0xff]  }
  0x80   : > { %v519_v23 = vrot.slane %v517_v18, 1  ;;  %v528_v35 = vor.u32 %v526_v28, %v524_v24  ;;  %v554_v45 = vshll.u32 %v11452_v38, 16  ;;  %v11461_v49 = vld [vmem:[%s11413_s8 + $0x30] sm:$0xff]   ;;  %v11466_v54 = vld [vmem:[%s11413_s8 + $0x38] sm:$0xff]   ;;  %v558_v56 = vshrl.u32 %v11452_v38, 16  ;;  %v11475_v63 = vld [vmem:[%s11413_s8 + $0x40] sm:$0xff]  }
  0x81   : > { %9762 = vmatpush3.bf16.msra.mxu0 %v10775_v5  ;;  %v536_v39 = vor.u32 %v534_v32, %v532_v36  ;;  %v548_v48 = vrot.slane %v546_v41, 1  ;;  %v544_v50 = vor.u32 %v542_v43, %v540_v40  ;;  %v10796_v51 = vld [vmem:[#allocation6 + $0xa8] sm:$0xff]   ;;  %v10805_v55 = vld [vmem:[#allocation6 + $0xf8] sm:$0xff]   ;;  %v562_v57 = vshll.u32 %v11461_v49, 16  ;;  %v10807_v60 = vld [vmem:[#allocation6 + $0xf0] sm:$0xff]   ;;  %s11157_s15 = scalar_lea.vmem %s14757_s12, 4608 }
  0x82   : > { %9814 = vmatpush3.bf16.msra.mxu1 %v10776_v6  ;;  %9763 = vmatprep.subr.bf16.mxu0 %v10777_v7  ;;  %v520_v27 = vor.u32 %v519_v23, %v515_v17  ;;  %v533_v42 = vsel %vm513_vm0, %v528_v35, %v532_v36  ;;  %v556_v53 = vrot.slane %v554_v45, 1  ;;  %v566_v59 = vshrl.u32 %v11461_v49, 16  ;;  %v10799_v0 = vld [vmem:[#allocation6 + $0xa0] sm:$0xff]   ;;  %v10810_v5 = vld [vmem:[#allocation6 + $0xe8] sm:$0xff]   ;;  %v10806_v23 = vld [vmem:[#allocation6 + $0x90] sm:$0xff]   ;;  %p11158_p12 = scmp.ne.s32.totalorder %s14757_s12, %s11157_s15  ;;  %p15185_p7 = scmp.ne.s32.totalorder %s14857_s30, 0 }
  0x83   : > { %9815 = vmatprep.subr.bf16.mxu1 %v10778_v8  ;;  %v541_v46 = vsel %vm513_vm0, %v536_v39, %v540_v40  ;;  %v552_v52 = vor.u32 %v550_v44, %v548_v48  ;;  %v549_v58 = vsel %vm513_vm0, %v544_v50, %v548_v48  ;;  %v570_v62 = vshll.u32 %v11466_v54, 16  ;;  %v11478_v2 = vld [vmem:[%s11413_s8 + $0x48] sm:$0xff]   ;;  %v11491_v19 = vld [vmem:[%s11413_s8 + $0x50] sm:$0xff]   ;;  %v11507_v32 = vld [vmem:[%s11413_s8 + $0x60] sm:$0xff]   ;;  %s11234_s29 = smov [#allocation9]  }
  0x84   : > { %v525_v31 = vsel %vm513_vm0, %v520_v27, %v524_v24  ;;  %v564_v1 = vrot.slane %v562_v57, 1  ;;  %v560_v3 = vor.u32 %v558_v56, %v556_v53  ;;  %v574_v4 = vshrl.u32 %v11466_v54, 16  ;;  %v10812_v12 = vld [vmem:[#allocation6 + $0xe0] sm:$0xff]   ;;  %v10811_v36 = vld [vmem:[#allocation6 + $0x88] sm:$0xff]   ;;  %v10816_v39 = vld [vmem:[#allocation6 + $0xd0] sm:$0xff]   ;;  %p11159_p13 = pnand %p11158_p12, %p15185_p7 }
  0x85   : > { %9764 = vmatpush3.bf16.msra.mxu0 %v10777_v7  ;;  %9773 = vmatprep.mubr.bf16.mxu0 %v525_v31  ;;  %v557_v61 = vsel %vm513_vm0, %v552_v52, %v556_v53  ;;  %v572_v7 = vrot.slane %v570_v62, 1  ;;  %v586_v15 = vshll.u32 %v11478_v2, 16  ;;  %v1173_v17 = vrot.slane %v11438_v20, 1  ;;  %v11511_v35 = vld [vmem:[%s11413_s8 + $0x68] sm:$0xff]  }
  0x86   : > { %9816 = vmatpush3.bf16.msra.mxu1 %v10778_v8  ;;  %9765 = vmatprep.subr.bf16.mxu0 %v10779_v9  ;;  %v568_v6 = vor.u32 %v566_v59, %v564_v1  ;;  %v578_v8 = vshll.u32 %v11475_v63, 16  ;;  %v590_v29 = vshrl.u32 %v11478_v2, 16  ;;  %v598_v33 = vshrl.u32 %v11491_v19, 16  ;;  %v11530_v59 = vld [vmem:[%s11413_s8 + $0x78] sm:$0xff]   ;;  %p11160_p0 = pneg %p11159_p13 }
  0x87   : > { %9817 = vmatprep.subr.bf16.mxu1 %v10780_v10  ;;  %v588_v28 = vrot.slane %v586_v15, 1  ;;  %v610_v45 = vshll.u32 %v11507_v32, 16  ;;  %v614_v50 = vshrl.u32 %v11507_v32, 16  ;;  %v1175_v53 = vrot.slane %v11441_v25, 1  ;;  %v11566_v15 = vld [vmem:[%s11413_s8 + $0x88] sm:$0xff]  }
  0x88   : > { %v573_v18 = vsel %vm513_vm0, %v568_v6, %v572_v7  ;;  %v618_v57 = vshll.u32 %v11511_v35, 16  ;;  %v1179_v62 = vrot.slane %v11452_v38, 1 }
  0x89   : > { %9766 = vmatpush3.bf16.msra.mxu0 %v10779_v9  ;;  %v10802_v9 = vld [vmem:[#allocation6 + $0x98] sm:$0xff]  }
  0x8a   : > { %9818 = vmatpush3.bf16.msra.mxu1 %v10780_v10  ;;  %9767 = vmatprep.subr.bf16.mxu0 %v10781_v11  ;;  %v1171_v10 = vrot.slane %v11434_v16, 1 }
  0x8b   : > { %9819 = vmatprep.subr.bf16.mxu1 %v10782_v14 }
  0x8c   : > { %v11499_v24 = vsel %vm1169_vm1, %v1171_v10, %v1173_v17 }
  0x8d   : > { %9768 = vmatpush3.bf16.msra.mxu0 %v10781_v11  ;;  %v582_v11 = vshrl.u32 %v11475_v63, 16 }
  0x8e   : > { %9820 = vmatpush3.bf16.msra.mxu1 %v10782_v14  ;;  %9769 = vmatprep.subr.bf16.mxu0 %v10783_v21  ;;  %v565_v14 = vsel %vm513_vm0, %v560_v3, %v564_v1  ;;  %v11547_v1 = vld [vmem:[%s11413_s8 + $0x80] sm:$0xff]   ;;  %v1181_v3 = vrot.slane %v11461_v49, 1 }
  0x8f   : > { %9821 = vmatprep.subr.bf16.mxu1 %v10784_v22 }
  0x91   : > { %9770 = vmatpush3.bf16.msra.mxu0 %v10783_v21  ;;  %v11494_v21 = vld [vmem:[%s11413_s8 + $0x58] sm:$0xff]  }
  0x92   : > { %9822 = vmatpush3.bf16.msra.mxu1 %v10784_v22  ;;  %9771 = vmatprep.subr.bf16.mxu0 %v10785_v26  ;;  %v580_v22 = vrot.slane %v578_v8, 1  ;;  %v602_v31 = vshll.u32 %v11494_v21, 16  ;;  %v622_v8 = vshrl.u32 %v11511_v35, 16 }
  0x93   : > { %9823 = vmatprep.subr.bf16.mxu1 %v10786_v30 }
  0x94   : > { %v584_v27 = vor.u32 %v582_v11, %v580_v22  ;;  %v604_v44 = vrot.slane %v602_v31, 1  ;;  %v634_v11 = vshll.u32 %v11530_v59, 16 }
  0x95   : > { %9772 = vmatpush3.bf16.msra.mxu0 %v10785_v26  ;;  %v576_v26 = vor.u32 %v574_v4, %v572_v7  ;;  %v620_v7 = vrot.slane %v618_v57, 1 }
  0x96   : > { %9824 = vmatpush3.bf16.msra.mxu1 %v10786_v30  ;;  %9861 = vmatprep.subr.bf16.mxu0 %v10790_v37  ;;  %v594_v30 = vshll.u32 %v11491_v19, 16  ;;  %v589_v41 = vsel %vm513_vm0, %v584_v27, %v588_v28 }
  0x97   : > { %9913 = vmatprep.subr.bf16.mxu1 %v10805_v55  ;;  %v581_v40 = vsel %vm513_vm0, %v576_v26, %v580_v22  ;;  %v11577_v22 = vld [vmem:[%s11413_s8 + $0x90] ss:$0 sps:$4 sm:$0x11]   ;;  %v638_v26 = vshrl.u32 %v11530_v59, 16 }
  0x98   : > { %9774 = vmatmul.mubr.bf16.vlgmr.msra.gmra.mxu0 %v533_v42  ;;  %v1148_v42 = vld [vmem:[%s11413_s8] sm:$0xe]  ;;  %v596_v43 = vrot.slane %v594_v30, 1 }
  0x99   : > { %9826 = vmatmul.mubr.bf16.vlgmr.msra.gmra.mxu1 %v11434_v16  ;;  %9862 = vmatpush3.bf16.msra.mxu0 %v10790_v37  ;;  %v606_v37 = vshrl.u32 %v11494_v21, 16  ;;  %v8833_v48 = vcombine.low %v1148_v42, %v11430_v13  ;;  %v1177_v13 = vrot.slane %v11449_v34, 1  ;;  %v10821_v16 = vld [vmem:[#allocation6 + $0xc0] sm:$0xff]   ;;  %v658_v42 = vshll.u32 %v11577_v22, 16 }
  0x9a   : > { %9777 = vmatprep.mubr.bf16.mxu0 %v541_v46  ;;  %9829 = vmatprep.mubr.bf16.mxu1 %v11438_v20  ;;  %v10815_v20 = vld [vmem:[#allocation6 + $0xd8] sm:$0xff]   ;;  %v11519_v46 = vld [vmem:[%s11413_s8 + $0x70] sm:$0xff]   ;;  %v600_v56 = vor.u32 %v598_v33, %v596_v43 }
  0x9b   : > { %9863 = vmatprep.subr.bf16.mxu0 %v10793_v47  ;;  %9914 = vmatpush3.bf16.msra.mxu1 %v10805_v55  ;;  %v1170_v52 = vrot.slane %v8833_v48, 1  ;;  %v592_v55 = vor.u32 %v590_v29, %v588_v28  ;;  %v11553_v6 = vsel %vm1169_vm1, %v1177_v13, %v1179_v62  ;;  %v636_v28 = vrot.slane %v634_v11, 1  ;;  %v11608_v48 = vld [vmem:[%s11413_s8 + $0xc] sm:$0xf] }
  0x9c   : > { %9915 = vmatprep.subr.bf16.mxu1 %v10807_v60  ;;  %v646_v29 = vshrl.u32 %v11547_v1, 16 }
  0x9d   : > { %9864 = vmatpush3.bf16.msra.mxu0 %v10793_v47  ;;  %v10818_v47 = vld [vmem:[#allocation6 + $0x80] sm:$0xff]   ;;  %v597_v4 = vsel %vm513_vm0, %v592_v55, %v596_v43  ;;  %v1199_v55 = vrot.slane %v11530_v59, 1  ;;  %v640_v11 = vor.u32 %v638_v26, %v636_v28 }
  0x9e   : > { %9865 = vmatprep.subr.bf16.mxu0 %v10796_v51  ;;  %v1486_v43 = vld [vmem:[%s11413_s8 + $0x8] sm:$0xe] }
  0x9f   : > { %9916 = vmatpush3.bf16.msra.mxu1 %v10807_v60  ;;  %v11538_v60 = vsel %vm1169_vm1, %v1173_v17, %v1175_v53 }
  0xa0   : > { %9778 = vmatmul.mubr.bf16.gmra.mxu0 %v549_v58  ;;  %9917 = vmatprep.subr.bf16.mxu1 %v10810_v5  ;;  %v626_v58 = vshll.u32 %v11519_v46, 16 }
  0xa1   : > { %9830 = vmatmul.mubr.bf16.gmra.mxu1 %v11441_v25  ;;  %9781 = vmatprep.mubr.bf16.mxu0 %v557_v61  ;;  %v11535_v25 = vsel %vm1169_vm1, %v1170_v52, %v1171_v10  ;;  %v11540_v61 = vld [vmem:[#allocation6 + $0x138] sm:$0xff]   ;;  %v1185_v10 = vrot.slane %v11475_v63, 1  ;;  %v11615_v52 = vld [vmem:[%s11413_s8 + $0x10] sm:$0xff]  }
  0xa2   : > { %9833 = vmatprep.mubr.bf16.mxu1 %v11449_v34  ;;  %9866 = vmatpush3.bf16.msra.mxu0 %v10796_v51  ;;  %v10820_v51 = vld [vmem:[#allocation6 + $0xc8] sm:$0xff]   ;;  %v11543_v34 = vsel %vm1169_vm1, %v1175_v53, %v1177_v13  ;;  %v1197_v53 = vrot.slane %v11519_v46, 1 }
  0xa3   : > { %9867 = vmatprep.subr.bf16.mxu0 %v10799_v0  ;;  %9918 = vmatpush3.bf16.msra.mxu1 %v10810_v5  ;;  %v605_v5 = vsel %vm513_vm0, %v600_v56, %v604_v44  ;;  %v11621_v56 = vld [vmem:[%s11413_s8 + $0x18] sm:$0xff]  }
  0xa4   : > { %9919 = vmatprep.subr.bf16.mxu1 %v10812_v12 }
  0xa6   : > { %9868 = vmatpush3.bf16.msra.mxu0 %v10799_v0  ;;  %v612_v0 = vrot.slane %v610_v45, 1  ;;  %v11604_v45 = vld [vmem:[#allocation6 + $0x178] sm:$0xff]  }
  0xa7   : > { %9869 = vmatprep.subr.bf16.mxu0 %v10802_v9  ;;  %9920 = vmatpush3.bf16.msra.mxu1 %v10812_v12  ;;  %v642_v12 = vshll.u32 %v11547_v1, 16 }
  0xa8   : > { %9782 = vmatmul.mubr.bf16.gmra.mxu0 %v565_v14  ;;  %9921 = vmatprep.subr.bf16.mxu1 %v10815_v20  ;;  %v608_v14 = vor.u32 %v606_v37, %v604_v44  ;;  %v1193_v37 = vrot.slane %v11507_v32, 1 }
  0xa9   : > { %9834 = vmatmul.mubr.bf16.gmra.mxu1 %v11452_v38  ;;  %9785 = vmatprep.mubr.bf16.mxu0 %v573_v18  ;;  %v11557_v38 = vsel %vm1169_vm1, %v1179_v62, %v1181_v3  ;;  %v644_v31 = vrot.slane %v642_v12, 1  ;;  %v8842_v62 = vcombine.low %v1486_v43, %v11608_v48 }
  0xaa   : > { %9837 = vmatprep.mubr.bf16.mxu1 %v11461_v49  ;;  %9870 = vmatpush3.bf16.msra.mxu0 %v10802_v9  ;;  %v628_v9 = vrot.slane %v626_v58, 1  ;;  %v1183_v49 = vrot.slane %v11466_v54, 1  ;;  %v613_v30 = vsel %vm513_vm0, %v608_v14, %v612_v0  ;;  %v660_v58 = vrot.slane %v658_v42, 1  ;;  %v11653_v14 = vld [vmem:[%s11413_s8 + $0x40] sm:$0xff]  }
  0xab   : > { %9871 = vmatprep.subr.bf16.mxu0 %v10806_v23  ;;  %9922 = vmatpush3.bf16.msra.mxu1 %v10815_v20  ;;  %v630_v20 = vshrl.u32 %v11519_v46, 16  ;;  %v1633_v12 = vrot.slane %v8842_v62, 1 }
  0xac   : > { %9923 = vmatprep.subr.bf16.mxu1 %v10816_v39  ;;  %v11569_v17 = vsel %vm1169_vm1, %v1181_v3, %v1183_v49  ;;  %v11572_v18 = vsel %vm1169_vm1, %v1183_v49, %v1185_v10  ;;  %v11648_v49 = vld [vmem:[%s11413_s8 + $0x38] sm:$0xff]  }
  0xae   : > { %9872 = vmatpush3.bf16.msra.mxu0 %v10806_v23  ;;  %v1189_v23 = vrot.slane %v11491_v19, 1 }
  0xaf   : > { %9873 = vmatprep.subr.bf16.mxu0 %v10811_v36  ;;  %9924 = vmatpush3.bf16.msra.mxu1 %v10816_v39  ;;  %v654_v39 = vshrl.u32 %v11566_v15, 16 }
  0xb0   : > { %9786 = vmatmul.mubr.bf16.gmra.mxu0 %v581_v40  ;;  %9925 = vmatprep.subr.bf16.mxu1 %v10820_v51 }
  0xb1   : > { %9838 = vmatmul.mubr.bf16.gmra.mxu1 %v11466_v54  ;;  %9789 = vmatprep.mubr.bf16.mxu0 %v589_v41  ;;  %v1187_v54 = vrot.slane %v11478_v2, 1  ;;  %v1195_v41 = vrot.slane %v11511_v35, 1 }
  0xb2   : > { %9841 = vmatprep.mubr.bf16.mxu1 %v11475_v63  ;;  %9874 = vmatpush3.bf16.msra.mxu0 %v10811_v36  ;;  %v616_v63 = vor.u32 %v614_v50, %v612_v0  ;;  %v650_v36 = vshll.u32 %v11566_v15, 16  ;;  %v11630_v0 = vld [vmem:[%s11413_s8 + $0x20] sm:$0xff]  }
  0xb3   : > { %9875 = vmatprep.subr.bf16.mxu0 %v10818_v47  ;;  %9926 = vmatpush3.bf16.msra.mxu1 %v10820_v51  ;;  %v11583_v27 = vsel %vm1169_vm1, %v1185_v10, %v1187_v54  ;;  %v11611_v50 = vsel %vm1169_vm1, %v1193_v37, %v1195_v41  ;;  %v632_v51 = vor.u32 %v630_v20, %v628_v9  ;;  %v1205_v10 = vrot.slane %v11577_v22, 1 }
  0xb4   : > { %9927 = vmatprep.subr.bf16.mxu1 %v10821_v16  ;;  %v621_v33 = vsel %vm513_vm0, %v616_v63, %v620_v7  ;;  %v11624_v57 = vsel %vm1169_vm1, %v1195_v41, %v1197_v53  ;;  %v648_v63 = vor.u32 %v646_v29, %v644_v31  ;;  %v1975_v29 = vshll.u32 %v8842_v62, 16 }
  0xb5   : > { %v637_v3 = vsel %vm513_vm0, %v632_v51, %v636_v28 }
  0xb6   : > { %9876 = vmatpush3.bf16.msra.mxu0 %v10818_v47  ;;  %v624_v47 = vor.u32 %v622_v8, %v620_v7  ;;  %v11644_v8 = vld [vmem:[%s11413_s8 + $0x30] sm:$0xff]   ;;  %v1977_v51 = vrot.slane %v1975_v29, 2 }
  0xb7   : > { %9965 = vmatprep.subr.bf16.mxu0 %v11540_v61  ;;  %9928 = vmatpush3.bf16.msra.mxu1 %v10821_v16  ;;  %v11633_v16 = vsel %vm1169_vm1, %v1197_v53, %v1199_v55  ;;  %v1642_v28 = vrot.slane %v11644_v8, 1 }
  0xb8   : > { %9790 = vmatmul.mubr.bf16.gmra.mxu0 %v597_v4  ;;  %10017 = vmatprep.subr.bf16.mxu1 %v11604_v45  ;;  %v629_v13 = vsel %vm513_vm0, %v624_v47, %v628_v9  ;;  %v1634_v4 = vrot.slane %v11615_v52, 1  ;;  %v1203_v9 = vrot.slane %v11566_v15, 1 }
  0xb9   : > { %9842 = vmatmul.mubr.bf16.gmra.mxu1 %v11478_v2  ;;  %9793 = vmatprep.mubr.bf16.mxu0 %v605_v5  ;;  %v11587_v2 = vsel %vm1169_vm1, %v1187_v54, %v1189_v23  ;;  %v11638_v5 = vld [vmem:[%s11413_s8 + $0x28] sm:$0xff]  }
  0xba   : > { %9845 = vmatprep.mubr.bf16.mxu1 %v11491_v19  ;;  %v1191_v19 = vrot.slane %v11494_v21, 1  ;;  %v11661_v20 = vsel %vm1169_vm1, %v1203_v9, %v1205_v10  ;;  %v1640_v26 = vrot.slane %v11638_v5, 1 }
  0xbc   : > { %v11596_v40 = vsel %vm1169_vm1, %v1189_v23, %v1191_v19  ;;  %v11602_v44 = vsel %vm1169_vm1, %v1191_v19, %v1193_v37  ;;  %v1636_v23 = vrot.slane %v11621_v56, 1  ;;  %v1644_v19 = vrot.slane %v11648_v49, 1 }
  0xbe   : > { %v11673_v42 = vsel %vm1169_vm1, %v1634_v4, %v1636_v23  ;;  %v11686_v53 = vsel %vm1169_vm1, %v1642_v28, %v1644_v19 }
  0xc0   : > { %9794 = vmatmul.mubr.bf16.gmra.mxu0 %v613_v30  ;;  %v1972_v30 = vshrl.u32 %v8842_v62, 16 }
  0xc1   : > { %9846 = vmatmul.mubr.bf16.gmra.mxu1 %v11494_v21  ;;  %9797 = vmatprep.mubr.bf16.mxu0 %v621_v33  ;;  %v652_v21 = vrot.slane %v650_v36, 1  ;;  %v645_v33 = vsel %vm513_vm0, %v640_v11, %v644_v31  ;;  %v11682_v31 = vsel %vm1169_vm1, %v1640_v26, %v1642_v28 }
  0xc2   : > { %9849 = vmatprep.mubr.bf16.mxu1 %v11507_v32  ;;  %v1201_v32 = vrot.slane %v11547_v1, 1  ;;  %v1974_v37 = vrot.slane %v1972_v30, 1  ;;  %v2001_v30 = vshll.u32 %v11630_v0, 16 }
  0xc3   : > { %v656_v22 = vor.u32 %v654_v39, %v652_v21  ;;  %v653_v36 = vsel %vm513_vm0, %v648_v63, %v652_v21  ;;  %v1635_v39 = vsel %vm1169_vm1, %v1633_v12, %v1634_v4  ;;  %v2420_v4 = vld [vmem:[%s11413_s8 + $0x8] sm:$0xc]  ;;  %v2445_v63 = vrot.slane %v11621_v56, 2 }
  0xc4   : > { %v11641_v7 = vsel %vm1169_vm1, %v1199_v55, %v1201_v32  ;;  %v11656_v54 = vsel %vm1169_vm1, %v1201_v32, %v1203_v9  ;;  %v1980_v55 = vshrl.u32 %v11615_v52, 16  ;;  %v1983_v32 = vshll.u32 %v11615_v52, 16 }
  0xc5   : > { %v661_v41 = vsel %vm513_vm0, %v656_v22, %v660_v58  ;;  %v1989_v58 = vshrl.u32 %v11621_v56, 16  ;;  %v2443_v9 = vrot.slane %v11615_v52, 2  ;;  %v8878_v12 = vcombine.low %v2420_v4, %v11608_v48  ;;  %v11736_v4 = vld [vmem:[%s11413_s8 + $0x48] sm:$0xff]  }
  0xc6   : > { %v1982_v62 = vrot.slane %v1980_v55, 1  ;;  %v2007_v22 = vshrl.u32 %v11638_v5, 16  ;;  %v2010_v52 = vshll.u32 %v11638_v5, 16 }
  0xc7   : > { %v1991_v10 = vrot.slane %v1989_v58, 1  ;;  %v11706_v28 = vsel %vm2441_vm3, %v2443_v9, %v2445_v63 }
  0xc8   : > { %9798 = vmatmul.mubr.bf16.gmra.mxu0 %v629_v13  ;;  %v1978_v13 = vor.u32 %v1977_v51, %v1974_v37  ;;  %v2012_v37 = vrot.slane %v2010_v52, 2  ;;  %v2447_v51 = vrot.slane %v11630_v0, 2  ;;  %v2046_v52 = vshll.u32 %v11736_v4, 16 }
  0xc9   : > { %9850 = vmatmul.mubr.bf16.gmra.mxu1 %v11511_v35  ;;  %9801 = vmatprep.mubr.bf16.mxu0 %v637_v3  ;;  %v1638_v35 = vrot.slane %v11630_v0, 1  ;;  %v1985_v3 = vrot.slane %v1983_v32, 2  ;;  %v2449_v32 = vrot.slane %v11638_v5, 2 }
  0xca   : > { %9853 = vmatprep.mubr.bf16.mxu1 %v11519_v46  ;;  %v14814_v46 = vrot.slane %v11653_v14, 1 }
  0xcb   : > { %v11676_v43 = vsel %vm1169_vm1, %v1636_v23, %v1638_v35  ;;  %v11679_v47 = vsel %vm1169_vm1, %v1638_v35, %v1640_v26  ;;  %v1986_v23 = vor.u32 %v1985_v3, %v1982_v62  ;;  %v2442_v26 = vrot.slane %v8878_v12, 2  ;;  %v10828_v12 = vld [vmem:[#allocation6 + $0x130] sm:$0xff]  }
  0xcc   : > { %v11691_v21 = vsel %vm1169_vm1, %v1644_v19, %v14814_v46  ;;  %v2025_v62 = vshrl.u32 %v11648_v49, 16 }
  0xcd   : > { %v11710_v19 = vsel %vm1970_vm2, %v1978_v13, %v1986_v23  ;;  %v2016_v13 = vshrl.u32 %v11644_v8, 16 }
  0xcf   : > { %v2018_v5 = vrot.slane %v2016_v13, 1 }
  0xd0   : > { %9802 = vmatmul.mubr.bf16.gmra.mxu0 %v645_v33  ;;  %v2003_v33 = vrot.slane %v2001_v30, 2  ;;  %v2037_v30 = vshll.u32 %v11653_v14, 16 }
  0xd1   : > { %9854 = vmatmul.mubr.bf16.gmra.mxu1 %v11530_v59  ;;  %9805 = vmatprep.mubr.bf16.mxu0 %v653_v36  ;;  %v1992_v59 = vshll.u32 %v11621_v56, 16  ;;  %v2009_v56 = vrot.slane %v2007_v22, 1  ;;  %v11716_v36 = vsel %vm2441_vm3, %v2442_v26, %v2443_v9  ;;  %v2027_v9 = vrot.slane %v2025_v62, 1 }
  0xd2   : > { %9857 = vmatprep.mubr.bf16.mxu1 %v11547_v1  ;;  %v1998_v1 = vshrl.u32 %v11630_v0, 16  ;;  %v2028_v0 = vshll.u32 %v11648_v49, 16  ;;  %v2043_v26 = vshrl.u32 %v11736_v4, 16  ;;  %v2455_v62 = vrot.slane %v11653_v14, 2 }
  0xd3   : > { %v1994_v11 = vrot.slane %v1992_v59, 2  ;;  %v2013_v58 = vor.u32 %v2012_v37, %v2009_v56  ;;  %v11725_v59 = vsel %vm2441_vm3, %v2445_v63, %v2447_v51  ;;  %v2039_v37 = vrot.slane %v2037_v30, 2  ;;  %v10846_v30 = vld [vmem:[#allocation6 + $0x168] sm:$0xff]  }
  0xd4   : > { %v2000_v48 = vrot.slane %v1998_v1, 1  ;;  %v2034_v1 = vshrl.u32 %v11653_v14, 16  ;;  %v2045_v13 = vrot.slane %v2043_v26, 1 }
  0xd5   : > { %v1995_v35 = vor.u32 %v1994_v11, %v1991_v10  ;;  %v2030_v10 = vrot.slane %v2028_v0, 2  ;;  %v2451_v11 = vrot.slane %v11644_v8, 2 }
  0xd6   : > { %v2004_v55 = vor.u32 %v2003_v33, %v2000_v48  ;;  %v11751_v48 = vld [vmem:[%s11413_s8 + $0x50] sm:$0xff]   ;;  %v2036_v56 = vrot.slane %v2034_v1, 1 }
  0xd7   : > { %v11713_v29 = vsel %vm1970_vm2, %v1986_v23, %v1995_v35  ;;  %v2453_v23 = vrot.slane %v11648_v49, 2  ;;  %v2031_v22 = vor.u32 %v2030_v10, %v2027_v9  ;;  %v11780_v9 = vld [vmem:[%s11413_s8 + $0x68] sm:$0xff]  }
  0xd8   : > { %9806 = vmatmul.mubr.bf16.gmra.mxu0 %v661_v41  ;;  %v2019_v41 = vshll.u32 %v11644_v8, 16  ;;  %v11754_v8 = vld [vmem:[%s11413_s8 + $0x58] sm:$0xff]   ;;  %v2040_v0 = vor.u32 %v2039_v37, %v2036_v56  ;;  %v2459_v56 = vrot.slane %v11751_v48, 2 }
  0xd9   : > { %9858 = vmatmul.mubr.bf16.gmra.mxu1 %v11566_v15  ;;  %9877 = vmatprep.mubr.bf16.mxu0 %v11535_v25  ;;  %v11730_v15 = vsel %vm1970_vm2, %v1995_v35, %v2004_v55  ;;  %v11733_v25 = vsel %vm2441_vm3, %v2447_v51, %v2449_v32  ;;  %v11746_v35 = vsel %vm2441_vm3, %v2449_v32, %v2451_v11  ;;  %v11763_v51 = vld [vmem:[#allocation6 + $0x128] sm:$0xff]  }
  0xda   : > { %9929 = vmatprep.mubr.bf16.mxu1 %v1635_v39  ;;  %v2021_v3 = vrot.slane %v2019_v41, 2  ;;  %v11739_v39 = vsel %vm1970_vm2, %v2004_v55, %v2013_v58  ;;  %v11760_v49 = vsel %vm2441_vm3, %v2451_v11, %v2453_v23  ;;  %v10843_v55 = vld [vmem:[#allocation6 + $0x170] sm:$0xff]   ;;  %v2048_v41 = vrot.slane %v2046_v52, 2 }
  0xdb   : > { %v2064_v11 = vshll.u32 %v11754_v8, 16 }
  0xdc   : > { %v2022_v63 = vor.u32 %v2021_v3, %v2018_v5  ;;  %v2052_v5 = vshrl.u32 %v11751_v48, 16  ;;  %v2055_v3 = vshll.u32 %v11751_v48, 16  ;;  %v2049_v10 = vor.u32 %v2048_v41, %v2045_v13 }
  0xdd   : > { %v2066_v52 = vrot.slane %v2064_v11, 2 }
  0xde   : > { %v11757_v33 = vsel %vm1970_vm2, %v2013_v58, %v2022_v63  ;;  %v11766_v32 = vsel %vm1970_vm2, %v2022_v63, %v2031_v22  ;;  %v11772_v58 = vld [vmem:[%s11413_s8 + $0x60] sm:$0xff]   ;;  %v11789_v63 = vsel %vm1970_vm2, %v2031_v22, %v2040_v0  ;;  %v2057_v1 = vrot.slane %v2055_v3, 2 }
  0xdf   : > { %v2461_v22 = vrot.slane %v11754_v8, 2  ;;  %v2070_v37 = vshrl.u32 %v11772_v58, 16  ;;  %v2073_v13 = vshll.u32 %v11772_v58, 16  ;;  %v10835_v3 = vld [vmem:[#allocation6 + $0x120] sm:$0xff]  }
  0xe0   : > { %9878 = vmatmul.mubr.bf16.vlgmr.msra.gmra.mxu0 %v11499_v24  ;;  %v2457_v24 = vrot.slane %v11736_v4, 2 }
  0xe1   : > { %9966 = vmatpush3.bf16.msra.mxu0 %v11540_v61  ;;  %9930 = vmatmul.mubr.bf16.vlgmr.msra.gmra.mxu1 %v11673_v42  ;;  %v11783_v61 = vsel %vm2441_vm3, %v2453_v23, %v2455_v62  ;;  %v2061_v42 = vshrl.u32 %v11754_v8, 16  ;;  %v11795_v23 = vsel %vm1970_vm2, %v2040_v0, %v2049_v10  ;;  %v2079_v0 = vshrl.u32 %v11780_v9, 16 }
  0xe2   : > { %9881 = vmatprep.mubr.bf16.mxu0 %v11538_v60  ;;  %9933 = vmatprep.mubr.bf16.mxu1 %v11676_v43  ;;  %v11792_v60 = vsel %vm2441_vm3, %v2455_v62, %v2457_v24  ;;  %v2054_v43 = vrot.slane %v2052_v5, 1  ;;  %v11803_v62 = vsel %vm2441_vm3, %v2457_v24, %v2459_v56  ;;  %v2082_v5 = vshll.u32 %v11780_v9, 16  ;;  %v10848_v24 = vld [vmem:[#allocation6 + $0x160] sm:$0xff]  }
  0xe3   : > { %9967 = vmatprep.subr.bf16.mxu0 %v10828_v12  ;;  %10018 = vmatpush3.bf16.msra.mxu1 %v11604_v45  ;;  %v2063_v26 = vrot.slane %v2061_v42, 1  ;;  %14866 = vst [vmem:[#allocation13_spill] sm:$0xff] %v11803_v62  ;;  %v11811_v42 = vld [vmem:[%s11413_s8 + $0x78] sm:$0xff]   ;;  %v2463_v62 = vrot.slane %v11772_v58, 2 }
  0xe4   : > { %10019 = vmatprep.subr.bf16.mxu1 %v10843_v55  ;;  %v2058_v45 = vor.u32 %v2057_v1, %v2054_v43  ;;  %v11817_v43 = vsel %vm2441_vm3, %v2459_v56, %v2461_v22  ;;  %v2072_v1 = vrot.slane %v2070_v37, 1  ;;  %v2084_v46 = vrot.slane %v2082_v5, 2  ;;  %v11837_v5 = vld [vmem:[%s11413_s8 + $0x80] sm:$0xff]  }
  0xe5   : > { %9968 = vmatpush3.bf16.msra.mxu0 %v10828_v12  ;;  %v2067_v41 = vor.u32 %v2066_v52, %v2063_v26  ;;  %v11808_v12 = vld [vmem:[%s11413_s8 + $0x70] sm:$0xff]   ;;  %14868 = vst [vmem:[#allocation15_spill] sm:$0xff] %v11817_v43  ;;  %v2075_v26 = vrot.slane %v2073_v13, 2  ;;  %v2465_v56 = vrot.slane %v11780_v9, 2  ;;  %v11832_v13 = vsel %vm2441_vm3, %v2461_v22, %v2463_v62  ;;  %v10851_v22 = vld [vmem:[#allocation6 + $0x158] sm:$0xff]  }
  0xe6   : > { %9969 = vmatprep.subr.bf16.mxu0 %v11763_v51  ;;  %v11814_v11 = vsel %vm1970_vm2, %v2049_v10, %v2058_v45  ;;  %v2091_v37 = vshll.u32 %v11808_v12, 16  ;;  %14870 = vst [vmem:[#allocation17_spill] sm:$0xff] %v11832_v13  ;;  %v2467_v43 = vrot.slane %v11808_v12, 2 }
  0xe7   : > { %10020 = vmatpush3.bf16.msra.mxu1 %v10843_v55  ;;  %14867 = vst [vmem:[#allocation14_spill] sm:$0xff] %v11814_v11  ;;  %v11821_v52 = vsel %vm1970_vm2, %v2058_v45, %v2067_v41  ;;  %v2081_v55 = vrot.slane %v2079_v0, 1  ;;  %v2076_v10 = vor.u32 %v2075_v26, %v2072_v1  ;;  %v2100_v0 = vshll.u32 %v11811_v42, 16  ;;  %v11840_v1 = vld [vmem:[%s11413_s8 + $0x88] sm:$0xff]  }
  0xe8   : > { %9882 = vmatmul.mubr.bf16.gmra.mxu0 %v11543_v34  ;;  %10021 = vmatprep.subr.bf16.mxu1 %v10846_v30  ;;  %14869 = vst [vmem:[#allocation16_spill] sm:$0xff] %v11821_v52  ;;  %v2088_v34 = vshrl.u32 %v11808_v12, 16  ;;  %v2469_v11 = vrot.slane %v11811_v42, 2 }
  0xe9   : > { %9934 = vmatmul.mubr.bf16.gmra.mxu1 %v11679_v47  ;;  %9885 = vmatprep.mubr.bf16.mxu0 %v11553_v6  ;;  %v2085_v45 = vor.u32 %v2084_v46, %v2081_v55  ;;  %v2097_v47 = vshrl.u32 %v11811_v42, 16  ;;  %v10838_v6 = vld [vmem:[#allocation6 + $0x118] sm:$0xff]   ;;  %v11843_v26 = vsel %vm1970_vm2, %v2067_v41, %v2076_v10  ;;  %v2106_v41 = vshrl.u32 %v11837_v5, 16 }
  0xea   : > { %9937 = vmatprep.mubr.bf16.mxu1 %v11682_v31  ;;  %9970 = vmatpush3.bf16.msra.mxu0 %v11763_v51  ;;  %v11846_v31 = vsel %vm2441_vm3, %v2463_v62, %v2465_v56  ;;  %v2090_v46 = vrot.slane %v2088_v34, 1  ;;  %v2093_v51 = vrot.slane %v2091_v37, 2  ;;  %v2109_v62 = vshll.u32 %v11837_v5, 16 }
  0xeb   : > { %9971 = vmatprep.subr.bf16.mxu0 %v10835_v3  ;;  %10022 = vmatpush3.bf16.msra.mxu1 %v10846_v30  ;;  %14871 = vst [vmem:[#allocation18_spill] sm:$0xff] %v11846_v31  ;;  %v11849_v55 = vsel %vm1970_vm2, %v2076_v10, %v2085_v45  ;;  %v2099_v13 = vrot.slane %v2097_v47, 1  ;;  %v2102_v30 = vrot.slane %v2100_v0, 2  ;;  %v11856_v37 = vsel %vm2441_vm3, %v2465_v56, %v2467_v43  ;;  %v10842_v47 = vld [vmem:[#allocation6 + $0x110] sm:$0xff]  }
  0xec   : > { %10023 = vmatprep.subr.bf16.mxu1 %v10848_v24  ;;  %14872 = vst [vmem:[#allocation19_spill] sm:$0xff] %v11849_v55  ;;  %v2094_v52 = vor.u32 %v2093_v51, %v2090_v46  ;;  %14873 = vst [vmem:[#allocation20_spill] sm:$0xff] %v11856_v37  ;;  %v2115_v10 = vshrl.u32 %v11840_v1, 16  ;;  %v2118_v31 = vshll.u32 %v11840_v1, 16  ;;  %v11861_v0 = vld [vmem:[%s11413_s8 + $0x90] sm:$0xff]   ;;  %v11867_v51 = vsel %vm2441_vm3, %v2467_v43, %v2469_v11 }
  0xed   : > { %v2103_v34 = vor.u32 %v2102_v30, %v2099_v13  ;;  %v2111_v13 = vrot.slane %v2109_v62, 2  ;;  %v10852_v56 = vld [vmem:[#allocation6 + $0x150] sm:$0xff]   ;;  %v2473_v43 = vrot.slane %v11840_v1, 2  ;;  %v1650_v62 = vrot.slane %v11751_v48, 1 }
  0xee   : > { %9972 = vmatpush3.bf16.msra.mxu0 %v10835_v3  ;;  %v11864_v46 = vsel %vm1970_vm2, %v2085_v45, %v2094_v52  ;;  %v2108_v3 = vrot.slane %v2106_v41, 1  ;;  %v2117_v37 = vrot.slane %v2115_v10, 1  ;;  %v2120_v55 = vrot.slane %v2118_v31, 2  ;;  %v10847_v31 = vld [vmem:[#allocation6 + $0x108] sm:$0xff]  }
  0xef   : > { %9973 = vmatprep.subr.bf16.mxu0 %v10838_v6  ;;  %10024 = vmatpush3.bf16.msra.mxu1 %v10848_v24  ;;  %v11871_v30 = vsel %vm1970_vm2, %v2094_v52, %v2103_v34  ;;  %v2471_v24 = vrot.slane %v11837_v5, 2  ;;  %v2124_v41 = vshrl.u32 %v11861_v0, 16  ;;  %v1648_v52 = vrot.slane %v11736_v4, 1  ;;  %v10856_v4 = vld [vmem:[#allocation6 + $0x148] sm:$0xff]  }
  0xf0   : > { %9886 = vmatmul.mubr.bf16.gmra.mxu0 %v11557_v38  ;;  %10025 = vmatprep.subr.bf16.mxu1 %v10851_v22  ;;  %v2112_v45 = vor.u32 %v2111_v13, %v2108_v3  ;;  %v2127_v38 = vshll.u32 %v11861_v0, 16  ;;  %v2121_v10 = vor.u32 %v2120_v55, %v2117_v37 }
  0xf1   : > { %9938 = vmatmul.mubr.bf16.gmra.mxu1 %v11686_v53  ;;  %9889 = vmatprep.mubr.bf16.mxu0 %v11569_v17  ;;  %v11883_v53 = vsel %vm2441_vm3, %v2469_v11, %v2471_v24  ;;  %v11889_v3 = vsel %vm2441_vm3, %v2471_v24, %v2473_v43  ;;  %v2126_v13 = vrot.slane %v2124_v41, 1  ;;  %v14874_v11 = vrot.slane %v11653_v14, 1  ;;  %v10853_v24 = vld [vmem:[#allocation6 + $0x100] sm:$0xff]   ;;  %v10864_v41 = vld [vmem:[#allocation6 + $0x1f8] sm:$0xff]  }
  0xf2   : > { %9941 = vmatprep.mubr.bf16.mxu1 %v11691_v21  ;;  %9974 = vmatpush3.bf16.msra.mxu0 %v10838_v6  ;;  %v11886_v17 = vsel %vm1970_vm2, %v2103_v34, %v2112_v45  ;;  %v2129_v21 = vrot.slane %v2127_v38, 2  ;;  %v11892_v48 = vsel %vm1970_vm2, %v2112_v45, %v2121_v10  ;;  %v2475_v6 = vrot.slane %v11861_v0, 2  ;;  %v10857_v14 = vld [vmem:[#allocation6 + $0x140] sm:$0xff]  }
  0xf3   : > { %9975 = vmatprep.subr.bf16.mxu0 %v10842_v47  ;;  %10026 = vmatpush3.bf16.msra.mxu1 %v10851_v22  ;;  %v1649_v22 = vsel %vm1169_vm1, %v14874_v11, %v1648_v52  ;;  %v1651_v37 = vsel %vm1169_vm1, %v1648_v52, %v1650_v62 }
  0xf4   : > { %10027 = vmatprep.subr.bf16.mxu1 %v10852_v56  ;;  %v11895_v55 = vor.u32 %v2129_v21, %v2126_v13  ;;  %v11903_v34 = vsel %vm2441_vm3, %v2473_v43, %v2475_v6  ;;  %v1654_v43 = vrot.slane %v11772_v58, 1  ;;  %v10865_v13 = vld [vmem:[#allocation6 + $0x190] sm:$0xff]  }
  0xf6   : > { %9976 = vmatpush3.bf16.msra.mxu0 %v10842_v47  ;;  %v11908_v45 = vsel %vm1970_vm2, %v2121_v10, %v11895_v55  ;;  %v1652_v47 = vrot.slane %v11754_v8, 1  ;;  %v1658_v8 = vrot.slane %v11808_v12, 1  ;;  %v1666_v12 = vrot.slane %v11861_v0, 1  ;;  %v3692_v10 = vld [vmem:[%s11413_s8 + $0x10] sm:$0x8]  ;;  %v12101_v0 = vld [vmem:[%s11413_s8 + $0x38] sm:$0xff]  }
  0xf7   : > { %9977 = vmatprep.subr.bf16.mxu0 %v10847_v31  ;;  %10028 = vmatpush3.bf16.msra.mxu1 %v10852_v56  ;;  %v10858_v56 = vld [vmem:[#allocation6 + $0x1b8] sm:$0xff]  }
  0xf8   : > { %9890 = vmatmul.mubr.bf16.gmra.mxu0 %v11572_v18  ;;  %10029 = vmatprep.subr.bf16.mxu1 %v10856_v4  ;;  %v1653_v38 = vsel %vm1169_vm1, %v1650_v62, %v1652_v47  ;;  %v1655_v18 = vsel %vm1169_vm1, %v1652_v47, %v1654_v43  ;;  %v4032_v47 = vld [vmem:[%s14806_s5 + $0x10] sm:$0xff] }
  0xf9   : > { %9942 = vmatmul.mubr.bf16.gmra.mxu1 %v1649_v22  ;;  %9893 = vmatprep.mubr.bf16.mxu0 %v11583_v27  ;;  %v1656_v27 = vrot.slane %v11780_v9, 1  ;;  %v10868_v22 = vld [vmem:[#allocation6 + $0x188] sm:$0xff]  }
  0xfa   : > { %9945 = vmatprep.mubr.bf16.mxu1 %v1651_v37  ;;  %9978 = vmatpush3.bf16.msra.mxu0 %v10847_v31  ;;  %v10855_v31 = vld [vmem:[%s11413_s8 + $0x98] ss:$0 sps:$4 sm:$0x11]   ;;  %v10874_v37 = vld [vmem:[#allocation6 + $0x1c8] sm:$0xff]  }
  0xfb   : > { %9979 = vmatprep.subr.bf16.mxu0 %v10853_v24  ;;  %10030 = vmatpush3.bf16.msra.mxu1 %v10856_v4  ;;  %v1657_v58 = vsel %vm1169_vm1, %v1654_v43, %v1656_v27  ;;  %v1659_v52 = vsel %vm1169_vm1, %v1656_v27, %v1658_v8  ;;  %v4033_v43 = vld [vmem:[%s14806_s5 + $0x18] sm:$0xff]  ;;  %v4035_v27 = vld [vmem:[%s14806_s5 + $0x28] sm:$0xff] }
  0xfc   : > { %10031 = vmatprep.subr.bf16.mxu1 %v10857_v14 }
  0xfe   : > { %9980 = vmatpush3.bf16.msra.mxu0 %v10853_v24  ;;  %v10875_v24 = vld [vmem:[#allocation6 + $0x1c0] sm:$0xff]  }
  0xff   : > { %10032 = vmatpush3.bf16.msra.mxu1 %v10857_v14  ;;  %10069 = vmatprep.subr.bf16.mxu0 %v10858_v56  ;;  %v14876_v14 = vld [vmem:[#allocation13_spill] sm:$0xff] }
 0x100   : > { %9894 = vmatmul.mubr.bf16.gmra.mxu0 %v11587_v2  ;;  %10121 = vmatprep.subr.bf16.mxu1 %v10864_v41  ;;  %v1660_v2 = vrot.slane %v11811_v42, 1 }
 0x101   : > { %9946 = vmatmul.mubr.bf16.gmra.mxu1 %v1653_v38  ;;  %9897 = vmatprep.mubr.bf16.mxu0 %v11596_v40  ;;  %v1662_v40 = vrot.slane %v11837_v5, 1  ;;  %v4034_v38 = vld [vmem:[%s14806_s5 + $0x20] sm:$0xff] }
 0x102   : > { %9949 = vmatprep.mubr.bf16.mxu1 %v1655_v18  ;;  %v1661_v62 = vsel %vm1169_vm1, %v1658_v8, %v1660_v2  ;;  %v14879_v18 = vld [vmem:[#allocation17_spill] sm:$0xff]  ;;  %v4036_v8 = vld [vmem:[%s14806_s5 + $0x30] sm:$0xff] }
 0x103   : > { %v1663_v9 = vsel %vm1169_vm1, %v1660_v2, %v1662_v40  ;;  %v14882_v2 = vld [vmem:[#allocation20_spill] sm:$0xff] }
 0x108   : > { %9898 = vmatmul.mubr.bf16.gmra.mxu0 %v11602_v44  ;;  %v1664_v44 = vrot.slane %v11840_v1, 1  ;;  %v10866_v1 = vld [vmem:[#allocation6 + $0x1f0] sm:$0xff]  }
 0x109   : > { %9950 = vmatmul.mubr.bf16.gmra.mxu1 %v1657_v58  ;;  %9901 = vmatprep.mubr.bf16.mxu0 %v11611_v50  ;;  %v14880_v58 = vld [vmem:[#allocation19_spill] sm:$0xff] }
 0x10a   : > { %9953 = vmatprep.mubr.bf16.mxu1 %v1659_v52  ;;  %v1665_v50 = vsel %vm1169_vm1, %v1662_v40, %v1664_v44  ;;  %v1667_v42 = vsel %vm1169_vm1, %v1664_v44, %v1666_v12  ;;  %v14881_v52 = vld [vmem:[#allocation18_spill] sm:$0xff]  ;;  %v12021_v44 = vld [vmem:[%s11413_s8 + $0x98] ss:$0 sps:$4 sm:$0x33]  }
 0x10b   : > { %v4038_v40 = vld [vmem:[%s14806_s5 + $0x40] sm:$0xff] }
 0x110   : > { %9902 = vmatmul.mubr.bf16.gmra.mxu0 %v11624_v57  ;;  %v1668_v57 = vrot.slane %v10855_v31, 1  ;;  %v4041_v31 = vld [vmem:[%s14806_s5 + $0x58] sm:$0xff] }
 0x111   : > { %9954 = vmatmul.mubr.bf16.gmra.mxu1 %v1661_v62  ;;  %9905 = vmatprep.mubr.bf16.mxu0 %v11633_v16  ;;  %v10860_v16 = vld [vmem:[#allocation6 + $0x1b0] sm:$0xff]   ;;  %v2758_v62 = vld [vmem:[%s11413_s8 + $0x10] sm:$0xc] }
 0x112   : > { %9957 = vmatprep.mubr.bf16.mxu1 %v1663_v9  ;;  %v1669_v5 = vsel %vm1169_vm1, %v1666_v12, %v1668_v57  ;;  %v4039_v9 = vld [vmem:[%s14806_s5 + $0x48] sm:$0xff]  ;;  %v2133_v57 = vshrl.u32 %v12021_v44, 16 }
 0x118   : > { %9906 = vmatmul.mubr.bf16.gmra.mxu0 %v11641_v7  ;;  %v10861_v7 = vld [vmem:[#allocation6 + $0x1a8] sm:$0xff]  }
 0x119   : > { %9958 = vmatmul.mubr.bf16.gmra.mxu1 %v1665_v50  ;;  %9909 = vmatprep.mubr.bf16.mxu0 %v11656_v54  ;;  %v10867_v54 = vld [vmem:[#allocation6 + $0x1e8] sm:$0xff]  }
 0x11a   : > { %9961 = vmatprep.mubr.bf16.mxu1 %v1667_v42 }
 0x120   : > { %9910 = vmatmul.mubr.bf16.gmra.mxu0 %v11661_v20  ;;  %v10862_v20 = vld [vmem:[#allocation6 + $0x1a0] sm:$0xff]  }
 0x121   : > { %9962 = vmatmul.mubr.bf16.gmra.mxu1 %v1669_v5  ;;  %9981 = vmatprep.mubr.bf16.mxu0 %v11710_v19  ;;  %v10869_v19 = vld [vmem:[#allocation6 + $0x1e0] sm:$0xff]   ;;  %v2136_v5 = vshll.u32 %v12021_v44, 16 }
 0x122   : > { %10033 = vmatprep.mubr.bf16.mxu1 %v11716_v36  ;;  %v11952_v36 = vld [vmem:[%s11413_s8 + $0x18] sm:$0xff]  }
 0x128   : > { %9982 = vmatmul.mubr.bf16.vlgmr.msra.gmra.mxu0 %v11713_v29  ;;  %v10863_v29 = vld [vmem:[#allocation6 + $0x198] sm:$0xff]  }
 0x129   : > { %10070 = vmatpush3.bf16.msra.mxu0 %v10858_v56  ;;  %10034 = vmatmul.mubr.bf16.vlgmr.msra.gmra.mxu1 %v11706_v28  ;;  %v11947_v28 = vld [vmem:[%s11413_s8 + $0x14] sm:$0xf]  ;;  %v14877_v56 = vld [vmem:[#allocation16_spill] sm:$0xff] }
 0x12a   : > { %9985 = vmatprep.mubr.bf16.mxu0 %v11730_v15  ;;  %10037 = vmatprep.mubr.bf16.mxu1 %v11725_v59  ;;  %v10870_v59 = vld [vmem:[#allocation6 + $0x1d8] sm:$0xff]   ;;  %v12024_v12 = vcombine.low %v2758_v62, %v11947_v28 }
 0x12b   : > { %10071 = vmatprep.subr.bf16.mxu0 %v10860_v16  ;;  %10122 = vmatpush3.bf16.msra.mxu1 %v10864_v41  ;;  %v11956_v15 = vld [vmem:[%s11413_s8 + $0x20] sm:$0xff]   ;;  %v14878_v41 = vld [vmem:[#allocation15_spill] sm:$0xff] }
 0x12c   : > { %10123 = vmatprep.subr.bf16.mxu1 %v10866_v1  ;;  %v14815_v4 = vrot.slane %v11956_v15, 3 }
 0x12d   : > { %10072 = vmatpush3.bf16.msra.mxu0 %v10860_v16 }
 0x12e   : > { %10073 = vmatprep.subr.bf16.mxu0 %v10861_v7 }
 0x12f   : > { %10124 = vmatpush3.bf16.msra.mxu1 %v10866_v1 }
 0x130   : > { %9986 = vmatmul.mubr.bf16.gmra.mxu0 %v11739_v39  ;;  %10125 = vmatprep.subr.bf16.mxu1 %v10867_v54  ;;  %v8923_v39 = vcombine.low %v3692_v10, %v11947_v28  ;;  %v2138_v10 = vrot.slane %v2136_v5, 2 }
 0x131   : > { %10038 = vmatmul.mubr.bf16.gmra.mxu1 %v11733_v25  ;;  %9989 = vmatprep.mubr.bf16.mxu0 %v11757_v33  ;;  %v3715_v25 = vrot.slane %v11952_v36, 3  ;;  %v10871_v33 = vld [vmem:[#allocation6 + $0x1d0] sm:$0xff]  }
 0x132   : > { %10041 = vmatprep.mubr.bf16.mxu1 %v11746_v35  ;;  %10074 = vmatpush3.bf16.msra.mxu0 %v10861_v7  ;;  %v3714_v21 = vrot.slane %v8923_v39, 3  ;;  %v3244_v7 = vshrl.u32 %v12024_v12, 16 }
 0x133   : > { %10075 = vmatprep.subr.bf16.mxu0 %v10862_v20  ;;  %10126 = vmatpush3.bf16.msra.mxu1 %v10867_v54  ;;  %v11969_v11 = vsel %vm3713_vm4, %v3715_v25, %v14815_v4  ;;  %v3247_v54 = vshll.u32 %v12024_v12, 16 }
 0x134   : > { %10127 = vmatprep.subr.bf16.mxu1 %v10869_v19  ;;  %v11963_v35 = vsel %vm3713_vm4, %v3714_v21, %v3715_v25  ;;  %v3246_v25 = vrot.slane %v3244_v7, 2 }
 0x136   : > { %10076 = vmatpush3.bf16.msra.mxu0 %v10862_v20  ;;  %v3252_v20 = vshrl.u32 %v11952_v36, 16 }
 0x137   : > { %10077 = vmatprep.subr.bf16.mxu0 %v10863_v29  ;;  %10128 = vmatpush3.bf16.msra.mxu1 %v10869_v19 }
 0x138   : > { %9990 = vmatmul.mubr.bf16.gmra.mxu0 %v11766_v32  ;;  %10129 = vmatprep.subr.bf16.mxu1 %v10870_v59  ;;  %v10872_v32 = vld [vmem:[#allocation6 + $0x180] sm:$0xff]  }
 0x139   : > { %10042 = vmatmul.mubr.bf16.gmra.mxu1 %v11760_v49  ;;  %9993 = vmatprep.mubr.bf16.mxu0 %v11789_v63  ;;  %v14875_v49 = vld [vmem:[#allocation14_spill] sm:$0xff]  ;;  %v11977_v63 = vld [vmem:[#allocation6 + $0x238] sm:$0xff]  }
 0x13a   : > { %10045 = vmatprep.mubr.bf16.mxu1 %v11783_v61  ;;  %10078 = vmatpush3.bf16.msra.mxu0 %v10863_v29  ;;  %v4030_v61 = vld [vmem:[%s14806_s5] sm:$0xff] }
 0x13b   : > { %10079 = vmatprep.subr.bf16.mxu0 %v10865_v13  ;;  %10130 = vmatpush3.bf16.msra.mxu1 %v10870_v59  ;;  %v2135_v59 = vrot.slane %v2133_v57, 1 }
 0x13c   : > { %10131 = vmatprep.subr.bf16.mxu1 %v10871_v33 }
 0x13e   : > { %10080 = vmatpush3.bf16.msra.mxu0 %v10865_v13 }
 0x13f   : > { %10081 = vmatprep.subr.bf16.mxu0 %v10868_v22  ;;  %10132 = vmatpush3.bf16.msra.mxu1 %v10871_v33  ;;  %v3249_v33 = vrot.slane %v3247_v54, 3  ;;  %v4049_v54 = vld [vmem:[%s14806_s5 + $0x98] sm:$0xff] }
 0x140   : > { %9994 = vmatmul.mubr.bf16.gmra.mxu0 %v11795_v23  ;;  %10133 = vmatprep.subr.bf16.mxu1 %v10874_v37  ;;  %v11233_v23 = vmov 0  }
 0x141   : > { %10046 = vmatmul.mubr.bf16.gmra.mxu1 %v11792_v60  ;;  %9997 = vmatprep.mubr.bf16.mxu0 %v14875_v49  ;;  %v4031_v60 = vld [vmem:[%s14806_s5 + $0x8] sm:$0xff] }
 0x142   : > { %10049 = vmatprep.mubr.bf16.mxu1 %v14876_v14  ;;  %10082 = vmatpush3.bf16.msra.mxu0 %v10868_v22  ;;  %v3254_v22 = vrot.slane %v3252_v20, 2  ;;  %v4045_v14 = vld [vmem:[%s14806_s5 + $0x78] sm:$0xff] }
 0x143   : > { %10083 = vmatprep.subr.bf16.mxu0 %v10872_v32  ;;  %10134 = vmatpush3.bf16.msra.mxu1 %v10874_v37 }
 0x144   : > { %10135 = vmatprep.subr.bf16.mxu1 %v10875_v24  ;;  %10769 = vset.pattern.permute.xlu0 %v11233_v23 }
 0x145   : > { %10770 = vset.pattern.permute.xlu1 %v11233_v23  ;;  %4147 = vperm.xlu0 %10769, %v4030_v61   ;;  %v2139_v23 = vor.u32 %v2138_v10, %v2135_v59 }
 0x146   : > { %10084 = vmatpush3.bf16.msra.mxu0 %v10872_v32  ;;  %4157 = vperm.xlu1 %10770, %v4032_v47   ;;  %v12055_v32 = vld [vmem:[%s11413_s8 + $0x28] sm:$0xff]  }
 0x147   : > { %10136 = vmatpush3.bf16.msra.mxu1 %v10875_v24  ;;  %10173 = vmatprep.subr.bf16.mxu0 %v11977_v63  ;;  %v4044_v24 = vld [vmem:[%s14806_s5 + $0x70] sm:$0xff]  ;;  %v2140_v62 = vsel %vm1970_vm2, %v11895_v55, %v2139_v23 }
 0x148   : > { %9998 = vmatmul.mubr.bf16.gmra.mxu0 %v14877_v56 }
 0x149   : > { %10050 = vmatmul.mubr.bf16.gmra.mxu1 %v14878_v41  ;;  %10001 = vmatprep.mubr.bf16.mxu0 %v11843_v26  ;;  %v4037_v26 = vld [vmem:[%s14806_s5 + $0x38] sm:$0xff] }
 0x14a   : > { %10053 = vmatprep.mubr.bf16.mxu1 %v14879_v18  ;;  %4152 = vperm.xlu0 %10769, %v4031_v60   ;;  %v2477_v60 = vrot.slane %v12021_v44, 2  ;;  %v3264_v18 = vshll.u32 %v11956_v15, 16 }
 0x14b   : > { %4162 = vperm.xlu1 %10770, %v4033_v43   ;;  %v2906_v43 = vrot.slane %v11952_v36, 2 }
 0x14e   : > { %4167 = vperm.xlu0 %10769, %v4034_v38   ;;  %v3261_v38 = vshrl.u32 %v11956_v15, 16 }
 0x14f   : > { %4172 = vperm.xlu1 %10770, %v4035_v27   ;;  %v3250_v27 = vor.u32 %v3249_v33, %v3246_v25  ;;  %v3288_v25 = vshrl.u32 %v12101_v0, 16  ;;  %v3291_v33 = vshll.u32 %v12101_v0, 16 }
 0x150   : > { %10002 = vmatmul.mubr.bf16.gmra.mxu0 %v14880_v58 }
 0x151   : > { %10054 = vmatmul.mubr.bf16.gmra.mxu1 %v14881_v52  ;;  %10005 = vmatprep.mubr.bf16.mxu0 %v11864_v46  ;;  %v4040_v46 = vld [vmem:[%s14806_s5 + $0x50] sm:$0xff] }
 0x152   : > { %10057 = vmatprep.mubr.bf16.mxu1 %v14882_v2  ;;  %4177 = vperm.xlu0 %10769, %v4036_v8   ;;  %v3270_v8 = vshrl.u32 %v12055_v32, 16  ;;  %v4047_v2 = vld [vmem:[%s14806_s5 + $0x88] sm:$0xff] }
 0x153   : > { %4182 = vperm.xlu1 %10770, %v4037_v26   ;;  %v3273_v26 = vshll.u32 %v12055_v32, 16 }
 0x154   : > { %v3272_v55 = vrot.slane %v3270_v8, 2 }
 0x156   : > { %4187 = vperm.xlu0 %10769, %v4038_v40  }
 0x157   : > { %4192 = vperm.xlu1 %10770, %v4039_v9   ;;  %v2478_v9 = vsel %vm2441_vm3, %v2475_v6, %v2477_v60  ;;  %v4048_v6 = vld [vmem:[%s14806_s5 + $0x90] sm:$0xff] }
 0x158   : > { %v9775_v50 = vpop.f32.mrf.mxu0  ;;  %10006 = vmatmul.mubr.bf16.gmra.mxu0 %v11871_v30 }
 0x159   : > { %v9827_v42 = vpop.f32.mrf.mxu1  ;;  %10058 = vmatmul.mubr.bf16.gmra.mxu1 %v11867_v51  ;;  %10009 = vmatprep.mubr.bf16.mxu0 %v11886_v17  ;;  %v3255_v51 = vshll.u32 %v11952_v36, 16  ;;  %v4042_v17 = vld [vmem:[%s14806_s5 + $0x60] sm:$0xff]  ;;  %v3293_v36 = vrot.slane %v3291_v33, 3 }
 0x15a   : > { %v12037_v16 = vadd.f32 %v9827_v42, %v9775_v50  ;;  %v762_v1 = vpop.f32.mrf.mxu0  ;;  %10061 = vmatprep.mubr.bf16.mxu1 %v11883_v53  ;;  %4197 = vperm.xlu0 %10769, %v4040_v46   ;;  %v4043_v53 = vld [vmem:[%s14806_s5 + $0x68] sm:$0xff]  ;;  %v3263_v50 = vrot.slane %v3261_v38, 2 }
 0x15b   : > { %v1005_v30 = vpop.f32.mrf.mxu1  ;;  %4202 = vperm.xlu1 %10770, %v4041_v31   ;;  %v3257_v37 = vrot.slane %v3255_v51, 3  ;;  %v3266_v31 = vrot.slane %v3264_v18, 3  ;;  %v12097_v42 = vld [vmem:[%s11413_s8 + $0x30] sm:$0xff]   ;;  %v2908_v51 = vrot.slane %v11956_v15, 2  ;;  %v12134_v18 = vld [vmem:[%s11413_s8 + $0x40] sm:$0xff]  }
 0x15c   : > { %v12047_v19 = vadd.f32 %v1005_v30, %v762_v1  ;;  %v9776_v28 = vpop.f32.mrf.mxu0  ;;  %v3275_v1 = vrot.slane %v3273_v26, 3  ;;  %v3282_v59 = vshll.u32 %v12097_v42, 16  ;;  %v10882_v26 = vld [vmem:[#allocation6 + $0x230] sm:$0xff]  }
 0x15d   : > { %v9828_v29 = vpop.f32.mrf.mxu1 }
 0x15e   : > { %v12052_v39 = vadd.f32 %v9828_v29, %v9776_v28  ;;  %v765_v13 = vpop.f32.mrf.mxu0  ;;  %4207 = vperm.xlu0 %10769, %v4042_v17   ;;  %v3279_v29 = vshrl.u32 %v12097_v42, 16  ;;  %v3284_v38 = vrot.slane %v3282_v59, 3  ;;  %v12170_v59 = vld [vmem:[%s11413_s8 + $0x50] sm:$0xff]  }
 0x15f   : > { %v1008_v21 = vpop.f32.mrf.mxu1  ;;  %4212 = vperm.xlu1 %10770, %v4043_v53   ;;  %v3267_v53 = vor.u32 %v3266_v31, %v3263_v50 }
 0x160   : > { %v12060_v49 = vadd.f32 %v1008_v21, %v765_v13  ;;  %v9779_v61 = vpop.f32.mrf.mxu0  ;;  %10010 = vmatmul.mubr.bf16.gmra.mxu0 %v11892_v48  ;;  %v2905_v48 = vrot.slane %v12024_v12, 2  ;;  %v2910_v13 = vrot.slane %v12055_v32, 2  ;;  %v3276_v21 = vor.u32 %v3275_v1, %v3272_v55 }
 0x161   : > { %v9831_v47 = vpop.f32.mrf.mxu1  ;;  %10062 = vmatmul.mubr.bf16.gmra.mxu1 %v11889_v3  ;;  %10013 = vmatprep.mubr.bf16.mxu0 %v11908_v45  ;;  %v3258_v45 = vor.u32 %v3257_v37, %v3254_v22  ;;  %v4050_v22 = vld [vmem:[%s14806_s5 + $0xa0] sm:$0xff] }
 0x162   : > { %v12070_v56 = vadd.f32 %v9831_v47, %v9779_v61  ;;  %v778_v41 = vpop.f32.mrf.mxu0  ;;  %10065 = vmatprep.mubr.bf16.mxu1 %v11903_v34  ;;  %4217 = vperm.xlu0 %10769, %v4044_v24   ;;  %v4046_v34 = vld [vmem:[%s14806_s5 + $0x80] sm:$0xff]  ;;  %v2907_v46 = vsel %vm2441_vm3, %v2905_v48, %v2906_v43  ;;  %v4051_v61 = vld [vmem:[%s14806_s5 + $0xa8] sm:$0xff]  ;;  %v2909_v47 = vsel %vm2441_vm3, %v2906_v43, %v2908_v51  ;;  %v3281_v48 = vrot.slane %v3279_v29, 2 }
 0x163   : > { %v1021_v3 = vpop.f32.mrf.mxu1  ;;  %4222 = vperm.xlu1 %10770, %v4045_v14   ;;  %v3259_v5 = vsel %vm3242_vm5, %v3250_v27, %v3258_v45  ;;  %v2911_v27 = vsel %vm2441_vm3, %v2908_v51, %v2910_v13  ;;  %v3277_v8 = vsel %vm3242_vm5, %v3267_v53, %v3276_v21  ;;  %v4054_v51 = vld [vmem:[%s14806_s5 + $0xc0] sm:$0xff] }
 0x164   : > { %v12081_v58 = vadd.f32 %v1021_v3, %v778_v41  ;;  %v9780_v52 = vpop.f32.mrf.mxu0  ;;  %v3268_v41 = vsel %vm3242_vm5, %v3258_v45, %v3267_v53  ;;  %v4052_v45 = vld [vmem:[%s14806_s5 + $0xb0] sm:$0xff]  ;;  %v3285_v31 = vor.u32 %v3284_v38, %v3281_v48 }
 0x165   : > { %v9832_v40 = vpop.f32.mrf.mxu1  ;;  %v12181_v48 = vld [vmem:[%s11413_s8 + $0x58] sm:$0xff]  }
 0x166   : > { %v12091_v44 = vadd.f32 %v9832_v40, %v9780_v52  ;;  %v781_v12 = vpop.f32.mrf.mxu0  ;;  %4227 = vperm.xlu0 %10769, %v4046_v34   ;;  %v3290_v34 = vrot.slane %v3288_v25, 2  ;;  %v12139_v52 = vld [vmem:[%s11413_s8 + $0x48] sm:$0xff]  }
 0x167   : > { %v1024_v57 = vpop.f32.mrf.mxu1  ;;  %4232 = vperm.xlu1 %10770, %v4047_v2  }
 0x168   : > { %v12106_v30 = vadd.f32 %v1024_v57, %v781_v12  ;;  %v9783_v7 = vpop.f32.mrf.mxu0  ;;  %10014 = vmatmul.mubr.bf16.gmra.mxu0 %v2140_v62  ;;  %v2912_v62 = vrot.slane %v12097_v42, 2  ;;  %v4053_v12 = vld [vmem:[%s14806_s5 + $0xb8] sm:$0xff]  ;;  %v3297_v57 = vshrl.u32 %v12134_v18, 16  ;;  %v12156_v1 = vor.u32 %v3293_v36, %v3290_v34 }
 0x169   : > { %v9835_v20 = vpop.f32.mrf.mxu1  ;;  %10066 = vmatmul.mubr.bf16.gmra.mxu1 %v2478_v9  ;;  %10085 = vmatprep.mubr.bf16.mxu0 %v2907_v46  ;;  %v2914_v9 = vrot.slane %v12101_v0, 2  ;;  %v4057_v34 = vld [vmem:[%s14806_s5 + $0xd8] sm:$0xff] }
 0x16a   : > { %v12112_v17 = vadd.f32 %v9835_v20, %v9783_v7  ;;  %v794_v28 = vpop.f32.mrf.mxu0  ;;  %10137 = vmatprep.mubr.bf16.mxu1 %v3259_v5  ;;  %4237 = vperm.xlu0 %10769, %v4048_v6   ;;  %v3300_v5 = vshll.u32 %v12134_v18, 16  ;;  %v3306_v6 = vshrl.u32 %v12139_v52, 16  ;;  %v3309_v7 = vshll.u32 %v12139_v52, 16 }
 0x16b   : > { %v1037_v10 = vpop.f32.mrf.mxu1  ;;  %4242 = vperm.xlu1 %10770, %v4049_v54   ;;  %v2913_v53 = vsel %vm2441_vm3, %v2910_v13, %v2912_v62  ;;  %v2915_v29 = vsel %vm2441_vm3, %v2912_v62, %v2914_v9  ;;  %v3318_v62 = vshll.u32 %v12170_v59, 16 }
 0x16c   : > { %v12122_v37 = vadd.f32 %v1037_v10, %v794_v28  ;;  %v9784_v24 = vpop.f32.mrf.mxu0  ;;  %v4055_v10 = vld [vmem:[%s14806_s5 + $0xc8] sm:$0xff] }
 0x16d   : > { %v9836_v14 = vpop.f32.mrf.mxu1 }
 0x16e   : > { %v12130_v23 = vadd.f32 %v9836_v14, %v9784_v24  ;;  %v797_v60 = vpop.f32.mrf.mxu0  ;;  %4247 = vperm.xlu0 %10769, %v4050_v22   ;;  %v3286_v22 = vsel %vm3242_vm5, %v3276_v21, %v3285_v31  ;;  %v3299_v24 = vrot.slane %v3297_v57, 2  ;;  %v3295_v14 = vsel %vm3242_vm5, %v3285_v31, %v12156_v1  ;;  %v4056_v21 = vld [vmem:[%s14806_s5 + $0xd0] sm:$0xff] }
 0x16f   : > { %v1040_v3 = vpop.f32.mrf.mxu1  ;;  %4252 = vperm.xlu1 %10770, %v4051_v61   ;;  %v3302_v61 = vrot.slane %v3300_v5, 3  ;;  %v3324_v31 = vshrl.u32 %v12181_v48, 16  ;;  %v3327_v57 = vshll.u32 %v12181_v48, 16  ;;  %v10891_v5 = vld [vmem:[#allocation6 + $0x218] sm:$0xff]  }
 0x170   : > { %v12141_v43 = vadd.f32 %v1040_v3, %v797_v60  ;;  %v9787_v2 = vpop.f32.mrf.mxu0  ;;  %10086 = vmatmul.mubr.bf16.vlgmr.msra.gmra.mxu0 %v2909_v47  ;;  %v3308_v47 = vrot.slane %v3306_v6, 2  ;;  %v3311_v60 = vrot.slane %v3309_v7, 3 }
 0x171   : > { %v9839_v40 = vpop.f32.mrf.mxu1  ;;  %10174 = vmatpush3.bf16.msra.mxu0 %v11977_v63  ;;  %10138 = vmatmul.mubr.bf16.vlgmr.msra.gmra.mxu1 %v3268_v41  ;;  %v10885_v63 = vld [vmem:[#allocation6 + $0x228] sm:$0xff]   ;;  %v10888_v41 = vld [vmem:[#allocation6 + $0x220] sm:$0xff]  }
 0x172   : > { %v12152_v46 = vadd.f32 %v9839_v40, %v9787_v2  ;;  %v810_v50 = vpop.f32.mrf.mxu0  ;;  %10089 = vmatprep.mubr.bf16.mxu0 %v2911_v27  ;;  %10141 = vmatprep.mubr.bf16.mxu1 %v3277_v8  ;;  %v2916_v8 = vrot.slane %v12134_v18, 2  ;;  %v2918_v40 = vrot.slane %v12139_v52, 2 }
 0x173   : > { %v1053_v55 = vpop.f32.mrf.mxu1  ;;  %10175 = vmatprep.subr.bf16.mxu0 %v10882_v26  ;;  %4257 = vperm.xlu0 %10769, %v4052_v45   ;;  %v3303_v45 = vor.u32 %v3302_v61, %v3299_v24  ;;  %v3320_v24 = vrot.slane %v3318_v62, 3 }
 0x174   : > { %v12160_v54 = vadd.f32 %v1053_v55, %v810_v50  ;;  %v9788_v20 = vpop.f32.mrf.mxu0  ;;  %4262 = vperm.xlu1 %10770, %v4053_v12   ;;  %v12197_v50 = vor.u32 %v3311_v60, %v3308_v47  ;;  %v12225_v47 = vld [vmem:[%s11413_s8 + $0x68] sm:$0xff]   ;;  %v10894_v60 = vld [vmem:[#allocation6 + $0x210] sm:$0xff]  }
 0x175   : > { %v9840_v28 = vpop.f32.mrf.mxu1  ;;  %10176 = vmatpush3.bf16.msra.mxu0 %v10882_v26  ;;  %v3315_v26 = vshrl.u32 %v12170_v59, 16  ;;  %14884 = vst [vmem:[#allocation13_spill] sm:$0xff] %v12225_v47 }
 0x176   : > { %v12175_v25 = vadd.f32 %v9840_v28, %v9788_v20  ;;  %v813_v33 = vpop.f32.mrf.mxu0  ;;  %10177 = vmatprep.subr.bf16.mxu0 %v10885_v63  ;;  %v2917_v20 = vsel %vm2441_vm3, %v2914_v9, %v2916_v8  ;;  %v12210_v28 = vld [vmem:[%s11413_s8 + $0x60] sm:$0xff]   ;;  %v3313_v61 = vsel %vm3242_vm5, %v3303_v45, %v12197_v50 }
 0x177   : > { %v1056_v13 = vpop.f32.mrf.mxu1  ;;  %4267 = vperm.xlu0 %10769, %v4054_v51   ;;  %v3317_v51 = vrot.slane %v3315_v26, 2  ;;  %14883 = vst [vmem:[#allocation14_spill] sm:$0xff] %v12210_v28  ;;  %v3336_v26 = vshll.u32 %v12210_v28, 16 }
 0x178   : > { %v12183_v38 = vadd.f32 %v1056_v13, %v813_v33  ;;  %v9791_v3 = vpop.f32.mrf.mxu0  ;;  %10090 = vmatmul.mubr.bf16.gmra.mxu0 %v2913_v53  ;;  %4272 = vperm.xlu1 %10770, %v4055_v10   ;;  %v4059_v53 = vld [vmem:[%s14806_s5 + $0xe8] sm:$0xff]  ;;  %v3304_v33 = vsel %vm3242_vm5, %v12156_v1, %v3303_v45  ;;  %v3326_v13 = vrot.slane %v3324_v31, 2 }
 0x179   : > { %v9843_v27 = vpop.f32.mrf.mxu1  ;;  %10142 = vmatmul.mubr.bf16.gmra.mxu1 %v3286_v22  ;;  %10093 = vmatprep.mubr.bf16.mxu0 %v2915_v29  ;;  %v2919_v22 = vsel %vm2441_vm3, %v2916_v8, %v2918_v40  ;;  %v3333_v8 = vshrl.u32 %v12210_v28, 16  ;;  %v3321_v62 = vor.u32 %v3320_v24, %v3317_v51  ;;  %v4062_v51 = vld [vmem:[%s14806_s5 + $0x100] sm:$0xff]  ;;  %v4063_v24 = vld [vmem:[%s14806_s5 + $0x108] sm:$0xff] }
 0x17a   : > { %v12193_v36 = vadd.f32 %v9843_v27, %v9791_v3  ;;  %v826_v2 = vpop.f32.mrf.mxu0  ;;  %10145 = vmatprep.mubr.bf16.mxu1 %v3295_v14  ;;  %10178 = vmatpush3.bf16.msra.mxu0 %v10885_v63  ;;  %v4058_v63 = vld [vmem:[%s14806_s5 + $0xe0] sm:$0xff]  ;;  %v3329_v14 = vrot.slane %v3327_v57, 3  ;;  %v2920_v27 = vrot.slane %v12170_v59, 2 }
 0x17b   : > { %v1069_v12 = vpop.f32.mrf.mxu1  ;;  %10179 = vmatprep.subr.bf16.mxu0 %v10888_v41  ;;  %4277 = vperm.xlu0 %10769, %v4056_v21  }
 0x17c   : > { %v12201_v55 = vadd.f32 %v1069_v12, %v826_v2  ;;  %v9792_v6 = vpop.f32.mrf.mxu0  ;;  %4282 = vperm.xlu1 %10770, %v4057_v34   ;;  %v4061_v34 = vld [vmem:[%s14806_s5 + $0xf8] sm:$0xff]  ;;  %v2922_v12 = vrot.slane %v12181_v48, 2  ;;  %v3330_v57 = vor.u32 %v3329_v14, %v3326_v13  ;;  %v3322_v13 = vsel %vm3242_vm5, %v12197_v50, %v3321_v62  ;;  %v4064_v50 = vld [vmem:[%s14806_s5 + $0x110] sm:$0xff] }
 0x17d   : > { %v9844_v7 = vpop.f32.mrf.mxu1 }
 0x17e   : > { %v12215_v29 = vadd.f32 %v9844_v7, %v9792_v6  ;;  %v829_v10 = vpop.f32.mrf.mxu0  ;;  %10180 = vmatpush3.bf16.msra.mxu0 %v10888_v41  ;;  %v4060_v41 = vld [vmem:[%s14806_s5 + $0xf0] sm:$0xff]  ;;  %v3342_v6 = vshrl.u32 %v12225_v47, 16  ;;  %v10897_v7 = vld [vmem:[#allocation6 + $0x208] sm:$0xff]   ;;  %v2923_v14 = vsel %vm2441_vm3, %v2920_v27, %v2922_v12 }
 0x17f   : > { %v1072_v9 = vpop.f32.mrf.mxu1  ;;  %10181 = vmatprep.subr.bf16.mxu0 %v10891_v5  ;;  %4287 = vperm.xlu0 %10769, %v4058_v63   ;;  %v3345_v63 = vshll.u32 %v12225_v47, 16 }
 0x180   : > { %v12227_v3 = vadd.f32 %v1072_v9, %v829_v10  ;;  %v9795_v1 = vpop.f32.mrf.mxu0  ;;  %10094 = vmatmul.mubr.bf16.gmra.mxu0 %v2917_v20  ;;  %4292 = vperm.xlu1 %10770, %v4059_v53   ;;  %v2921_v10 = vsel %vm2441_vm3, %v2918_v40, %v2920_v27  ;;  %v3331_v40 = vsel %vm3242_vm5, %v3321_v62, %v3330_v57  ;;  %v2924_v27 = vrot.slane %v12210_v28, 2 }
 0x181   : > { %v9847_v21 = vpop.f32.mrf.mxu1  ;;  %10146 = vmatmul.mubr.bf16.gmra.mxu1 %v3304_v33  ;;  %10097 = vmatprep.mubr.bf16.mxu0 %v2919_v22  ;;  %v3335_v33 = vrot.slane %v3333_v8, 2  ;;  %v3338_v22 = vrot.slane %v3336_v26, 3  ;;  %v3347_v8 = vrot.slane %v3345_v63, 3  ;;  %v12264_v26 = vld [vmem:[%s11413_s8 + $0x78] sm:$0xff]  }
 0x182   : > { %v12238_v2 = vadd.f32 %v9847_v21, %v9795_v1  ;;  %v842_v45 = vpop.f32.mrf.mxu0  ;;  %10149 = vmatprep.mubr.bf16.mxu1 %v3313_v61  ;;  %10182 = vmatpush3.bf16.msra.mxu0 %v10891_v5  ;;  %v12260_v1 = vld [vmem:[%s11413_s8 + $0x70] sm:$0xff]   ;;  %v3344_v21 = vrot.slane %v3342_v6, 2  ;;  %14886 = vst [vmem:[#allocation15_spill] sm:$0xff] %v12264_v26  ;;  %v4065_v6 = vld [vmem:[%s14806_s5 + $0x118] sm:$0xff] }
 0x183   : > { %v1085_v31 = vpop.f32.mrf.mxu1  ;;  %10183 = vmatprep.subr.bf16.mxu0 %v10894_v60  ;;  %4297 = vperm.xlu0 %10769, %v4060_v41   ;;  %14885 = vst [vmem:[#allocation16_spill] sm:$0xff] %v12260_v1  ;;  %v3339_v62 = vor.u32 %v3338_v22, %v3335_v33  ;;  %v3360_v33 = vshrl.u32 %v12264_v26, 16  ;;  %v3363_v22 = vshll.u32 %v12264_v26, 16 }
 0x184   : > { %v12243_v20 = vadd.f32 %v1085_v31, %v842_v45  ;;  %v9796_v53 = vpop.f32.mrf.mxu0  ;;  %4302 = vperm.xlu1 %10770, %v4061_v34   ;;  %v10901_v34 = vld [vmem:[#allocation6 + $0x200] sm:$0xff]  }
 0x185   : > { %v9848_v5 = vpop.f32.mrf.mxu1 }
 0x186   : > { %v12254_v9 = vadd.f32 %v9848_v5, %v9796_v53  ;;  %v845_v61 = vpop.f32.mrf.mxu0  ;;  %10184 = vmatpush3.bf16.msra.mxu0 %v10894_v60  ;;  %v3351_v5 = vshrl.u32 %v12260_v1, 16 }
 0x187   : > { %v1088_v41 = vpop.f32.mrf.mxu1  ;;  %10185 = vmatprep.subr.bf16.mxu0 %v10897_v7  ;;  %4307 = vperm.xlu0 %10769, %v4062_v51   ;;  %v2926_v51 = vrot.slane %v12225_v47, 2 }
 0x188   : > { %v12266_v45 = vadd.f32 %v1088_v41, %v845_v61  ;;  %v9799_v31 = vpop.f32.mrf.mxu0  ;;  %10098 = vmatmul.mubr.bf16.gmra.mxu0 %v2921_v10  ;;  %4312 = vperm.xlu1 %10770, %v4063_v24   ;;  %v3354_v10 = vshll.u32 %v12260_v1, 16  ;;  %v3348_v61 = vor.u32 %v3347_v8, %v3344_v21  ;;  %v3353_v4 = vrot.slane %v3351_v5, 2 }
 0x189   : > { %v9851_v60 = vpop.f32.mrf.mxu1  ;;  %10150 = vmatmul.mubr.bf16.gmra.mxu1 %v3322_v13  ;;  %10101 = vmatprep.mubr.bf16.mxu0 %v2923_v14  ;;  %v2927_v8 = vsel %vm2441_vm3, %v2924_v27, %v2926_v51 }
 0x18a   : > { %v12275_v63 = vadd.f32 %v9851_v60, %v9799_v31  ;;  %v858_v53 = vpop.f32.mrf.mxu0  ;;  %10153 = vmatprep.mubr.bf16.mxu1 %v3331_v40  ;;  %10186 = vmatpush3.bf16.msra.mxu0 %v10897_v7  ;;  %v2925_v40 = vsel %vm2441_vm3, %v2922_v12, %v2924_v27  ;;  %v3340_v31 = vsel %vm3242_vm5, %v3330_v57, %v3339_v62  ;;  %v12287_v60 = vld [vmem:[%s11413_s8 + $0x80] sm:$0xff]   ;;  %v3356_v47 = vrot.slane %v3354_v10, 3 }
 0x18b   : > { %v1101_v24 = vpop.f32.mrf.mxu1  ;;  %10187 = vmatprep.subr.bf16.mxu0 %v10901_v34  ;;  %4317 = vperm.xlu0 %10769, %v4064_v50   ;;  %14888 = vst [vmem:[#allocation19_spill] sm:$0xff] %v12287_v60  ;;  %v3369_v27 = vshrl.u32 %v12287_v60, 16 }
 0x18c   : > { %v12282_v13 = vadd.f32 %v1101_v24, %v858_v53  ;;  %v9800_v14 = vpop.f32.mrf.mxu0  ;;  %4322 = vperm.xlu1 %10770, %v4065_v6   ;;  %v3349_v53 = vsel %vm3242_vm5, %v3339_v62, %v3348_v61  ;;  %v3362_v24 = vrot.slane %v3360_v33, 2  ;;  %v3365_v6 = vrot.slane %v3363_v22, 3 }
 0x18d   : > { %v9852_v41 = vpop.f32.mrf.mxu1  ;;  %v3357_v10 = vor.u32 %v3356_v47, %v3353_v4  ;;  %v2930_v33 = vrot.slane %v12264_v26, 2 }
 0x18e   : > { %14887 = vst [vmem:[#allocation17_spill] sm:$0xff] %v12282_v13  ;;  %v12289_v7 = vadd.f32 %v9852_v41, %v9800_v14  ;;  %v861_v21 = vpop.f32.mrf.mxu0  ;;  %10188 = vmatpush3.bf16.msra.mxu0 %v10901_v34  ;;  %v12294_v13 = vld [vmem:[%s11413_s8 + $0x88] sm:$0xff]   ;;  %v2928_v14 = vrot.slane %v12260_v1, 2  ;;  %v3372_v34 = vshll.u32 %v12287_v60, 16  ;;  %v3366_v41 = vor.u32 %v3365_v6, %v3362_v24  ;;  %v12314_v6 = vld [vmem:[%s11413_s8 + $0x90] sm:$0xff]  }
 0x18f   : > { %v1104_v50 = vpop.f32.mrf.mxu1  ;;  %14889 = vst [vmem:[#allocation18_spill] sm:$0xff] %v12294_v13  ;;  %v3358_v47 = vsel %vm3242_vm5, %v3348_v61, %v3357_v10  ;;  %v2932_v61 = vrot.slane %v12287_v60, 2 }
 0x190   : > { %v12296_v12 = vadd.f32 %v1104_v50, %v861_v21  ;;  %v9803_v57 = vpop.f32.mrf.mxu0  ;;  %10102 = vmatmul.mubr.bf16.gmra.mxu0 %v2925_v40  ;;  %v3378_v40 = vshrl.u32 %v12294_v13, 16  ;;  %v3374_v1 = vrot.slane %v3372_v34, 3  ;;  %v2931_v24 = vsel %vm2441_vm3, %v2928_v14, %v2930_v33 }
 0x191   : > { %v9855_v28 = vpop.f32.mrf.mxu1  ;;  %10154 = vmatmul.mubr.bf16.gmra.mxu1 %v3340_v31  ;;  %10105 = vmatprep.mubr.bf16.mxu0 %v2927_v8  ;;  %v3381_v31 = vshll.u32 %v12294_v13, 16 }
 0x192   : > { %14890 = vst [vmem:[#allocation20_spill] sm:$0xff] %v12296_v12  ;;  %v12301_v5 = vadd.f32 %v9855_v28, %v9803_v57  ;;  %v874_v62 = vpop.f32.mrf.mxu0  ;;  %10157 = vmatprep.mubr.bf16.mxu1 %v3349_v53  ;;  %v2929_v28 = vsel %vm2441_vm3, %v2926_v51, %v2928_v14  ;;  %v3371_v57 = vrot.slane %v3369_v27, 2 }
 0x193   : > { %v1117_v22 = vpop.f32.mrf.mxu1 }
 0x194   : > { %14891 = vst [vmem:[#allocation21_spill] sm:$0xff] %v12301_v5  ;;  %v12306_v21 = vadd.f32 %v1117_v22, %v874_v62  ;;  %v9804_v8 = vpop.f32.mrf.mxu0  ;;  %v3367_v5 = vsel %vm3242_vm5, %v3357_v10, %v3366_v41  ;;  %v3380_v62 = vrot.slane %v3378_v40, 2  ;;  %v3383_v22 = vrot.slane %v3381_v31, 3 }
 0x195   : > { %v9856_v50 = vpop.f32.mrf.mxu1  ;;  %v3375_v34 = vor.u32 %v3374_v1, %v3371_v57  ;;  %v2934_v10 = vrot.slane %v12294_v13, 2  ;;  %v3387_v40 = vshrl.u32 %v12314_v6, 16 }
 0x196   : > { %14892 = vst [vmem:[#allocation22_spill] sm:$0xff] %v12306_v21  ;;  %v12309_v53 = vadd.f32 %v9856_v50, %v9804_v8  ;;  %v877_v4 = vpop.f32.mrf.mxu0  ;;  %v12318_v21 = vld [vmem:[%s11413_s8 + $0x98] sm:$0xff]   ;;  %v3384_v50 = vor.u32 %v3383_v22, %v3380_v62  ;;  %v12340_v22 = vld [vmem:[%s11413_s8 + $0xa0] ss:$0 sps:$4 sm:$0x77]  }
 0x197   : > { %v1120_v26 = vpop.f32.mrf.mxu1  ;;  %14893 = vst [vmem:[#allocation23_spill] sm:$0xff] %v12318_v21  ;;  %v2935_v13 = vsel %vm2441_vm3, %v2932_v61, %v2934_v10  ;;  %v3389_v60 = vrot.slane %v3387_v40, 2  ;;  %14898 = vst [vmem:[#allocation28_spill] sm:$0xff] %v12340_v22 }
 0x198   : > { %v12320_v12 = vadd.f32 %v1120_v26, %v877_v4  ;;  %v9807_v51 = vpop.f32.mrf.mxu0  ;;  %10106 = vmatmul.mubr.bf16.gmra.mxu0 %v2929_v28  ;;  %v3390_v26 = vshll.u32 %v12314_v6, 16  ;;  %v3396_v28 = vshrl.u32 %v12318_v21, 16  ;;  %v3399_v4 = vshll.u32 %v12318_v21, 16 }
 0x199   : > { %v9859_v27 = vpop.f32.mrf.mxu1  ;;  %10158 = vmatmul.mubr.bf16.gmra.mxu1 %v3358_v47  ;;  %10109 = vmatprep.mubr.bf16.mxu0 %v2931_v24  ;;  %v2933_v24 = vsel %vm2441_vm3, %v2930_v33, %v2932_v61 }
 0x19a   : > { %14894 = vst [vmem:[#allocation24_spill] sm:$0xff] %v12320_v12  ;;  %v12323_v14 = vadd.f32 %v9859_v27, %v9807_v51  ;;  %v890_v8 = vpop.f32.mrf.mxu0  ;;  %10161 = vmatprep.mubr.bf16.mxu1 %v3367_v5  ;;  %v3376_v5 = vsel %vm3242_vm5, %v3366_v41, %v3375_v34  ;;  %v3392_v62 = vrot.slane %v3390_v26, 3  ;;  %v2938_v26 = vrot.slane %v12318_v21, 2 }
 0x19b   : > { %v1133_v31 = vpop.f32.mrf.mxu1 }
 0x19c   : > { %14895 = vst [vmem:[#allocation25_spill] sm:$0xff] %v12323_v14  ;;  %v12330_v47 = vadd.f32 %v1133_v31, %v890_v8  ;;  %v9808_v1 = vpop.f32.mrf.mxu0  ;;  %v3385_v8 = vsel %vm3242_vm5, %v3375_v34, %v3384_v50  ;;  %v3398_v31 = vrot.slane %v3396_v28, 2  ;;  %v3393_v40 = vor.u32 %v3392_v62, %v3389_v60  ;;  %v10902_v62 = vld [vmem:[%s11413_s8 + $0xa0] ss:$0 sps:$4 sm:$0x33]   ;;  %s11161_s8 = sshll.u32 %s11234_s29, 4  ;;  %s11162_s8 = int_to_ptr.vmem [resolvable:$false] %s11161_s8 }
 0x19d   : > { %v9860_v57 = vpop.f32.mrf.mxu1  ;;  %v3408_v34 = vshll.u32 %v12340_v22, 16  ;;  %s11163_s27 = scalar_lea.vmem %s11162_s8, 9216  ;;  %p11164_p3 = scmp.lt.s32.totalorder %s14757_s12, %s11162_s8 }
 0x19e   : > { %14896 = vst [vmem:[#allocation26_spill] sm:$0xff] %v12330_v47  ;;  %v12334_v51 = vadd.f32 %v9860_v57, %v9808_v1  ;;  %v12336_v27 = vpop.f32.mrf.mxu0  ;;  %v3401_v47 = vrot.slane %v3399_v4, 3  ;;  %v2936_v1 = vrot.slane %v12314_v6, 2  ;;  %v3405_v57 = vshrl.u32 %v12340_v22, 16  ;;  %p11165_p8 = scmp.lt.s32.totalorder %s11163_s27, %s11157_s15 }
 0x19f   : > { %14897 = vst [vmem:[#allocation27_spill] sm:$0xff] %v12336_v27  ;;  %v12342_v14 = vpop.f32.mrf.mxu1  ;;  %v3394_v27 = vsel %vm3242_vm5, %v3384_v50, %v3393_v40  ;;  %v2940_v50 = vrot.slane %v10902_v62, 2 }
 0x1a0   : > { %14899 = vst [vmem:[#allocation29_spill] sm:$0xff] %v12342_v14  ;;  %v9879_v12 = vpop.f32.mrf.mxu0  ;;  %10110 = vmatmul.mubr.bf16.gmra.mxu0 %v2933_v24  ;;  %v2937_v60 = vsel %vm2441_vm3, %v2934_v10, %v2936_v1  ;;  %v2939_v22 = vsel %vm2441_vm3, %v2936_v1, %v2938_v26  ;;  %v3407_v21 = vrot.slane %v3405_v57, 2  ;;  %p11166_p5 = por %p11165_p8, %p11164_p3 }
 0x1a1   : > { %v1452_v33 = vadd.f32 %v9879_v12, %v12037_v16  ;;  %v9931_v41 = vpop.f32.mrf.mxu1  ;;  %10162 = vmatmul.mubr.bf16.gmra.mxu1 %v3376_v5  ;;  %10113 = vmatprep.mubr.bf16.mxu0 %v2935_v13  ;;  %v3402_v12 = vor.u32 %v3401_v47, %v3398_v31 }
 0x1a2   : > { %v1307_v61 = vpop.f32.mrf.mxu0  ;;  %10165 = vmatprep.mubr.bf16.mxu1 %v3385_v8  ;;  %p11167_p2 = pnand %p11166_p5, %p11160_p0 }
 0x1a3   : > { %v1450_v28 = vadd.f32 %v1307_v61, %v12047_v19  ;;  %v12351_v4 = vadd.f32 %v9931_v41, %v1452_v33  ;;  %v1770_v16 = vpop.f32.mrf.mxu1  ;;  %v3410_v19 = vrot.slane %v3408_v34, 3 }
 0x1a4   : > { %v9880_v24 = vpop.f32.mrf.mxu0 }
 0x1a5   : > { %v1453_v13 = vadd.f32 %v9880_v24, %v12052_v39  ;;  %v12354_v5 = vadd.f32 %v1770_v16, %v1450_v28  ;;  %v9932_v14 = vpop.f32.mrf.mxu1  ;;  %v3403_v39 = vsel %vm3242_vm5, %v3393_v40, %v3402_v12  ;;  %v3411_v57 = vor.u32 %v3410_v19, %v3407_v21 }
 0x1a6   : > { %v1310_v8 = vpop.f32.mrf.mxu0 }
 0x1a7   : > { %v12361_v33 = vadd.f32 %v1310_v8, %v12060_v49  ;;  %v12363_v47 = vadd.f32 %v9932_v14, %v1453_v13  ;;  %v12365_v31 = vpop.f32.mrf.mxu1 }
 0x1a8   : > { %v9883_v41 = vpop.f32.mrf.mxu0  ;;  %10114 = vmatmul.mubr.bf16.gmra.mxu0 %v2937_v60 }
 0x1a9   : > { %v1456_v10 = vadd.f32 %v9883_v41, %v12070_v56  ;;  %v9935_v61 = vpop.f32.mrf.mxu1  ;;  %10166 = vmatmul.mubr.bf16.gmra.mxu1 %v3394_v27  ;;  %10117 = vmatprep.mubr.bf16.mxu0 %v2939_v22  ;;  %v2941_v56 = vsel %vm2441_vm3, %v2938_v26, %v2940_v50  ;;  %v3412_v27 = vsel %vm3242_vm5, %v3402_v12, %v3411_v57  ;;  %v3719_v26 = vrot.slane %v12055_v32, 3 }
 0x1aa   : > { %v1323_v1 = vpop.f32.mrf.mxu0  ;;  %10169 = vmatprep.mubr.bf16.mxu1 %v3403_v39 }
 0x1ab   : > { %v1454_v49 = vadd.f32 %v1323_v1, %v12081_v58  ;;  %v12370_v34 = vadd.f32 %v9935_v61, %v1456_v10  ;;  %v1786_v14 = vpop.f32.mrf.mxu1 }
 0x1ac   : > { %v9884_v28 = vpop.f32.mrf.mxu0 }
 0x1ad   : > { %v1457_v16 = vadd.f32 %v9884_v28, %v12091_v44  ;;  %v12373_v40 = vadd.f32 %v1786_v14, %v1454_v49  ;;  %v9936_v24 = vpop.f32.mrf.mxu1  ;;  %v3721_v14 = vrot.slane %v12097_v42, 3 }
 0x1ae   : > { %v1326_v13 = vpop.f32.mrf.mxu0 }
 0x1af   : > { %v12378_v22 = vadd.f32 %v1326_v13, %v12106_v30  ;;  %v12380_v21 = vadd.f32 %v9936_v24, %v1457_v16  ;;  %v12382_v58 = vpop.f32.mrf.mxu1 }
 0x1b0   : > { %v9887_v60 = vpop.f32.mrf.mxu0  ;;  %10118 = vmatmul.mubr.bf16.gmra.mxu0 %v2941_v56 }
 0x1b1   : > { %v1460_v62 = vadd.f32 %v9887_v60, %v12112_v17  ;;  %v9939_v44 = vpop.f32.mrf.mxu1  ;;  %10170 = vmatmul.mubr.bf16.gmra.mxu1 %v3412_v27  ;;  %10189 = vmatprep.mubr.bf16.mxu0 %v11963_v35  ;;  %v14900_v17 = vrot.slane %v11956_v15, 3  ;;  %v3723_v15 = vrot.slane %v12101_v0, 3 }
 0x1b2   : > { %v1339_v8 = vpop.f32.mrf.mxu0 }
 0x1b3   : > { %v1458_v12 = vadd.f32 %v1339_v8, %v12122_v37  ;;  %v12388_v19 = vadd.f32 %v9939_v44, %v1460_v62  ;;  %v1802_v30 = vpop.f32.mrf.mxu1  ;;  %v3720_v1 = vsel %vm3713_vm4, %v14900_v17, %v3719_v26  ;;  %v3724_v62 = vsel %vm3713_vm4, %v3721_v14, %v3723_v15 }
 0x1b4   : > { %v9888_v39 = vpop.f32.mrf.mxu0 }
 0x1b5   : > { %v1461_v41 = vadd.f32 %v9888_v39, %v12130_v23  ;;  %v12391_v10 = vadd.f32 %v1802_v30, %v1458_v12  ;;  %v9940_v61 = vpop.f32.mrf.mxu1  ;;  %v3725_v12 = vrot.slane %v12134_v18, 3 }
 0x1b6   : > { %v1342_v50 = vpop.f32.mrf.mxu0 }
 0x1b7   : > { %v12397_v35 = vadd.f32 %v1342_v50, %v12141_v43  ;;  %v12399_v32 = vadd.f32 %v9940_v61, %v1461_v41  ;;  %v12401_v37 = vpop.f32.mrf.mxu1 }
 0x1b8   : > { %v9891_v57 = vpop.f32.mrf.mxu0  ;;  %10190 = vmatmul.mubr.bf16.vlgmr.msra.gmra.mxu0 %v11969_v11 }
 0x1b9   : > { %v1464_v23 = vadd.f32 %v9891_v57, %v12152_v46  ;;  %v9943_v49 = vpop.f32.mrf.mxu1  ;;  %10193 = vmatprep.mubr.bf16.mxu0 %v3720_v1  ;;  %v3722_v46 = vsel %vm3713_vm4, %v3719_v26, %v3721_v14  ;;  %v3727_v26 = vrot.slane %v12139_v52, 3 }
 0x1ba   : > { %v1355_v28 = vpop.f32.mrf.mxu0 }
 0x1bb   : > { %v1462_v16 = vadd.f32 %v1355_v28, %v12160_v54  ;;  %v12408_v43 = vadd.f32 %v9943_v49, %v1464_v23  ;;  %v1818_v24 = vpop.f32.mrf.mxu1  ;;  %v3728_v23 = vsel %vm3713_vm4, %v3725_v12, %v3727_v26  ;;  %v3729_v28 = vrot.slane %v12170_v59, 3 }
 0x1bc   : > { %v9892_v56 = vpop.f32.mrf.mxu0 }
 0x1bd   : > { %v1465_v13 = vadd.f32 %v9892_v56, %v12175_v25  ;;  %v12411_v27 = vadd.f32 %v1818_v24, %v1462_v16  ;;  %v9944_v11 = vpop.f32.mrf.mxu1 }
 0x1be   : > { %v1358_v60 = vpop.f32.mrf.mxu0 }
 0x1bf   : > { %v12416_v42 = vadd.f32 %v1358_v60, %v12183_v38  ;;  %v12418_v0 = vadd.f32 %v9944_v11, %v1465_v13  ;;  %v12420_v54 = vpop.f32.mrf.mxu1 }
 0x1c0   : > { %v9895_v44 = vpop.f32.mrf.mxu0  ;;  %10194 = vmatmul.mubr.bf16.gmra.mxu0 %v3722_v46 }
 0x1c1   : > { %v1468_v8 = vadd.f32 %v9895_v44, %v12193_v36  ;;  %v9947_v25 = vpop.f32.mrf.mxu1  ;;  %10197 = vmatprep.mubr.bf16.mxu0 %v3724_v62  ;;  %v3726_v36 = vsel %vm3713_vm4, %v3723_v15, %v3725_v12  ;;  %v3731_v15 = vrot.slane %v12181_v48, 3 }
 0x1c2   : > { %v1371_v30 = vpop.f32.mrf.mxu0 }
 0x1c3   : > { %v1466_v39 = vadd.f32 %v1371_v30, %v12201_v55  ;;  %v12426_v41 = vadd.f32 %v9947_v25, %v1468_v8  ;;  %v1834_v38 = vpop.f32.mrf.mxu1  ;;  %v3732_v44 = vsel %vm3713_vm4, %v3729_v28, %v3731_v15  ;;  %v10905_v8 = vld [vmem:[#allocation8 + $0x78] sm:$0xff]   ;;  %v14901_v30 = vld [vmem:[#allocation14_spill] sm:$0xff] }
 0x1c4   : > { %v9896_v61 = vpop.f32.mrf.mxu0  ;;  %10225 = vmatprep.subr.bf16.mxu1 %v10905_v8 }
 0x1c5   : > { %v1469_v50 = vadd.f32 %v9896_v61, %v12215_v29  ;;  %v12429_v17 = vadd.f32 %v1834_v38, %v1466_v39  ;;  %v9948_v1 = vpop.f32.mrf.mxu1  ;;  %v3733_v39 = vrot.slane %v14901_v30, 3  ;;  %v14902_v38 = vld [vmem:[#allocation13_spill] sm:$0xff]  ;;  %10226 = vmatpush3.bf16.msra.mxu1 %v10905_v8  ;;  %v10906_v8 = vld [vmem:[#allocation8 + $0x70] sm:$0xff]  }
 0x1c6   : > { %v1374_v57 = vpop.f32.mrf.mxu0  ;;  %v3735_v61 = vrot.slane %v14902_v38, 3  ;;  %10227 = vmatprep.subr.bf16.mxu1 %v10906_v8 }
 0x1c7   : > { %v12434_v18 = vadd.f32 %v1374_v57, %v12227_v3  ;;  %v12436_v52 = vadd.f32 %v9948_v1, %v1469_v50  ;;  %v12438_v55 = vpop.f32.mrf.mxu1 }
 0x1c8   : > { %v9899_v49 = vpop.f32.mrf.mxu0  ;;  %10198 = vmatmul.mubr.bf16.gmra.mxu0 %v3726_v36 }
 0x1c9   : > { %v1472_v14 = vadd.f32 %v9899_v49, %v12238_v2  ;;  %v9951_v29 = vpop.f32.mrf.mxu1  ;;  %10201 = vmatprep.mubr.bf16.mxu0 %v3728_v23  ;;  %v3730_v2 = vsel %vm3713_vm4, %v3727_v26, %v3729_v28  ;;  %v3736_v28 = vsel %vm3713_vm4, %v3733_v39, %v3735_v61  ;;  %10228 = vmatpush3.bf16.msra.mxu1 %v10906_v8  ;;  %v10907_v8 = vld [vmem:[#allocation8 + $0x68] sm:$0xff]  }
 0x1ca   : > { %v1387_v16 = vpop.f32.mrf.mxu0  ;;  %10229 = vmatprep.subr.bf16.mxu1 %v10907_v8 }
 0x1cb   : > { %v1470_v24 = vadd.f32 %v1387_v16, %v12243_v20  ;;  %v12444_v56 = vadd.f32 %v9951_v29, %v1472_v14  ;;  %v1850_v3 = vpop.f32.mrf.mxu1  ;;  %v3734_v14 = vsel %vm3713_vm4, %v3731_v15, %v3733_v39  ;;  %v14904_v16 = vld [vmem:[#allocation20_spill] sm:$0xff] }
 0x1cc   : > { %v9900_v13 = vpop.f32.mrf.mxu0 }
 0x1cd   : > { %v1473_v11 = vadd.f32 %v9900_v13, %v12254_v9  ;;  %v12447_v46 = vadd.f32 %v1850_v3, %v1470_v24  ;;  %v9952_v60 = vpop.f32.mrf.mxu1  ;;  %10230 = vmatpush3.bf16.msra.mxu1 %v10907_v8 }
 0x1ce   : > { %v1390_v62 = vpop.f32.mrf.mxu0 }
 0x1cf   : > { %v12452_v59 = vadd.f32 %v1390_v62, %v12266_v45  ;;  %v12454_v48 = vadd.f32 %v9952_v60, %v1473_v11  ;;  %v12456_v20 = vpop.f32.mrf.mxu1  ;;  %v14903_v45 = vld [vmem:[#allocation17_spill] sm:$0xff]  ;;  %v14906_v62 = vld [vmem:[#allocation16_spill] sm:$0xff] }
 0x1d0   : > { %v9903_v25 = vpop.f32.mrf.mxu0  ;;  %10202 = vmatmul.mubr.bf16.gmra.mxu0 %v3730_v2  ;;  %v14905_v60 = vld [vmem:[#allocation21_spill] sm:$0xff] }
 0x1d1   : > { %v1476_v9 = vadd.f32 %v9903_v25, %v12275_v63  ;;  %v9955_v12 = vpop.f32.mrf.mxu1  ;;  %10205 = vmatprep.mubr.bf16.mxu0 %v3732_v44  ;;  %v3737_v44 = vrot.slane %v14906_v62, 3  ;;  %v14907_v25 = vld [vmem:[#allocation15_spill] sm:$0xff] }
 0x1d2   : > { %v1403_v26 = vpop.f32.mrf.mxu0 }
 0x1d3   : > { %v1474_v50 = vadd.f32 %v1403_v26, %v14903_v45  ;;  %v12462_v1 = vadd.f32 %v9955_v12, %v1476_v9  ;;  %v1866_v36 = vpop.f32.mrf.mxu1  ;;  %v3739_v9 = vrot.slane %v14907_v25, 3  ;;  %v14908_v12 = vld [vmem:[#allocation22_spill] sm:$0xff] }
 0x1d4   : > { %v9904_v57 = vpop.f32.mrf.mxu0 }
 0x1d5   : > { %v1477_v23 = vadd.f32 %v9904_v57, %v12289_v7  ;;  %v12465_v49 = vadd.f32 %v1866_v36, %v1474_v50  ;;  %v9956_v63 = vpop.f32.mrf.mxu1  ;;  %v3738_v57 = vsel %vm3713_vm4, %v3735_v61, %v3737_v44 }
 0x1d6   : > { %v1406_v29 = vpop.f32.mrf.mxu0 }
 0x1d7   : > { %v12470_v24 = vadd.f32 %v1406_v29, %v14904_v16  ;;  %v12472_v3 = vadd.f32 %v9956_v63, %v1477_v23  ;;  %v12474_v13 = vpop.f32.mrf.mxu1  ;;  %v3740_v63 = vsel %vm3713_vm4, %v3737_v44, %v3739_v9  ;;  %v14913_v44 = vld [vmem:[#allocation26_spill] sm:$0xff] }
 0x1d8   : > { %v9907_v11 = vpop.f32.mrf.mxu0  ;;  %10206 = vmatmul.mubr.bf16.gmra.mxu0 %v3734_v14  ;;  %v14909_v14 = vld [vmem:[#allocation24_spill] sm:$0xff] }
 0x1d9   : > { %v1480_v2 = vadd.f32 %v9907_v11, %v14905_v60  ;;  %v9959_v7 = vpop.f32.mrf.mxu1  ;;  %10209 = vmatprep.mubr.bf16.mxu0 %v3736_v28  ;;  %v14910_v60 = vld [vmem:[#allocation25_spill] sm:$0xff] }
 0x1da   : > { %v1419_v15 = vpop.f32.mrf.mxu0 }
 0x1db   : > { %v1478_v30 = vadd.f32 %v1419_v15, %v14908_v12  ;;  %v12480_v39 = vadd.f32 %v9959_v7, %v1480_v2  ;;  %v1882_v26 = vpop.f32.mrf.mxu1  ;;  %v14911_v7 = vld [vmem:[#allocation19_spill] sm:$0xff]  ;;  %v14912_v15 = vld [vmem:[#allocation18_spill] sm:$0xff] }
 0x1dc   : > { %v9908_v38 = vpop.f32.mrf.mxu0  ;;  %v3741_v62 = vrot.slane %v14911_v7, 3  ;;  %v3743_v25 = vrot.slane %v14912_v15, 3 }
 0x1dd   : > { %v1481_v45 = vadd.f32 %v9908_v38, %v12309_v53  ;;  %v12483_v50 = vadd.f32 %v1882_v26, %v1478_v30  ;;  %v9960_v36 = vpop.f32.mrf.mxu1 }
 0x1de   : > { %v1422_v23 = vpop.f32.mrf.mxu0 }
 0x1df   : > { %v12488_v29 = vadd.f32 %v1422_v23, %v14909_v14  ;;  %v12490_v28 = vadd.f32 %v9960_v36, %v1481_v45  ;;  %v12492_v16 = vpop.f32.mrf.mxu1  ;;  %v3742_v23 = vsel %vm3713_vm4, %v3739_v9, %v3741_v62  ;;  %v3744_v14 = vsel %vm3713_vm4, %v3741_v62, %v3743_v25 }
 0x1e0   : > { %v9911_v11 = vpop.f32.mrf.mxu0  ;;  %10210 = vmatmul.mubr.bf16.gmra.mxu0 %v3738_v57 }
 0x1e1   : > { %v1484_v2 = vadd.f32 %v9911_v11, %v14910_v60  ;;  %v9963_v53 = vpop.f32.mrf.mxu1  ;;  %10213 = vmatprep.mubr.bf16.mxu0 %v3740_v63 }
 0x1e2   : > { %v1435_v61 = vpop.f32.mrf.mxu0 }
 0x1e3   : > { %v1482_v12 = vadd.f32 %v1435_v61, %v14913_v44  ;;  %v12498_v30 = vadd.f32 %v9963_v53, %v1484_v2  ;;  %v1898_v26 = vpop.f32.mrf.mxu1  ;;  %v14914_v61 = vld [vmem:[#allocation23_spill] sm:$0xff] }
 0x1e4   : > { %v9912_v38 = vpop.f32.mrf.mxu0  ;;  %v3747_v15 = vrot.slane %v14914_v61, 3 }
 0x1e5   : > { %v1485_v45 = vadd.f32 %v9912_v38, %v12334_v51  ;;  %v12501_v36 = vadd.f32 %v1898_v26, %v1482_v12  ;;  %v9964_v57 = vpop.f32.mrf.mxu1  ;;  %v3745_v51 = vrot.slane %v12314_v6, 3  ;;  %v10908_v12 = vld [vmem:[#allocation8 + $0x60] sm:$0xff]  }
 0x1e6   : > { %v12504_v63 = vpop.f32.mrf.mxu0  ;;  %10231 = vmatprep.subr.bf16.mxu1 %v10908_v12 }
 0x1e7   : > { %v12507_v11 = vadd.f32 %v9964_v57, %v1485_v45  ;;  %v12509_v60 = vpop.f32.mrf.mxu1  ;;  %v3748_v6 = vsel %vm3713_vm4, %v3745_v51, %v3747_v15  ;;  %10232 = vmatpush3.bf16.msra.mxu1 %v10908_v12 }
 0x1e8   : > { %v9983_v2 = vpop.f32.mrf.mxu0  ;;  %10214 = vmatmul.mubr.bf16.gmra.mxu0 %v3742_v23 }
 0x1e9   : > { %v2386_v53 = vadd.f32 %v9983_v2, %v12351_v4  ;;  %v10035_v7 = vpop.f32.mrf.mxu1  ;;  %10217 = vmatprep.mubr.bf16.mxu0 %v3744_v14  ;;  %v3746_v4 = vsel %vm3713_vm4, %v3743_v25, %v3745_v51  ;;  %v10909_v51 = vld [vmem:[#allocation8 + $0x58] sm:$0xff]  }
 0x1ea   : > { %v2241_v8 = vpop.f32.mrf.mxu0  ;;  %10233 = vmatprep.subr.bf16.mxu1 %v10909_v51 }
 0x1eb   : > { %v2384_v9 = vadd.f32 %v2241_v8, %v12354_v5  ;;  %v12515_v44 = vadd.f32 %v10035_v7, %v2386_v53  ;;  %v2579_v62 = vpop.f32.mrf.mxu1  ;;  %v14916_v7 = vld [vmem:[#allocation28_spill] sm:$0xff]  ;;  %10234 = vmatpush3.bf16.msra.mxu1 %v10909_v51 }
 0x1ec   : > { %v9984_v26 = vpop.f32.mrf.mxu0  ;;  %v3749_v8 = vrot.slane %v14916_v7, 3  ;;  %v10910_v7 = vld [vmem:[#allocation8 + $0x38] sm:$0xff]  }
 0x1ed   : > { %v2387_v38 = vadd.f32 %v9984_v26, %v12363_v47  ;;  %v12518_v45 = vadd.f32 %v2579_v62, %v2384_v9  ;;  %v10036_v57 = vpop.f32.mrf.mxu1  ;;  %10277 = vmatprep.subr.bf16.mxu0 %v10910_v7 }
 0x1ee   : > { %v12521_v23 = vpop.f32.mrf.mxu0  ;;  %10278 = vmatpush3.bf16.msra.mxu0 %v10910_v7 }
 0x1ef   : > { %v12524_v14 = vadd.f32 %v10036_v57, %v2387_v38  ;;  %v12526_v5 = vpop.f32.mrf.mxu1 }
 0x1f0   : > { %14915 = vst [vmem:[#allocation14_spill] sm:$0xff] %v12526_v5  ;;  %v9987_v2 = vpop.f32.mrf.mxu0  ;;  %10218 = vmatmul.mubr.bf16.gmra.mxu0 %v3746_v4  ;;  %v3750_v4 = vsel %vm3713_vm4, %v3747_v15, %v3749_v8 }
 0x1f1   : > { %v2390_v53 = vadd.f32 %v9987_v2, %v12370_v34  ;;  %v10039_v47 = vpop.f32.mrf.mxu1  ;;  %10221 = vmatprep.mubr.bf16.mxu0 %v3748_v6 }
 0x1f2   : > { %v2257_v61 = vpop.f32.mrf.mxu0 }
 0x1f3   : > { %v2388_v25 = vadd.f32 %v2257_v61, %v12373_v40  ;;  %v12531_v9 = vadd.f32 %v10039_v47, %v2390_v53  ;;  %v2595_v62 = vpop.f32.mrf.mxu1 }
 0x1f4   : > { %v9988_v12 = vpop.f32.mrf.mxu0 }
 0x1f5   : > { %v2391_v26 = vadd.f32 %v9988_v12, %v12380_v21  ;;  %v12534_v38 = vadd.f32 %v2595_v62, %v2388_v25  ;;  %v10040_v57 = vpop.f32.mrf.mxu1 }
 0x1f6   : > { %v12537_v34 = vpop.f32.mrf.mxu0 }
 0x1f7   : > { %v12539_v6 = vadd.f32 %v10040_v57, %v2391_v26  ;;  %v12541_v2 = vpop.f32.mrf.mxu1  ;;  %v10912_v26 = vld [vmem:[#allocation8 + $0x30] sm:$0xff]  }
 0x1f8   : > { %14917 = vst [vmem:[#allocation13_spill] sm:$0xff] %v12541_v2  ;;  %v9991_v40 = vpop.f32.mrf.mxu0  ;;  %10222 = vmatmul.mubr.bf16.gmra.mxu0 %v3750_v4  ;;  %10279 = vmatprep.subr.bf16.mxu0 %v10912_v26  ;;  %v10911_v2 = vld [vmem:[#allocation8 + $0x50] sm:$0xff]  }
 0x1f9   : > { %v2394_v53 = vadd.f32 %v9991_v40, %v12388_v19  ;;  %v10043_v47 = vpop.f32.mrf.mxu1  ;;  %10280 = vmatpush3.bf16.msra.mxu0 %v10912_v26  ;;  %10235 = vmatprep.subr.bf16.mxu1 %v10911_v2 }
 0x1fa   : > { %v2273_v21 = vpop.f32.mrf.mxu0  ;;  %10236 = vmatpush3.bf16.msra.mxu1 %v10911_v2 }
 0x1fb   : > { %v2392_v61 = vadd.f32 %v2273_v21, %v12391_v10  ;;  %v12545_v25 = vadd.f32 %v10043_v47, %v2394_v53  ;;  %v2611_v15 = vpop.f32.mrf.mxu1  ;;  %v10913_v47 = vld [vmem:[#allocation8 + $0x28] sm:$0xff]  }
 0x1fc   : > { %v9992_v8 = vpop.f32.mrf.mxu0  ;;  %10281 = vmatprep.subr.bf16.mxu0 %v10913_v47 }
 0x1fd   : > { %v2395_v62 = vadd.f32 %v9992_v8, %v12399_v32  ;;  %v12548_v51 = vadd.f32 %v2611_v15, %v2392_v61  ;;  %v10044_v12 = vpop.f32.mrf.mxu1  ;;  %10282 = vmatpush3.bf16.msra.mxu0 %v10913_v47  ;;  %v10916_v47 = vld [vmem:[#allocation8 + $0x18] sm:$0xff]  }
 0x1fe   : > { %v12550_v57 = vpop.f32.mrf.mxu0 }
 0x1ff   : > { %v12552_v19 = vadd.f32 %v10044_v12, %v2395_v62  ;;  %v12554_v4 = vpop.f32.mrf.mxu1 }
 0x200   : > { %14918 = vst [vmem:[#allocation17_spill] sm:$0xff] %v12554_v4  ;;  %v9995_v10 = vpop.f32.mrf.mxu0  ;;  %v10915_v4 = vld [vmem:[#allocation8 + $0x20] sm:$0xff]  }
 0x201   : > { %v2398_v40 = vadd.f32 %v9995_v10, %v12408_v43  ;;  %v10047_v53 = vpop.f32.mrf.mxu1  ;;  %10283 = vmatprep.subr.bf16.mxu0 %v10915_v4 }
 0x202   : > { %v2289_v7 = vpop.f32.mrf.mxu0  ;;  %10284 = vmatpush3.bf16.msra.mxu0 %v10915_v4 }
 0x203   : > { %v2396_v32 = vadd.f32 %v2289_v7, %v12411_v27  ;;  %v12558_v21 = vadd.f32 %v10047_v53, %v2398_v40  ;;  %v2627_v61 = vpop.f32.mrf.mxu1  ;;  %10285 = vmatprep.subr.bf16.mxu0 %v10916_v47 }
 0x204   : > { %v9996_v15 = vpop.f32.mrf.mxu0 }
 0x205   : > { %v2399_v8 = vadd.f32 %v9996_v15, %v12418_v0  ;;  %v12561_v62 = vadd.f32 %v2627_v61, %v2396_v32  ;;  %v10048_v12 = vpop.f32.mrf.mxu1 }
 0x206   : > { %v12563_v26 = vpop.f32.mrf.mxu0  ;;  %10286 = vmatpush3.bf16.msra.mxu0 %v10916_v47  ;;  %v10919_v47 = vld [vmem:[#allocation8 + $0x8] sm:$0xff]  }
 0x207   : > { %v12565_v43 = vadd.f32 %v10048_v12, %v2399_v8  ;;  %v12567_v10 = vpop.f32.mrf.mxu1 }
 0x208   : > { %14919 = vst [vmem:[#allocation20_spill] sm:$0xff] %v12567_v10  ;;  %v9999_v27 = vpop.f32.mrf.mxu0  ;;  %v10914_v10 = vld [vmem:[#allocation8 + $0x48] sm:$0xff]  }
 0x209   : > { %v2402_v40 = vadd.f32 %v9999_v27, %v12426_v41  ;;  %v10051_v53 = vpop.f32.mrf.mxu1  ;;  %v10918_v41 = vld [vmem:[#allocation8 + $0x10] sm:$0xff]   ;;  %10237 = vmatprep.subr.bf16.mxu1 %v10914_v10 }
 0x20a   : > { %v2305_v0 = vpop.f32.mrf.mxu0  ;;  %10287 = vmatprep.subr.bf16.mxu0 %v10918_v41  ;;  %10238 = vmatpush3.bf16.msra.mxu1 %v10914_v10 }
 0x20b   : > { %v2400_v7 = vadd.f32 %v2305_v0, %v12429_v17  ;;  %v12571_v32 = vadd.f32 %v10051_v53, %v2402_v40  ;;  %v2643_v61 = vpop.f32.mrf.mxu1  ;;  %10288 = vmatpush3.bf16.msra.mxu0 %v10918_v41 }
 0x20c   : > { %v10000_v15 = vpop.f32.mrf.mxu0  ;;  %10289 = vmatprep.subr.bf16.mxu0 %v10919_v47 }
 0x20d   : > { %v2403_v8 = vadd.f32 %v10000_v15, %v12436_v52  ;;  %v12574_v12 = vadd.f32 %v2643_v61, %v2400_v7  ;;  %v10052_v4 = vpop.f32.mrf.mxu1  ;;  %v10917_v52 = vld [vmem:[#allocation8 + $0x40] sm:$0xff]  }
 0x20e   : > { %v12576_v27 = vpop.f32.mrf.mxu0  ;;  %10239 = vmatprep.subr.bf16.mxu1 %v10917_v52 }
 0x20f   : > { %14920 = vst [vmem:[#allocation21_spill] sm:$0xff] %v12576_v27  ;;  %v12578_v5 = vadd.f32 %v10052_v4, %v2403_v8  ;;  %v12580_v2 = vpop.f32.mrf.mxu1  ;;  %10240 = vmatpush3.bf16.msra.mxu1 %v10917_v52  ;;  %10290 = vmatpush3.bf16.msra.mxu0 %v10919_v47 }
 0x210   : > { %14921 = vst [vmem:[#allocation16_spill] sm:$0xff] %v12580_v2  ;;  %v10003_v17 = vpop.f32.mrf.mxu0 }
 0x211   : > { %v2406_v40 = vadd.f32 %v10003_v17, %v12444_v56  ;;  %v10055_v53 = vpop.f32.mrf.mxu1  ;;  %v10923_v17 = vld [vmem:[#allocation8] sm:$0xff]  }
 0x212   : > { %v2321_v0 = vpop.f32.mrf.mxu0  ;;  %10291 = vmatprep.subr.bf16.mxu0 %v10923_v17 }
 0x213   : > { %v2404_v7 = vadd.f32 %v2321_v0, %v12447_v46  ;;  %v12584_v61 = vadd.f32 %v10055_v53, %v2406_v40  ;;  %v2659_v15 = vpop.f32.mrf.mxu1  ;;  %10292 = vmatpush3.bf16.msra.mxu0 %v10923_v17 }
 0x214   : > { %v10004_v8 = vpop.f32.mrf.mxu0 }
 0x215   : > { %v2407_v4 = vadd.f32 %v10004_v8, %v12454_v48  ;;  %v12587_v10 = vadd.f32 %v2659_v15, %v2404_v7  ;;  %v10056_v41 = vpop.f32.mrf.mxu1 }
 0x216   : > { %v12589_v56 = vpop.f32.mrf.mxu0 }
 0x217   : > { %14922 = vst [vmem:[#allocation15_spill] sm:$0xff] %v12589_v56  ;;  %v12591_v2 = vadd.f32 %v10056_v41, %v2407_v4  ;;  %v12593_v27 = vpop.f32.mrf.mxu1 }
 0x218   : > { %14923 = vst [vmem:[#allocation22_spill] sm:$0xff] %v12593_v27  ;;  %v10007_v46 = vpop.f32.mrf.mxu0 }
 0x219   : > { %v2410_v40 = vadd.f32 %v10007_v46, %v12462_v1  ;;  %v10059_v53 = vpop.f32.mrf.mxu1 }
 0x21a   : > { %v2337_v52 = vpop.f32.mrf.mxu0 }
 0x21b   : > { %v2408_v47 = vadd.f32 %v2337_v52, %v12465_v49  ;;  %v12597_v48 = vadd.f32 %v10059_v53, %v2410_v40  ;;  %v2675_v0 = vpop.f32.mrf.mxu1  ;;  %v12609_v49 = vld [vmem:[#allocation8 + $0xb8] sm:$0xff]  }
 0x21c   : > { %v10008_v7 = vpop.f32.mrf.mxu0  ;;  %14926 = vst [vmem:[#allocation19_spill] sm:$0xff] %v12609_v49  ;;  %10329 = vmatprep.subr.bf16.mxu1 %v12609_v49 }
 0x21d   : > { %v2411_v15 = vadd.f32 %v10008_v7, %v12472_v3  ;;  %v12600_v8 = vadd.f32 %v2675_v0, %v2408_v47  ;;  %v10060_v4 = vpop.f32.mrf.mxu1 }
 0x21e   : > { %v12602_v41 = vpop.f32.mrf.mxu0 }
 0x21f   : > { %14924 = vst [vmem:[#allocation24_spill] sm:$0xff] %v12602_v41  ;;  %v12604_v27 = vadd.f32 %v10060_v4, %v2411_v15  ;;  %v12606_v56 = vpop.f32.mrf.mxu1 }
 0x220   : > { %14925 = vst [vmem:[#allocation25_spill] sm:$0xff] %v12606_v56  ;;  %v10011_v1 = vpop.f32.mrf.mxu0 }
 0x221   : > { %v2414_v17 = vadd.f32 %v10011_v1, %v12480_v39  ;;  %v10063_v46 = vpop.f32.mrf.mxu1 }
 0x222   : > { %v2353_v40 = vpop.f32.mrf.mxu0 }
 0x223   : > { %v2412_v53 = vadd.f32 %v2353_v40, %v12483_v50  ;;  %v12612_v52 = vadd.f32 %v10063_v46, %v2414_v17  ;;  %v2691_v3 = vpop.f32.mrf.mxu1 }
 0x224   : > { %v10012_v47 = vpop.f32.mrf.mxu0 }
 0x225   : > { %v2415_v0 = vadd.f32 %v10012_v47, %v12490_v28  ;;  %v12616_v7 = vadd.f32 %v2691_v3, %v2412_v53  ;;  %v10064_v15 = vpop.f32.mrf.mxu1 }
 0x226   : > { %v12618_v4 = vpop.f32.mrf.mxu0 }
 0x227   : > { %v12620_v39 = vadd.f32 %v10064_v15, %v2415_v0  ;;  %v12622_v1 = vpop.f32.mrf.mxu1 }
 0x228   : > { %14927 = vst [vmem:[#allocation18_spill] sm:$0xff] %v12622_v1  ;;  %v10015_v56 = vpop.f32.mrf.mxu0 }
 0x229   : > { %v2418_v50 = vadd.f32 %v10015_v56, %v12498_v30  ;;  %v10067_v17 = vpop.f32.mrf.mxu1 }
 0x22a   : > { %v2369_v46 = vpop.f32.mrf.mxu0 }
 0x22b   : > { %v2416_v40 = vadd.f32 %v2369_v46, %v12501_v36  ;;  %v12626_v49 = vadd.f32 %v10067_v17, %v2418_v50  ;;  %v2707_v41 = vpop.f32.mrf.mxu1 }
 0x22c   : > { %v10016_v28 = vpop.f32.mrf.mxu0 }
 0x22d   : > { %v2419_v53 = vadd.f32 %v10016_v28, %v12507_v11  ;;  %v12629_v3 = vadd.f32 %v2707_v41, %v2416_v40  ;;  %v10068_v47 = vpop.f32.mrf.mxu1 }
 0x22e   : > { %v12631_v0 = vpop.f32.mrf.mxu0 }
 0x22f   : > { %v12633_v15 = vadd.f32 %v10068_v47, %v2419_v53  ;;  %v12635_v1 = vpop.f32.mrf.mxu1 }
 0x230   : > { %14928 = vst [vmem:[#allocation26_spill] sm:$0xff] %v12635_v1  ;;  %v10087_v30 = vpop.f32.mrf.mxu0 }
 0x231   : > { %v12638_v56 = vadd.f32 %v10087_v30, %v12515_v44  ;;  %v12640_v36 = vpop.f32.mrf.mxu1 }
 0x232   : > { %v3042_v50 = vpop.f32.mrf.mxu0 }
 0x233   : > { %v12643_v17 = vadd.f32 %v3042_v50, %v12518_v45  ;;  %v12645_v11 = vpop.f32.mrf.mxu1 }
 0x234   : > { %v10088_v41 = vpop.f32.mrf.mxu0 }
 0x235   : > { %v12648_v46 = vadd.f32 %v10088_v41, %v12524_v14  ;;  %v12650_v40 = vpop.f32.mrf.mxu1 }
 0x236   : > { %14930 = vst [vmem:[#allocation28_spill] sm:$0xff] %v12650_v40  ;;  %v12652_v28 = vpop.f32.mrf.mxu0 }
 0x237   : > { %14929 = vst [vmem:[#allocation23_spill] sm:$0xff] %v12648_v46  ;;  %v12654_v53 = vpop.f32.mrf.mxu1 }
 0x238   : > { %14931 = vst [vmem:[#allocation30_spill] sm:$0xff] %v12654_v53  ;;  %v10091_v44 = vpop.f32.mrf.mxu0 }
 0x239   : > { %v12657_v47 = vadd.f32 %v10091_v44, %v12531_v9  ;;  %v12659_v30 = vpop.f32.mrf.mxu1 }
 0x23a   : > { %14932 = vst [vmem:[#allocation31_spill] sm:$0xff] %v12659_v30  ;;  %v3058_v45 = vpop.f32.mrf.mxu0 }
 0x23b   : > { %v12662_v50 = vadd.f32 %v3058_v45, %v12534_v38  ;;  %v12664_v1 = vpop.f32.mrf.mxu1 }
 0x23c   : > { %14933 = vst [vmem:[#allocation32_spill] sm:$0xff] %v12664_v1  ;;  %v10092_v14 = vpop.f32.mrf.mxu0 }
 0x23d   : > { %v12667_v41 = vadd.f32 %v10092_v14, %v12539_v6  ;;  %v12669_v40 = vpop.f32.mrf.mxu1 }
 0x23e   : > { %14935 = vst [vmem:[#allocation34_spill] sm:$0xff] %v12669_v40  ;;  %v12671_v46 = vpop.f32.mrf.mxu0 }
 0x23f   : > { %14934 = vst [vmem:[#allocation33_spill] sm:$0xff] %v12667_v41  ;;  %v12673_v53 = vpop.f32.mrf.mxu1 }
 0x240   : > { %14936 = vst [vmem:[#allocation35_spill] sm:$0xff] %v12673_v53  ;;  %v10095_v9 = vpop.f32.mrf.mxu0 }
 0x241   : > { %v12676_v44 = vadd.f32 %v10095_v9, %v12545_v25  ;;  %v12678_v30 = vpop.f32.mrf.mxu1 }
 0x242   : > { %14937 = vst [vmem:[#allocation36_spill] sm:$0xff] %v12678_v30  ;;  %v3074_v38 = vpop.f32.mrf.mxu0 }
 0x243   : > { %v12681_v45 = vadd.f32 %v3074_v38, %v12548_v51  ;;  %v12683_v1 = vpop.f32.mrf.mxu1  ;;  %v12699_v38 = vld [vmem:[#allocation8 + $0xf8] sm:$0xff]  }
 0x244   : > { %14938 = vst [vmem:[#allocation37_spill] sm:$0xff] %v12683_v1  ;;  %v10096_v6 = vpop.f32.mrf.mxu0  ;;  %14943 = vst [vmem:[#allocation42_spill] sm:$0xff] %v12699_v38  ;;  %10381 = vmatprep.subr.bf16.mxu0 %v12699_v38 }
 0x245   : > { %v12686_v14 = vadd.f32 %v10096_v6, %v12552_v19  ;;  %v12688_v40 = vpop.f32.mrf.mxu1 }
 0x246   : > { %14939 = vst [vmem:[#allocation38_spill] sm:$0xff] %v12688_v40  ;;  %v12690_v41 = vpop.f32.mrf.mxu0 }
 0x247   : > { %v12692_v53 = vpop.f32.mrf.mxu1 }
 0x248   : > { %14940 = vst [vmem:[#allocation39_spill] sm:$0xff] %v12692_v53  ;;  %v10099_v25 = vpop.f32.mrf.mxu0 }
 0x249   : > { %v12695_v9 = vadd.f32 %v10099_v25, %v12558_v21  ;;  %v12697_v30 = vpop.f32.mrf.mxu1 }
 0x24a   : > { %14942 = vst [vmem:[#allocation41_spill] sm:$0xff] %v12697_v30  ;;  %v3090_v51 = vpop.f32.mrf.mxu0 }
 0x24b   : > { %14941 = vst [vmem:[#allocation40_spill] sm:$0xff] %v12695_v9  ;;  %v12702_v1 = vadd.f32 %v3090_v51, %v12561_v62  ;;  %v12704_v19 = vpop.f32.mrf.mxu1 }
 0x24c   : > { %14944 = vst [vmem:[#allocation43_spill] sm:$0xff] %v12704_v19  ;;  %v10100_v6 = vpop.f32.mrf.mxu0 }
 0x24d   : > { %v12708_v40 = vadd.f32 %v10100_v6, %v12565_v43  ;;  %v12710_v53 = vpop.f32.mrf.mxu1 }
 0x24e   : > { %14946 = vst [vmem:[#allocation45_spill] sm:$0xff] %v12710_v53  ;;  %v12712_v21 = vpop.f32.mrf.mxu0 }
 0x24f   : > { %14945 = vst [vmem:[#allocation44_spill] sm:$0xff] %v12708_v40  ;;  %v12714_v25 = vpop.f32.mrf.mxu1 }
 0x250   : > { %14947 = vst [vmem:[#allocation46_spill] sm:$0xff] %v12714_v25  ;;  %v10103_v30 = vpop.f32.mrf.mxu0 }
 0x251   : > { %v12717_v9 = vadd.f32 %v10103_v30, %v12571_v32  ;;  %v12719_v62 = vpop.f32.mrf.mxu1  ;;  %v12735_v32 = vpop.permute.xlu0 %4147 }
 0x252   : > { %14948 = vst [vmem:[#allocation47_spill] sm:$0xff] %v12719_v62  ;;  %v3106_v51 = vpop.f32.mrf.mxu0  ;;  %14953 = vst [vmem:[#allocation52_spill] sm:$0xff] %v12735_v32 }
 0x253   : > { %v12722_v19 = vadd.f32 %v3106_v51, %v12574_v12  ;;  %v12724_v38 = vpop.f32.mrf.mxu1 }
 0x254   : > { %14949 = vst [vmem:[#allocation48_spill] sm:$0xff] %v12724_v38  ;;  %v10104_v43 = vpop.f32.mrf.mxu0 }
 0x255   : > { %v12727_v6 = vadd.f32 %v10104_v43, %v12578_v5  ;;  %v12729_v53 = vpop.f32.mrf.mxu1  ;;  %v12747_v43 = vpop.permute.xlu1 %4157 }
 0x256   : > { %14951 = vst [vmem:[#allocation50_spill] sm:$0xff] %v12729_v53  ;;  %v12731_v40 = vpop.f32.mrf.mxu0  ;;  %v12754_v32 = vpop.permute.xlu0 %4152 }
 0x257   : > { %14950 = vst [vmem:[#allocation49_spill] sm:$0xff] %v12727_v6  ;;  %v12733_v25 = vpop.f32.mrf.mxu1  ;;  %14960 = vst [vmem:[#allocation59_spill] sm:$0xff] %v12754_v32 }
 0x258   : > { %14952 = vst [vmem:[#allocation51_spill] sm:$0xff] %v12733_v25  ;;  %v10107_v30 = vpop.f32.mrf.mxu0 }
 0x259   : > { %v12738_v62 = vadd.f32 %v10107_v30, %v12584_v61  ;;  %v12740_v12 = vpop.f32.mrf.mxu1 }
 0x25a   : > { %14955 = vst [vmem:[#allocation54_spill] sm:$0xff] %v12740_v12  ;;  %v3122_v51 = vpop.f32.mrf.mxu0 }
 0x25b   : > { %14954 = vst [vmem:[#allocation53_spill] sm:$0xff] %v12738_v62  ;;  %v12743_v38 = vadd.f32 %v3122_v51, %v12587_v10  ;;  %v12745_v5 = vpop.f32.mrf.mxu1 }
 0x25c   : > { %14957 = vst [vmem:[#allocation56_spill] sm:$0xff] %v12745_v5  ;;  %v10108_v53 = vpop.f32.mrf.mxu0  ;;  %v12765_v5 = vpop.permute.xlu1 %4162 }
 0x25d   : > { %14956 = vst [vmem:[#allocation55_spill] sm:$0xff] %v12743_v38  ;;  %v12750_v6 = vadd.f32 %v10108_v53, %v12591_v2  ;;  %v12752_v25 = vpop.f32.mrf.mxu1  ;;  %v12770_v53 = vpop.permute.xlu0 %4167 }
 0x25e   : > { %14959 = vst [vmem:[#allocation58_spill] sm:$0xff] %v12752_v25  ;;  %v12756_v61 = vpop.f32.mrf.mxu0  ;;  %14965 = vst [vmem:[#allocation64_spill] sm:$0xff] %v12770_v53  ;;  %v4542_v53 = vld [vmem:[#allocation2 + $0x8] sm:$0xf] }
 0x25f   : > { %14958 = vst [vmem:[#allocation57_spill] sm:$0xff] %v12750_v6  ;;  %v12758_v30 = vpop.f32.mrf.mxu1 }
 0x260   : > { %14961 = vst [vmem:[#allocation60_spill] sm:$0xff] %v12758_v30  ;;  %v10111_v12 = vpop.f32.mrf.mxu0 }
 0x261   : > { %v12761_v10 = vadd.f32 %v10111_v12, %v12597_v48  ;;  %v12763_v51 = vpop.f32.mrf.mxu1  ;;  %v12779_v48 = vpop.permute.xlu1 %4172 }
 0x262   : > { %14963 = vst [vmem:[#allocation62_spill] sm:$0xff] %v12763_v51  ;;  %v3138_v38 = vpop.f32.mrf.mxu0  ;;  %14969 = vst [vmem:[#allocation68_spill] sm:$0xff] %v12779_v48 }
 0x263   : > { %14962 = vst [vmem:[#allocation61_spill] sm:$0xff] %v12761_v10  ;;  %v12768_v2 = vadd.f32 %v3138_v38, %v12600_v8  ;;  %v12775_v62 = vpop.f32.mrf.mxu1  ;;  %v12786_v8 = vpop.permute.xlu0 %4177 }
 0x264   : > { %v10112_v25 = vpop.f32.mrf.mxu0  ;;  %14967 = vst [vmem:[#allocation66_spill] sm:$0xff] %v12775_v62  ;;  %14972 = vst [vmem:[#allocation71_spill] sm:$0xff] %v12786_v8 }
 0x265   : > { %14964 = vst [vmem:[#allocation63_spill] sm:$0xff] %v12768_v2  ;;  %v12773_v6 = vadd.f32 %v10112_v25, %v12604_v27  ;;  %v12781_v51 = vpop.f32.mrf.mxu1  ;;  %v4541_v2 = vld [vmem:[#allocation2 + $0x4] sm:$0xc] }
 0x266   : > { %v12777_v30 = vpop.f32.mrf.mxu0  ;;  %14970 = vst [vmem:[#allocation69_spill] sm:$0xff] %v12781_v51  ;;  %v8996_v48 = vcombine.low %v4541_v2, %v4542_v53  ;;  %v14975_v51 = vld [vmem:[#allocation29_spill] sm:$0xff] }
 0x267   : > { %14966 = vst [vmem:[#allocation65_spill] sm:$0xff] %v12773_v6  ;;  %14968 = vst [vmem:[#allocation67_spill] sm:$0xff] %v12777_v30  ;;  %v12791_v6 = vpop.f32.mrf.mxu1  ;;  %v14974_v30 = vld [vmem:[#allocation27_spill] sm:$0xff] }
 0x268   : > { %v10115_v12 = vpop.f32.mrf.mxu0  ;;  %v1137_v32 = vadd.f32 %v14975_v51, %v14974_v30 }
 0x269   : > { %v12784_v10 = vadd.f32 %v10115_v12, %v12612_v52  ;;  %v1914_v52 = vadd.f32 %v12365_v31, %v12361_v33  ;;  %v12800_v12 = vpop.permute.xlu1 %4182  ;;  %v1926_v33 = vadd.f32 %v12420_v54, %v12416_v42  ;;  %v12814_v31 = vpop.f32.mrf.mxu1  ;;  %v1938_v42 = vadd.f32 %v12474_v13, %v12470_v24  ;;  %v14978_v24 = vld [vmem:[#allocation15_spill] sm:$0xff] }
 0x26a   : > { %v3154_v38 = vpop.f32.mrf.mxu0 }
 0x26b   : > { %14971 = vst [vmem:[#allocation70_spill] sm:$0xff] %v12784_v10  ;;  %v12789_v27 = vadd.f32 %v3154_v38, %v12616_v7  ;;  %v4594_v10 = vld [vmem:[#allocation2 + $0x4] sm:$0x8]  ;;  %v1918_v7 = vadd.f32 %v12382_v58, %v12378_v22  ;;  %v1922_v38 = vadd.f32 %v12401_v37, %v12397_v35  ;;  %v2385_v2 = vadd.f32 %v12521_v23, %v1914_v52 }
 0x26c   : > { %v10116_v25 = vpop.f32.mrf.mxu0  ;;  %v4992_v22 = vshll.u32 %v8996_v48, 16  ;;  %v1930_v58 = vadd.f32 %v12438_v55, %v12434_v18  ;;  %v1934_v35 = vadd.f32 %v12456_v20, %v12452_v59  ;;  %v12824_v23 = vcombine.low %v4594_v10, %v4542_v53  ;;  %v14976_v59 = vld [vmem:[#allocation14_spill] sm:$0xff] }
 0x26d   : > { %v12794_v62 = vadd.f32 %v10116_v25, %v12620_v39  ;;  %v1483_v39 = vadd.f32 %v12504_v63, %v1137_v32  ;;  %v12810_v25 = vpop.permute.xlu0 %4187  ;;  %v2389_v37 = vadd.f32 %v12537_v34, %v1918_v7  ;;  %v2393_v54 = vadd.f32 %v12550_v57, %v1922_v38  ;;  %v14977_v34 = vld [vmem:[#allocation21_spill] sm:$0xff]  ;;  %v12838_v53 = vpop.permute.xlu1 %4192 }
 0x26e   : > { %v12802_v8 = vpop.f32.mrf.mxu0  ;;  %v1942_v18 = vadd.f32 %v12492_v16, %v12488_v29  ;;  %v2723_v20 = vadd.f32 %v14976_v59, %v2385_v2  ;;  %v2401_v10 = vadd.f32 %v14977_v34, %v1930_v58  ;;  %v2405_v13 = vadd.f32 %v14978_v24, %v1934_v35  ;;  %v12841_v57 = vpop.f32.mrf.mxu1  ;;  %v14979_v29 = vld [vmem:[#allocation13_spill] sm:$0xff] }
 0x26f   : > { %14973 = vst [vmem:[#allocation72_spill] sm:$0xff] %v12794_v62  ;;  %v4989_v62 = vshrl.u32 %v8996_v48, 16  ;;  %v1946_v55 = vadd.f32 %v12509_v60, %v1483_v39  ;;  %v12848_v52 = vrot.slane %v4992_v22, 3  ;;  %v2727_v16 = vadd.f32 %v14979_v29, %v2389_v37  ;;  %v14980_v60 = vld [vmem:[#allocation24_spill] sm:$0xff] }
 0x270   : > { %v10119_v30 = vpop.f32.mrf.mxu0  ;;  %v2409_v7 = vadd.f32 %v14980_v60, %v1938_v42  ;;  %v5424_v2 = vshrl.u32 %v12824_v23, 16  ;;  %v3658_v22 = vadd.f32 %v12640_v36, %v12638_v56  ;;  %v14983_v37 = vld [vmem:[#allocation16_spill] sm:$0xff]  ;;  %v3186_v59 = vadd.f32 %v12652_v28, %v2723_v20  ;;  %v12875_v56 = vpop.f32.mrf.mxu1  ;;  %v14985_v28 = vld [vmem:[#allocation25_spill] sm:$0xff]  ;;  %v14988_v60 = vld [vmem:[#allocation18_spill] sm:$0xff] }
 0x271   : > { %v12817_v51 = vadd.f32 %v10119_v30, %v12626_v49  ;;  %v2397_v49 = vadd.f32 %v12563_v26, %v1926_v33  ;;  %v12852_v38 = vpop.permute.xlu0 %4197  ;;  %v5427_v30 = vshll.u32 %v12824_v23, 16  ;;  %v14981_v33 = vld [vmem:[#allocation17_spill] sm:$0xff]  ;;  %v2417_v42 = vadd.f32 %v12631_v0, %v1946_v55  ;;  %v12883_v20 = vpop.permute.xlu1 %4202 }
 0x272   : > { %v3170_v63 = vpop.f32.mrf.mxu0  ;;  %v2731_v58 = vadd.f32 %v14981_v33, %v2393_v54  ;;  %v3190_v55 = vadd.f32 %v12671_v46, %v2727_v16  ;;  %v12885_v29 = vrot.slane %v5424_v2, 3  ;;  %v14990_v33 = vld [vmem:[#allocation28_spill] sm:$0xff]  ;;  %v14992_v46 = vld [vmem:[#allocation30_spill] sm:$0xff] }
 0x273   : > { %v12831_v32 = vadd.f32 %v3170_v63, %v12629_v3  ;;  %v12846_v3 = vrot.slane %v4989_v62, 2  ;;  %v2413_v62 = vadd.f32 %v12618_v4, %v1942_v18  ;;  %v2739_v63 = vadd.f32 %v14983_v37, %v2401_v10 }
 0x274   : > { %v10120_v48 = vpop.f32.mrf.mxu0  ;;  %v3656_v4 = vadd.f32 %v12645_v11, %v12643_v17  ;;  %v12880_v18 = vadd.f32 %v14985_v28, %v2409_v7  ;;  %14986 = vst [vmem:[#allocation27_spill] sm:$0xff] %v12885_v29  ;;  %v14989_v11 = vld [vmem:[#allocation23_spill] sm:$0xff]  ;;  %v14991_v7 = vld [vmem:[#allocation26_spill] sm:$0xff]  ;;  %v3657_v16 = vadd.f32 %v14992_v46, %v3186_v59 }
 0x275   : > { %v12844_v26 = vadd.f32 %v10120_v48, %v12633_v15  ;;  %v14982_v15 = vld [vmem:[#allocation20_spill] sm:$0xff]  ;;  %v12869_v48 = vld [vmem:[%s14803_s2] ss:$0 sm:$0xff]  ;;  %v12890_v17 = vadd.f32 %v14988_v60, %v2413_v62  ;;  %v12902_v28 = vpop.permute.xlu0 %4207  ;;  %v14997_v59 = vld [vmem:[#allocation35_spill] sm:$0xff] }
 0x276   : > { %v12854_v39 = vpop.f32.mrf.mxu0  ;;  %v2735_v35 = vadd.f32 %v14982_v15, %v2397_v49  ;;  %v14984_v49 = vld [vmem:[#allocation22_spill] sm:$0xff]  ;;  %v3659_v15 = vadd.f32 %v14990_v33, %v14989_v11  ;;  %v14994_v60 = vld [vmem:[#allocation32_spill] sm:$0xff]  ;;  %v14995_v11 = vld [vmem:[#allocation33_spill] sm:$0xff] }
 0x277   : > { %v2743_v24 = vadd.f32 %v14984_v49, %v2405_v13  ;;  %v12887_v13 = vrot.slane %v5427_v30, 4  ;;  %v14993_v49 = vld [vmem:[#allocation31_spill] sm:$0xff]  ;;  %v3194_v30 = vadd.f32 %v12690_v41, %v2731_v58  ;;  %v3660_v0 = vadd.f32 %v14994_v60, %v12662_v50  ;;  %v14996_v33 = vld [vmem:[#allocation34_spill] sm:$0xff]  ;;  %v14999_v41 = vld [vmem:[#allocation37_spill] sm:$0xff] }
 0x278   : > { %v10191_v34 = vpop.f32.mrf.mxu0  ;;  %v3662_v2 = vadd.f32 %v14993_v49, %v12657_v47  ;;  %v14998_v47 = vld [vmem:[#allocation36_spill] sm:$0xff]  ;;  %v12916_v58 = vadd.f32 %v14999_v41, %v12681_v45  ;;  %v3198_v49 = vadd.f32 %v12712_v21, %v2735_v35  ;;  %v15000_v60 = vld [vmem:[#allocation38_spill] sm:$0xff]  ;;  %v15004_v45 = vld [vmem:[#allocation43_spill] sm:$0xff]  ;;  %v12935_v21 = vpop.permute.xlu1 %4212 }
 0x279   : > { %v3996_v36 = vadd.f32 %v10191_v34, %v3658_v22  ;;  %14987 = vst [vmem:[#allocation29_spill] sm:$0xff] %v12887_v13  ;;  %v12896_v34 = vadd.f32 %v14991_v7, %v2417_v42  ;;  %v3661_v7 = vadd.f32 %v14997_v59, %v3190_v55  ;;  %v3666_v46 = vadd.f32 %v14998_v47, %v12676_v44  ;;  %v15002_v59 = vld [vmem:[#allocation40_spill] sm:$0xff]  ;;  %v15003_v44 = vld [vmem:[#allocation41_spill] sm:$0xff] }
 0x27a   : > { %v3851_v10 = vpop.f32.mrf.mxu0  ;;  %v12929_v47 = vadd.f32 %v15003_v44, %v15002_v59  ;;  %v12933_v41 = vadd.f32 %v15004_v45, %v12702_v1  ;;  %v15007_v44 = vld [vmem:[#allocation46_spill] sm:$0xff]  ;;  %v15008_v1 = vld [vmem:[#allocation47_spill] sm:$0xff] }
 0x27b   : > { %v4075_v22 = vadd.f32 %v12869_v48, %v3996_v36  ;;  %v3994_v37 = vadd.f32 %v3851_v10, %v3656_v4  ;;  %v3663_v36 = vadd.f32 %v14996_v33, %v14995_v11  ;;  %v12908_v4 = vpop.f32.mrf.mxu1  ;;  %v12921_v11 = vadd.f32 %v15000_v60, %v12686_v14  ;;  %v15005_v60 = vld [vmem:[#allocation44_spill] sm:$0xff] }
 0x27c   : > { %v10192_v62 = vpop.f32.mrf.mxu0  ;;  %v3202_v14 = vadd.f32 %v12731_v40, %v2739_v63  ;;  %v12946_v54 = vadd.f32 %v15007_v44, %v3198_v49  ;;  %v12950_v45 = vadd.f32 %v15008_v1, %v12717_v9  ;;  %v12952_v40 = vpop.permute.xlu0 %4217  ;;  %v3206_v63 = vadd.f32 %v12756_v61, %v2743_v24  ;;  %v15010_v49 = vld [vmem:[#allocation49_spill] sm:$0xff]  ;;  %v15011_v44 = vld [vmem:[#allocation50_spill] sm:$0xff]  ;;  %v15013_v9 = vld [vmem:[#allocation51_spill] sm:$0xff] }
 0x27d   : > { %v4073_v42 = vadd.f32 %v12869_v48, %v3994_v37  ;;  %v3997_v10 = vadd.f32 %v10192_v62, %v3659_v15  ;;  %v4111_v33 = vmax.f32 %v4075_v22, 0.0  ;;  %v15001_v62 = vld [vmem:[#allocation39_spill] sm:$0xff]  ;;  %v12938_v22 = vpop.f32.mrf.mxu1  ;;  %v12963_v13 = vadd.f32 %v15011_v44, %v15010_v49 }
 0x27e   : > { %v3854_v50 = vpop.f32.mrf.mxu0  ;;  %v12925_v55 = vadd.f32 %v15001_v62, %v3194_v30  ;;  %v15006_v62 = vld [vmem:[#allocation45_spill] sm:$0xff]  ;;  %v12966_v1 = vadd.f32 %v15013_v9, %v3202_v14  ;;  %v15020_v44 = vld [vmem:[#allocation55_spill] sm:$0xff]  ;;  %v15021_v14 = vld [vmem:[#allocation56_spill] sm:$0xff] }
 0x27f   : > { %v4076_v37 = vadd.f32 %v12869_v48, %v3997_v10  ;;  %v3995_v15 = vadd.f32 %v3854_v50, %v3657_v16  ;;  %v4109_v10 = vmax.f32 %v4073_v42, 0.0  ;;  %v12943_v59 = vadd.f32 %v15006_v62, %v15005_v60  ;;  %v15009_v60 = vld [vmem:[#allocation48_spill] sm:$0xff]  ;;  %15012 = vst [vmem:[#allocation14_spill] sm:$0xff] %v12963_v13  ;;  %v3641_v29 = vpop.f32.mrf.mxu1 }
 0x280   : > { %v10195_v35 = vpop.f32.mrf.mxu0  ;;  %v12959_v62 = vadd.f32 %v15009_v60, %v12722_v19  ;;  %15014 = vst [vmem:[#allocation21_spill] sm:$0xff] %v12966_v1  ;;  %v12972_v19 = vpop.permute.xlu1 %4222  ;;  %v15018_v60 = vld [vmem:[#allocation54_spill] sm:$0xff]  ;;  %v12980_v9 = vadd.f32 %v15021_v14, %v15020_v44 }
 0x281   : > { %v4112_v16 = vmax.f32 %v4076_v37, 0.0  ;;  %v4074_v30 = vadd.f32 %v12869_v48, %v3995_v15  ;;  %v4000_v50 = vadd.f32 %v10195_v35, %v3662_v2  ;;  %v4327_v37 = vmul.f32 %v12747_v43, %v4111_v33  ;;  %v15015_v43 = vld [vmem:[#allocation52_spill] sm:$0xff]  ;;  %v15028_v44 = vld [vmem:[#allocation62_spill] sm:$0xff] }
 0x282   : > { %v3867_v42 = vpop.f32.mrf.mxu0  ;;  %v4325_v33 = vmul.f32 %v15015_v43, %v4109_v10  ;;  %15022 = vst [vmem:[#allocation13_spill] sm:$0xff] %v12980_v9 }
 0x283   : > { %v4328_v2 = vmul.f32 %v12765_v5, %v4112_v16  ;;  %v4110_v15 = vmax.f32 %v4074_v30, 0.0  ;;  %v3998_v35 = vadd.f32 %v3867_v42, %v3660_v0  ;;  %v4079_v61 = vadd.f32 %v12869_v48, %v4000_v50  ;;  %v15016_v16 = vld [vmem:[#allocation59_spill] sm:$0xff]  ;;  %v15017_v42 = vld [vmem:[#allocation53_spill] sm:$0xff] }
 0x284   : > { %v10196_v24 = vpop.f32.mrf.mxu0  ;;  %v12976_v49 = vadd.f32 %v15018_v60, %v15017_v42  ;;  %v15023_v50 = vld [vmem:[#allocation67_spill] sm:$0xff]  ;;  %v12991_v60 = vpop.permute.xlu0 %4227 }
 0x285   : > { %v9189_v5 = vpack.c.bf16 %v4328_v2, %v4327_v37  ;;  %v4326_v0 = vmul.f32 %v15016_v16, %v4110_v15  ;;  %v4077_v30 = vadd.f32 %v12869_v48, %v3998_v35  ;;  %v3210_v1 = vadd.f32 %v15023_v50, %v12880_v18  ;;  %v15024_v37 = vld [vmem:[#allocation57_spill] sm:$0xff]  ;;  %v15025_v2 = vld [vmem:[#allocation58_spill] sm:$0xff]  ;;  %v15026_v35 = vld [vmem:[#allocation60_spill] sm:$0xff] }
 0x286   : > { %15019 = vst [vmem:[#allocation15_spill] sm:$0xff] %v12976_v49  ;;  %v4001_v13 = vadd.f32 %v10196_v24, %v3663_v36  ;;  %v3870_v10 = vpop.f32.mrf.mxu0  ;;  %v12986_v15 = vadd.f32 %v15025_v2, %v15024_v37  ;;  %v12989_v43 = vadd.f32 %v15026_v35, %v3206_v63  ;;  %v15027_v49 = vld [vmem:[#allocation61_spill] sm:$0xff]  ;;  %v4115_v9 = vmax.f32 %v4079_v61, 0.0  ;;  %v15029_v50 = vld [vmem:[#allocation63_spill] sm:$0xff]  ;;  %v15030_v37 = vld [vmem:[#allocation66_spill] sm:$0xff] }
 0x287   : > { %9272 = vst [vmem:[#allocation2 + $0x18] sm:$0xff] %v9189_v5   ;;  %v9184_v16 = vpack.c.bf16 %v4326_v0, %v4325_v33  ;;  %v3999_v42 = vadd.f32 %v3870_v10, %v3661_v7  ;;  %v12995_v14 = vadd.f32 %v15028_v44, %v15027_v49  ;;  %v4113_v18 = vmax.f32 %v4077_v30, 0.0  ;;  %v15031_v63 = vld [vmem:[#allocation65_spill] sm:$0xff]  ;;  %v10172_v7 = vpop.f32.mrf.mxu1  ;;  %v15033_v61 = vld [vmem:[#allocation70_spill] sm:$0xff] }
 0x288   : > { %v4080_v36 = vadd.f32 %v12869_v48, %v4001_v13  ;;  %v10199_v24 = vpop.f32.mrf.mxu0  ;;  %v13000_v2 = vadd.f32 %v15030_v37, %v15029_v50  ;;  %v15032_v35 = vld [vmem:[#allocation69_spill] sm:$0xff]  ;;  %v13008_v49 = vadd.f32 %v12791_v6, %v3210_v1  ;;  %v13012_v13 = vadd.f32 %v12814_v31, %v15033_v61  ;;  %v13022_v6 = vpop.permute.xlu1 %4232  ;;  %v15034_v1 = vld [vmem:[#allocation71_spill] sm:$0xff]  ;;  %v15035_v37 = vld [vmem:[#allocation64_spill] sm:$0xff] }
 0x289   : > { %v13004_v5 = vadd.f32 %v15032_v35, %v15031_v63  ;;  %9271 = vst [vmem:[#allocation2 + $0x10] sm:$0xff] %v9184_v16   ;;  %v4078_v33 = vadd.f32 %v12869_v48, %v3999_v42  ;;  %v4004_v0 = vadd.f32 %v10199_v24, %v3666_v46  ;;  %v3214_v30 = vadd.f32 %v12802_v8, %v12890_v17  ;;  %v3644_v63 = vpop.f32.mrf.mxu1  ;;  %v15037_v61 = vld [vmem:[#allocation72_spill] sm:$0xff] }
 0x28a   : > { %v4116_v10 = vmax.f32 %v4080_v36, 0.0  ;;  %v3883_v44 = vpop.f32.mrf.mxu0  ;;  %v13018_v50 = vadd.f32 %v12841_v57, %v12789_v27  ;;  %v3218_v31 = vadd.f32 %v12854_v39, %v12896_v34  ;;  %v4331_v24 = vmul.f32 %v15034_v1, %v4115_v9  ;;  %v15036_v27 = vld [vmem:[#allocation68_spill] sm:$0xff] }
 0x28b   : > { %v4114_v16 = vmax.f32 %v4078_v33, 0.0  ;;  %v4083_v42 = vadd.f32 %v12869_v48, %v4004_v0  ;;  %v4002_v46 = vadd.f32 %v3883_v44, %v12916_v58  ;;  %v4329_v8 = vmul.f32 %v15035_v37, %v4113_v18  ;;  %v13032_v0 = vpop.permute.xlu0 %4237 }
 0x28c   : > { %v4332_v17 = vmul.f32 %v12800_v12, %v4116_v10  ;;  %v10200_v36 = vpop.f32.mrf.mxu0  ;;  %v13036_v39 = vadd.f32 %v12875_v56, %v15037_v61  ;;  %v13039_v34 = vadd.f32 %v12908_v4, %v3214_v30  ;;  %v13043_v12 = vadd.f32 %v12938_v22, %v12817_v51 }
 0x28d   : > { %v4330_v57 = vmul.f32 %v15036_v27, %v4114_v16  ;;  %v4119_v35 = vmax.f32 %v4083_v42, 0.0  ;;  %v4081_v33 = vadd.f32 %v12869_v48, %v4002_v46  ;;  %v4005_v58 = vadd.f32 %v10200_v36, %v12921_v11 }
 0x28e   : > { %v9199_v9 = vpack.c.bf16 %v4332_v17, %v4331_v24  ;;  %v3886_v18 = vpop.f32.mrf.mxu0  ;;  %v13045_v10 = vld [vmem:[#allocation2 + $0x18] sm:$0xf]  ;;  %v13048_v44 = vadd.f32 %v3641_v29, %v12831_v32  ;;  %v13051_v56 = vld [vmem:[#allocation2 + $0x1c] sm:$0xf]  ;;  %v13054_v4 = vadd.f32 %v10172_v7, %v12844_v26  ;;  %v13056_v30 = vadd.f32 %v3644_v63, %v3218_v31  ;;  %v13068_v31 = vpop.permute.xlu1 %4242 }
 0x28f   : > { %v9194_v11 = vpack.c.bf16 %v4330_v57, %v4329_v8  ;;  %v4117_v16 = vmax.f32 %v4081_v33, 0.0  ;;  %v4084_v42 = vadd.f32 %v12869_v48, %v4005_v58  ;;  %v4003_v51 = vadd.f32 %v3886_v18, %v12925_v55  ;;  %v13078_v27 = vpop.permute.xlu0 %4247 }
 0x290   : > { %9274 = vst [vmem:[#allocation2 + $0x28] sm:$0xff] %v9199_v9   ;;  %v10203_v22 = vpop.f32.mrf.mxu0  ;;  %v13059_v46 = vld [vmem:[#allocation2 + $0xc] sm:$0xff]   ;;  %v4335_v29 = vmul.f32 %v12852_v38, %v4119_v35  ;;  %v13066_v7 = vld [vmem:[#allocation2 + $0x14] sm:$0xff]   ;;  %v15038_v33 = vrot.slane %v12824_v23, 3 }
 0x291   : > { %9273 = vst [vmem:[#allocation2 + $0x20] sm:$0xff] %v9194_v11   ;;  %v4333_v1 = vmul.f32 %v12810_v25, %v4117_v16  ;;  %v4120_v24 = vmax.f32 %v4084_v42, 0.0  ;;  %v4008_v26 = vadd.f32 %v10203_v22, %v12929_v47  ;;  %v4082_v55 = vadd.f32 %v12869_v48, %v4003_v51  ;;  %v10928_v16 = vld [vmem:[#allocation8 + $0xb0] sm:$0xff]  }
 0x292   : > { %v3899_v37 = vpop.f32.mrf.mxu0  ;;  %v4706_v8 = vrot.slane %v13059_v46, 3  ;;  %v4997_v17 = vshrl.u32 %v13059_v46, 16  ;;  %v5000_v36 = vshll.u32 %v13059_v46, 16  ;;  %v4708_v47 = vrot.slane %v13066_v7, 3 }
 0x293   : > { %v4336_v38 = vmul.f32 %v12883_v20, %v4120_v24  ;;  %v4087_v25 = vadd.f32 %v12869_v48, %v4008_v26  ;;  %v4006_v63 = vadd.f32 %v3899_v37, %v12933_v41  ;;  %v4118_v57 = vmax.f32 %v4082_v55, 0.0 }
 0x294   : > { %v10204_v35 = vpop.f32.mrf.mxu0  ;;  %v4707_v58 = vsel %vm3713_vm4, %v15038_v33, %v4706_v8  ;;  %v4999_v61 = vrot.slane %v4997_v17, 2  ;;  %v5002_v20 = vrot.slane %v5000_v36, 3  ;;  %v4709_v23 = vsel %vm3713_vm4, %v4706_v8, %v4708_v47 }
 0x295   : > { %v9209_v9 = vpack.c.bf16 %v4336_v38, %v4335_v29  ;;  %v4123_v18 = vmax.f32 %v4087_v25, 0.0  ;;  %v4085_v41 = vadd.f32 %v12869_v48, %v4006_v63  ;;  %v4009_v11 = vadd.f32 %v10204_v35, %v12943_v59  ;;  %10241 = vmatprep.mubr.bf16.mxu1 %v4707_v58  ;;  %v13095_v59 = vpop.permute.xlu1 %4252 }
 0x296   : > { %v4334_v42 = vmul.f32 %v12838_v53, %v4118_v57  ;;  %v3902_v51 = vpop.f32.mrf.mxu0  ;;  %v5003_v22 = vor.u32 %v5002_v20, %v4999_v61  ;;  %v5006_v24 = vshrl.u32 %v13066_v7, 16  ;;  %10242 = vmatmul.mubr.bf16.vlgmr.msra.gmra.mxu1 %v4709_v23  ;;  %v15039_v53 = vld [vmem:[#allocation19_spill] sm:$0xff]  ;;  %v15040_v8 = vor.u32 %v12848_v52, %v12846_v3  ;;  %v10931_v3 = vld [vmem:[#allocation8 + $0xa8] sm:$0xff]   ;;  %v13112_v52 = vpop.permute.xlu0 %4257 }
 0x297   : > { %9276 = vst [vmem:[#allocation2 + $0x38] sm:$0xff] %v9209_v9   ;;  %v4339_v26 = vmul.f32 %v12952_v40, %v4123_v18  ;;  %v4121_v55 = vmax.f32 %v4085_v41, 0.0  ;;  %v4088_v29 = vadd.f32 %v12869_v48, %v4009_v11  ;;  %v4007_v37 = vadd.f32 %v3902_v51, %v12946_v54  ;;  %10330 = vmatpush3.bf16.msra.mxu1 %v15039_v53 }
 0x298   : > { %v9204_v38 = vpack.c.bf16 %v4334_v42, %v4333_v1  ;;  %v10207_v25 = vpop.f32.mrf.mxu0  ;;  %v5004_v63 = vsel %vm3242_vm5, %v15040_v8, %v5003_v22  ;;  %v5008_v40 = vrot.slane %v5006_v24, 2  ;;  %v5009_v57 = vshll.u32 %v13066_v7, 16  ;;  %v13105_v35 = vld [vmem:[#allocation2 + $0x1c] sm:$0xff]   ;;  %v13107_v54 = vld [vmem:[#allocation2 + $0x24] sm:$0xff]   ;;  %10331 = vmatprep.subr.bf16.mxu1 %v10928_v16 }
 0x299   : > { %v4337_v33 = vmul.f32 %v12902_v28, %v4121_v55  ;;  %v4124_v1 = vmax.f32 %v4088_v29, 0.0  ;;  %v4086_v58 = vadd.f32 %v12869_v48, %v4007_v37  ;;  %v4012_v61 = vadd.f32 %v10207_v25, %v12950_v45  ;;  %10293 = vmatprep.mubr.bf16.mxu0 %v5004_v63  ;;  %v10934_v25 = vld [vmem:[#allocation8 + $0xa0] sm:$0xff]  }
 0x29a   : > { %9275 = vst [vmem:[#allocation2 + $0x30] sm:$0xff] %v9204_v38   ;;  %v3915_v20 = vpop.f32.mrf.mxu0  ;;  %v5011_v9 = vrot.slane %v5009_v57, 3  ;;  %v4710_v18 = vrot.slane %v13105_v35, 3  ;;  %v4712_v41 = vrot.slane %v13107_v54, 3  ;;  %v5015_v28 = vshrl.u32 %v13105_v35, 16 }
 0x29b   : > { %v4340_v11 = vmul.f32 %v12972_v19, %v4124_v1  ;;  %v4122_v42 = vmax.f32 %v4086_v58, 0.0  ;;  %v4091_v45 = vadd.f32 %v12869_v48, %v4012_v61  ;;  %v4010_v51 = vadd.f32 %v3915_v20, %v12959_v62  ;;  %10332 = vmatpush3.bf16.msra.mxu1 %v10928_v16  ;;  %v10944_v62 = vld [vmem:[#allocation8 + $0xf0] sm:$0xff]   ;;  %v15041_v1 = vld [vmem:[#allocation14_spill] sm:$0xff] }
 0x29c   : > { %v5012_v23 = vor.u32 %v5011_v9, %v5008_v40  ;;  %v10208_v55 = vpop.f32.mrf.mxu0  ;;  %v4711_v29 = vsel %vm3713_vm4, %v4708_v47, %v4710_v18  ;;  %v4713_v37 = vsel %vm3713_vm4, %v4710_v18, %v4712_v41  ;;  %v5017_v38 = vrot.slane %v5015_v28, 2  ;;  %10333 = vmatprep.subr.bf16.mxu1 %v10931_v3  ;;  %v13130_v40 = vpop.permute.xlu1 %4262  ;;  %v15042_v18 = vld [vmem:[#allocation21_spill] sm:$0xff] }
 0x29d   : > { %v9219_v53 = vpack.c.bf16 %v4340_v11, %v4339_v26  ;;  %v4338_v19 = vmul.f32 %v12935_v21, %v4122_v42  ;;  %v4127_v8 = vmax.f32 %v4091_v45, 0.0  ;;  %v4089_v63 = vadd.f32 %v12869_v48, %v4010_v51  ;;  %10245 = vmatprep.mubr.bf16.mxu1 %v4711_v29  ;;  %v13138_v42 = vpop.permute.xlu0 %4267  ;;  %v15043_v29 = vld [vmem:[#allocation42_spill] sm:$0xff] }
 0x29e   : > { %v5013_v47 = vsel %vm3242_vm5, %v5003_v22, %v5012_v23  ;;  %v4013_v58 = vadd.f32 %v10208_v55, %v15041_v1  ;;  %v3918_v16 = vpop.f32.mrf.mxu0  ;;  %v5018_v61 = vshll.u32 %v13105_v35, 16  ;;  %v5024_v20 = vshrl.u32 %v13107_v54, 16  ;;  %10246 = vmatmul.mubr.bf16.gmra.mxu1 %v4713_v37 }
 0x29f   : > { %9278 = vst [vmem:[#allocation2 + $0x48] sm:$0xff] %v9219_v53   ;;  %v9214_v26 = vpack.c.bf16 %v4338_v19, %v4337_v33  ;;  %v4343_v21 = vmul.f32 %v13032_v0, %v4127_v8  ;;  %v4125_v9 = vmax.f32 %v4089_v63, 0.0  ;;  %10294 = vmatmul.mubr.bf16.vlgmr.msra.gmra.mxu0 %v5013_v47  ;;  %v4011_v11 = vadd.f32 %v3918_v16, %v15042_v18  ;;  %v13146_v0 = vld [vmem:[#allocation8 + $0x98] sm:$0xff]   ;;  %v15044_v19 = vld [vmem:[#allocation15_spill] sm:$0xff] }
 0x2a0   : > { %v4092_v22 = vadd.f32 %v12869_v48, %v4013_v58  ;;  %v10211_v45 = vpop.f32.mrf.mxu0  ;;  %v5020_v51 = vrot.slane %v5018_v61, 3  ;;  %v5026_v55 = vrot.slane %v5024_v20, 2  ;;  %v5027_v33 = vshll.u32 %v13107_v54, 16  ;;  %10334 = vmatpush3.bf16.msra.mxu1 %v10931_v3  ;;  %10382 = vmatpush3.bf16.msra.mxu0 %v15043_v29 }
 0x2a1   : > { %9277 = vst [vmem:[#allocation2 + $0x40] sm:$0xff] %v9214_v26   ;;  %v4341_v37 = vmul.f32 %v12991_v60, %v4125_v9  ;;  %v4090_v53 = vadd.f32 %v12869_v48, %v4011_v11  ;;  %v4016_v8 = vadd.f32 %v10211_v45, %v15044_v19  ;;  %v13152_v63 = vld [vmem:[#allocation2 + $0x2c] sm:$0xff]   ;;  %10335 = vmatprep.subr.bf16.mxu1 %v10934_v25  ;;  %v13156_v47 = vrot.slane %v4997_v17, 3  ;;  %v13160_v26 = vld [vmem:[#allocation2 + $0x34] sm:$0xff]   ;;  %v10945_v60 = vld [vmem:[#allocation8 + $0xe8] sm:$0xff]  }
 0x2a2   : > { %10383 = vmatprep.subr.bf16.mxu0 %v10944_v62  ;;  %v4128_v3 = vmax.f32 %v4092_v22, 0.0  ;;  %v3931_v1 = vpop.f32.mrf.mxu0  ;;  %v5021_v58 = vor.u32 %v5020_v51, %v5017_v38  ;;  %v5029_v16 = vrot.slane %v5027_v33, 3  ;;  %v13164_v9 = vrot.slane %v5000_v36, 4  ;;  %v15045_v45 = vld [vmem:[#allocation13_spill] sm:$0xff]  ;;  %v13169_v22 = vpop.permute.xlu1 %4272 }
 0x2a3   : > { %v4126_v18 = vmax.f32 %v4090_v53, 0.0  ;;  %v4095_v11 = vadd.f32 %v12869_v48, %v4016_v8  ;;  %v4014_v29 = vadd.f32 %v3931_v1, %v15045_v45  ;;  %v4714_v17 = vrot.slane %v13152_v63, 3 }
 0x2a4   : > { %v4344_v38 = vmul.f32 %v13068_v31, %v4128_v3  ;;  %v5022_v51 = vsel %vm3242_vm5, %v5012_v23, %v5021_v58  ;;  %v13173_v19 = vor.u32 %v5029_v16, %v5026_v55  ;;  %v10212_v32 = vpop.f32.mrf.mxu0  ;;  %v4716_v46 = vrot.slane %v13160_v26, 3  ;;  %10336 = vmatpush3.bf16.msra.mxu1 %v10934_v25  ;;  %10384 = vmatpush3.bf16.msra.mxu0 %v10944_v62  ;;  %v10949_v31 = vld [vmem:[#allocation8 + $0xe0] sm:$0xff]   ;;  %v13180_v3 = vpop.permute.xlu0 %4277  ;;  %v10941_v62 = vld [vmem:[#allocation8 + $0x90] sm:$0xff]  }
 0x2a5   : > { %v4342_v36 = vmul.f32 %v13022_v6, %v4126_v18  ;;  %v4131_v53 = vmax.f32 %v4095_v11, 0.0  ;;  %v4093_v8 = vadd.f32 %v12869_v48, %v4014_v29  ;;  %10297 = vmatprep.mubr.bf16.mxu0 %v5022_v51  ;;  %v4017_v1 = vadd.f32 %v10212_v32, %v12986_v15  ;;  %10337 = vmatprep.subr.bf16.mxu1 %v13146_v0 }
 0x2a6   : > { %v9229_v23 = vpack.c.bf16 %v4344_v38, %v4343_v21  ;;  %v5031_v55 = vsel %vm3242_vm5, %v5021_v58, %v13173_v19  ;;  %v3934_v16 = vpop.f32.mrf.mxu0  ;;  %v4715_v6 = vsel %vm3713_vm4, %v4712_v41, %v4714_v17  ;;  %v4717_v25 = vsel %vm3713_vm4, %v4714_v17, %v4716_v46  ;;  %10385 = vmatprep.subr.bf16.mxu0 %v10945_v60 }
 0x2a7   : > { %v9224_v15 = vpack.c.bf16 %v4342_v36, %v4341_v37  ;;  %v4347_v32 = vmul.f32 %v13112_v52, %v4131_v53  ;;  %v4129_v18 = vmax.f32 %v4093_v8, 0.0  ;;  %10298 = vmatmul.mubr.bf16.gmra.mxu0 %v5031_v55  ;;  %v4096_v21 = vadd.f32 %v12869_v48, %v4017_v1  ;;  %10249 = vmatprep.mubr.bf16.mxu1 %v4715_v6  ;;  %v10950_v36 = vld [vmem:[#allocation8 + $0xd8] sm:$0xff]   ;;  %v13206_v53 = vpop.permute.xlu1 %4282 }
 0x2a8   : > { %9280 = vst [vmem:[#allocation2 + $0x58] sm:$0xff] %v9229_v23   ;;  %v4015_v58 = vadd.f32 %v3934_v16, %v12989_v43  ;;  %10250 = vmatmul.mubr.bf16.gmra.mxu1 %v4717_v25  ;;  %v10215_v11 = vpop.f32.mrf.mxu0  ;;  %v14827_v41 = vshrl.u32 %v13152_v63, 16  ;;  %v14826_v45 = vshll.u32 %v13152_v63, 16  ;;  %v5042_v29 = vshrl.u32 %v13160_v26, 16  ;;  %v13196_v17 = vld [vmem:[#allocation2 + $0x3c] sm:$0xff]   ;;  %10386 = vmatpush3.bf16.msra.mxu0 %v10945_v60  ;;  %v13203_v51 = vld [vmem:[#allocation2 + $0x44] sm:$0xff]   ;;  %v13220_v25 = vpop.permute.xlu0 %4287 }
 0x2a9   : > { %9279 = vst [vmem:[#allocation2 + $0x50] sm:$0xff] %v9224_v15   ;;  %v13199_v52 = vmul.f32 %v13078_v27, %v4129_v18  ;;  %v4132_v37 = vmax.f32 %v4096_v21, 0.0  ;;  %v4020_v38 = vadd.f32 %v10215_v11, %v12995_v14  ;;  %v5045_v43 = vshll.u32 %v13160_v26, 16  ;;  %10338 = vmatpush3.bf16.msra.mxu1 %v13146_v0  ;;  %10387 = vmatprep.subr.bf16.mxu0 %v10949_v31  ;;  %v10946_v23 = vld [vmem:[#allocation8 + $0x88] sm:$0xff]   ;;  %v13449_v26 = vld [vmem:[#allocation2 + $0x38] sm:$0xf] }
 0x2aa   : > { %v4094_v8 = vadd.f32 %v12869_v48, %v4015_v58  ;;  %v3947_v60 = vpop.f32.mrf.mxu0  ;;  %v5035_v27 = vrot.slane %v14827_v41, 2  ;;  %v5038_v1 = vrot.slane %v14826_v45, 3  ;;  %v5044_v14 = vrot.slane %v5042_v29, 2  ;;  %10339 = vmatprep.subr.bf16.mxu1 %v10941_v62 }
 0x2ab   : > { %v4348_v0 = vmul.f32 %v13130_v40, %v4132_v37  ;;  %v4099_v55 = vadd.f32 %v12869_v48, %v4020_v38  ;;  %v4018_v16 = vadd.f32 %v3947_v60, %v13000_v2  ;;  %v5047_v6 = vrot.slane %v5045_v43, 3  ;;  %v10954_v2 = vld [vmem:[#allocation8 + $0xd0] sm:$0xff]  }
 0x2ac   : > { %v4130_v15 = vmax.f32 %v4094_v8, 0.0  ;;  %v5039_v18 = vor.u32 %v5038_v1, %v5035_v27  ;;  %v10216_v21 = vpop.f32.mrf.mxu0  ;;  %v4718_v58 = vrot.slane %v13196_v17, 3  ;;  %v4720_v11 = vrot.slane %v13203_v51, 3  ;;  %10388 = vmatpush3.bf16.msra.mxu0 %v10949_v31 }
 0x2ad   : > { %v9239_v45 = vpack.c.bf16 %v4348_v0, %v4347_v32  ;;  %v4135_v41 = vmax.f32 %v4099_v55, 0.0  ;;  %v4097_v40 = vadd.f32 %v12869_v48, %v4018_v16  ;;  %v13225_v37 = vor.u32 %v5047_v6, %v5044_v14  ;;  %10340 = vmatpush3.bf16.msra.mxu1 %v10941_v62  ;;  %10389 = vmatprep.subr.bf16.mxu0 %v10950_v36  ;;  %v4298_v6 = vpop.permute.xlu0 %4297 }
 0x2ae   : > { %v4346_v38 = vmul.f32 %v13095_v59, %v4130_v15  ;;  %v5040_v8 = vsel %vm3242_vm5, %v13173_v19, %v5039_v18  ;;  %v4021_v60 = vadd.f32 %v10216_v21, %v13004_v5  ;;  %v3950_v27 = vpop.f32.mrf.mxu0  ;;  %v4719_v31 = vsel %vm3713_vm4, %v4716_v46, %v4718_v58  ;;  %10341 = vmatprep.subr.bf16.mxu1 %v10946_v23  ;;  %v10952_v19 = vld [vmem:[#allocation8 + $0x80] sm:$0xff]   ;;  %v13240_v5 = vpop.permute.xlu1 %4292 }
 0x2af   : > { %9282 = vst [vmem:[#allocation2 + $0x68] sm:$0xff] %v9239_v45   ;;  %v13235_v32 = vmul.f32 %v13180_v3, %v4135_v41  ;;  %v4133_v62 = vmax.f32 %v4097_v40, 0.0  ;;  %10301 = vmatprep.mubr.bf16.mxu0 %v5040_v8  ;;  %v5049_v59 = vsel %vm3242_vm5, %v5039_v18, %v13225_v37  ;;  %v4019_v1 = vadd.f32 %v3950_v27, %v13008_v49  ;;  %v10955_v8 = vld [vmem:[#allocation8 + $0xc8] sm:$0xff]  }
 0x2b0   : > { %10253 = vmatprep.mubr.bf16.mxu1 %v4719_v31  ;;  %v9234_v14 = vpack.c.bf16 %v4346_v38, %v13199_v52  ;;  %10302 = vmatmul.mubr.bf16.gmra.mxu0 %v5049_v59  ;;  %v4100_v46 = vadd.f32 %v12869_v48, %v4021_v60  ;;  %v4721_v3 = vsel %vm3713_vm4, %v4718_v58, %v4720_v11  ;;  %v10219_v41 = vpop.f32.mrf.mxu0  ;;  %v14829_v45 = vshrl.u32 %v13196_v17, 16  ;;  %v13248_v0 = vld [vmem:[#allocation2 + $0x4c] sm:$0xff]  }
 0x2b1   : > { %v4349_v49 = vmul.f32 %v13138_v42, %v4133_v62  ;;  %v4098_v55 = vadd.f32 %v12869_v48, %v4019_v1  ;;  %10254 = vmatmul.mubr.bf16.gmra.mxu1 %v4721_v3  ;;  %v4024_v16 = vadd.f32 %v10219_v41, %v13012_v13  ;;  %v14828_v52 = vshll.u32 %v13196_v17, 16  ;;  %10390 = vmatpush3.bf16.msra.mxu0 %v10950_v36  ;;  %v13262_v60 = vld [vmem:[#allocation8 + $0x138] sm:$0xff]  }
 0x2b2   : > { %9281 = vst [vmem:[#allocation2 + $0x60] sm:$0xff] %v9234_v14   ;;  %v4136_v15 = vmax.f32 %v4100_v46, 0.0  ;;  %v3963_v18 = vpop.f32.mrf.mxu0  ;;  %v5053_v21 = vrot.slane %v14829_v45, 2  ;;  %v5060_v58 = vshrl.u32 %v13203_v51, 16  ;;  %v5063_v40 = vshll.u32 %v13203_v51, 16  ;;  %10342 = vmatpush3.bf16.msra.mxu1 %v10946_v23  ;;  %10391 = vmatprep.subr.bf16.mxu0 %v10954_v2  ;;  %v13270_v1 = vld [vmem:[#allocation2 + $0x54] sm:$0xff]   ;;  %v4303_v41 = vpop.permute.xlu1 %4302 }
 0x2b3   : > { %v4134_v42 = vmax.f32 %v4098_v55, 0.0  ;;  %v4103_v38 = vadd.f32 %v12869_v48, %v4024_v16  ;;  %v4022_v13 = vadd.f32 %v3963_v18, %v13018_v50  ;;  %v5056_v36 = vrot.slane %v14828_v52, 3  ;;  %10343 = vmatprep.subr.bf16.mxu1 %v10952_v19 }
 0x2b4   : > { %v4352_v27 = vmul.f32 %v13206_v53, %v4136_v15  ;;  %v5062_v31 = vrot.slane %v5060_v58, 2  ;;  %v5065_v23 = vrot.slane %v5063_v40, 3  ;;  %v10220_v62 = vpop.f32.mrf.mxu0  ;;  %v4722_v59 = vrot.slane %v13248_v0, 3 }
 0x2b5   : > { %v4350_v50 = vmul.f32 %v13169_v22, %v4134_v42  ;;  %v4139_v14 = vmax.f32 %v4103_v38, 0.0  ;;  %v4101_v46 = vadd.f32 %v12869_v48, %v4022_v13  ;;  %v5057_v3 = vor.u32 %v5056_v36, %v5053_v21  ;;  %10392 = vmatpush3.bf16.msra.mxu0 %v10954_v2  ;;  %v10960_v2 = vld [vmem:[#allocation8 + $0xc0] sm:$0xff]   ;;  %v4308_v21 = vpop.permute.xlu0 %4307 }
 0x2b6   : > { %v9249_v53 = vpack.c.bf16 %v4352_v27, %v13235_v32  ;;  %v5066_v55 = vor.u32 %v5065_v23, %v5062_v31  ;;  %v4025_v16 = vadd.f32 %v10220_v62, %v13036_v39  ;;  %v3966_v15 = vpop.f32.mrf.mxu0  ;;  %v4723_v18 = vsel %vm3713_vm4, %v4720_v11, %v4722_v59  ;;  %10344 = vmatpush3.bf16.msra.mxu1 %v10952_v19 }
 0x2b7   : > { %v9244_v52 = vpack.c.bf16 %v4350_v50, %v4349_v49  ;;  %v4355_v45 = vmul.f32 %v4298_v6, %v4139_v14  ;;  %v4137_v22 = vmax.f32 %v4101_v46, 0.0  ;;  %v5058_v42 = vsel %vm3242_vm5, %v13225_v37, %v5057_v3  ;;  %10257 = vmatprep.mubr.bf16.mxu1 %v4723_v18  ;;  %10393 = vmatprep.subr.bf16.mxu0 %v10955_v8  ;;  %v13301_v14 = vld [vmem:[#allocation8 + $0x178] sm:$0xff]  }
 0x2b8   : > { %9284 = vst [vmem:[#allocation2 + $0x78] sm:$0xff] %v9249_v53   ;;  %10305 = vmatprep.mubr.bf16.mxu0 %v5058_v42  ;;  %v5067_v39 = vsel %vm3242_vm5, %v5057_v3, %v5066_v55  ;;  %v4104_v32 = vadd.f32 %v12869_v48, %v4025_v16  ;;  %v4023_v38 = vadd.f32 %v3966_v15, %v13039_v34  ;;  %v4724_v11 = vrot.slane %v13270_v1, 3  ;;  %v10223_v19 = vpop.f32.mrf.mxu0 }
 0x2b9   : > { %10433 = vmatprep.subr.bf16.mxu1 %v13262_v60  ;;  %9283 = vst [vmem:[#allocation2 + $0x70] sm:$0xff] %v9244_v52   ;;  %v4353_v37 = vmul.f32 %v13220_v25, %v4137_v22  ;;  %10306 = vmatmul.mubr.bf16.gmra.mxu0 %v5067_v39  ;;  %v4028_v49 = vadd.f32 %v10223_v19, %v13043_v12  ;;  %v14840_v6 = vshrl.u32 %v13248_v0, 16  ;;  %v14838_v13 = vshll.u32 %v13248_v0, 16  ;;  %v13293_v62 = vld [vmem:[#allocation2 + $0x5c] sm:$0xff]   ;;  %v13308_v42 = vld [vmem:[#allocation2 + $0x64] sm:$0xff]   ;;  %v4318_v39 = vpop.permute.xlu0 %4317 }
 0x2ba   : > { %v4140_v36 = vmax.f32 %v4104_v32, 0.0  ;;  %v4102_v27 = vadd.f32 %v12869_v48, %v4023_v38  ;;  %v4725_v34 = vsel %vm3713_vm4, %v4722_v59, %v4724_v11  ;;  %v3979_v31 = vpop.f32.mrf.mxu0  ;;  %v5078_v23 = vshrl.u32 %v13270_v1, 16  ;;  %10394 = vmatpush3.bf16.msra.mxu0 %v10955_v8  ;;  %v4313_v59 = vpop.permute.xlu1 %4312 }
 0x2bb   : > { %10258 = vmatmul.mubr.bf16.gmra.mxu1 %v4725_v34  ;;  %v4107_v25 = vadd.f32 %v12869_v48, %v4028_v49  ;;  %v4026_v12 = vadd.f32 %v3979_v31, %v13048_v44  ;;  %v5071_v52 = vrot.slane %v14840_v6, 2  ;;  %v5074_v50 = vrot.slane %v14838_v13, 3  ;;  %10395 = vmatprep.subr.bf16.mxu0 %v10960_v2  ;;  %v11076_v13 = vld [vmem:[#allocation2 + $0x1c] sm:$0xf]  ;;  %v13421_v6 = vld [vmem:[#allocation2 + $0x28] sm:$0xf] }
 0x2bc   : > { %v4356_v46 = vmul.f32 %v4303_v41, %v4140_v36  ;;  %v4138_v3 = vmax.f32 %v4102_v27, 0.0  ;;  %v5080_v8 = vrot.slane %v5078_v23, 2  ;;  %v5081_v53 = vshll.u32 %v13270_v1, 16  ;;  %v10224_v16 = vpop.f32.mrf.mxu0  ;;  %v10979_v1 = vld [vmem:[#allocation8 + $0x170] sm:$0xff]  }
 0x2bd   : > { %v4143_v15 = vmax.f32 %v4107_v25, 0.0  ;;  %v4105_v44 = vadd.f32 %v12869_v48, %v4026_v12  ;;  %v5075_v18 = vor.u32 %v5074_v50, %v5071_v52  ;;  %v4029_v22 = vadd.f32 %v10224_v16, %v13054_v4 }
 0x2be   : > { %v9259_v32 = vpack.c.bf16 %v4356_v46, %v4355_v45  ;;  %v4354_v38 = vmul.f32 %v13240_v5, %v4138_v3  ;;  %v5083_v41 = vrot.slane %v5081_v53, 3  ;;  %v3982_v19 = vpop.f32.mrf.mxu0  ;;  %v4726_v49 = vrot.slane %v13293_v62, 3  ;;  %10396 = vmatpush3.bf16.msra.mxu0 %v10960_v2  ;;  %v4323_v46 = vpop.permute.xlu1 %4322 }
 0x2bf   : > { %v4359_v36 = vmul.f32 %v4318_v39, %v4143_v15  ;;  %v4141_v27 = vmax.f32 %v4105_v44, 0.0  ;;  %v5076_v34 = vsel %vm3242_vm5, %v5066_v55, %v5075_v18  ;;  %v4108_v31 = vadd.f32 %v12869_v48, %v4029_v22  ;;  %10485 = vmatprep.subr.bf16.mxu0 %v13301_v14 }
 0x2c0   : > { %9286 = vst [vmem:[#allocation2 + $0x88] sm:$0xff] %v9259_v32   ;;  %v9254_v4 = vpack.c.bf16 %v4354_v38, %v4353_v37  ;;  %10309 = vmatprep.mubr.bf16.mxu0 %v5076_v34  ;;  %v5084_v45 = vor.u32 %v5083_v41, %v5080_v8  ;;  %v4027_v5 = vadd.f32 %v3982_v19, %v13056_v30  ;;  %v13319_v12 = vld [vmem:[#allocation2 + $0x6c] sm:$0xff]   ;;  %v4728_v55 = vrot.slane %v13308_v42, 3  ;;  %v13323_v50 = vld [vmem:[#allocation2 + $0x74] sm:$0xff]   ;;  %v11075_v30 = vld [vmem:[%s14803_s2] ss:$0 sm:$0xff] }
 0x2c1   : > { %v4727_v25 = vsel %vm3713_vm4, %v4724_v11, %v4726_v49  ;;  %v4357_v2 = vmul.f32 %v4308_v21, %v4141_v27  ;;  %v4144_v52 = vmax.f32 %v4108_v31, 0.0  ;;  %v14831_v48 = vshrl.u32 %v13293_v62, 16 }
 0x2c2   : > { %10261 = vmatprep.mubr.bf16.mxu1 %v4727_v25  ;;  %9285 = vst [vmem:[#allocation2 + $0x80] sm:$0xff] %v9254_v4   ;;  %v5085_v37 = vsel %vm3242_vm5, %v5075_v18, %v5084_v45  ;;  %v4106_v11 = vadd.f32 %v11075_v30, %v4027_v5  ;;  %v14830_v3 = vshll.u32 %v13293_v62, 16  ;;  %v5096_v21 = vshrl.u32 %v13308_v42, 16 }
 0x2c3   : > { %10310 = vmatmul.mubr.bf16.gmra.mxu0 %v5085_v37  ;;  %v4360_v8 = vmul.f32 %v4323_v46, %v4144_v52  ;;  %v4729_v16 = vsel %vm3713_vm4, %v4726_v49, %v4728_v55  ;;  %v5089_v15 = vrot.slane %v14831_v48, 2  ;;  %v5099_v44 = vshll.u32 %v13308_v42, 16  ;;  %v15046_v52 = vld [vmem:[#allocation27_spill] sm:$0xff]  ;;  %v15047_v46 = vld [vmem:[#allocation29_spill] sm:$0xff] }
 0x2c4   : > { %v4142_v22 = vmax.f32 %v4106_v11, 0.0  ;;  %10262 = vmatmul.mubr.bf16.gmra.mxu1 %v4729_v16  ;;  %v5092_v18 = vrot.slane %v14830_v3, 3  ;;  %v5098_v39 = vrot.slane %v5096_v21, 2  ;;  %v4730_v32 = vrot.slane %v13319_v12, 3 }
 0x2c5   : > { %v9269_v38 = vpack.c.bf16 %v4360_v8, %v4359_v36  ;;  %v5101_v41 = vrot.slane %v5099_v44, 3  ;;  %v4732_v19 = vrot.slane %v13323_v50, 3  ;;  %v5105_v49 = vshrl.u32 %v13319_v12, 16 }
 0x2c6   : > { %v4358_v27 = vmul.f32 %v4313_v59, %v4142_v22  ;;  %v5093_v34 = vor.u32 %v5092_v18, %v5089_v15  ;;  %v4731_v31 = vsel %vm3713_vm4, %v4728_v55, %v4730_v32  ;;  %v5108_v4 = vshll.u32 %v13319_v12, 16 }
 0x2c7   : > { %9288 = vst [vmem:[#allocation2 + $0x98] sm:$0xff] %v9269_v38   ;;  %v5102_v5 = vor.u32 %v5101_v41, %v5098_v39  ;;  %10265 = vmatprep.mubr.bf16.mxu1 %v4731_v31  ;;  %v5107_v25 = vrot.slane %v5105_v49, 2  ;;  %v14837_v36 = vshrl.u32 %v13323_v50, 16  ;;  %v5430_v37 = vor.u32 %v15047_v46, %v15046_v52  ;;  %v5787_v38 = vld [vmem:[#allocation2 + $0xc] sm:$0x8] }
 0x2c8   : > { %v9264_v30 = vpack.c.bf16 %v4358_v27, %v4357_v2  ;;  %v5094_v11 = vsel %vm3242_vm5, %v5084_v45, %v5093_v34  ;;  %v5110_v59 = vrot.slane %v5108_v4, 3  ;;  %v14836_v55 = vshll.u32 %v13323_v50, 16  ;;  %v13367_v41 = vld [vmem:[#allocation2 + $0x10] sm:$0xf] }
 0x2c9   : > { %10313 = vmatprep.mubr.bf16.mxu0 %v5094_v11  ;;  %v5103_v8 = vsel %vm3242_vm5, %v5093_v34, %v5102_v5  ;;  %v4733_v16 = vsel %vm3713_vm4, %v4730_v32, %v4732_v19  ;;  %v5116_v15 = vrot.slane %v14837_v36, 2  ;;  %v13359_v22 = vld [vmem:[#allocation2 + $0x7c] sm:$0xff]   ;;  %v5433_v2 = vor.u32 %v13164_v9, %v13156_v47  ;;  %v13365_v39 = vld [vmem:[#allocation2 + $0x84] sm:$0xff]  }
 0x2ca   : > { %9287 = vst [vmem:[#allocation2 + $0x90] sm:$0xff] %v9264_v30   ;;  %v5111_v45 = vor.u32 %v5110_v59, %v5107_v25  ;;  %v5119_v18 = vrot.slane %v14836_v55, 3  ;;  %v4734_v32 = vrot.slane %v13359_v22, 3  ;;  %v14835_v27 = vshrl.u32 %v13359_v22, 16 }
 0x2cb   : > { %10314 = vmatmul.mubr.bf16.gmra.mxu0 %v5103_v8  ;;  %v14834_v34 = vshll.u32 %v13359_v22, 16  ;;  %v13373_v31 = vsel %vm5422_vm6, %v5430_v37, %v5433_v2  ;;  %v4736_v25 = vrot.slane %v13365_v39, 3  ;;  %v14833_v52 = vshrl.u32 %v13365_v39, 16 }
 0x2cc   : > { %10266 = vmatmul.mubr.bf16.gmra.mxu1 %v4733_v16  ;;  %v5112_v47 = vsel %vm3242_vm5, %v5102_v5, %v5111_v45  ;;  %v5120_v9 = vor.u32 %v5119_v18, %v5116_v15  ;;  %v4735_v46 = vsel %vm3713_vm4, %v4732_v19, %v4734_v32  ;;  %v5125_v30 = vrot.slane %v14835_v27, 2  ;;  %v13386_v16 = vld [vmem:[#allocation2 + $0x14] sm:$0xf] }
 0x2cd   : > { %10317 = vmatprep.mubr.bf16.mxu0 %v5112_v47  ;;  %v5128_v11 = vrot.slane %v14834_v34, 3  ;;  %v14832_v37 = vshll.u32 %v13365_v39, 16  ;;  %10269 = vmatprep.mubr.bf16.mxu1 %v4735_v46  ;;  %v9014_v59 = vcombine.low %v5787_v38, %v13367_v41  ;;  %v5134_v15 = vrot.slane %v14833_v52, 2  ;;  %v13405_v34 = vld [vmem:[#allocation2 + $0x20] sm:$0xf] }
 0x2ce   : > { %v5121_v5 = vsel %vm3242_vm5, %v5111_v45, %v5120_v9  ;;  %v5435_v18 = vrot.slane %v5006_v24, 3  ;;  %v5436_v47 = vrot.slane %v5009_v57, 4  ;;  %v4737_v46 = vsel %vm3713_vm4, %v4734_v32, %v4736_v25 }
 0x2cf   : > { %v5129_v8 = vor.u32 %v5128_v11, %v5125_v30  ;;  %v5137_v19 = vrot.slane %v14832_v37, 3  ;;  %v9015_v11 = vcombine.low %v13386_v16, %v13045_v10  ;;  %v5935_v3 = vshrl.u32 %v9014_v59, 16 }
 0x2d0   : > { %v5437_v48 = vor.u32 %v5436_v47, %v5435_v18  ;;  %v5938_v57 = vshll.u32 %v9014_v59, 16  ;;  %v5439_v27 = vrot.slane %v5015_v28, 3  ;;  %v5440_v28 = vrot.slane %v5018_v61, 4 }
 0x2d1   : > { %v5130_v38 = vsel %vm3242_vm5, %v5120_v9, %v5129_v8  ;;  %v13398_v45 = vld [vmem:[#allocation2 + $0x8c] sm:$0xff]   ;;  %v10953_v30 = vld [vmem:[#allocation2 + $0x94] ss:$0 sps:$4 sm:$0x77]   ;;  %v5138_v32 = vor.u32 %v5137_v19, %v5134_v15  ;;  %v5943_v59 = vshrl.u32 %v9015_v11, 16  ;;  %v15054_v12 = vshrl.u32 %v13323_v50, 16 }
 0x2d2   : > { %v4738_v37 = vrot.slane %v13398_v45, 3  ;;  %v14839_v24 = vshrl.u32 %v13398_v45, 16  ;;  %v14841_v7 = vshll.u32 %v13398_v45, 16  ;;  %v5150_v9 = vshrl.u32 %v10953_v30, 16  ;;  %v13415_v19 = vld [vmem:[#allocation2 + $0x24] sm:$0xf] }
 0x2d3   : > { %10318 = vmatmul.mubr.bf16.gmra.mxu0 %v5121_v5  ;;  %v5153_v52 = vshll.u32 %v10953_v30, 16  ;;  %v4740_v5 = vrot.slane %v10953_v30, 3  ;;  %v5438_v15 = vsel %vm5422_vm6, %v5433_v2, %v5437_v48  ;;  %v5441_v2 = vor.u32 %v5440_v28, %v5439_v27  ;;  %v13432_v27 = vld [vmem:[#allocation2 + $0x2c] sm:$0xf]  ;;  %v13444_v28 = vld [vmem:[#allocation2 + $0x34] sm:$0xf] }
 0x2d4   : > { %10270 = vmatmul.mubr.bf16.gmra.mxu1 %v4737_v46  ;;  %10321 = vmatprep.mubr.bf16.mxu0 %v5130_v38  ;;  %v4739_v18 = vsel %vm3713_vm4, %v4736_v25, %v4738_v37  ;;  %v5143_v47 = vrot.slane %v14839_v24, 2  ;;  %v5146_v55 = vrot.slane %v14841_v7, 3  ;;  %v5946_v46 = vshll.u32 %v9015_v11, 16 }
 0x2d5   : > { %10273 = vmatprep.mubr.bf16.mxu1 %v4739_v18  ;;  %v5139_v25 = vsel %vm3242_vm5, %v5129_v8, %v5138_v32  ;;  %v5152_v30 = vrot.slane %v5150_v9, 2  ;;  %v5155_v36 = vrot.slane %v5153_v52, 3  ;;  %v9016_v24 = vcombine.low %v11076_v13, %v13405_v34 }
 0x2d6   : > { %v5147_v38 = vor.u32 %v5146_v55, %v5143_v47  ;;  %v4741_v18 = vsel %vm3713_vm4, %v4738_v37, %v4740_v5  ;;  %v5443_v55 = vrot.slane %v5024_v20, 3  ;;  %v5937_v47 = vrot.slane %v5935_v3, 3 }
 0x2d7   : > { %v5940_v35 = vrot.slane %v5938_v57, 4  ;;  %v5945_v61 = vrot.slane %v5943_v59, 3  ;;  %v5948_v7 = vrot.slane %v5946_v46, 4  ;;  %v5442_v52 = vsel %vm5422_vm6, %v5437_v48, %v5441_v2 }
 0x2d8   : > { %v5148_v11 = vsel %vm3242_vm5, %v5138_v32, %v5147_v38  ;;  %v9017_v13 = vcombine.low %v13415_v19, %v13421_v6  ;;  %v5444_v8 = vrot.slane %v5027_v33, 4  ;;  %v5156_v37 = vor.u32 %v5155_v36, %v5152_v30  ;;  %v13434_v32 = vld [vmem:[#allocation2 + $0x30] sm:$0xf]  ;;  %v10963_v30 = vld [vmem:[#allocation8 + $0x130] sm:$0xff]  }
 0x2d9   : > { %v5451_v20 = vrot.slane %v5042_v29, 3  ;;  %v5952_v3 = vshrl.u32 %v9016_v24, 16  ;;  %v5452_v57 = vrot.slane %v5045_v43, 4  ;;  %v5941_v9 = vor.u32 %v5940_v35, %v5937_v47 }
 0x2da   : > { %v5445_v48 = vor.u32 %v5444_v8, %v5443_v55  ;;  %v5949_v54 = vor.u32 %v5948_v7, %v5945_v61  ;;  %v5955_v33 = vshll.u32 %v9016_v24, 16  ;;  %v5961_v5 = vshrl.u32 %v9017_v13, 16  ;;  %v10966_v8 = vld [vmem:[#allocation8 + $0x128] sm:$0xff]  }
 0x2db   : > { %10322 = vmatmul.mubr.bf16.gmra.mxu0 %v5139_v25  ;;  %v5964_v59 = vshll.u32 %v9017_v13, 16  ;;  %v9018_v46 = vcombine.low %v13432_v27, %v13434_v32  ;;  %v5157_v29 = vsel %vm3242_vm5, %v5147_v38, %v5156_v37  ;;  %v5954_v25 = vrot.slane %v5952_v3, 3 }
 0x2dc   : > { %10274 = vmatmul.mubr.bf16.gmra.mxu1 %v4741_v18  ;;  %10325 = vmatprep.mubr.bf16.mxu0 %v5148_v11  ;;  %v5446_v36 = vsel %vm5422_vm6, %v5441_v2, %v5445_v48  ;;  %v5950_v43 = vsel %vm5422_vm6, %v5941_v9, %v5949_v54  ;;  %v5957_v24 = vrot.slane %v5955_v33, 4  ;;  %v9019_v7 = vcombine.low %v13444_v28, %v13449_v26  ;;  %v13467_v9 = vld [vmem:[#allocation2 + $0x44] sm:$0xf]  ;;  %v13469_v33 = vld [vmem:[#allocation2 + $0x48] sm:$0xf] }
 0x2dd   : > { %10345 = vmatprep.mubr.bf16.mxu1 %v13373_v31  ;;  %v13447_v31 = vor.u32 %v5452_v57, %v5451_v20  ;;  %v5459_v18 = vrot.slane %v5060_v58, 3  ;;  %v5963_v11 = vrot.slane %v5961_v5, 3  ;;  %v5966_v2 = vrot.slane %v5964_v59, 4  ;;  %v13463_v58 = vld [vmem:[#allocation2 + $0x40] sm:$0xf] }
 0x2de   : > { %v5970_v55 = vshrl.u32 %v9018_v46, 16  ;;  %v5973_v38 = vshll.u32 %v9018_v46, 16  ;;  %v15048_v47 = vshrl.u32 %v13152_v63, 16  ;;  %v15049_v61 = vshll.u32 %v13152_v63, 16 }
 0x2df   : > { %v5460_v37 = vrot.slane %v5063_v40, 4  ;;  %v5958_v20 = vor.u32 %v5957_v24, %v5954_v25  ;;  %v5979_v3 = vshrl.u32 %v9019_v7, 16  ;;  %v5982_v57 = vshll.u32 %v9019_v7, 16 }
 0x2e0   : > { %v5447_v35 = vrot.slane %v15048_v47, 3  ;;  %v5448_v13 = vrot.slane %v15049_v61, 4  ;;  %v5967_v5 = vor.u32 %v5966_v2, %v5963_v11  ;;  %v5972_v51 = vrot.slane %v5970_v55, 3  ;;  %v13490_v61 = vld [vmem:[#allocation2 + $0x50] sm:$0xf] }
 0x2e1   : > { %v13471_v63 = vor.u32 %v5460_v37, %v5459_v18  ;;  %v5975_v40 = vrot.slane %v5973_v38, 4  ;;  %v5468_v59 = vrot.slane %v5081_v53, 4  ;;  %v5959_v25 = vsel %vm5422_vm6, %v5949_v54, %v5958_v20 }
 0x2e2   : > { %v5968_v7 = vsel %vm5422_vm6, %v5958_v20, %v5967_v5  ;;  %v5984_v18 = vrot.slane %v5982_v57, 4  ;;  %v15050_v11 = vshrl.u32 %v13196_v17, 16  ;;  %v15051_v54 = vshll.u32 %v13196_v17, 16  ;;  %v13501_v20 = vld [vmem:[#allocation2 + $0x4c] sm:$0xf]  ;;  %v10981_v57 = vld [vmem:[#allocation8 + $0x168] sm:$0xff]  }
 0x2e3   : > { %10326 = vmatmul.mubr.bf16.gmra.mxu0 %v5157_v29  ;;  %v9021_v29 = vcombine.low %v13467_v9, %v13469_v33  ;;  %v5476_v37 = vrot.slane %v5099_v44, 4 }
 0x2e4   : > { %10397 = vmatprep.mubr.bf16.mxu0 %v5950_v43  ;;  %10346 = vmatmul.mubr.bf16.vlgmr.msra.gmra.mxu1 %v5438_v15  ;;  %v13465_v15 = vld [vmem:[#allocation2 + $0x3c] sm:$0xf]  ;;  %v5455_v2 = vrot.slane %v15050_v11, 3  ;;  %v5456_v55 = vrot.slane %v15051_v54, 4  ;;  %v15055_v11 = vshll.u32 %v13323_v50, 16 }
 0x2e5   : > { %10349 = vmatprep.mubr.bf16.mxu1 %v5442_v52  ;;  %10434 = vmatpush3.bf16.msra.mxu1 %v13262_v60  ;;  %v5449_v52 = vor.u32 %v5448_v13, %v5447_v35  ;;  %v5467_v60 = vrot.slane %v5078_v23, 3  ;;  %v9020_v46 = vcombine.low %v13465_v15, %v13463_v58  ;;  %v10969_v43 = vld [vmem:[#allocation8 + $0x120] sm:$0xff]   ;;  %v5981_v23 = vrot.slane %v5979_v3, 3  ;;  %v13503_v3 = vld [vmem:[#allocation2 + $0x54] sm:$0xf] }
 0x2e6   : > { %10435 = vmatprep.subr.bf16.mxu1 %v10963_v30  ;;  %v5997_v35 = vshrl.u32 %v9021_v29, 16  ;;  %v5475_v13 = vrot.slane %v5096_v21, 3  ;;  %v5479_v21 = vrot.slane %v5105_v49, 3  ;;  %v5457_v42 = vor.u32 %v5456_v55, %v5455_v2 }
 0x2e7   : > { %v13482_v24 = vor.u32 %v5468_v59, %v5467_v60  ;;  %v5450_v53 = vsel %vm5422_vm6, %v5445_v48, %v5449_v52  ;;  %v5988_v38 = vshrl.u32 %v9020_v46, 16  ;;  %v5991_v47 = vshll.u32 %v9020_v46, 16  ;;  %v10973_v48 = vld [vmem:[#allocation8 + $0x118] sm:$0xff]   ;;  %v13512_v59 = vld [vmem:[#allocation2 + $0x58] sm:$0xf] }
 0x2e8   : > { %v13497_v17 = vor.u32 %v5984_v18, %v5981_v23  ;;  %v13510_v44 = vor.u32 %v5476_v37, %v5475_v13  ;;  %v5480_v46 = vrot.slane %v5108_v4, 4  ;;  %v9023_v23 = vcombine.low %v13503_v3, %v13512_v59  ;;  %v10978_v18 = vld [vmem:[#allocation8 + $0x110] sm:$0xff]   ;;  %v13540_v37 = vld [vmem:[#allocation2 + $0x64] sm:$0xf] }
 0x2e9   : > { %10436 = vmatpush3.bf16.msra.mxu1 %v10963_v30  ;;  %v5976_v30 = vor.u32 %v5975_v40, %v5972_v51  ;;  %v5990_v40 = vrot.slane %v5988_v38, 3  ;;  %v5993_v60 = vrot.slane %v5991_v47, 4  ;;  %v5483_v4 = vrot.slane %v15054_v12, 3 }
 0x2ea   : > { %10437 = vmatprep.subr.bf16.mxu1 %v10966_v8  ;;  %v5484_v2 = vrot.slane %v15055_v11, 4  ;;  %v5458_v54 = vsel %vm5422_vm6, %v13447_v31, %v5457_v42  ;;  %v6015_v13 = vshrl.u32 %v9023_v23, 16  ;;  %v15060_v11 = vshrl.u32 %v13398_v45, 16 }
 0x2eb   : > { %10398 = vmatmul.mubr.bf16.vlgmr.msra.gmra.mxu0 %v5959_v25  ;;  %v5977_v51 = vsel %vm5422_vm6, %v5967_v5, %v5976_v30  ;;  %v15053_v5 = vshll.u32 %v13248_v0, 16  ;;  %v5994_v47 = vor.u32 %v5993_v60, %v5990_v40  ;;  %v15057_v40 = vshll.u32 %v13359_v22, 16 }
 0x2ec   : > { %10401 = vmatprep.mubr.bf16.mxu0 %v5968_v7  ;;  %10350 = vmatmul.mubr.bf16.gmra.mxu1 %v5446_v36  ;;  %v6000_v36 = vshll.u32 %v9021_v29, 16  ;;  %v15052_v29 = vshrl.u32 %v13248_v0, 16  ;;  %v10984_v0 = vld [vmem:[#allocation8 + $0x160] sm:$0xff]   ;;  %v5485_v38 = vor.u32 %v5484_v2, %v5483_v4  ;;  %v5495_v2 = vrot.slane %v15060_v11, 3 }
 0x2ed   : > { %10353 = vmatprep.mubr.bf16.mxu1 %v5450_v53  ;;  %10438 = vmatpush3.bf16.msra.mxu1 %v10966_v8  ;;  %v5454_v8 = vsel %vm5422_vm6, %v5449_v52, %v13447_v31  ;;  %v5999_v52 = vrot.slane %v5997_v35, 3  ;;  %v5464_v7 = vrot.slane %v15053_v5, 4  ;;  %v5481_v53 = vor.u32 %v5480_v46, %v5479_v21  ;;  %v10983_v31 = vld [vmem:[#allocation8 + $0x108] sm:$0xff]  }
 0x2ee   : > { %10439 = vmatprep.subr.bf16.mxu1 %v10969_v43  ;;  %10486 = vmatpush3.bf16.msra.mxu0 %v13301_v14  ;;  %v9022_v14 = vcombine.low %v13501_v20, %v13490_v61  ;;  %v6002_v49 = vrot.slane %v6000_v36, 4  ;;  %v5463_v25 = vrot.slane %v15052_v29, 3  ;;  %v13538_v36 = vld [vmem:[#allocation2 + $0x60] sm:$0xf]  ;;  %v5488_v60 = vrot.slane %v15057_v40, 4 }
 0x2ef   : > { %10487 = vmatprep.subr.bf16.mxu0 %v10979_v1  ;;  %v13545_v21 = vsel %vm5422_vm6, %v5481_v53, %v5485_v38  ;;  %v5462_v46 = vsel %vm5422_vm6, %v5457_v42, %v13471_v63  ;;  %v13553_v29 = vld [vmem:[#allocation2 + $0x68] sm:$0xf]  ;;  %v5995_v42 = vsel %vm5422_vm6, %v13497_v17, %v5994_v47  ;;  %v15062_v40 = vshll.u32 %v13293_v62, 16 }
 0x2f0   : > { %v6006_v55 = vshrl.u32 %v9022_v14, 16  ;;  %v13534_v35 = vor.u32 %v6002_v49, %v5999_v52  ;;  %v13536_v50 = vor.u32 %v5464_v7, %v5463_v25  ;;  %v10986_v52 = vld [vmem:[#allocation8 + $0x158] sm:$0xff]   ;;  %v15058_v25 = vshrl.u32 %v13365_v39, 16 }
 0x2f1   : > { %10440 = vmatpush3.bf16.msra.mxu1 %v10969_v43  ;;  %v5986_v43 = vsel %vm5422_vm6, %v5976_v30, %v13497_v17  ;;  %v13532_v30 = vsel %vm5422_vm6, %v13510_v44, %v5481_v53 }
 0x2f2   : > { %10441 = vmatprep.subr.bf16.mxu1 %v10973_v48  ;;  %10488 = vmatpush3.bf16.msra.mxu0 %v10979_v1  ;;  %v6009_v1 = vshll.u32 %v9022_v14, 16  ;;  %v6008_v49 = vrot.slane %v6006_v55, 3  ;;  %v5491_v5 = vrot.slane %v15058_v25, 3  ;;  %v6004_v12 = vsel %vm5422_vm6, %v5994_v47, %v13534_v35  ;;  %v10990_v47 = vld [vmem:[#allocation8 + $0x150] sm:$0xff]  }
 0x2f3   : > { %10402 = vmatmul.mubr.bf16.gmra.mxu0 %v5977_v51  ;;  %10489 = vmatprep.subr.bf16.mxu0 %v10981_v57  ;;  %v15056_v51 = vshrl.u32 %v13359_v22, 16  ;;  %v5466_v4 = vsel %vm5422_vm6, %v13471_v63, %v13536_v50  ;;  %v15061_v63 = vshrl.u32 %v13293_v62, 16 }
 0x2f4   : > { %10405 = vmatprep.mubr.bf16.mxu0 %v5986_v43  ;;  %10354 = vmatmul.mubr.bf16.gmra.mxu1 %v5454_v8  ;;  %v6018_v8 = vshll.u32 %v9023_v23, 16  ;;  %v9025_v23 = vcombine.low %v13540_v37, %v13553_v29  ;;  %v15059_v43 = vshll.u32 %v13365_v39, 16  ;;  %v6017_v39 = vrot.slane %v6015_v13, 3 }
 0x2f5   : > { %10357 = vmatprep.mubr.bf16.mxu1 %v5458_v54  ;;  %10442 = vmatpush3.bf16.msra.mxu1 %v10973_v48  ;;  %v13542_v48 = vld [vmem:[#allocation2 + $0x5c] sm:$0xf]  ;;  %v5487_v14 = vrot.slane %v15056_v51, 3  ;;  %v10989_v54 = vld [vmem:[#allocation2 + $0x94] ss:$0 sps:$4 sm:$0xff]  }
 0x2f6   : > { %10443 = vmatprep.subr.bf16.mxu1 %v10978_v18  ;;  %10490 = vmatpush3.bf16.msra.mxu0 %v10981_v57  ;;  %v6011_v57 = vrot.slane %v6009_v1, 4  ;;  %v9024_v7 = vcombine.low %v13542_v48, %v13538_v36  ;;  %v5492_v53 = vrot.slane %v15059_v43, 4  ;;  %v6020_v55 = vrot.slane %v6018_v8, 4 }
 0x2f7   : > { %10491 = vmatprep.subr.bf16.mxu0 %v10984_v0  ;;  %v5489_v22 = vor.u32 %v5488_v60, %v5487_v14  ;;  %v5471_v14 = vrot.slane %v15061_v63, 3  ;;  %v15063_v60 = vshll.u32 %v13398_v45, 16  ;;  %v6036_v43 = vshll.u32 %v9025_v23, 16 }
 0x2f8   : > { %v5493_v17 = vor.u32 %v5492_v53, %v5491_v5  ;;  %v6012_v51 = vor.u32 %v6011_v57, %v6008_v49  ;;  %v6024_v13 = vshrl.u32 %v9024_v7, 16  ;;  %v6027_v8 = vshll.u32 %v9024_v7, 16  ;;  %v13586_v53 = vld [vmem:[#allocation8 + $0x1b8] sm:$0xff]   ;;  %v13588_v7 = vld [vmem:[#allocation2 + $0x6c] sm:$0xf] }
 0x2f9   : > { %10444 = vmatpush3.bf16.msra.mxu1 %v10978_v18  ;;  %v10988_v18 = vld [vmem:[#allocation8 + $0x100] sm:$0xff]   ;;  %v13573_v1 = vsel %vm5422_vm6, %v5485_v38, %v5489_v22  ;;  %v5496_v25 = vrot.slane %v15063_v60, 4  ;;  %v6033_v38 = vshrl.u32 %v9025_v23, 16  ;;  %v5500_v57 = vshrl.u32 %v10989_v54, 16 }
 0x2fa   : > { %10445 = vmatprep.subr.bf16.mxu1 %v10983_v31  ;;  %10492 = vmatpush3.bf16.msra.mxu0 %v10984_v0  ;;  %v5472_v0 = vrot.slane %v15062_v40, 4  ;;  %v13582_v5 = vsel %vm5422_vm6, %v5489_v22, %v5493_v17  ;;  %v5503_v62 = vshll.u32 %v10989_v54, 16  ;;  %v6021_v45 = vor.u32 %v6020_v55, %v6017_v39  ;;  %v13599_v55 = vld [vmem:[#allocation2 + $0x78] sm:$0xf] }
 0x2fb   : > { %10406 = vmatmul.mubr.bf16.gmra.mxu0 %v5995_v42  ;;  %10493 = vmatprep.subr.bf16.mxu0 %v10986_v52  ;;  %v5497_v49 = vor.u32 %v5496_v25, %v5495_v2  ;;  %v10993_v42 = vld [vmem:[#allocation8 + $0x148] sm:$0xff]   ;;  %v5502_v23 = vrot.slane %v5500_v57, 3  ;;  %v6029_v11 = vrot.slane %v6027_v8, 4  ;;  %v6035_v54 = vrot.slane %v6033_v38, 3  ;;  %v10996_v40 = vld [vmem:[#allocation8 + $0x140] sm:$0xff]  }
 0x2fc   : > { %10409 = vmatprep.mubr.bf16.mxu0 %v6004_v12  ;;  %10358 = vmatmul.mubr.bf16.gmra.mxu1 %v5462_v46  ;;  %v13584_v46 = vld [vmem:[#allocation2 + $0x70] sm:$0xf]  ;;  %v5473_v12 = vor.u32 %v5472_v0, %v5471_v14  ;;  %v6038_v39 = vrot.slane %v6036_v43, 4  ;;  %v5505_v63 = vrot.slane %v5503_v62, 4  ;;  %v9041_v14 = vcombine.low %v13367_v41, %v13386_v16  ;;  %v13615_v43 = vld [vmem:[#allocation2 + $0x80] sm:$0xf] }
 0x2fd   : > { %10361 = vmatprep.mubr.bf16.mxu1 %v5466_v4  ;;  %10446 = vmatpush3.bf16.msra.mxu1 %v10983_v31  ;;  %v13590_v31 = vld [vmem:[#allocation2 + $0x74] sm:$0xf]  ;;  %v13593_v22 = vsel %vm5422_vm6, %v5493_v17, %v5497_v49  ;;  %v6026_v4 = vrot.slane %v6024_v13, 3  ;;  %v9026_v2 = vcombine.low %v13588_v7, %v13584_v46  ;;  %v5470_v17 = vsel %vm5422_vm6, %v13536_v50, %v13482_v24 }
 0x2fe   : > { %10494 = vmatpush3.bf16.msra.mxu0 %v10986_v52  ;;  %10447 = vmatprep.subr.bf16.mxu1 %v10988_v18  ;;  %v6013_v52 = vsel %vm5422_vm6, %v13534_v35, %v6012_v51  ;;  %v6022_v35 = vsel %vm5422_vm6, %v6012_v51, %v6021_v45  ;;  %v5474_v0 = vsel %vm5422_vm6, %v13482_v24, %v5473_v12  ;;  %v13619_v62 = vld [vmem:[#allocation8 + $0x1f8] sm:$0xff]   ;;  %v13621_v24 = vld [vmem:[#allocation2 + $0x84] sm:$0xf] }
 0x2ff   : > { %10495 = vmatprep.subr.bf16.mxu0 %v10990_v47  ;;  %v6042_v60 = vshrl.u32 %v9026_v2, 16  ;;  %v6045_v25 = vshll.u32 %v9026_v2, 16  ;;  %v6030_v13 = vor.u32 %v6029_v11, %v6026_v4  ;;  %v6039_v51 = vor.u32 %v6038_v39, %v6035_v54 }
 0x300   : > { %v9043_v57 = vcombine.low %v13405_v34, %v13415_v19  ;;  %v5478_v54 = vsel %vm5422_vm6, %v5473_v12, %v13510_v44 }
 0x301   : > { %10448 = vmatpush3.bf16.msra.mxu1 %v10988_v18  ;;  %v9027_v18 = vcombine.low %v13590_v31, %v13599_v55  ;;  %v6047_v4 = vrot.slane %v6045_v25, 4  ;;  %v6031_v11 = vsel %vm5422_vm6, %v6021_v45, %v6030_v13  ;;  %v6040_v2 = vsel %vm5422_vm6, %v6030_v13, %v6039_v51 }
 0x302   : > { %10496 = vmatpush3.bf16.msra.mxu0 %v10990_v47  ;;  %10537 = vmatprep.subr.bf16.mxu1 %v13586_v53  ;;  %v5506_v47 = vor.u32 %v5505_v63, %v5502_v23  ;;  %v13635_v63 = vld [vmem:[#allocation2 + $0x88] sm:$0xf] }
 0x303   : > { %10410 = vmatmul.mubr.bf16.gmra.mxu0 %v6013_v52  ;;  %10497 = vmatprep.subr.bf16.mxu0 %v10993_v42  ;;  %v6051_v50 = vshrl.u32 %v9027_v18, 16  ;;  %v6054_v38 = vshll.u32 %v9027_v18, 16  ;;  %v6044_v52 = vrot.slane %v6042_v60, 3  ;;  %v9029_v18 = vcombine.low %v13621_v24, %v13635_v63 }
 0x304   : > { %10413 = vmatprep.mubr.bf16.mxu0 %v6022_v35  ;;  %10362 = vmatmul.mubr.bf16.gmra.mxu1 %v5470_v17  ;;  %v13613_v8 = vsel %vm5422_vm6, %v5497_v49, %v5506_v47  ;;  %v13625_v49 = vld [vmem:[#allocation2 + $0x7c] sm:$0xf] }
 0x305   : > { %10365 = vmatprep.mubr.bf16.mxu1 %v5474_v0  ;;  %v9028_v39 = vcombine.low %v13625_v49, %v13615_v43  ;;  %v6053_v35 = vrot.slane %v6051_v50, 3  ;;  %v6056_v17 = vrot.slane %v6054_v38, 4  ;;  %v6048_v12 = vor.u32 %v6047_v4, %v6044_v52  ;;  %v13647_v50 = vld [vmem:[#allocation2 + $0x90] sm:$0xf] }
 0x306   : > { %10498 = vmatpush3.bf16.msra.mxu0 %v10993_v42  ;;  %v6069_v25 = vshrl.u32 %v9029_v18, 16  ;;  %v6072_v13 = vshll.u32 %v9029_v18, 16  ;;  %v11009_v42 = vld [vmem:[#allocation2 + $0x40] sm:$0xff]  }
 0x307   : > { %10499 = vmatprep.subr.bf16.mxu0 %v10996_v40  ;;  %v6063_v0 = vshll.u32 %v9028_v39, 16  ;;  %v6057_v60 = vor.u32 %v6056_v17, %v6053_v35  ;;  %v13660_v35 = vld [vmem:[#allocation2 + $0x98] sm:$0xf] }
 0x308   : > { %v6071_v38 = vrot.slane %v6069_v25, 3 }
 0x309   : > { %v6065_v4 = vrot.slane %v6063_v0, 4  ;;  %v6058_v18 = vsel %vm5422_vm6, %v6048_v12, %v6057_v60 }
 0x30a   : > { %10500 = vmatpush3.bf16.msra.mxu0 %v10996_v40  ;;  %v6060_v40 = vshrl.u32 %v9028_v39, 16 }
 0x30b   : > { %10414 = vmatmul.mubr.bf16.gmra.mxu0 %v6031_v11  ;;  %10589 = vmatprep.subr.bf16.mxu0 %v13619_v62  ;;  %v13651_v11 = vld [vmem:[#allocation2 + $0x94] sm:$0xf] }
 0x30c   : > { %10417 = vmatprep.mubr.bf16.mxu0 %v6040_v2  ;;  %10366 = vmatmul.mubr.bf16.gmra.mxu1 %v5478_v54  ;;  %v6049_v2 = vsel %vm5422_vm6, %v6039_v51, %v6048_v12  ;;  %v13654_v54 = vld [vmem:[#allocation2 + $0x8c] sm:$0xf]  ;;  %v6062_v52 = vrot.slane %v6060_v40, 3  ;;  %v6074_v51 = vrot.slane %v6072_v13, 4  ;;  %v9031_v47 = vcombine.low %v13651_v11, %v13660_v35 }
 0x30d   : > { %10369 = vmatprep.mubr.bf16.mxu1 %v13532_v30  ;;  %v9030_v39 = vcombine.low %v13654_v54, %v13647_v50 }
 0x30e   : > { %v6066_v17 = vor.u32 %v6065_v4, %v6062_v52  ;;  %v6075_v12 = vor.u32 %v6074_v51, %v6071_v38  ;;  %v6087_v25 = vshrl.u32 %v9031_v47, 16  ;;  %v6090_v13 = vshll.u32 %v9031_v47, 16 }
 0x30f   : > { %v6081_v30 = vshll.u32 %v9030_v39, 16 }
 0x310   : > { %v6067_v40 = vsel %vm5422_vm6, %v6057_v60, %v6066_v17  ;;  %v6076_v38 = vsel %vm5422_vm6, %v6066_v17, %v6075_v12  ;;  %v6089_v4 = vrot.slane %v6087_v25, 3  ;;  %v6092_v47 = vrot.slane %v6090_v13, 4 }
 0x311   : > { %v6083_v45 = vrot.slane %v6081_v30, 4 }
 0x312   : > { %v6093_v17 = vor.u32 %v6092_v47, %v6089_v4 }
 0x313   : > { %10418 = vmatmul.mubr.bf16.gmra.mxu0 %v6049_v2  ;;  %v6078_v2 = vshrl.u32 %v9030_v39, 16  ;;  %v10994_v39 = vld [vmem:[#allocation2 + $0x10] sm:$0xff]  }
 0x314   : > { %10421 = vmatprep.mubr.bf16.mxu0 %v6058_v18  ;;  %10370 = vmatmul.mubr.bf16.gmra.mxu1 %v13545_v21  ;;  %v13677_v18 = vld [vmem:[#allocation2 + $0x9c] sm:$0xf]  ;;  %v6847_v25 = vshll.u32 %v10994_v39, 16 }
 0x315   : > { %10373 = vmatprep.mubr.bf16.mxu1 %v13573_v1  ;;  %15064 = vst [vmem:[#allocation24_spill] sm:$0xff] %v13677_v18  ;;  %v6080_v1 = vrot.slane %v6078_v2, 3  ;;  %v9032_v60 = vcombine.low %v13677_v18, %v13677_v18  ;;  %v13691_v2 = vld [vmem:[#allocation2 + $0x28] sm:$0xff]   ;;  %v10995_v21 = vld [vmem:[#allocation2 + $0x18] sm:$0xff]  }
 0x316   : > { %15065 = vst [vmem:[#allocation17_spill] sm:$0xff] %v13691_v2  ;;  %v6849_v44 = vrot.slane %v6847_v25, 1  ;;  %v14843_v0 = vshrl.u32 %v13691_v2, 16  ;;  %v6852_v47 = vshll.u32 %v10995_v21, 16  ;;  %v13721_v18 = vld [vmem:[#allocation2 + $0x68] sm:$0xff]  }
 0x317   : > { %v6096_v13 = vshrl.u32 %v9032_v60, 16  ;;  %v6099_v52 = vshll.u32 %v9032_v60, 16 }
 0x318   : > { %v8215_v60 = vrot.slane %v14843_v0, 1 }
 0x31b   : > { %10422 = vmatmul.mubr.bf16.gmra.mxu0 %v6067_v40  ;;  %v6084_v40 = vor.u32 %v6083_v45, %v6080_v1  ;;  %v6098_v45 = vrot.slane %v6096_v13, 3  ;;  %v6101_v1 = vrot.slane %v6099_v52, 4  ;;  %v11000_v13 = vld [vmem:[#allocation2 + $0x28] sm:$0xff]   ;;  %v11004_v52 = vld [vmem:[#allocation2 + $0x30] sm:$0xff]  }
 0x31c   : > { %10425 = vmatprep.mubr.bf16.mxu0 %v6076_v38  ;;  %10374 = vmatmul.mubr.bf16.gmra.mxu1 %v13582_v5  ;;  %v14842_v5 = vshll.u32 %v13691_v2, 16 }
 0x31d   : > { %10377 = vmatprep.mubr.bf16.mxu1 %v13593_v22  ;;  %v6085_v38 = vsel %vm5422_vm6, %v6075_v12, %v6084_v40  ;;  %v6094_v51 = vsel %vm5422_vm6, %v6084_v40, %v6093_v17  ;;  %v10999_v22 = vld [vmem:[#allocation2 + $0x20] sm:$0xff]   ;;  %v6845_v12 = vshrl.u32 %v10994_v39, 16  ;;  %v11014_v39 = vld [vmem:[#allocation2 + $0x50] sm:$0xff]  }
 0x31e   : > { %v8216_v4 = vrot.slane %v14842_v5, 2  ;;  %v6860_v25 = vshll.u32 %v10999_v22, 16  ;;  %v11003_v5 = vld [vmem:[#allocation8 + $0x1b0] sm:$0xff]  }
 0x31f   : > { %v6850_v40 = vor.u32 %v6849_v44, %v6845_v12  ;;  %v15066_v44 = vcombine.low %v13045_v10, %v13051_v56  ;;  %v11008_v12 = vld [vmem:[#allocation8 + $0x1a8] sm:$0xff]  }
 0x320   : > { %v6862_v16 = vrot.slane %v6860_v25, 1  ;;  %v13716_v10 = vld [vmem:[#allocation2 + $0x60] sm:$0xff]  }
 0x321   : > { %v6924_v2 = vshll.u32 %v13716_v10, 16 }
 0x323   : > { %10426 = vmatmul.mubr.bf16.gmra.mxu0 %v6085_v38  ;;  %v13705_v38 = vor.u32 %v8216_v4, %v8215_v60  ;;  %v11010_v4 = vld [vmem:[#allocation2 + $0x48] sm:$0xff]   ;;  %v11015_v60 = vld [vmem:[#allocation2 + $0x58] sm:$0xff]  }
 0x324   : > { %10429 = vmatprep.mubr.bf16.mxu0 %v6094_v51  ;;  %10378 = vmatmul.mubr.bf16.gmra.mxu1 %v13613_v8  ;;  %v6102_v51 = vor.u32 %v6101_v1, %v6098_v45  ;;  %v6854_v8 = vrot.slane %v6852_v47, 1  ;;  %v6868_v45 = vshll.u32 %v11000_v13, 16  ;;  %v6856_v1 = vshrl.u32 %v10995_v21, 16  ;;  %v11013_v21 = vld [vmem:[#allocation8 + $0x1a0] sm:$0xff]  }
 0x325   : > { %10449 = vmatprep.mubr.bf16.mxu1 %v9041_v14  ;;  %v11005_v14 = vld [vmem:[#allocation2 + $0x38] sm:$0xff]   ;;  %v6892_v47 = vshll.u32 %v11009_v42, 16 }
 0x326   : > { %v6103_v30 = vsel %vm5422_vm6, %v6093_v17, %v6102_v51  ;;  %v6855_v41 = vsel %vm513_vm0, %v6850_v40, %v6854_v8  ;;  %v6864_v17 = vshrl.u32 %v10999_v22, 16  ;;  %v6884_v25 = vshll.u32 %v11005_v14, 16 }
 0x327   : > { %v6908_v51 = vshll.u32 %v11014_v39, 16  ;;  %v6858_v56 = vor.u32 %v6856_v1, %v6854_v8  ;;  %v6916_v22 = vshll.u32 %v11015_v60, 16  ;;  %v11028_v8 = vld [vmem:[#allocation8 + $0x1f0] sm:$0xff]  }
 0x328   : > { %v6866_v40 = vor.u32 %v6864_v17, %v6862_v16  ;;  %v6886_v17 = vrot.slane %v6884_v25, 1 }
 0x329   : > { %v6863_v19 = vsel %vm513_vm0, %v6858_v56, %v6862_v16  ;;  %v6910_v23 = vrot.slane %v6908_v51, 1  ;;  %v6896_v16 = vshrl.u32 %v11009_v42, 16  ;;  %v6904_v56 = vshrl.u32 %v11010_v4, 16 }
 0x32a   : > { %v13730_v42 = vrot.slane %v6924_v2, 1  ;;  %v6928_v2 = vshrl.u32 %v13716_v10, 16  ;;  %v13761_v10 = vld [vmem:[#allocation2 + $0x58] sm:$0xff]  }
 0x32b   : > { %10430 = vmatmul.mubr.bf16.gmra.mxu0 %v6103_v30  ;;  %v6876_v30 = vshll.u32 %v11004_v52, 16 }
 0x32c   : > { %10501 = vmatprep.mubr.bf16.mxu0 %v6855_v41  ;;  %10450 = vmatmul.mubr.bf16.vlgmr.msra.gmra.mxu1 %v15066_v44  ;;  %v6900_v41 = vshll.u32 %v11010_v4, 16  ;;  %v6870_v44 = vrot.slane %v6868_v45, 1 }
 0x32d   : > { %10453 = vmatprep.mubr.bf16.mxu1 %v9043_v57  ;;  %10538 = vmatpush3.bf16.msra.mxu1 %v13586_v53  ;;  %v6878_v34 = vrot.slane %v6876_v30, 1  ;;  %v6880_v53 = vshrl.u32 %v11004_v52, 16  ;;  %v6894_v57 = vrot.slane %v6892_v47, 1  ;;  %v6872_v52 = vshrl.u32 %v11000_v13, 16 }
 0x32e   : > { %10539 = vmatprep.subr.bf16.mxu1 %v11003_v5  ;;  %v6871_v0 = vsel %vm513_vm0, %v6866_v40, %v6870_v44  ;;  %v6902_v45 = vrot.slane %v6900_v41, 1  ;;  %v15068_v30 = vcombine.low %v13434_v32, %v13444_v28  ;;  %v6888_v47 = vshrl.u32 %v11005_v14, 16  ;;  %v13733_v32 = vld [vmem:[#allocation2 + $0x70] sm:$0xff]   ;;  %v11031_v28 = vld [vmem:[#allocation8 + $0x1e8] sm:$0xff]  }
 0x32f   : > { %v6882_v1 = vor.u32 %v6880_v53, %v6878_v34  ;;  %v6912_v40 = vshrl.u32 %v11014_v39, 16  ;;  %v6874_v25 = vor.u32 %v6872_v52, %v6870_v44  ;;  %v6898_v51 = vor.u32 %v6896_v16, %v6894_v57  ;;  %v13737_v41 = vld [vmem:[#allocation2 + $0x30] sm:$0xff]   ;;  %v13745_v53 = vld [vmem:[#allocation2 + $0x38] sm:$0xff]  }
 0x330   : > { %v6932_v13 = vshll.u32 %v13721_v18, 16  ;;  %v6906_v14 = vor.u32 %v6904_v56, %v6902_v45  ;;  %v6920_v39 = vshrl.u32 %v11015_v60, 16  ;;  %v13767_v16 = vor.u32 %v6928_v2, %v13730_v42 }
 0x331   : > { %10540 = vmatpush3.bf16.msra.mxu1 %v11003_v5  ;;  %v15067_v5 = vcombine.low %v13421_v6, %v13432_v27  ;;  %v6890_v6 = vor.u32 %v6888_v47, %v6886_v17  ;;  %v6914_v27 = vor.u32 %v6912_v40, %v6910_v23  ;;  %v6879_v4 = vsel %vm513_vm0, %v6874_v25, %v6878_v34 }
 0x332   : > { %10541 = vmatprep.subr.bf16.mxu1 %v11008_v12  ;;  %v13752_v60 = vsel %vm513_vm0, %v6898_v51, %v6902_v45  ;;  %v13755_v52 = vsel %vm513_vm0, %v6906_v14, %v6910_v23  ;;  %v13769_v45 = vrot.slane %v6932_v13, 1  ;;  %v15069_v47 = vcombine.low %v13449_v26, %v13465_v15  ;;  %v11033_v13 = vld [vmem:[#allocation8 + $0x188] sm:$0xff]   ;;  %v11042_v14 = vld [vmem:[#allocation8 + $0x1d0] sm:$0xff]  }
 0x333   : > { %10502 = vmatmul.mubr.bf16.vlgmr.msra.gmra.mxu0 %v6863_v19  ;;  %v11019_v19 = vld [vmem:[#allocation8 + $0x198] sm:$0xff]   ;;  %v13742_v44 = vsel %vm513_vm0, %v6890_v6, %v6894_v57  ;;  %v11026_v57 = vld [vmem:[#allocation8 + $0x190] sm:$0xff]   ;;  %v14850_v51 = vshll.u32 %v13737_v41, 16  ;;  %v14849_v56 = vshrl.u32 %v13737_v41, 16  ;;  %v13785_v6 = vld [vmem:[#allocation2 + $0x78] sm:$0xff]   ;;  %v15074_v23 = vshll.u32 %v13745_v53, 16 }
 0x334   : > { %10505 = vmatprep.mubr.bf16.mxu0 %v6871_v0  ;;  %10454 = vmatmul.mubr.bf16.gmra.mxu1 %v15067_v5  ;;  %v6918_v0 = vrot.slane %v6916_v22, 1  ;;  %v13747_v22 = vld [vmem:[#allocation2 + $0x40] sm:$0xff]   ;;  %v13749_v5 = vld [vmem:[#allocation2 + $0x48] sm:$0xff]  }
 0x335   : > { %10457 = vmatprep.mubr.bf16.mxu1 %v15068_v30  ;;  %10542 = vmatpush3.bf16.msra.mxu1 %v11008_v12  ;;  %v13735_v12 = vld [vmem:[#allocation2 + $0x20] sm:$0xff]   ;;  %v11035_v30 = vld [vmem:[#allocation8 + $0x1e0] sm:$0xff]  }
 0x336   : > { %10543 = vmatprep.subr.bf16.mxu1 %v11013_v21  ;;  %10590 = vmatpush3.bf16.msra.mxu0 %v13619_v62  ;;  %v6887_v62 = vsel %vm513_vm0, %v6882_v1, %v6886_v17  ;;  %v13757_v34 = vor.u32 %v6920_v39, %v6918_v0  ;;  %v13764_v17 = vsel %vm513_vm0, %v6914_v27, %v6918_v0  ;;  %v13772_v1 = vld [vmem:[#allocation2 + $0x60] sm:$0xff]   ;;  %v14848_v40 = vshll.u32 %v13735_v12, 16  ;;  %v13783_v0 = vld [vmem:[#allocation2 + $0x70] sm:$0xff]   ;;  %v13808_v39 = vld [vmem:[#allocation2 + $0x98] sm:$0xff]  }
 0x337   : > { %10591 = vmatprep.subr.bf16.mxu0 %v11028_v8  ;;  %v14847_v25 = vshrl.u32 %v13735_v12, 16  ;;  %v15070_v27 = vcombine.low %v13463_v58, %v13467_v9  ;;  %v11040_v58 = vld [vmem:[#allocation8 + $0x180] sm:$0xff]   ;;  %v8219_v9 = vrot.slane %v14849_v56, 1  ;;  %v15075_v56 = vcombine.low %v13490_v61, %v13503_v3 }
 0x338   : > { %v8212_v15 = vrot.slane %v14848_v40, 2 }
 0x339   : > { %10544 = vmatpush3.bf16.msra.mxu1 %v11013_v21  ;;  %v13759_v21 = vld [vmem:[#allocation2 + $0x50] sm:$0xff]  }
 0x33a   : > { %10545 = vmatprep.subr.bf16.mxu1 %v11019_v19  ;;  %10592 = vmatpush3.bf16.msra.mxu0 %v11028_v8  ;;  %v13774_v8 = vld [vmem:[#allocation2 + $0x68] sm:$0xff]  }
 0x33b   : > { %10506 = vmatmul.mubr.bf16.gmra.mxu0 %v6879_v4  ;;  %10593 = vmatprep.subr.bf16.mxu0 %v11031_v28  ;;  %v13794_v4 = vld [vmem:[#allocation2 + $0x80] sm:$0xff]  }
 0x33c   : > { %10509 = vmatprep.mubr.bf16.mxu0 %v6887_v62  ;;  %10458 = vmatmul.mubr.bf16.gmra.mxu1 %v15069_v47  ;;  %v13802_v47 = vld [vmem:[#allocation2 + $0x90] sm:$0xff]   ;;  %v13818_v62 = vld [vmem:[#allocation2 + $0xa0] sm:$0xff]  }
 0x33d   : > { %10461 = vmatprep.mubr.bf16.mxu1 %v15070_v27  ;;  %10546 = vmatpush3.bf16.msra.mxu1 %v11019_v19  ;;  %v13800_v19 = vld [vmem:[#allocation2 + $0x88] sm:$0xff]   ;;  %v11038_v27 = vld [vmem:[#allocation8 + $0x1d8] sm:$0xff]  }
 0x33e   : > { %10547 = vmatprep.subr.bf16.mxu1 %v11026_v57  ;;  %10594 = vmatpush3.bf16.msra.mxu0 %v11031_v28  ;;  %v15073_v28 = vshrl.u32 %v13745_v53, 16 }
 0x33f   : > { %10595 = vmatprep.subr.bf16.mxu0 %v11035_v30 }
 0x340   : > { %v8223_v2 = vrot.slane %v15073_v28, 1  ;;  %v13853_v28 = vld [vmem:[#allocation8 + $0x238] sm:$0xff]  }
 0x341   : > { %10548 = vmatpush3.bf16.msra.mxu1 %v11026_v57  ;;  %v8211_v57 = vrot.slane %v14847_v25, 1  ;;  %v15071_v25 = vcombine.low %v13469_v33, %v13501_v20  ;;  %v15076_v20 = vshrl.u32 %v13747_v22, 16 }
 0x342   : > { %10549 = vmatprep.subr.bf16.mxu1 %v11033_v13  ;;  %10596 = vmatpush3.bf16.msra.mxu0 %v11035_v30  ;;  %v8224_v30 = vrot.slane %v15074_v23, 2 }
 0x343   : > { %10510 = vmatmul.mubr.bf16.gmra.mxu0 %v13742_v44  ;;  %10597 = vmatprep.subr.bf16.mxu0 %v11038_v27  ;;  %v13836_v40 = vor.u32 %v8212_v15, %v8211_v57  ;;  %v8220_v44 = vrot.slane %v14850_v51, 2  ;;  %v15077_v15 = vshll.u32 %v13747_v22, 16  ;;  %v11046_v51 = vld [vmem:[#allocation8 + $0x1c8] sm:$0xff]  }
 0x344   : > { %10513 = vmatprep.mubr.bf16.mxu0 %v13752_v60  ;;  %10462 = vmatmul.mubr.bf16.gmra.mxu1 %v15071_v25  ;;  %v8227_v25 = vrot.slane %v15076_v20, 1  ;;  %v8225_v23 = vor.u32 %v8224_v30, %v8223_v2  ;;  %v15080_v60 = vshrl.u32 %v13759_v21, 16 }
 0x345   : > { %15072 = vst [vmem:[#allocation20_spill] sm:$0xff] %v13836_v40  ;;  %10465 = vmatprep.mubr.bf16.mxu1 %v15075_v56  ;;  %10550 = vmatpush3.bf16.msra.mxu1 %v11033_v13  ;;  %v8228_v57 = vrot.slane %v15077_v15, 2  ;;  %v13858_v61 = vsel %vm1970_vm2, %v13836_v40, %v13705_v38  ;;  %v8221_v3 = vor.u32 %v8220_v44, %v8219_v9  ;;  %v15078_v56 = vshrl.u32 %v13749_v5, 16 }
 0x346   : > { %10598 = vmatpush3.bf16.msra.mxu0 %v11038_v27  ;;  %10551 = vmatprep.subr.bf16.mxu1 %v11040_v58  ;;  %v15079_v27 = vshll.u32 %v13749_v5, 16  ;;  %v8235_v26 = vrot.slane %v15080_v60, 1  ;;  %v15082_v9 = vshll.u32 %v13759_v21, 16  ;;  %v15083_v44 = vshrl.u32 %v13761_v10, 16 }
 0x347   : > { %v8231_v13 = vrot.slane %v15078_v56, 1  ;;  %10599 = vmatprep.subr.bf16.mxu0 %v11042_v14  ;;  %v8229_v33 = vor.u32 %v8228_v57, %v8227_v25  ;;  %v13869_v40 = vsel %vm1970_vm2, %v13705_v38, %v8221_v3  ;;  %v13872_v2 = vsel %vm1970_vm2, %v8221_v3, %v8225_v23 }
 0x348   : > { %v8232_v15 = vrot.slane %v15079_v27, 2  ;;  %15081 = vst [vmem:[#allocation16_spill] sm:$0xff] %v13872_v2  ;;  %v8236_v30 = vrot.slane %v15082_v9, 2  ;;  %v8239_v56 = vrot.slane %v15083_v44, 1  ;;  %v15085_v60 = vshll.u32 %v13761_v10, 16 }
 0x349   : > { %10552 = vmatpush3.bf16.msra.mxu1 %v11040_v58  ;;  %v13879_v25 = vsel %vm1970_vm2, %v8225_v23, %v8229_v33  ;;  %v15086_v38 = vshrl.u32 %v13772_v1, 16  ;;  %v15087_v9 = vshll.u32 %v13772_v1, 16  ;;  %v15088_v44 = vshrl.u32 %v13774_v8, 16 }
 0x34a   : > { %15084 = vst [vmem:[#allocation22_spill] sm:$0xff] %v13879_v25  ;;  %v8233_v57 = vor.u32 %v8232_v15, %v8231_v13  ;;  %v8240_v27 = vrot.slane %v15085_v60, 2  ;;  %10600 = vmatpush3.bf16.msra.mxu0 %v11042_v14  ;;  %10641 = vmatprep.subr.bf16.mxu1 %v13853_v28  ;;  %v8237_v3 = vor.u32 %v8236_v30, %v8235_v26  ;;  %v15089_v23 = vshll.u32 %v13774_v8, 16  ;;  %v11049_v13 = vld [vmem:[#allocation8 + $0x1c0] sm:$0xff]  }
 0x34b   : > { %v8243_v20 = vrot.slane %v15086_v38, 1  ;;  %v8244_v2 = vrot.slane %v15087_v9, 2  ;;  %v8247_v58 = vrot.slane %v15088_v44, 1  ;;  %10514 = vmatmul.mubr.bf16.gmra.mxu0 %v13755_v52  ;;  %10601 = vmatprep.subr.bf16.mxu0 %v11046_v51  ;;  %v15090_v60 = vshrl.u32 %v13783_v0, 16 }
 0x34c   : > { %v8248_v25 = vrot.slane %v15089_v23, 2  ;;  %v13894_v15 = vsel %vm1970_vm2, %v8229_v33, %v8233_v57  ;;  %v8241_v14 = vor.u32 %v8240_v27, %v8239_v56  ;;  %v15091_v30 = vshll.u32 %v13783_v0, 16  ;;  %10517 = vmatprep.mubr.bf16.mxu0 %v13764_v17 }
 0x34d   : > { %v8251_v26 = vrot.slane %v15090_v60, 1  ;;  %v15092_v9 = vcombine.low %v13512_v59, %v13542_v48  ;;  %v13905_v52 = vsel %vm1970_vm2, %v8233_v57, %v8237_v3  ;;  %v8245_v44 = vor.u32 %v8244_v2, %v8243_v20 }
 0x34e   : > { %v8252_v38 = vrot.slane %v15091_v30, 2  ;;  %v8249_v23 = vor.u32 %v8248_v25, %v8247_v58  ;;  %v15093_v33 = vshrl.u32 %v13785_v6, 16  ;;  %v15094_v27 = vcombine.low %v13538_v36, %v13540_v37  ;;  %10602 = vmatpush3.bf16.msra.mxu0 %v11046_v51 }
 0x34f   : > { %10466 = vmatmul.mubr.bf16.gmra.mxu1 %v15092_v9  ;;  %v13913_v60 = vsel %vm1970_vm2, %v8237_v3, %v8241_v14  ;;  %v15095_v30 = vshll.u32 %v13785_v6, 16  ;;  %v15096_v48 = vshrl.u32 %v13794_v4, 16  ;;  %v13920_v20 = vsel %vm1970_vm2, %v8241_v14, %v8245_v44  ;;  %10603 = vmatprep.subr.bf16.mxu0 %v11049_v13 }
 0x350   : > { %v8255_v56 = vrot.slane %v15093_v33, 1  ;;  %10469 = vmatprep.mubr.bf16.mxu1 %v15094_v27  ;;  %v8253_v17 = vor.u32 %v8252_v38, %v8251_v26  ;;  %v13923_v2 = vsel %vm1970_vm2, %v8245_v44, %v8249_v23  ;;  %v15098_v36 = vshll.u32 %v13794_v4, 16 }
 0x351   : > { %v8256_v59 = vrot.slane %v15095_v30, 2  ;;  %v8259_v57 = vrot.slane %v15096_v48, 1  ;;  %15097 = vst [vmem:[#allocation25_spill] sm:$0xff] %v13923_v2  ;;  %v15099_v25 = vshrl.u32 %v13800_v19, 16  ;;  %v15101_v38 = vshll.u32 %v13800_v19, 16  ;;  %v11025_v2 = vld [vmem:[#allocation2 + $0x78] sm:$0xff]  }
 0x352   : > { %v8260_v37 = vrot.slane %v15098_v36, 2  ;;  %v13930_v58 = vsel %vm1970_vm2, %v8249_v23, %v8253_v17  ;;  %v15102_v14 = vshrl.u32 %v13802_v47, 16  ;;  %v15103_v44 = vshll.u32 %v13802_v47, 16  ;;  %10604 = vmatpush3.bf16.msra.mxu0 %v11049_v13 }
 0x353   : > { %v8263_v3 = vrot.slane %v15099_v25, 1  ;;  %15100 = vst [vmem:[#allocation18_spill] sm:$0xff] %v13930_v58  ;;  %v8257_v26 = vor.u32 %v8256_v59, %v8255_v56  ;;  %v8264_v51 = vrot.slane %v15101_v38, 2  ;;  %v15104_v30 = vshrl.u32 %v13808_v39, 16 }
 0x354   : > { %v8267_v9 = vrot.slane %v15102_v14, 1  ;;  %v8261_v33 = vor.u32 %v8260_v37, %v8259_v57  ;;  %v8268_v27 = vrot.slane %v15103_v44, 2  ;;  %v15105_v36 = vshll.u32 %v13808_v39, 16 }
 0x355   : > { %v8271_v48 = vrot.slane %v15104_v30, 1  ;;  %v13943_v23 = vsel %vm1970_vm2, %v8253_v17, %v8257_v26  ;;  %v8265_v56 = vor.u32 %v8264_v51, %v8263_v3  ;;  %v15107_v59 = vshrl.u32 %v13818_v62, 16 }
 0x356   : > { %v8272_v25 = vrot.slane %v15105_v36, 2  ;;  %15106 = vst [vmem:[#allocation23_spill] sm:$0xff] %v13943_v23  ;;  %v15108_v14 = vshll.u32 %v13818_v62, 16  ;;  %v6927_v37 = vsel %vm513_vm0, %v13757_v34, %v13730_v42  ;;  %v13953_v44 = vsel %vm1970_vm2, %v8257_v26, %v8261_v33 }
 0x357   : > { %v8275_v38 = vrot.slane %v15107_v59, 1  ;;  %15109 = vst [vmem:[#allocation28_spill] sm:$0xff] %v13953_v44  ;;  %v8269_v30 = vor.u32 %v8268_v27, %v8267_v9  ;;  %10518 = vmatmul.mubr.bf16.gmra.mxu0 %v6927_v37  ;;  %v6935_v17 = vsel %vm513_vm0, %v13767_v16, %v13769_v45  ;;  %v15110_v3 = vshll.u32 %v13733_v32, 16  ;;  %v11030_v59 = vld [vmem:[#allocation2 + $0x80] sm:$0xff]   ;;  %v10243_v27 = vpop.f32.mrf.mxu1 }
 0x358   : > { %v8276_v57 = vrot.slane %v15108_v14, 2  ;;  %v8273_v36 = vor.u32 %v8272_v25, %v8271_v48  ;;  %v13961_v14 = vsel %vm1970_vm2, %v8261_v33, %v8265_v56  ;;  %10521 = vmatprep.mubr.bf16.mxu0 %v6935_v17  ;;  %v15113_v42 = vcombine.low %v13553_v29, %v13588_v7  ;;  %v13986_v17 = vld [vmem:[#allocation2 + $0x1c] sm:$0xf] }
 0x359   : > { %v6942_v51 = vrot.slane %v15110_v3, 1  ;;  %15111 = vst [vmem:[#allocation26_spill] sm:$0xff] %v13961_v14  ;;  %v13969_v34 = vsel %vm1970_vm2, %v8265_v56, %v8269_v30  ;;  %v15116_v16 = vcombine.low %v13584_v46, %v13590_v31  ;;  %v6944_v26 = vshrl.u32 %v13733_v32, 16 }
 0x35a   : > { %v13963_v23 = vor.u32 %v8276_v57, %v8275_v38  ;;  %10470 = vmatmul.mubr.bf16.gmra.mxu1 %v15113_v42  ;;  %15114 = vst [vmem:[#allocation31_spill] sm:$0xff] %v13969_v34  ;;  %v13972_v13 = vsel %vm1970_vm2, %v8269_v30, %v8273_v36  ;;  %v6948_v9 = vshll.u32 %v11025_v2, 16  ;;  %v6936_v29 = vshrl.u32 %v13721_v18, 16  ;;  %v4842_v38 = vpop.f32.mrf.mxu1  ;;  %v11032_v57 = vld [vmem:[#allocation2 + $0x88] sm:$0xff]   ;;  %v11037_v30 = vld [vmem:[#allocation2 + $0x90] sm:$0xff]  }
 0x35b   : > { %15115 = vst [vmem:[#allocation32_spill] sm:$0xff] %v13972_v13  ;;  %10473 = vmatprep.mubr.bf16.mxu1 %v15116_v16  ;;  %v6946_v7 = vor.u32 %v6944_v26, %v6942_v51  ;;  %v6956_v48 = vshll.u32 %v11030_v59, 16  ;;  %v15118_v18 = vcombine.low %v13599_v55, %v13625_v49  ;;  %v6960_v3 = vshrl.u32 %v11030_v59, 16 }
 0x35c   : > { %15112 = vst [vmem:[#allocation30_spill] sm:$0xff] %v13963_v23  ;;  %v13980_v33 = vsel %vm1970_vm2, %v8273_v36, %v13963_v23  ;;  %v6938_v25 = vor.u32 %v6936_v29, %v13769_v45  ;;  %v6950_v56 = vrot.slane %v6948_v9, 1  ;;  %v10244_v32 = vpop.f32.mrf.mxu1  ;;  %v7271_v36 = vld [vmem:[#allocation2 + $0x18] sm:$0xf]  ;;  %v15119_v45 = vcombine.low %v13615_v43, %v13621_v24 }
 0x35d   : > { %15117 = vst [vmem:[#allocation33_spill] sm:$0xff] %v13980_v33  ;;  %v6958_v37 = vrot.slane %v6956_v48, 1  ;;  %v6952_v16 = vshrl.u32 %v11025_v2, 16  ;;  %v9094_v26 = vcombine.low %v7271_v36, %v13986_v17  ;;  %v6972_v48 = vshll.u32 %v11037_v30, 16 }
 0x35e   : > { %v6943_v46 = vsel %vm513_vm0, %v6938_v25, %v6942_v51  ;;  %v6951_v31 = vsel %vm513_vm0, %v6946_v7, %v6950_v56  ;;  %v6964_v51 = vshll.u32 %v11032_v57, 16  ;;  %v4845_v42 = vpop.f32.mrf.mxu1  ;;  %v15141_v13 = vshrl.u32 %v13761_v10, 16 }
 0x35f   : > { %10522 = vmatmul.mubr.bf16.gmra.mxu0 %v6943_v46  ;;  %v10295_v9 = vpop.f32.mrf.mxu0  ;;  %v6962_v29 = vor.u32 %v6960_v3, %v6958_v37  ;;  %v6954_v46 = vor.u32 %v6952_v16, %v6950_v56  ;;  %v7421_v59 = vshll.u32 %v9094_v26, 16  ;;  %v6974_v3 = vrot.slane %v6972_v48, 1  ;;  %v11045_v48 = vld [vmem:[#allocation2 + $0xa0] ss:$0 sps:$4 sm:$0x11]  }
 0x360   : > { %10525 = vmatprep.mubr.bf16.mxu0 %v6951_v31  ;;  %v10247_v7 = vpop.f32.mrf.mxu1  ;;  %v13995_v25 = vadd.f32 %v10295_v9, %v10243_v27  ;;  %v6966_v31 = vrot.slane %v6964_v51, 1  ;;  %v15120_v27 = vcombine.low %v13635_v63, %v13654_v54  ;;  %v15121_v56 = vcombine.low %v13647_v50, %v13651_v11 }
 0x361   : > { %v5258_v55 = vpop.f32.mrf.mxu0  ;;  %v6959_v43 = vsel %vm513_vm0, %v6954_v46, %v6958_v37  ;;  %v6976_v37 = vshrl.u32 %v11037_v30, 16  ;;  %v7423_v46 = vrot.slane %v7421_v59, 1  ;;  %v7419_v54 = vshrl.u32 %v9094_v26, 16  ;;  %v15123_v26 = vld [vmem:[#allocation24_spill] sm:$0xff] }
 0x362   : > { %10474 = vmatmul.mubr.bf16.gmra.mxu1 %v15118_v18  ;;  %v4858_v49 = vpop.f32.mrf.mxu1  ;;  %v11039_v18 = vld [vmem:[#allocation2 + $0x98] sm:$0xff]   ;;  %v13998_v24 = vadd.f32 %v5258_v55, %v4842_v38  ;;  %v6967_v2 = vsel %vm513_vm0, %v6962_v29, %v6966_v31  ;;  %v6968_v29 = vshrl.u32 %v11032_v57, 16  ;;  %v6988_v59 = vshll.u32 %v11045_v48, 16 }
 0x363   : > { %10477 = vmatprep.mubr.bf16.mxu1 %v15119_v45  ;;  %v10296_v36 = vpop.f32.mrf.mxu0  ;;  %v6980_v51 = vshll.u32 %v11039_v18, 16 }
 0x364   : > { %v10248_v45 = vpop.f32.mrf.mxu1  ;;  %v14001_v23 = vadd.f32 %v10296_v36, %v10244_v32  ;;  %v6978_v32 = vor.u32 %v6976_v37, %v6974_v3  ;;  %v15122_v36 = vshll.u32 %v13735_v12, 16 }
 0x365   : > { %v5261_v38 = vpop.f32.mrf.mxu0  ;;  %v6982_v11 = vrot.slane %v6980_v51, 1 }
 0x366   : > { %v4861_v16 = vpop.f32.mrf.mxu1  ;;  %v14009_v9 = vadd.f32 %v5261_v38, %v4845_v42  ;;  %v7428_v50 = vrot.slane %v15122_v36, 1  ;;  %v7424_v42 = vor.u32 %v7423_v46, %v7419_v54  ;;  %v7845_v38 = vld [vmem:[#allocation2 + $0x18] sm:$0xe] }
 0x367   : > { %10526 = vmatmul.mubr.bf16.gmra.mxu0 %v6959_v43  ;;  %v10299_v55 = vpop.f32.mrf.mxu0  ;;  %v14026_v48 = vcombine.low %v7845_v38, %v13986_v17 }
 0x368   : > { %10529 = vmatprep.mubr.bf16.mxu0 %v6967_v2  ;;  %v14011_v43 = vadd.f32 %v10299_v55, %v10247_v7  ;;  %v6970_v2 = vor.u32 %v6968_v29, %v6966_v31  ;;  %v10251_v63 = vpop.f32.mrf.mxu1  ;;  %v6983_v7 = vsel %vm513_vm0, %v6978_v32, %v6982_v11  ;;  %v15124_v29 = vcombine.low %v13660_v35, %v15123_v26 }
 0x369   : > { %v7429_v51 = vsel %vm513_vm0, %v7424_v42, %v7428_v50  ;;  %v15127_v35 = vshrl.u32 %v13735_v12, 16  ;;  %v7867_v42 = vrot.slane %v13735_v12, 1  ;;  %v7866_v17 = vrot.slane %v14026_v48, 1 }
 0x36a   : > { %10478 = vmatmul.mubr.bf16.gmra.mxu1 %v15120_v27  ;;  %v5274_v27 = vpop.f32.mrf.mxu0  ;;  %v6975_v30 = vsel %vm513_vm0, %v6970_v2, %v6974_v3  ;;  %v4874_v57 = vpop.f32.mrf.mxu1  ;;  %v6990_v2 = vrot.slane %v6988_v59, 1 }
 0x36b   : > { %10481 = vmatprep.mubr.bf16.mxu1 %v15121_v56  ;;  %v14016_v56 = vadd.f32 %v5274_v27, %v4858_v49  ;;  %v6984_v49 = vshrl.u32 %v11039_v18, 16  ;;  %v15128_v18 = vshll.u32 %v13737_v41, 16 }
 0x36c   : > { %v10300_v37 = vpop.f32.mrf.mxu0  ;;  %v10252_v3 = vpop.f32.mrf.mxu1 }
 0x36d   : > { %v14019_v31 = vadd.f32 %v10300_v37, %v10248_v45  ;;  %v6986_v32 = vor.u32 %v6984_v49, %v6982_v11  ;;  %v15125_v45 = vld [vmem:[#allocation17_spill] sm:$0xff]  ;;  %v7444_v37 = vrot.slane %v15128_v18, 1 }
 0x36e   : > { %v5277_v46 = vpop.f32.mrf.mxu0  ;;  %v4877_v54 = vpop.f32.mrf.mxu1  ;;  %v15126_v36 = vshll.u32 %v15125_v45, 16  ;;  %v15129_v38 = vshrl.u32 %v15125_v45, 16 }
 0x36f   : > { %10530 = vmatmul.mubr.bf16.gmra.mxu0 %v6975_v30  ;;  %v14028_v55 = vadd.f32 %v5277_v46, %v4861_v16  ;;  %v7432_v30 = vor.u32 %v15127_v35, %v7428_v50  ;;  %v6991_v11 = vsel %vm513_vm0, %v6986_v32, %v6990_v2  ;;  %v7868_v50 = vsel %vm1169_vm1, %v7866_v17, %v7867_v42 }
 0x370   : > { %10533 = vmatprep.mubr.bf16.mxu0 %v6983_v7  ;;  %v7436_v27 = vrot.slane %v15126_v36, 1  ;;  %v10303_v7 = vpop.f32.mrf.mxu0 }
 0x371   : > { %v14037_v26 = vadd.f32 %v10303_v7, %v10251_v63  ;;  %v10255_v16 = vpop.f32.mrf.mxu1  ;;  %v15130_v7 = vshll.u32 %v13745_v53, 16 }
 0x372   : > { %10482 = vmatmul.mubr.bf16.gmra.mxu1 %v15124_v29  ;;  %v5290_v59 = vpop.f32.mrf.mxu0  ;;  %v7440_v29 = vor.u32 %v15129_v38, %v7436_v27  ;;  %v7437_v49 = vsel %vm513_vm0, %v7432_v30, %v7436_v27  ;;  %v7871_v27 = vrot.slane %v13737_v41, 1  ;;  %v15132_v38 = vshll.u32 %v13747_v22, 16 }
 0x373   : > { %10553 = vmatprep.mubr.bf16.mxu1 %v7429_v51  ;;  %v11054_v51 = vld [vmem:[#allocation8 + $0x230] sm:$0xff]   ;;  %v14044_v12 = vadd.f32 %v5290_v59, %v4874_v57  ;;  %v4890_v46 = vpop.f32.mrf.mxu1  ;;  %v7452_v18 = vrot.slane %v15130_v7, 1  ;;  %v11057_v57 = vld [vmem:[#allocation8 + $0x228] sm:$0xff]  }
 0x374   : > { %v10304_v63 = vpop.f32.mrf.mxu0  ;;  %v7445_v36 = vsel %vm513_vm0, %v7440_v29, %v7444_v37 }
 0x375   : > { %v14048_v35 = vadd.f32 %v10304_v63, %v10252_v3  ;;  %v10256_v32 = vpop.f32.mrf.mxu1  ;;  %v7869_v3 = vrot.slane %v15125_v45, 1 }
 0x376   : > { %v5293_v2 = vpop.f32.mrf.mxu0 }
 0x377   : > { %10534 = vmatmul.mubr.bf16.gmra.mxu0 %v6991_v11  ;;  %v14053_v17 = vadd.f32 %v5293_v2, %v4877_v54  ;;  %v4893_v30 = vpop.f32.mrf.mxu1  ;;  %v15131_v11 = vshrl.u32 %v13737_v41, 16  ;;  %v15133_v54 = vshrl.u32 %v13745_v53, 16  ;;  %v7872_v41 = vsel %vm1169_vm1, %v7869_v3, %v7871_v27 }
 0x378   : > { %10605 = vmatprep.mubr.bf16.mxu0 %v7868_v50 }
 0x379   : > { %v7448_v59 = vor.u32 %v15131_v11, %v7444_v37  ;;  %v10307_v29 = vpop.f32.mrf.mxu0  ;;  %v7456_v63 = vor.u32 %v15133_v54, %v7452_v18 }
 0x37a   : > { %10554 = vmatmul.mubr.bf16.vlgmr.msra.gmra.mxu1 %v7437_v49  ;;  %v14061_v50 = vadd.f32 %v10307_v29, %v10255_v16  ;;  %v7870_v49 = vsel %vm1169_vm1, %v7867_v42, %v7869_v3  ;;  %v11063_v3 = vld [vmem:[#allocation8 + $0x218] sm:$0xff]  }
 0x37b   : > { %10557 = vmatprep.mubr.bf16.mxu1 %v7445_v36  ;;  %10642 = vmatpush3.bf16.msra.mxu1 %v13853_v28  ;;  %v7460_v28 = vrot.slane %v15132_v38, 1  ;;  %v11060_v36 = vld [vmem:[#allocation8 + $0x220] sm:$0xff]   ;;  %v5306_v37 = vpop.f32.mrf.mxu0  ;;  %v10259_v2 = vpop.f32.mrf.mxu1  ;;  %v7453_v45 = vsel %vm513_vm0, %v7448_v59, %v7452_v18  ;;  %v15134_v38 = vshll.u32 %v13749_v5, 16  ;;  %v7875_v18 = vrot.slane %v13747_v22, 1 }
 0x37c   : > { %10643 = vmatprep.subr.bf16.mxu1 %v11054_v51  ;;  %v14068_v7 = vadd.f32 %v5306_v37, %v4890_v46  ;;  %v15135_v46 = vshrl.u32 %v13747_v22, 16 }
 0x37d   : > { %v7461_v16 = vsel %vm513_vm0, %v7456_v63, %v7460_v28  ;;  %v4906_v42 = vpop.f32.mrf.mxu1  ;;  %v7468_v29 = vrot.slane %v15134_v38, 1  ;;  %v7873_v63 = vrot.slane %v13745_v53, 1  ;;  %v11066_v38 = vld [vmem:[#allocation8 + $0x210] sm:$0xff]  }
 0x37e   : > { %v7464_v59 = vor.u32 %v15135_v46, %v7460_v28 }
 0x37f   : > { %10644 = vmatpush3.bf16.msra.mxu1 %v11054_v51  ;;  %10606 = vmatmul.mubr.bf16.vlgmr.msra.gmra.mxu0 %v7870_v49  ;;  %v10308_v51 = vpop.f32.mrf.mxu0  ;;  %v10260_v54 = vpop.f32.mrf.mxu1  ;;  %v7876_v22 = vsel %vm1169_vm1, %v7873_v63, %v7875_v18 }
 0x380   : > { %10645 = vmatprep.subr.bf16.mxu1 %v11057_v57  ;;  %10609 = vmatprep.mubr.bf16.mxu0 %v7872_v41  ;;  %v14071_v11 = vadd.f32 %v10308_v51, %v10256_v32 }
 0x381   : > { %v5309_v49 = vpop.f32.mrf.mxu0  ;;  %v4909_v37 = vpop.f32.mrf.mxu1 }
 0x382   : > { %10558 = vmatmul.mubr.bf16.gmra.mxu1 %v7453_v45  ;;  %v14078_v41 = vadd.f32 %v5309_v49, %v4893_v30  ;;  %v7874_v45 = vsel %vm1169_vm1, %v7871_v27, %v7873_v63  ;;  %v7469_v30 = vsel %vm513_vm0, %v7464_v59, %v7468_v29  ;;  %v11069_v63 = vld [vmem:[#allocation8 + $0x208] sm:$0xff]  }
 0x383   : > { %10561 = vmatprep.mubr.bf16.mxu1 %v7461_v16  ;;  %10646 = vmatpush3.bf16.msra.mxu1 %v11057_v57  ;;  %v15136_v57 = vshll.u32 %v13759_v21, 16  ;;  %v15137_v16 = vshrl.u32 %v13749_v5, 16  ;;  %v10311_v33 = vpop.f32.mrf.mxu0 }
 0x384   : > { %10647 = vmatprep.subr.bf16.mxu1 %v11060_v36  ;;  %v14088_v28 = vadd.f32 %v10311_v33, %v10259_v2  ;;  %v10263_v53 = vpop.f32.mrf.mxu1  ;;  %v7879_v33 = vrot.slane %v13759_v21, 1  ;;  %v15139_v2 = vshrl.u32 %v13759_v21, 16  ;;  %v11072_v21 = vld [vmem:[#allocation8 + $0x200] sm:$0xff]  }
 0x385   : > { %v7476_v32 = vrot.slane %v15136_v57, 1  ;;  %v7472_v51 = vor.u32 %v15137_v16, %v7468_v29  ;;  %v5322_v49 = vpop.f32.mrf.mxu0  ;;  %v15138_v57 = vshll.u32 %v13761_v10, 16 }
 0x386   : > { %v14091_v27 = vadd.f32 %v5322_v49, %v4906_v42  ;;  %v4922_v46 = vpop.f32.mrf.mxu1  ;;  %v15140_v42 = vshll.u32 %v13772_v1, 16 }
 0x387   : > { %10648 = vmatpush3.bf16.msra.mxu1 %v11060_v36  ;;  %10610 = vmatmul.mubr.bf16.gmra.mxu0 %v7874_v45  ;;  %v7477_v36 = vsel %vm513_vm0, %v7472_v51, %v7476_v32  ;;  %v7484_v45 = vrot.slane %v15138_v57, 1  ;;  %v10312_v16 = vpop.f32.mrf.mxu0  ;;  %v7480_v29 = vor.u32 %v15139_v2, %v7476_v32 }
 0x388   : > { %10649 = vmatprep.subr.bf16.mxu1 %v11063_v3  ;;  %10613 = vmatprep.mubr.bf16.mxu0 %v7876_v22  ;;  %v14098_v59 = vadd.f32 %v10312_v16, %v10260_v54  ;;  %v10264_v51 = vpop.f32.mrf.mxu1  ;;  %v7877_v22 = vrot.slane %v13749_v5, 1 }
 0x389   : > { %v7488_v34 = vor.u32 %v15141_v13, %v7484_v45  ;;  %v7485_v5 = vsel %vm513_vm0, %v7480_v29, %v7484_v45  ;;  %v7883_v45 = vrot.slane %v13772_v1, 1 }
 0x38a   : > { %10562 = vmatmul.mubr.bf16.gmra.mxu1 %v7469_v30  ;;  %v5325_v30 = vpop.f32.mrf.mxu0  ;;  %v7878_v49 = vsel %vm1169_vm1, %v7875_v18, %v7877_v22  ;;  %v4925_v57 = vpop.f32.mrf.mxu1  ;;  %v7880_v32 = vsel %vm1169_vm1, %v7877_v22, %v7879_v33 }
 0x38b   : > { %10565 = vmatprep.mubr.bf16.mxu1 %v7477_v36  ;;  %10650 = vmatpush3.bf16.msra.mxu1 %v11063_v3  ;;  %v7492_v3 = vrot.slane %v15140_v42, 1  ;;  %v14103_v36 = vadd.f32 %v5325_v30, %v4909_v37  ;;  %v15142_v42 = vshll.u32 %v13774_v8, 16 }
 0x38c   : > { %10651 = vmatprep.subr.bf16.mxu1 %v11066_v38  ;;  %v10315_v54 = vpop.f32.mrf.mxu0 }
 0x38d   : > { %v14110_v16 = vadd.f32 %v10315_v54, %v10263_v53  ;;  %v7493_v37 = vsel %vm513_vm0, %v7488_v34, %v7492_v3  ;;  %v7500_v30 = vrot.slane %v15142_v42, 1  ;;  %v15143_v53 = vshrl.u32 %v13772_v1, 16 }
 0x38e   : > { %v5338_v18 = vpop.f32.mrf.mxu0  ;;  %v7881_v34 = vrot.slane %v13761_v10, 1  ;;  %v15145_v42 = vshrl.u32 %v13774_v8, 16 }
 0x38f   : > { %10652 = vmatpush3.bf16.msra.mxu1 %v11066_v38  ;;  %10614 = vmatmul.mubr.bf16.gmra.mxu0 %v7878_v49  ;;  %v10267_v38 = vpop.f32.mrf.mxu1  ;;  %v14113_v2 = vadd.f32 %v5338_v18, %v4922_v46  ;;  %v7496_v29 = vor.u32 %v15143_v53, %v7492_v3 }
 0x390   : > { %10653 = vmatprep.subr.bf16.mxu1 %v11069_v63  ;;  %10617 = vmatprep.mubr.bf16.mxu0 %v7880_v32  ;;  %v10316_v22 = vpop.f32.mrf.mxu0  ;;  %v7504_v14 = vor.u32 %v15145_v42, %v7500_v30 }
 0x391   : > { %v4938_v13 = vpop.f32.mrf.mxu1  ;;  %v14120_v49 = vadd.f32 %v10316_v22, %v10264_v51  ;;  %v7884_v51 = vsel %vm1169_vm1, %v7881_v34, %v7883_v45  ;;  %v7501_v3 = vsel %vm513_vm0, %v7496_v29, %v7500_v30  ;;  %v15147_v30 = vshrl.u32 %v13783_v0, 16 }
 0x392   : > { %10566 = vmatmul.mubr.bf16.gmra.mxu1 %v7485_v5  ;;  %v5341_v32 = vpop.f32.mrf.mxu0 }
 0x393   : > { %10569 = vmatprep.mubr.bf16.mxu1 %v7493_v37  ;;  %10654 = vmatpush3.bf16.msra.mxu1 %v11069_v63  ;;  %v10268_v54 = vpop.f32.mrf.mxu1  ;;  %v15144_v63 = vshll.u32 %v13783_v0, 16  ;;  %v14125_v5 = vadd.f32 %v5341_v32, %v4925_v57  ;;  %v7882_v37 = vsel %vm1169_vm1, %v7879_v33, %v7881_v34  ;;  %v7887_v34 = vrot.slane %v13783_v0, 1 }
 0x394   : > { %10655 = vmatprep.subr.bf16.mxu1 %v11072_v21  ;;  %v10319_v1 = vpop.f32.mrf.mxu0 }
 0x395   : > { %v7508_v46 = vrot.slane %v15144_v63, 1  ;;  %v4941_v18 = vpop.f32.mrf.mxu1  ;;  %v14132_v10 = vadd.f32 %v10319_v1, %v10267_v38  ;;  %v15146_v63 = vshll.u32 %v13785_v6, 16  ;;  %v7885_v1 = vrot.slane %v13774_v8, 1 }
 0x397   : > { %10656 = vmatpush3.bf16.msra.mxu1 %v11072_v21  ;;  %10618 = vmatmul.mubr.bf16.gmra.mxu0 %v7882_v37  ;;  %v10271_v22 = vpop.f32.mrf.mxu1  ;;  %v7509_v57 = vsel %vm513_vm0, %v7504_v14, %v7508_v46  ;;  %v5354_v21 = vpop.f32.mrf.mxu0  ;;  %v7516_v32 = vrot.slane %v15146_v63, 1  ;;  %v7512_v38 = vor.u32 %v15147_v30, %v7508_v46  ;;  %v15148_v14 = vshll.u32 %v13794_v4, 16 }
 0x398   : > { %10621 = vmatprep.mubr.bf16.mxu0 %v7884_v51  ;;  %v14135_v33 = vadd.f32 %v5354_v21, %v4938_v13  ;;  %v15149_v63 = vshrl.u32 %v13785_v6, 16  ;;  %v7888_v0 = vsel %vm1169_vm1, %v7885_v1, %v7887_v34 }
 0x399   : > { %v4954_v53 = vpop.f32.mrf.mxu1  ;;  %v10320_v37 = vpop.f32.mrf.mxu0  ;;  %v7524_v51 = vrot.slane %v15148_v14, 1  ;;  %v15152_v14 = vshll.u32 %v13800_v19, 16 }
 0x39a   : > { %10570 = vmatmul.mubr.bf16.gmra.mxu1 %v7501_v3  ;;  %v14142_v29 = vadd.f32 %v10320_v37, %v10268_v54  ;;  %v7520_v44 = vor.u32 %v15149_v63, %v7516_v32  ;;  %v7517_v54 = vsel %vm513_vm0, %v7512_v38, %v7516_v32  ;;  %v15153_v32 = vshrl.u32 %v13794_v4, 16 }
 0x39b   : > { %10573 = vmatprep.mubr.bf16.mxu1 %v7509_v57  ;;  %v10272_v42 = vpop.f32.mrf.mxu1  ;;  %v5357_v13 = vpop.f32.mrf.mxu0  ;;  %v7886_v57 = vsel %vm1169_vm1, %v7883_v45, %v7885_v1  ;;  %v7891_v1 = vrot.slane %v13794_v4, 1  ;;  %v7889_v63 = vrot.slane %v13785_v6, 1 }
 0x39c   : > { %v14147_v3 = vadd.f32 %v5357_v13, %v4941_v18  ;;  %v7525_v18 = vsel %vm513_vm0, %v7520_v44, %v7524_v51  ;;  %v7532_v13 = vrot.slane %v15152_v14, 1  ;;  %v15154_v44 = vshll.u32 %v13802_v47, 16 }
 0x39d   : > { %v4957_v21 = vpop.f32.mrf.mxu1  ;;  %v10323_v58 = vpop.f32.mrf.mxu0  ;;  %v15155_v14 = vshrl.u32 %v13800_v19, 16  ;;  %v7892_v4 = vsel %vm1169_vm1, %v7889_v63, %v7891_v1 }
 0x39e   : > { %v14154_v46 = vadd.f32 %v10323_v58, %v10271_v22  ;;  %v7528_v58 = vor.u32 %v15153_v32, %v7524_v51 }
 0x39f   : > { %10622 = vmatmul.mubr.bf16.gmra.mxu0 %v7886_v57  ;;  %v10275_v8 = vpop.f32.mrf.mxu1  ;;  %v5370_v37 = vpop.f32.mrf.mxu0 }
 0x3a0   : > { %15150 = vst [vmem:[#allocation34_spill] sm:$0xff] %v14154_v46  ;;  %10625 = vmatprep.mubr.bf16.mxu0 %v7888_v0  ;;  %v14157_v45 = vadd.f32 %v5370_v37, %v4954_v53  ;;  %v7540_v0 = vrot.slane %v15154_v44, 1 }
 0x3a1   : > { %v4970_v30 = vpop.f32.mrf.mxu1  ;;  %v10324_v57 = vpop.f32.mrf.mxu0 }
 0x3a2   : > { %10574 = vmatmul.mubr.bf16.gmra.mxu1 %v7517_v54  ;;  %15151 = vst [vmem:[#allocation35_spill] sm:$0xff] %v14157_v45  ;;  %v14164_v22 = vadd.f32 %v10324_v57, %v10272_v42  ;;  %v7536_v45 = vor.u32 %v15155_v14, %v7532_v13  ;;  %v7533_v42 = vsel %vm513_vm0, %v7528_v58, %v7532_v13  ;;  %v15156_v57 = vshll.u32 %v13808_v39, 16 }
 0x3a3   : > { %10577 = vmatprep.mubr.bf16.mxu1 %v7525_v18  ;;  %v10276_v38 = vpop.f32.mrf.mxu1  ;;  %v5373_v53 = vpop.f32.mrf.mxu0  ;;  %v7890_v18 = vsel %vm1169_vm1, %v7887_v34, %v7889_v63  ;;  %v15157_v58 = vshrl.u32 %v13802_v47, 16 }
 0x3a4   : > { %v14169_v54 = vadd.f32 %v5373_v53, %v4957_v21  ;;  %v7541_v21 = vsel %vm513_vm0, %v7536_v45, %v7540_v0  ;;  %v7548_v34 = vrot.slane %v15156_v57, 1  ;;  %v14182_v53 = vld [vmem:[#allocation2 + $0xa8] ss:$0 sps:$4 sm:$0x11]  }
 0x3a5   : > { %v4973_v37 = vpop.f32.mrf.mxu1  ;;  %v10327_v46 = vpop.f32.mrf.mxu0  ;;  %v7544_v45 = vor.u32 %v15157_v58, %v7540_v0  ;;  %v8204_v0 = vshrl.u32 %v14026_v48, 16 }
 0x3a6   : > { %v14176_v51 = vadd.f32 %v10327_v46, %v10275_v8  ;;  %v7895_v8 = vrot.slane %v13802_v47, 1 }
 0x3a7   : > { %10626 = vmatmul.mubr.bf16.gmra.mxu0 %v7890_v18  ;;  %v10347_v6 = vpop.f32.mrf.mxu1  ;;  %v5386_v32 = vpop.f32.mrf.mxu0 }
 0x3a8   : > { %10629 = vmatprep.mubr.bf16.mxu0 %v7892_v4  ;;  %v5753_v44 = vadd.f32 %v10347_v6, %v13995_v25  ;;  %v14184_v18 = vadd.f32 %v5386_v32, %v4970_v30  ;;  %v15158_v25 = vshrl.u32 %v13808_v39, 16  ;;  %v15159_v30 = vshll.u32 %v13818_v62, 16 }
 0x3a9   : > { %v5608_v63 = vpop.f32.mrf.mxu1  ;;  %v10328_v13 = vpop.f32.mrf.mxu0 }
 0x3aa   : > { %10578 = vmatmul.mubr.bf16.gmra.mxu1 %v7533_v42  ;;  %v5751_v46 = vadd.f32 %v5608_v63, %v13998_v24  ;;  %v14190_v14 = vadd.f32 %v10328_v13, %v10276_v38  ;;  %v7893_v42 = vrot.slane %v13800_v19, 1  ;;  %v7552_v6 = vor.u32 %v15158_v25, %v7548_v34 }
 0x3ab   : > { %10581 = vmatprep.mubr.bf16.mxu1 %v7541_v21  ;;  %v10348_v4 = vpop.f32.mrf.mxu1  ;;  %v7556_v21 = vrot.slane %v15159_v30, 1  ;;  %v5389_v57 = vpop.f32.mrf.mxu0  ;;  %v7562_v24 = vshll.u32 %v14182_v53, 16  ;;  %v8207_v19 = vshll.u32 %v14026_v48, 16  ;;  %v7549_v30 = vsel %vm513_vm0, %v7544_v45, %v7548_v34 }
 0x3ac   : > { %v5754_v32 = vadd.f32 %v10348_v4, %v14001_v23  ;;  %v14199_v63 = vadd.f32 %v5389_v57, %v4973_v37  ;;  %v7894_v47 = vsel %vm1169_vm1, %v7891_v1, %v7893_v42  ;;  %v7896_v58 = vsel %vm1169_vm1, %v7893_v42, %v7895_v8 }
 0x3ad   : > { %v5611_v38 = vpop.f32.mrf.mxu1  ;;  %v10399_v13 = vpop.f32.mrf.mxu0  ;;  %v7557_v1 = vsel %vm513_vm0, %v7552_v6, %v7556_v21  ;;  %v15161_v48 = vshrl.u32 %v13818_v62, 16  ;;  %v8209_v34 = vrot.slane %v8207_v19, 2  ;;  %v7899_v6 = vrot.slane %v13818_v62, 1 }
 0x3ae   : > { %15160 = vst [vmem:[#allocation36_spill] sm:$0xff] %v14199_v63  ;;  %v5752_v25 = vadd.f32 %v5611_v38, %v14009_v9  ;;  %v14207_v23 = vadd.f32 %v10399_v13, %v5753_v44  ;;  %v7564_v63 = vrot.slane %v7562_v24, 1  ;;  %v8206_v38 = vrot.slane %v8204_v0, 1 }
 0x3af   : > { %10630 = vmatmul.mubr.bf16.gmra.mxu0 %v7894_v47  ;;  %v10351_v37 = vpop.f32.mrf.mxu1  ;;  %v6204_v4 = vpop.f32.mrf.mxu0  ;;  %v7560_v47 = vor.u32 %v15161_v48, %v7556_v21  ;;  %v7897_v13 = vrot.slane %v13808_v39, 1 }
 0x3b0   : > { %10633 = vmatprep.mubr.bf16.mxu0 %v7896_v58  ;;  %v5757_v57 = vadd.f32 %v10351_v37, %v14011_v43  ;;  %v14213_v42 = vadd.f32 %v6204_v4, %v5751_v46  ;;  %v8210_v19 = vor.u32 %v8209_v34, %v8206_v38 }
 0x3b1   : > { %v5624_v9 = vpop.f32.mrf.mxu1  ;;  %v10400_v44 = vpop.f32.mrf.mxu0  ;;  %v7565_v21 = vsel %vm513_vm0, %v7560_v47, %v7564_v63  ;;  %v7898_v24 = vsel %vm1169_vm1, %v7895_v8, %v7897_v13  ;;  %v7900_v39 = vsel %vm1169_vm1, %v7897_v13, %v7899_v6 }
 0x3b2   : > { %10582 = vmatmul.mubr.bf16.gmra.mxu1 %v7549_v30  ;;  %v5755_v45 = vadd.f32 %v5624_v9, %v14016_v56  ;;  %v14218_v58 = vadd.f32 %v10400_v44, %v5754_v32 }
 0x3b3   : > { %10585 = vmatprep.mubr.bf16.mxu1 %v7557_v1  ;;  %v10352_v43 = vpop.f32.mrf.mxu1  ;;  %v6207_v30 = vpop.f32.mrf.mxu0 }
 0x3b4   : > { %v5758_v37 = vadd.f32 %v10352_v43, %v14019_v31  ;;  %v14222_v46 = vadd.f32 %v6207_v30, %v5752_v25  ;;  %v15162_v31 = vld [vmem:[#allocation20_spill] sm:$0xff]  ;;  %v7901_v25 = vrot.slane %v14182_v53, 1 }
 0x3b5   : > { %v5627_v0 = vpop.f32.mrf.mxu1  ;;  %v10403_v1 = vpop.f32.mrf.mxu0  ;;  %v8214_v63 = vsel %vm1970_vm2, %v8210_v19, %v15162_v31 }
 0x3b6   : > { %v5756_v62 = vadd.f32 %v5627_v0, %v14028_v55  ;;  %v14227_v56 = vadd.f32 %v10403_v1, %v5757_v57  ;;  %v7902_v34 = vsel %vm1169_vm1, %v7899_v6, %v7901_v25 }
 0x3b7   : > { %10634 = vmatmul.mubr.bf16.gmra.mxu0 %v7898_v24  ;;  %v10355_v32 = vpop.f32.mrf.mxu1  ;;  %v6220_v4 = vpop.f32.mrf.mxu0 }
 0x3b8   : > { %10637 = vmatprep.mubr.bf16.mxu0 %v7900_v39  ;;  %v5761_v8 = vadd.f32 %v10355_v32, %v14037_v26  ;;  %v14233_v48 = vadd.f32 %v6220_v4, %v5755_v45  ;;  %v15164_v4 = vld [vmem:[#allocation22_spill] sm:$0xff] }
 0x3b9   : > { %v5640_v47 = vpop.f32.mrf.mxu1  ;;  %v10404_v9 = vpop.f32.mrf.mxu0 }
 0x3ba   : > { %10586 = vmatmul.mubr.bf16.gmra.mxu1 %v7565_v21  ;;  %v5759_v55 = vadd.f32 %v5640_v47, %v14044_v12  ;;  %v14236_v57 = vadd.f32 %v10404_v9, %v5758_v37 }
 0x3bb   : > { %10657 = vmatprep.mubr.bf16.mxu1 %v8214_v63  ;;  %v10356_v38 = vpop.f32.mrf.mxu1  ;;  %v6223_v44 = vpop.f32.mrf.mxu0  ;;  %v15163_v63 = vld [vmem:[#allocation16_spill] sm:$0xff] }
 0x3bc   : > { %v5762_v13 = vadd.f32 %v10356_v38, %v14048_v35  ;;  %v14240_v43 = vadd.f32 %v6223_v44, %v5756_v62 }
 0x3bd   : > { %v5643_v53 = vpop.f32.mrf.mxu1  ;;  %v10407_v30 = vpop.f32.mrf.mxu0 }
 0x3be   : > { %v5760_v26 = vadd.f32 %v5643_v53, %v14053_v17  ;;  %v14243_v45 = vadd.f32 %v10407_v30, %v5761_v8 }
 0x3bf   : > { %10638 = vmatmul.mubr.bf16.gmra.mxu0 %v7902_v34  ;;  %v10359_v21 = vpop.f32.mrf.mxu1  ;;  %v6236_v12 = vpop.f32.mrf.mxu0 }
 0x3c0   : > { %v5765_v37 = vadd.f32 %v10359_v21, %v14061_v50  ;;  %v14248_v6 = vadd.f32 %v6236_v12, %v5759_v55 }
 0x3c1   : > { %v5656_v35 = vpop.f32.mrf.mxu1  ;;  %v10408_v24 = vpop.f32.mrf.mxu0 }
 0x3c2   : > { %10658 = vmatmul.mubr.bf16.vlgmr.msra.gmra.mxu1 %v13858_v61  ;;  %v5763_v0 = vadd.f32 %v5656_v35, %v14068_v7  ;;  %v14251_v19 = vadd.f32 %v10408_v24, %v5762_v13 }
 0x3c3   : > { %10661 = vmatprep.mubr.bf16.mxu1 %v13869_v40  ;;  %v10360_v1 = vpop.f32.mrf.mxu1  ;;  %v6239_v17 = vpop.f32.mrf.mxu0 }
 0x3c4   : > { %v5766_v39 = vadd.f32 %v10360_v1, %v14071_v11  ;;  %v14254_v62 = vadd.f32 %v6239_v17, %v5760_v26 }
 0x3c5   : > { %v5659_v61 = vpop.f32.mrf.mxu1  ;;  %v10411_v32 = vpop.f32.mrf.mxu0 }
 0x3c6   : > { %v5764_v50 = vadd.f32 %v5659_v61, %v14078_v41  ;;  %v14257_v31 = vadd.f32 %v10411_v32, %v5765_v37 }
 0x3c7   : > { %v10363_v40 = vpop.f32.mrf.mxu1  ;;  %v6252_v25 = vpop.f32.mrf.mxu0 }
 0x3c8   : > { %v5769_v7 = vadd.f32 %v10363_v40, %v14088_v28  ;;  %v14262_v8 = vadd.f32 %v6252_v25, %v5763_v0 }
 0x3c9   : > { %v5672_v47 = vpop.f32.mrf.mxu1  ;;  %v10412_v11 = vpop.f32.mrf.mxu0 }
 0x3ca   : > { %10662 = vmatmul.mubr.bf16.gmra.mxu1 %v15163_v63  ;;  %v5767_v9 = vadd.f32 %v5672_v47, %v14091_v27  ;;  %v14265_v55 = vadd.f32 %v10412_v11, %v5766_v39 }
 0x3cb   : > { %10665 = vmatprep.mubr.bf16.mxu1 %v15164_v4  ;;  %v10364_v38 = vpop.f32.mrf.mxu1  ;;  %v6255_v41 = vpop.f32.mrf.mxu0 }
 0x3cc   : > { %v5770_v34 = vadd.f32 %v10364_v38, %v14098_v59  ;;  %v14268_v44 = vadd.f32 %v6255_v41, %v5764_v50  ;;  %v15165_v38 = vld [vmem:[#allocation25_spill] sm:$0xff] }
 0x3cd   : > { %v5675_v13 = vpop.f32.mrf.mxu1  ;;  %v10415_v53 = vpop.f32.mrf.mxu0 }
 0x3ce   : > { %v5768_v28 = vadd.f32 %v5675_v13, %v14103_v36  ;;  %v14271_v30 = vadd.f32 %v10415_v53, %v5769_v7  ;;  %v15167_v13 = vld [vmem:[#allocation18_spill] sm:$0xff] }
 0x3cf   : > { %v10367_v26 = vpop.f32.mrf.mxu1  ;;  %v6268_v21 = vpop.f32.mrf.mxu0 }
 0x3d0   : > { %v5773_v27 = vadd.f32 %v10367_v26, %v14110_v16  ;;  %v14276_v12 = vadd.f32 %v6268_v21, %v5767_v9  ;;  %v15168_v26 = vld [vmem:[#allocation35_spill] sm:$0xff] }
 0x3d1   : > { %v5688_v37 = vpop.f32.mrf.mxu1  ;;  %v10416_v59 = vpop.f32.mrf.mxu0 }
 0x3d2   : > { %10666 = vmatmul.mubr.bf16.gmra.mxu1 %v13894_v15  ;;  %v5771_v35 = vadd.f32 %v5688_v37, %v14113_v2  ;;  %v14279_v24 = vadd.f32 %v10416_v59, %v5770_v34  ;;  %v15166_v34 = vld [vmem:[#allocation34_spill] sm:$0xff] }
 0x3d3   : > { %10669 = vmatprep.mubr.bf16.mxu1 %v13905_v52  ;;  %v10368_v0 = vpop.f32.mrf.mxu1  ;;  %v6271_v36 = vpop.f32.mrf.mxu0 }
 0x3d4   : > { %v5774_v1 = vadd.f32 %v10368_v0, %v14120_v49  ;;  %v14282_v17 = vadd.f32 %v6271_v36, %v5768_v28 }
 0x3d5   : > { %v5691_v15 = vpop.f32.mrf.mxu1  ;;  %v10419_v39 = vpop.f32.mrf.mxu0 }
 0x3d6   : > { %v5772_v16 = vadd.f32 %v5691_v15, %v14125_v5  ;;  %v14285_v61 = vadd.f32 %v10419_v39, %v5773_v27 }
 0x3d7   : > { %v10371_v52 = vpop.f32.mrf.mxu1  ;;  %v6284_v32 = vpop.f32.mrf.mxu0 }
 0x3d8   : > { %v5777_v2 = vadd.f32 %v10371_v52, %v14132_v10  ;;  %v14290_v50 = vadd.f32 %v6284_v32, %v5771_v35 }
 0x3d9   : > { %v5704_v40 = vpop.f32.mrf.mxu1  ;;  %v10420_v49 = vpop.f32.mrf.mxu0 }
 0x3da   : > { %10670 = vmatmul.mubr.bf16.gmra.mxu1 %v13913_v60  ;;  %v5775_v63 = vadd.f32 %v5704_v40, %v14135_v33  ;;  %v14293_v25 = vadd.f32 %v10420_v49, %v5774_v1 }
 0x3db   : > { %10673 = vmatprep.mubr.bf16.mxu1 %v13920_v20  ;;  %v10372_v7 = vpop.f32.mrf.mxu1  ;;  %v6287_v5 = vpop.f32.mrf.mxu0 }
 0x3dc   : > { %v5778_v4 = vadd.f32 %v10372_v7, %v14142_v29  ;;  %v14296_v47 = vadd.f32 %v6287_v5, %v5772_v16  ;;  %v15169_v16 = vld [vmem:[#allocation23_spill] sm:$0xff] }
 0x3dd   : > { %v5707_v60 = vpop.f32.mrf.mxu1  ;;  %v10423_v11 = vpop.f32.mrf.mxu0 }
 0x3de   : > { %v5776_v10 = vadd.f32 %v5707_v60, %v14147_v3  ;;  %v14299_v9 = vadd.f32 %v10423_v11, %v5777_v2  ;;  %v15170_v2 = vld [vmem:[#allocation28_spill] sm:$0xff]  ;;  %v11074_v60 = vld [vmem:[#allocation2 + $0xa8] ss:$0 sps:$4 sm:$0x33]  }
 0x3df   : > { %v10375_v20 = vpop.f32.mrf.mxu1  ;;  %v6300_v41 = vpop.f32.mrf.mxu0 }
 0x3e0   : > { %v5781_v33 = vadd.f32 %v10375_v20, %v15166_v34  ;;  %v14304_v53 = vadd.f32 %v6300_v41, %v5775_v63 }
 0x3e1   : > { %v5720_v28 = vpop.f32.mrf.mxu1  ;;  %v10424_v29 = vpop.f32.mrf.mxu0 }
 0x3e2   : > { %10674 = vmatmul.mubr.bf16.gmra.mxu1 %v15165_v38  ;;  %v5779_v21 = vadd.f32 %v5720_v28, %v15168_v26  ;;  %v14307_v27 = vadd.f32 %v10424_v29, %v5778_v4  ;;  %v15173_v28 = vld [vmem:[#allocation31_spill] sm:$0xff]  ;;  %v8280_v29 = vshrl.u32 %v11074_v60, 16  ;;  %v8283_v26 = vshll.u32 %v11074_v60, 16 }
 0x3e3   : > { %10677 = vmatprep.mubr.bf16.mxu1 %v15167_v13  ;;  %v10376_v37 = vpop.f32.mrf.mxu1  ;;  %v6303_v3 = vpop.f32.mrf.mxu0 }
 0x3e4   : > { %v5782_v59 = vadd.f32 %v10376_v37, %v14164_v22  ;;  %v14310_v35 = vadd.f32 %v6303_v3, %v5776_v10 }
 0x3e5   : > { %v5723_v0 = vpop.f32.mrf.mxu1  ;;  %v10427_v36 = vpop.f32.mrf.mxu0 }
 0x3e6   : > { %v5780_v1 = vadd.f32 %v5723_v0, %v14169_v54  ;;  %v14313_v15 = vadd.f32 %v10427_v36, %v5781_v33  ;;  %v15172_v33 = vld [vmem:[#allocation26_spill] sm:$0xff] }
 0x3e7   : > { %v10379_v39 = vpop.f32.mrf.mxu1  ;;  %v6316_v52 = vpop.f32.mrf.mxu0 }
 0x3e8   : > { %v5785_v32 = vadd.f32 %v10379_v39, %v14176_v51  ;;  %v14318_v40 = vadd.f32 %v6316_v52, %v5779_v21  ;;  %v15171_v51 = vld [vmem:[#allocation36_spill] sm:$0xff]  ;;  %v8282_v39 = vrot.slane %v8280_v29, 1 }
 0x3e9   : > { %v5736_v49 = vpop.f32.mrf.mxu1  ;;  %v10428_v22 = vpop.f32.mrf.mxu0 }
 0x3ea   : > { %10678 = vmatmul.mubr.bf16.gmra.mxu1 %v15169_v16  ;;  %v5783_v63 = vadd.f32 %v5736_v49, %v14184_v18  ;;  %v14321_v7 = vadd.f32 %v10428_v22, %v5782_v59  ;;  %v8285_v16 = vrot.slane %v8283_v26, 2 }
 0x3eb   : > { %10681 = vmatprep.mubr.bf16.mxu1 %v15170_v2  ;;  %v10380_v5 = vpop.f32.mrf.mxu1  ;;  %v6319_v54 = vpop.f32.mrf.mxu0 }
 0x3ec   : > { %v5786_v4 = vadd.f32 %v10380_v5, %v14190_v14  ;;  %v14324_v11 = vadd.f32 %v6319_v54, %v5780_v1  ;;  %v15175_v54 = vld [vmem:[#allocation33_spill] sm:$0xff] }
 0x3ed   : > { %v5739_v10 = vpop.f32.mrf.mxu1  ;;  %v10431_v20 = vpop.f32.mrf.mxu0 }
 0x3ee   : > { %v5784_v38 = vadd.f32 %v5739_v10, %v15171_v51  ;;  %v14327_v41 = vadd.f32 %v10431_v20, %v5785_v32 }
 0x3ef   : > { %v10451_v34 = vpop.f32.mrf.mxu1  ;;  %v6332_v13 = vpop.f32.mrf.mxu0 }
 0x3f0   : > { %v6663_v18 = vadd.f32 %v10451_v34, %v14207_v23  ;;  %v14332_v14 = vadd.f32 %v6332_v13, %v5783_v63  ;;  %v15174_v63 = vld [vmem:[#allocation32_spill] sm:$0xff] }
 0x3f1   : > { %v6518_v21 = vpop.f32.mrf.mxu1  ;;  %v10432_v37 = vpop.f32.mrf.mxu0 }
 0x3f2   : > { %10682 = vmatmul.mubr.bf16.gmra.mxu1 %v15172_v33  ;;  %v6661_v3 = vadd.f32 %v6518_v21, %v14213_v42  ;;  %v14335_v59 = vadd.f32 %v10432_v37, %v5786_v4  ;;  %v8286_v4 = vor.u32 %v8285_v16, %v8282_v39  ;;  %v15176_v33 = vld [vmem:[#allocation30_spill] sm:$0xff] }
 0x3f3   : > { %10685 = vmatprep.mubr.bf16.mxu1 %v15173_v28  ;;  %v10452_v0 = vpop.f32.mrf.mxu1  ;;  %v6335_v36 = vpop.f32.mrf.mxu0 }
 0x3f4   : > { %v6664_v1 = vadd.f32 %v10452_v0, %v14218_v58  ;;  %v14338_v52 = vadd.f32 %v6335_v36, %v5784_v38  ;;  %v8287_v13 = vsel %vm1970_vm2, %v15176_v33, %v8286_v4 }
 0x3f5   : > { %v6521_v23 = vpop.f32.mrf.mxu1  ;;  %v10503_v32 = vpop.f32.mrf.mxu0 }
 0x3f6   : > { %v6662_v2 = vadd.f32 %v6521_v23, %v14222_v46  ;;  %v14341_v49 = vadd.f32 %v10503_v32, %v6663_v18 }
 0x3f7   : > { %v10455_v22 = vpop.f32.mrf.mxu1  ;;  %v7092_v42 = vpop.f32.mrf.mxu0 }
 0x3f8   : > { %v6667_v5 = vadd.f32 %v10455_v22, %v14227_v56  ;;  %v14346_v58 = vadd.f32 %v7092_v42, %v6661_v3 }
 0x3f9   : > { %v6534_v60 = vpop.f32.mrf.mxu1  ;;  %v10504_v10 = vpop.f32.mrf.mxu0 }
 0x3fa   : > { %10686 = vmatmul.mubr.bf16.gmra.mxu1 %v15174_v63  ;;  %v6665_v20 = vadd.f32 %v6534_v60, %v14233_v48  ;;  %v14349_v51 = vadd.f32 %v10504_v10, %v6664_v1 }
 0x3fb   : > { %10689 = vmatprep.mubr.bf16.mxu1 %v15175_v54  ;;  %v10456_v46 = vpop.f32.mrf.mxu1  ;;  %v7095_v38 = vpop.f32.mrf.mxu0 }
 0x3fc   : > { %v6668_v34 = vadd.f32 %v10456_v46, %v14236_v57  ;;  %v14354_v18 = vadd.f32 %v7095_v38, %v6662_v2 }
 0x3fd   : > { %v6537_v56 = vpop.f32.mrf.mxu1  ;;  %v10507_v28 = vpop.f32.mrf.mxu0 }
 0x3fe   : > { %v6666_v29 = vadd.f32 %v6537_v56, %v14240_v43  ;;  %v14357_v26 = vadd.f32 %v10507_v28, %v6667_v5 }
 0x3ff   : > { %v10459_v21 = vpop.f32.mrf.mxu1  ;;  %v7108_v48 = vpop.f32.mrf.mxu0 }
 0x400   : > { %v6671_v37 = vadd.f32 %v10459_v21, %v14243_v45  ;;  %v14360_v3 = vadd.f32 %v7108_v48, %v6665_v20 }
 0x401   : > { %v6550_v0 = vpop.f32.mrf.mxu1  ;;  %v10508_v57 = vpop.f32.mrf.mxu0 }
 0x402   : > { %10690 = vmatmul.mubr.bf16.gmra.mxu1 %v8287_v13  ;;  %v6669_v36 = vadd.f32 %v6550_v0, %v14248_v6  ;;  %v14363_v1 = vadd.f32 %v10508_v57, %v6668_v34 }
 0x403   : > { %v10460_v39 = vpop.f32.mrf.mxu1  ;;  %v7111_v16 = vpop.f32.mrf.mxu0 }
 0x404   : > { %v6672_v23 = vadd.f32 %v10460_v39, %v14251_v19  ;;  %v14366_v43 = vadd.f32 %v7111_v16, %v6666_v29 }
 0x405   : > { %v6553_v32 = vpop.f32.mrf.mxu1  ;;  %v10511_v2 = vpop.f32.mrf.mxu0 }
 0x406   : > { %v6670_v22 = vadd.f32 %v6553_v32, %v14254_v62  ;;  %v14369_v63 = vadd.f32 %v10511_v2, %v6671_v37 }
 0x407   : > { %v10463_v45 = vpop.f32.mrf.mxu1  ;;  %v7124_v42 = vpop.f32.mrf.mxu0 }
 0x408   : > { %v6675_v5 = vadd.f32 %v10463_v45, %v14257_v31  ;;  %v14372_v54 = vadd.f32 %v7124_v42, %v6669_v36 }
 0x409   : > { %v6566_v6 = vpop.f32.mrf.mxu1  ;;  %v10512_v4 = vpop.f32.mrf.mxu0 }
 0x40a   : > { %v6673_v60 = vadd.f32 %v6566_v6, %v14262_v8  ;;  %v14375_v10 = vadd.f32 %v10512_v4, %v6672_v23 }
 0x40b   : > { %v10464_v19 = vpop.f32.mrf.mxu1  ;;  %v7127_v20 = vpop.f32.mrf.mxu0 }
 0x40c   : > { %v6676_v46 = vadd.f32 %v10464_v19, %v14265_v55  ;;  %v14378_v38 = vadd.f32 %v7127_v20, %v6670_v22 }
 0x40d   : > { %v6569_v62 = vpop.f32.mrf.mxu1  ;;  %v10515_v34 = vpop.f32.mrf.mxu0 }
 0x40e   : > { %v6674_v33 = vadd.f32 %v6569_v62, %v14268_v44  ;;  %v14381_v13 = vadd.f32 %v10515_v34, %v6675_v5 }
 0x40f   : > { %v10467_v31 = vpop.f32.mrf.mxu1  ;;  %v7140_v56 = vpop.f32.mrf.mxu0 }
 0x410   : > { %v6679_v28 = vadd.f32 %v10467_v31, %v14271_v30  ;;  %v14384_v29 = vadd.f32 %v7140_v56, %v6673_v60 }
 0x411   : > { %v6582_v8 = vpop.f32.mrf.mxu1  ;;  %v10516_v21 = vpop.f32.mrf.mxu0 }
 0x412   : > { %v6677_v48 = vadd.f32 %v6582_v8, %v14276_v12  ;;  %v14387_v37 = vadd.f32 %v10516_v21, %v6676_v46 }
 0x413   : > { %v10468_v55 = vpop.f32.mrf.mxu1  ;;  %v7143_v0 = vpop.f32.mrf.mxu0 }
 0x414   : > { %v6680_v57 = vadd.f32 %v10468_v55, %v14279_v24  ;;  %v14390_v36 = vadd.f32 %v7143_v0, %v6674_v33 }
 0x415   : > { %v6585_v44 = vpop.f32.mrf.mxu1 }
 0x416   : > { %v6678_v16 = vadd.f32 %v6585_v44, %v14282_v17 }
 0x417   : > { %v10519_v39 = vpop.f32.mrf.mxu0 }
 0x418   : > { %v14393_v23 = vadd.f32 %v10519_v39, %v6679_v28 }
 0x419   : > { %v7156_v32 = vpop.f32.mrf.mxu0 }
 0x41a   : > { %v10471_v30 = vpop.f32.mrf.mxu1  ;;  %v14396_v22 = vadd.f32 %v7156_v32, %v6677_v48 }
 0x41b   : > { %v6683_v2 = vadd.f32 %v10471_v30, %v14285_v61  ;;  %v10520_v45 = vpop.f32.mrf.mxu0 }
 0x41c   : > { %v6598_v12 = vpop.f32.mrf.mxu1  ;;  %v14399_v5 = vadd.f32 %v10520_v45, %v6680_v57 }
 0x41d   : > { %v6681_v42 = vadd.f32 %v6598_v12, %v14290_v50  ;;  %v7159_v6 = vpop.f32.mrf.mxu0 }
 0x41e   : > { %v10472_v24 = vpop.f32.mrf.mxu1  ;;  %v14402_v60 = vadd.f32 %v7159_v6, %v6678_v16 }
 0x41f   : > { %v6684_v4 = vadd.f32 %v10472_v24, %v14293_v25  ;;  %v10523_v19 = vpop.f32.mrf.mxu0 }
 0x420   : > { %v6601_v17 = vpop.f32.mrf.mxu1  ;;  %v14405_v46 = vadd.f32 %v10523_v19, %v6683_v2 }
 0x421   : > { %v6682_v20 = vadd.f32 %v6601_v17, %v14296_v47  ;;  %v7172_v62 = vpop.f32.mrf.mxu0 }
 0x422   : > { %v10475_v61 = vpop.f32.mrf.mxu1  ;;  %v14408_v33 = vadd.f32 %v7172_v62, %v6681_v42 }
 0x423   : > { %v6687_v34 = vadd.f32 %v10475_v61, %v14299_v9  ;;  %v10524_v31 = vpop.f32.mrf.mxu0 }
 0x424   : > { %v6614_v50 = vpop.f32.mrf.mxu1  ;;  %v14411_v28 = vadd.f32 %v10524_v31, %v6684_v4 }
 0x425   : > { %v6685_v56 = vadd.f32 %v6614_v50, %v14304_v53  ;;  %v7175_v8 = vpop.f32.mrf.mxu0 }
 0x426   : > { %v10476_v25 = vpop.f32.mrf.mxu1  ;;  %v14414_v48 = vadd.f32 %v7175_v8, %v6682_v20 }
 0x427   : > { %v6688_v21 = vadd.f32 %v10476_v25, %v14307_v27  ;;  %v10527_v55 = vpop.f32.mrf.mxu0 }
 0x428   : > { %v6617_v47 = vpop.f32.mrf.mxu1  ;;  %v14417_v57 = vadd.f32 %v10527_v55, %v6687_v34 }
 0x429   : > { %v6686_v0 = vadd.f32 %v6617_v47, %v14310_v35  ;;  %v7188_v44 = vpop.f32.mrf.mxu0 }
 0x42a   : > { %v10479_v9 = vpop.f32.mrf.mxu1  ;;  %v14420_v16 = vadd.f32 %v7188_v44, %v6685_v56 }
 0x42b   : > { %v6691_v39 = vadd.f32 %v10479_v9, %v14313_v15  ;;  %v10528_v30 = vpop.f32.mrf.mxu0 }
 0x42c   : > { %v6630_v53 = vpop.f32.mrf.mxu1  ;;  %v14423_v2 = vadd.f32 %v10528_v30, %v6688_v21 }
 0x42d   : > { %v6689_v32 = vadd.f32 %v6630_v53, %v14318_v40  ;;  %v7191_v12 = vpop.f32.mrf.mxu0 }
 0x42e   : > { %v10480_v27 = vpop.f32.mrf.mxu1  ;;  %v14426_v42 = vadd.f32 %v7191_v12, %v6686_v0 }
 0x42f   : > { %v6692_v45 = vadd.f32 %v10480_v27, %v14321_v7  ;;  %v10531_v24 = vpop.f32.mrf.mxu0 }
 0x430   : > { %v6633_v35 = vpop.f32.mrf.mxu1  ;;  %v14429_v4 = vadd.f32 %v10531_v24, %v6691_v39 }
 0x431   : > { %v6690_v6 = vadd.f32 %v6633_v35, %v14324_v11  ;;  %v7204_v17 = vpop.f32.mrf.mxu0 }
 0x432   : > { %v10483_v15 = vpop.f32.mrf.mxu1  ;;  %v14432_v20 = vadd.f32 %v7204_v17, %v6689_v32 }
 0x433   : > { %v6695_v19 = vadd.f32 %v10483_v15, %v14327_v41  ;;  %v10532_v61 = vpop.f32.mrf.mxu0 }
 0x434   : > { %v6646_v40 = vpop.f32.mrf.mxu1  ;;  %v14435_v34 = vadd.f32 %v10532_v61, %v6692_v45 }
 0x435   : > { %v6693_v62 = vadd.f32 %v6646_v40, %v14332_v14  ;;  %v7207_v50 = vpop.f32.mrf.mxu0 }
 0x436   : > { %v10484_v7 = vpop.f32.mrf.mxu1  ;;  %v14438_v56 = vadd.f32 %v7207_v50, %v6690_v6 }
 0x437   : > { %v6696_v31 = vadd.f32 %v10484_v7, %v14335_v59  ;;  %v10535_v25 = vpop.f32.mrf.mxu0 }
 0x438   : > { %v6649_v11 = vpop.f32.mrf.mxu1  ;;  %v14441_v21 = vadd.f32 %v10535_v25, %v6695_v19 }
 0x439   : > { %v6694_v8 = vadd.f32 %v6649_v11, %v14338_v52  ;;  %v7220_v47 = vpop.f32.mrf.mxu0 }
 0x43a   : > { %v10555_v41 = vpop.f32.mrf.mxu1  ;;  %v14446_v14 = vadd.f32 %v7220_v47, %v6693_v62 }
 0x43b   : > { %v14444_v55 = vadd.f32 %v10555_v41, %v14341_v49  ;;  %v10536_v9 = vpop.f32.mrf.mxu0 }
 0x43c   : > { %v7666_v0 = vpop.f32.mrf.mxu1  ;;  %v14451_v59 = vadd.f32 %v10536_v9, %v6696_v31 }
 0x43d   : > { %v14449_v44 = vadd.f32 %v7666_v0, %v14346_v58  ;;  %v7223_v53 = vpop.f32.mrf.mxu0 }
 0x43e   : > { %v10556_v39 = vpop.f32.mrf.mxu1  ;;  %v14456_v30 = vadd.f32 %v7223_v53, %v6694_v8 }
 0x43f   : > { %v14454_v52 = vadd.f32 %v10556_v39, %v14349_v51  ;;  %v14458_v27 = vpop.f32.mrf.mxu0 }
 0x440   : > { %v7669_v32 = vpop.f32.mrf.mxu1 }
 0x441   : > { %v14461_v49 = vadd.f32 %v7669_v32, %v14354_v18  ;;  %v14463_v45 = vpop.f32.mrf.mxu0 }
 0x442   : > { %v10559_v12 = vpop.f32.mrf.mxu1 }
 0x443   : > { %v14466_v58 = vadd.f32 %v10559_v12, %v14357_v26  ;;  %v14468_v24 = vpop.f32.mrf.mxu0 }
 0x444   : > { %v7682_v35 = vpop.f32.mrf.mxu1 }
 0x445   : > { %v14471_v51 = vadd.f32 %v7682_v35, %v14360_v3  ;;  %v14473_v15 = vpop.f32.mrf.mxu0 }
 0x446   : > { %v10560_v6 = vpop.f32.mrf.mxu1 }
 0x447   : > { %v14476_v17 = vadd.f32 %v10560_v6, %v14363_v1  ;;  %v14478_v19 = vpop.f32.mrf.mxu0 }
 0x448   : > { %v7685_v18 = vpop.f32.mrf.mxu1 }
 0x449   : > { %v14481_v40 = vadd.f32 %v7685_v18, %v14366_v43  ;;  %v14486_v62 = vpop.f32.mrf.mxu0 }
 0x44a   : > { %v10563_v26 = vpop.f32.mrf.mxu1 }
 0x44b   : > { %v14484_v61 = vadd.f32 %v10563_v26, %v14369_v63  ;;  %v14494_v31 = vpop.f32.mrf.mxu0 }
 0x44c   : > { %v7698_v3 = vpop.f32.mrf.mxu1 }
 0x44d   : > { %v14489_v7 = vadd.f32 %v7698_v3, %v14372_v54  ;;  %v14502_v8 = vpop.f32.mrf.mxu0 }
 0x44e   : > { %v10564_v50 = vpop.f32.mrf.mxu1 }
 0x44f   : > { %v14492_v1 = vadd.f32 %v10564_v50, %v14375_v10  ;;  %v14510_v0 = vpop.f32.mrf.mxu0 }
 0x450   : > { %v7701_v11 = vpop.f32.mrf.mxu1 }
 0x451   : > { %v14497_v43 = vadd.f32 %v7701_v11, %v14378_v38  ;;  %v14518_v53 = vpop.f32.mrf.mxu0 }
 0x452   : > { %v10567_v25 = vpop.f32.mrf.mxu1 }
 0x453   : > { %v14500_v63 = vadd.f32 %v10567_v25, %v14381_v13  ;;  %v14526_v35 = vpop.f32.mrf.mxu0 }
 0x454   : > { %v7714_v41 = vpop.f32.mrf.mxu1 }
 0x455   : > { %v14505_v54 = vadd.f32 %v7714_v41, %v14384_v29  ;;  %v14534_v26 = vpop.f32.mrf.mxu0 }
 0x456   : > { %v10568_v47 = vpop.f32.mrf.mxu1 }
 0x457   : > { %v14508_v10 = vadd.f32 %v10568_v47, %v14387_v37  ;;  %v14542_v11 = vpop.f32.mrf.mxu0 }
 0x458   : > { %v7717_v9 = vpop.f32.mrf.mxu1 }
 0x459   : > { %v14513_v38 = vadd.f32 %v7717_v9, %v14390_v36  ;;  %v14550_v47 = vpop.f32.mrf.mxu0 }
 0x45a   : > { %v10571_v39 = vpop.f32.mrf.mxu1 }
 0x45b   : > { %v14516_v13 = vadd.f32 %v10571_v39, %v14393_v23 }
 0x45c   : > { %v7730_v32 = vpop.f32.mrf.mxu1 }
 0x45d   : > { %v14521_v29 = vadd.f32 %v7730_v32, %v14396_v22  ;;  %v14558_v32 = vpop.f32.mrf.mxu0 }
 0x45e   : > { %v10572_v12 = vpop.f32.mrf.mxu1 }
 0x45f   : > { %v14524_v37 = vadd.f32 %v10572_v12, %v14399_v5 }
 0x460   : > { %v7733_v6 = vpop.f32.mrf.mxu1 }
 0x461   : > { %v14529_v36 = vadd.f32 %v7733_v6, %v14402_v60 }
 0x462   : > { %v10575_v18 = vpop.f32.mrf.mxu1 }
 0x463   : > { %v14532_v23 = vadd.f32 %v10575_v18, %v14405_v46  ;;  %v14566_v18 = vpop.f32.mrf.mxu0 }
 0x464   : > { %v7746_v3 = vpop.f32.mrf.mxu1 }
 0x465   : > { %v14537_v22 = vadd.f32 %v7746_v3, %v14408_v33 }
 0x466   : > { %v10576_v50 = vpop.f32.mrf.mxu1 }
 0x467   : > { %v14540_v5 = vadd.f32 %v10576_v50, %v14411_v28 }
 0x468   : > { %v7749_v25 = vpop.f32.mrf.mxu1 }
 0x469   : > { %v14545_v60 = vadd.f32 %v7749_v25, %v14414_v48  ;;  %v14574_v25 = vpop.f32.mrf.mxu0 }
 0x46a   : > { %v10579_v41 = vpop.f32.mrf.mxu1 }
 0x46b   : > { %v14548_v46 = vadd.f32 %v10579_v41, %v14417_v57 }
 0x46c   : > { %v7762_v9 = vpop.f32.mrf.mxu1 }
 0x46d   : > { %v14553_v33 = vadd.f32 %v7762_v9, %v14420_v16 }
 0x46e   : > { %v10580_v39 = vpop.f32.mrf.mxu1 }
 0x46f   : > { %v14556_v28 = vadd.f32 %v10580_v39, %v14423_v2  ;;  %v14582_v39 = vpop.f32.mrf.mxu0 }
 0x470   : > { %v7765_v12 = vpop.f32.mrf.mxu1 }
 0x471   : > { %v14561_v48 = vadd.f32 %v7765_v12, %v14426_v42 }
 0x472   : > { %v10583_v6 = vpop.f32.mrf.mxu1 }
 0x473   : > { %v14564_v57 = vadd.f32 %v10583_v6, %v14429_v4 }
 0x474   : > { %v7778_v3 = vpop.f32.mrf.mxu1 }
 0x475   : > { %v14569_v16 = vadd.f32 %v7778_v3, %v14432_v20  ;;  %v14590_v3 = vpop.f32.mrf.mxu0 }
 0x476   : > { %v10584_v50 = vpop.f32.mrf.mxu1 }
 0x477   : > { %v14572_v2 = vadd.f32 %v10584_v50, %v14435_v34 }
 0x478   : > { %v7781_v41 = vpop.f32.mrf.mxu1 }
 0x479   : > { %v14577_v42 = vadd.f32 %v7781_v41, %v14438_v56  ;;  %v8148_v56 = vadd.f32 %v14458_v27, %v14444_v55  ;;  %v8149_v55 = vadd.f32 %v14468_v24, %v14454_v52 }
 0x47a   : > { %v10587_v9 = vpop.f32.mrf.mxu1 }
 0x47b   : > { %v14580_v4 = vadd.f32 %v10587_v9, %v14441_v21  ;;  %v14600_v9 = vld [vmem:[%s14805_s4] ss:$0 sm:$0xff] }
 0x47c   : > { %v7794_v12 = vpop.f32.mrf.mxu1 }
 0x47d   : > { %15177 = vst [vmem:[#allocation37_spill] sm:$0xff] %v14580_v4  ;;  %v14585_v20 = vadd.f32 %v7794_v12, %v14446_v14  ;;  %v8146_v14 = vadd.f32 %v14463_v45, %v14449_v44  ;;  %v14604_v12 = vpop.f32.mrf.mxu0 }
 0x47e   : > { %v10588_v6 = vpop.f32.mrf.mxu1 }
 0x47f   : > { %15178 = vst [vmem:[#allocation38_spill] sm:$0xff] %v14585_v20  ;;  %v14588_v34 = vadd.f32 %v10588_v6, %v14451_v59  ;;  %v14612_v44 = vpop.f32.mrf.mxu0 }
 0x480   : > { %v7797_v50 = vpop.f32.mrf.mxu1 }
 0x481   : > { %15179 = vst [vmem:[#allocation39_spill] sm:$0xff] %v14588_v34  ;;  %v14595_v41 = vadd.f32 %v7797_v50, %v14456_v30 }
 0x482   : > { %v10659_v21 = vpop.f32.mrf.mxu1 }
 0x483   : > { %15180 = vst [vmem:[#allocation40_spill] sm:$0xff] %v14595_v41  ;;  %v8533_v59 = vadd.f32 %v10659_v21, %v8148_v56  ;;  %v8147_v41 = vadd.f32 %v14473_v15, %v14461_v49  ;;  %v8152_v56 = vadd.f32 %v14478_v19, %v14466_v58  ;;  %v8150_v49 = vadd.f32 %v14486_v62, %v14471_v51 }
 0x484   : > { %v8388_v6 = vpop.f32.mrf.mxu1  ;;  %v8153_v58 = vadd.f32 %v14494_v31, %v14476_v17  ;;  %v8151_v51 = vadd.f32 %v14502_v8, %v14481_v40  ;;  %v8156_v17 = vadd.f32 %v14510_v0, %v14484_v61  ;;  %v8154_v40 = vadd.f32 %v14518_v53, %v14489_v7 }
 0x485   : > { %v8576_v30 = vadd.f32 %v14600_v9, %v8533_v59  ;;  %v8531_v27 = vadd.f32 %v8388_v6, %v8146_v14  ;;  %v8157_v61 = vadd.f32 %v14526_v35, %v14492_v1  ;;  %v8155_v7 = vadd.f32 %v14534_v26, %v14497_v43 }
 0x486   : > { %v10660_v50 = vpop.f32.mrf.mxu1  ;;  %v8160_v1 = vadd.f32 %v14542_v11, %v14500_v63  ;;  %v8158_v43 = vadd.f32 %v14550_v47, %v14505_v54  ;;  %v8161_v63 = vadd.f32 %v14558_v32, %v14508_v10  ;;  %v8159_v54 = vadd.f32 %v14566_v18, %v14513_v38 }
 0x487   : > { %v8612_v34 = vmax.f32 %v8576_v30, 0.0  ;;  %v8574_v20 = vadd.f32 %v14600_v9, %v8531_v27  ;;  %v8534_v4 = vadd.f32 %v10660_v50, %v8149_v55  ;;  %v14622_v55 = vpop.f32.mrf.mxu0  ;;  %v8164_v10 = vadd.f32 %v14574_v25, %v14516_v13 }
 0x488   : > { %v8391_v45 = vpop.f32.mrf.mxu1  ;;  %v8162_v38 = vadd.f32 %v14582_v39, %v14521_v29  ;;  %v8165_v13 = vadd.f32 %v14590_v3, %v14524_v37  ;;  %v8163_v29 = vadd.f32 %v14604_v12, %v14529_v36  ;;  %v8168_v37 = vadd.f32 %v14612_v44, %v14532_v23 }
 0x489   : > { %8648 = vst [vmem:[%s11424_s11 + $0x10] sm:$0xff] %v8612_v34  ;;  %v8610_v52 = vmax.f32 %v8574_v20, 0.0  ;;  %v8577_v24 = vadd.f32 %v14600_v9, %v8534_v4  ;;  %v8532_v21 = vadd.f32 %v8391_v45, %v8147_v41  ;;  %v14632_v50 = vpop.f32.mrf.mxu0  ;;  %v8166_v36 = vadd.f32 %v14622_v55, %v14537_v22 }
 0x48a   : > { %v10663_v14 = vpop.f32.mrf.mxu1  ;;  %v8169_v23 = vadd.f32 %v14632_v50, %v14540_v5 }
 0x48b   : > { %8646 = vst [vmem:[%s11424_s11] sm:$0xff] %v8610_v52  ;;  %v8613_v15 = vmax.f32 %v8577_v24, 0.0  ;;  %v8575_v59 = vadd.f32 %v14600_v9, %v8532_v21  ;;  %v8537_v6 = vadd.f32 %v10663_v14, %v8152_v56 }
 0x48c   : > { %v8404_v30 = vpop.f32.mrf.mxu1 }
 0x48d   : > { %8649 = vst [vmem:[%s11424_s11 + $0x18] sm:$0xff] %v8613_v15  ;;  %v8611_v19 = vmax.f32 %v8575_v59, 0.0  ;;  %v8580_v4 = vadd.f32 %v14600_v9, %v8537_v6  ;;  %v8535_v20 = vadd.f32 %v8404_v30, %v8150_v49  ;;  %v14642_v49 = vpop.f32.mrf.mxu0 }
 0x48e   : > { %v10664_v34 = vpop.f32.mrf.mxu1  ;;  %v8167_v22 = vadd.f32 %v14642_v49, %v14545_v60 }
 0x48f   : > { %8647 = vst [vmem:[%s11424_s11 + $0x8] sm:$0xff] %v8611_v19  ;;  %v8616_v62 = vmax.f32 %v8580_v4, 0.0  ;;  %v8578_v41 = vadd.f32 %v14600_v9, %v8535_v20  ;;  %v8538_v27 = vadd.f32 %v10664_v34, %v8153_v58  ;;  %v14652_v4 = vpop.f32.mrf.mxu0 }
 0x490   : > { %v8407_v45 = vpop.f32.mrf.mxu1  ;;  %v8172_v5 = vadd.f32 %v14652_v4, %v14548_v46 }
 0x491   : > { %8652 = vst [vmem:[%s11424_s11 + $0x30] sm:$0xff] %v8616_v62  ;;  %v8614_v31 = vmax.f32 %v8578_v41, 0.0  ;;  %v8581_v56 = vadd.f32 %v14600_v9, %v8538_v27  ;;  %v8536_v52 = vadd.f32 %v8407_v45, %v8151_v51  ;;  %v14662_v45 = vpop.f32.mrf.mxu0 }
 0x492   : > { %v10667_v24 = vpop.f32.mrf.mxu1  ;;  %v8170_v60 = vadd.f32 %v14662_v45, %v14553_v33 }
 0x493   : > { %8650 = vst [vmem:[%s11424_s11 + $0x20] sm:$0xff] %v8614_v31  ;;  %v8617_v8 = vmax.f32 %v8581_v56, 0.0  ;;  %v8579_v21 = vadd.f32 %v14600_v9, %v8536_v52  ;;  %v8541_v14 = vadd.f32 %v10667_v24, %v8156_v17 }
 0x494   : > { %v8420_v15 = vpop.f32.mrf.mxu1 }
 0x495   : > { %8653 = vst [vmem:[%s11424_s11 + $0x38] sm:$0xff] %v8617_v8  ;;  %v8615_v0 = vmax.f32 %v8579_v21, 0.0  ;;  %v8584_v59 = vadd.f32 %v14600_v9, %v8541_v14  ;;  %v8539_v6 = vadd.f32 %v8420_v15, %v8154_v40  ;;  %v14672_v8 = vpop.f32.mrf.mxu0 }
 0x496   : > { %v10668_v30 = vpop.f32.mrf.mxu1  ;;  %v8173_v46 = vadd.f32 %v14672_v8, %v14556_v28 }
 0x497   : > { %8651 = vst [vmem:[%s11424_s11 + $0x28] sm:$0xff] %v8615_v0  ;;  %v8620_v53 = vmax.f32 %v8584_v59, 0.0  ;;  %v8582_v58 = vadd.f32 %v14600_v9, %v8539_v6  ;;  %v8542_v19 = vadd.f32 %v10668_v30, %v8157_v61  ;;  %v8102_v6 = vpop.f32.mrf.mxu0 }
 0x498   : > { %v8423_v20 = vpop.f32.mrf.mxu1  ;;  %v8171_v33 = vadd.f32 %v8102_v6, %v14561_v48 }
 0x499   : > { %8656 = vst [vmem:[%s11424_s11 + $0x50] sm:$0xff] %v8620_v53  ;;  %v8618_v35 = vmax.f32 %v8582_v58, 0.0  ;;  %v8585_v34 = vadd.f32 %v14600_v9, %v8542_v19  ;;  %v8540_v51 = vadd.f32 %v8423_v20, %v8155_v7 }
 0x49a   : > { %v10671_v62 = vpop.f32.mrf.mxu1 }
 0x49b   : > { %8654 = vst [vmem:[%s11424_s11 + $0x40] sm:$0xff] %v8618_v35  ;;  %v8621_v26 = vmax.f32 %v8585_v34, 0.0  ;;  %v8583_v41 = vadd.f32 %v14600_v9, %v8540_v51  ;;  %v8545_v27 = vadd.f32 %v10671_v62, %v8160_v1  ;;  %v10635_v1 = vpop.f32.mrf.mxu0 }
 0x49c   : > { %v8436_v17 = vpop.f32.mrf.mxu1 }
 0x49d   : > { %8657 = vst [vmem:[%s11424_s11 + $0x58] sm:$0xff] %v8621_v26  ;;  %v8619_v11 = vmax.f32 %v8583_v41, 0.0  ;;  %v8588_v31 = vadd.f32 %v14600_v9, %v8545_v27  ;;  %v8543_v56 = vadd.f32 %v8436_v17, %v8158_v43  ;;  %v8115_v41 = vpop.f32.mrf.mxu0 }
 0x49e   : > { %v10672_v52 = vpop.f32.mrf.mxu1 }
 0x49f   : > { %8655 = vst [vmem:[%s11424_s11 + $0x48] sm:$0xff] %v8619_v11  ;;  %v8624_v47 = vmax.f32 %v8588_v31, 0.0  ;;  %v8586_v24 = vadd.f32 %v14600_v9, %v8543_v56  ;;  %v8546_v40 = vadd.f32 %v10672_v52, %v8161_v63  ;;  %v10636_v52 = vpop.f32.mrf.mxu0 }
 0x4a0   : > { %v8439_v21 = vpop.f32.mrf.mxu1 }
 0x4a1   : > { %8660 = vst [vmem:[%s11424_s11 + $0x70] sm:$0xff] %v8624_v47  ;;  %v8622_v32 = vmax.f32 %v8586_v24, 0.0  ;;  %v8589_v14 = vadd.f32 %v14600_v9, %v8546_v40  ;;  %v8544_v15 = vadd.f32 %v8439_v21, %v8159_v54 }
 0x4a2   : > { %v10675_v61 = vpop.f32.mrf.mxu1 }
 0x4a3   : > { %8658 = vst [vmem:[%s11424_s11 + $0x60] sm:$0xff] %v8622_v32  ;;  %v8625_v18 = vmax.f32 %v8589_v14, 0.0  ;;  %v8587_v0 = vadd.f32 %v14600_v9, %v8544_v15  ;;  %v8549_v59 = vadd.f32 %v10675_v61, %v8164_v10  ;;  %v8118_v32 = vpop.f32.mrf.mxu0 }
 0x4a4   : > { %v8452_v30 = vpop.f32.mrf.mxu1 }
 0x4a5   : > { %8661 = vst [vmem:[%s11424_s11 + $0x78] sm:$0xff] %v8625_v18  ;;  %v8623_v25 = vmax.f32 %v8587_v0, 0.0  ;;  %v8592_v7 = vadd.f32 %v14600_v9, %v8549_v59  ;;  %v8547_v53 = vadd.f32 %v8452_v30, %v8162_v38  ;;  %v10639_v59 = vpop.f32.mrf.mxu0 }
 0x4a6   : > { %v10676_v58 = vpop.f32.mrf.mxu1 }
 0x4a7   : > { %8659 = vst [vmem:[%s11424_s11 + $0x68] sm:$0xff] %v8623_v25  ;;  %v8628_v39 = vmax.f32 %v8592_v7, 0.0  ;;  %v8590_v19 = vadd.f32 %v14600_v9, %v8547_v53  ;;  %v8550_v20 = vadd.f32 %v10676_v58, %v8165_v13  ;;  %v8176_v13 = vadd.f32 %v10635_v1, %v14564_v57 }
 0x4a8   : > { %v8455_v35 = vpop.f32.mrf.mxu1  ;;  %v8174_v53 = vadd.f32 %v8115_v41, %v14569_v16 }
 0x4a9   : > { %8664 = vst [vmem:[%s11424_s11 + $0x90] sm:$0xff] %v8628_v39  ;;  %v8626_v3 = vmax.f32 %v8590_v19, 0.0  ;;  %v8593_v34 = vadd.f32 %v14600_v9, %v8550_v20  ;;  %v8548_v51 = vadd.f32 %v8455_v35, %v8163_v29  ;;  %v8131_v29 = vpop.f32.mrf.mxu0  ;;  %v8177_v19 = vadd.f32 %v10636_v52, %v14572_v2 }
 0x4aa   : > { %v10679_v62 = vpop.f32.mrf.mxu1 }
 0x4ab   : > { %8662 = vst [vmem:[%s11424_s11 + $0x80] sm:$0xff] %v8626_v3  ;;  %v8629_v12 = vmax.f32 %v8593_v34, 0.0  ;;  %v8591_v43 = vadd.f32 %v14600_v9, %v8548_v51  ;;  %v8553_v26 = vadd.f32 %v10679_v62, %v8168_v37  ;;  %v8175_v37 = vadd.f32 %v8118_v32, %v14577_v42  ;;  %v10640_v51 = vpop.f32.mrf.mxu0 }
 0x4ac   : > { %v8468_v27 = vpop.f32.mrf.mxu1 }
 0x4ad   : > { %8665 = vst [vmem:[%s11424_s11 + $0x98] sm:$0xff] %v8629_v12  ;;  %v8627_v44 = vmax.f32 %v8591_v43, 0.0  ;;  %v8596_v17 = vadd.f32 %v14600_v9, %v8553_v26  ;;  %v8551_v63 = vadd.f32 %v8468_v27, %v8166_v36  ;;  %v15181_v36 = vld [vmem:[#allocation37_spill] sm:$0xff]  ;;  %v15182_v27 = vld [vmem:[#allocation38_spill] sm:$0xff] }
 0x4ae   : > { %v10680_v11 = vpop.f32.mrf.mxu1  ;;  %v8180_v12 = vadd.f32 %v10639_v59, %v15181_v36 }
 0x4af   : > { %8663 = vst [vmem:[%s11424_s11 + $0x88] sm:$0xff] %v8627_v44  ;;  %v8632_v55 = vmax.f32 %v8596_v17, 0.0  ;;  %v8594_v31 = vadd.f32 %v14600_v9, %v8551_v63  ;;  %v8554_v56 = vadd.f32 %v10680_v11, %v8169_v23  ;;  %v8178_v23 = vadd.f32 %v8131_v29, %v15182_v27  ;;  %v8134_v63 = vpop.f32.mrf.mxu0 }
 0x4b0   : > { %v8471_v54 = vpop.f32.mrf.mxu1 }
 0x4b1   : > { %8668 = vst [vmem:[%s11424_s11 + $0xb0] sm:$0xff] %v8632_v55  ;;  %v8630_v50 = vmax.f32 %v8594_v31, 0.0  ;;  %v8597_v47 = vadd.f32 %v14600_v9, %v8554_v56  ;;  %v8552_v24 = vadd.f32 %v8471_v54, %v8167_v22  ;;  %v15183_v22 = vld [vmem:[#allocation39_spill] sm:$0xff] }
 0x4b2   : > { %v10683_v40 = vpop.f32.mrf.mxu1  ;;  %v8181_v55 = vadd.f32 %v10640_v51, %v15183_v22 }
 0x4b3   : > { %8666 = vst [vmem:[%s11424_s11 + $0xa0] sm:$0xff] %v8630_v50  ;;  %v8633_v49 = vmax.f32 %v8597_v47, 0.0  ;;  %v8595_v21 = vadd.f32 %v14600_v9, %v8552_v24  ;;  %v8557_v10 = vadd.f32 %v10683_v40, %v8172_v5  ;;  %v15184_v5 = vld [vmem:[#allocation40_spill] sm:$0xff] }
 0x4b4   : > { %v8484_v14 = vpop.f32.mrf.mxu1  ;;  %v8179_v50 = vadd.f32 %v8134_v63, %v15184_v5 }
 0x4b5   : > { %8669 = vst [vmem:[%s11424_s11 + $0xb8] sm:$0xff] %v8633_v49  ;;  %v8631_v4 = vmax.f32 %v8595_v21, 0.0  ;;  %v8600_v15 = vadd.f32 %v14600_v9, %v8557_v10  ;;  %v8555_v61 = vadd.f32 %v8484_v14, %v8170_v60 }
 0x4b6   : > { %v10684_v38 = vpop.f32.mrf.mxu1 }
 0x4b7   : > { %8667 = vst [vmem:[%s11424_s11 + $0xa8] sm:$0xff] %v8631_v4  ;;  %v8636_v45 = vmax.f32 %v8600_v15, 0.0  ;;  %v8598_v18 = vadd.f32 %v14600_v9, %v8555_v61  ;;  %v8558_v0 = vadd.f32 %v10684_v38, %v8173_v46 }
 0x4b8   : > { %v8487_v30 = vpop.f32.mrf.mxu1 }
 0x4b9   : > { %8672 = vst [vmem:[%s11424_s11 + $0xd0] sm:$0xff] %v8636_v45  ;;  %v8634_v28 = vmax.f32 %v8598_v18, 0.0  ;;  %v8601_v8 = vadd.f32 %v14600_v9, %v8558_v0  ;;  %v8556_v25 = vadd.f32 %v8487_v30, %v8171_v33 }
 0x4ba   : > { %v10687_v7 = vpop.f32.mrf.mxu1 }
 0x4bb   : > { %8670 = vst [vmem:[%s11424_s11 + $0xc0] sm:$0xff] %v8634_v28  ;;  %v8637_v48 = vmax.f32 %v8601_v8, 0.0  ;;  %v8599_v6 = vadd.f32 %v14600_v9, %v8556_v25  ;;  %v8561_v58 = vadd.f32 %v10687_v7, %v8176_v13 }
 0x4bc   : > { %v8500_v39 = vpop.f32.mrf.mxu1 }
 0x4bd   : > { %8673 = vst [vmem:[%s11424_s11 + $0xd8] sm:$0xff] %v8637_v48  ;;  %v8635_v57 = vmax.f32 %v8599_v6, 0.0  ;;  %v8604_v20 = vadd.f32 %v14600_v9, %v8561_v58  ;;  %v8559_v1 = vadd.f32 %v8500_v39, %v8174_v53 }
 0x4be   : > { %v10688_v35 = vpop.f32.mrf.mxu1 }
 0x4bf   : > { %8671 = vst [vmem:[%s11424_s11 + $0xc8] sm:$0xff] %v8635_v57  ;;  %v8640_v16 = vmax.f32 %v8604_v20, 0.0  ;;  %v8602_v3 = vadd.f32 %v14600_v9, %v8559_v1  ;;  %v8562_v34 = vadd.f32 %v10688_v35, %v8177_v19 }
 0x4c0   : > { %v8503_v62 = vpop.f32.mrf.mxu1 }
 0x4c1   : > { %8676 = vst [vmem:[%s11424_s11 + $0xf0] sm:$0xff] %v8640_v16  ;;  %v8638_v2 = vmax.f32 %v8602_v3, 0.0  ;;  %v8605_v43 = vadd.f32 %v14600_v9, %v8562_v34  ;;  %v8560_v26 = vadd.f32 %v8503_v62, %v8175_v37 }
 0x4c2   : > { %v10691_v41 = vpop.f32.mrf.mxu1 }
 0x4c3   : > { %8674 = vst [vmem:[%s11424_s11 + $0xe0] sm:$0xff] %v8638_v2  ;;  %v8641_v42 = vmax.f32 %v8605_v43, 0.0  ;;  %v8603_v44 = vadd.f32 %v14600_v9, %v8560_v26  ;;  %v8565_v17 = vadd.f32 %v10691_v41, %v8180_v12 }
 0x4c4   : > { %v8516_v11 = vpop.f32.mrf.mxu1 }
 0x4c5   : > { %8677 = vst [vmem:[%s11424_s11 + $0xf8] sm:$0xff] %v8641_v42  ;;  %v8639_v31 = vmax.f32 %v8603_v44, 0.0  ;;  %v8608_v56 = vadd.f32 %v14600_v9, %v8565_v17  ;;  %v8563_v52 = vadd.f32 %v8516_v11, %v8178_v23 }
 0x4c6   : > { %v10692_v54 = vpop.f32.mrf.mxu1 }
 0x4c7   : > { %8675 = vst [vmem:[%s11424_s11 + $0xe8] sm:$0xff] %v8639_v31  ;;  %v8644_v47 = vmax.f32 %v8608_v56, 0.0  ;;  %v8606_v24 = vadd.f32 %v14600_v9, %v8563_v52  ;;  %v8566_v40 = vadd.f32 %v10692_v54, %v8181_v55 }
 0x4c8   : > { %v8519_v60 = vpop.f32.mrf.mxu1 }
 0x4c9   : > { %8680 = vst [vmem:[%s11424_s11 + $0x110] sm:$0xff] %v8644_v47  ;;  %v8642_v49 = vmax.f32 %v8606_v24, 0.0  ;;  %v8609_v21 = vadd.f32 %v14600_v9, %v8566_v40  ;;  %v8564_v10 = vadd.f32 %v8519_v60, %v8179_v50 }
 0x4cb   : > { %8678 = vst [vmem:[%s11424_s11 + $0x100] sm:$0xff] %v8642_v49  ;;  %v8645_v32 = vmax.f32 %v8609_v21, 0.0  ;;  %v8607_v14 = vadd.f32 %v14600_v9, %v8564_v10 }
 0x4cd   : > { %8681 = vst [vmem:[%s11424_s11 + $0x118] sm:$0xff] %v8645_v32  ;;  %v8643_v46 = vmax.f32 %v8607_v14, 0.0 }
 0x4cf   : > { %8679 = vst [vmem:[%s11424_s11 + $0x108] sm:$0xff] %v8643_v46 }
 0x4d0   : > { %11170 = shalt.err (!%p11167_p2)
}
 0x4d1   : > { %s11171_s11 = scalar_lea.hbm %s14754_s10, 4608  ;;  %s11175_s20 = scalar_lea.hbm %s14807_s6, 9216 }
 0x4d2   : > { %p11172_p10 = scmp.ne.s32.totalorder %s14754_s10, %s11171_s11  ;;  %p11176_p6 = scmp.lt.s32.totalorder %s14754_s10, %s14807_s6 }
 0x4d3   : > { %p11177_p9 = scmp.lt.s32.totalorder %s11175_s20, %s11171_s11 }
 0x4d4   : > { %p11173_p1 = pnand %p11172_p10, %p15185_p7 }
 0x4d5   : > { %p11178_p11 = por %p11177_p9, %p11176_p6 }
 0x4d6   : > { %p11174_p4 = pneg %p11173_p1 }
 0x4d8   : > { %p11179_p12 = pnand %p11178_p11, %p11174_p4 }
 0x4da   : > { %11182 = shalt.err (!%p11179_p12)
}
 0x4db   : > { %s11235_s13 = smov 128   ;;  %s11236_s26 = smov 8  }
 0x4dc   : > { %10706 = dma.vmem_to_hbm [thread:$0]  (%p15185_p7), %s14757_s12, 4608, %s14754_s10, %s8683_s25, %s11235_s13, %s11235_s13, %s11236_s26  }
 0x4dd PF: > { %s8711_s15 = sand.u32 1, %s11213_s21   ;;  %p15186_p13 = scmp.ne.s32.totalorder %s14854_s28, 0 }
 0x4de   : > { %p15187_p0 = scmp.ge.s32.totalorder %s11225_s24, 2  ;;  %s8712_s29 = scalar_lea.sflag [#allocation5], %s8711_s15 }
 0x4e0   : > { %p10720_p3 = pnand %p15187_p0, %p15186_p13 }
 0x4e2   : > { %p10721_p8 = pneg %p10720_p3 }
 0x4e4   : > { %11208 = dma.done.wait (%p10721_p8), %s8712_s29, 4608  }
 0x4e5   : > { %11210 = vsyncadd (%p10721_p8), %s8712_s29, 4294962688  ;;  %p20_p5 = scmp.ge.s32.totalorder %s11351_s19, 4   ;;  %s15188_s21 = smov %s11217_s22 }
 0x4e6   : > { %s15189_s22 = smov %s11221_s23  ;;  %s15190_s23 = smov %s11367_s7 }
 0x4e7   : > { %s15191_s24 = smov %s11351_s19  ;;  %22 = sbr.rel (!%p20_p5) target bundleno = 6 (0x6), region = 117 }
 0x4ec   :  { %8717 = vsyncpa [#allocation4], 1 }
 0x4ed   :  { %8719 = vsyncpa [#allocation4 + $0x1], 1 }
 0x4ee   :  { %8720 = vsyncpa [#allocation7], 1 }
 0x4ef   :  { %8721 = vsyncpa [#allocation5], 1 }
 0x4f0   :  { %8723 = vsyncpa [#allocation5 + $0x1], 1 }

</bundles_post_ra>
